<compile_context>
chip_gen: v7x
topology: tpu7x:2x2x1
jax: 0.10.0
libtpu: 0.0.40
codegen_flags: <defaults>
</compile_context>

<pallas_src>
import functools
import math

import jax
import jax.numpy as jnp
from jax.experimental import pallas as pl
from jax.experimental.pallas import tpu as pltpu


# ----------------------------------------------------------------------------
# Fused Pallas kernel: the whole model forward in one invocation.
# ----------------------------------------------------------------------------
def _fused_model_kernel(x_ref, w_ref, b_ref, sbias_ref, tbias_ref, o_ref, *,
                        num_heads, num_layers, compute_dtype):
    """Full SpatioTemporalSignificanceScoring forward.

    x_ref  : (R, E)  flat rows, R = b*t*n, row index r = (bi*t + ti)*n + ni
    w_ref  : (num_layers, 2, 4, E, E)  [layer, {spatial,temporal}, {q,k,v,o}]
             stored pre-transposed so x @ w == x @ W_pt^T
    b_ref  : (num_layers, 2, 4, 1, E)
    sbias_ref, tbias_ref : (R, R) additive masks (0 inside group, -1e30 outside)
    o_ref  : (R, E)
    """
    E = x_ref.shape[-1]
    Dh = E // num_heads
    scale = 1.0 / math.sqrt(Dh)

    sbias = sbias_ref[...]
    tbias = tbias_ref[...]

    def masked_mha(x, li, ai, bias):
        wq = w_ref[li, ai, 0].astype(compute_dtype)
        wk = w_ref[li, ai, 1].astype(compute_dtype)
        wv = w_ref[li, ai, 2].astype(compute_dtype)
        wo = w_ref[li, ai, 3].astype(compute_dtype)
        bq = b_ref[li, ai, 0]
        bk = b_ref[li, ai, 1]
        bv = b_ref[li, ai, 2]
        bo = b_ref[li, ai, 3]

        xc = x.astype(compute_dtype)
        # One big projection matmul per Q/K/V over ALL rows (f32 accumulate).
        q = jnp.dot(xc, wq, preferred_element_type=jnp.float32) + bq   # (R, E)
        k = jnp.dot(xc, wk, preferred_element_type=jnp.float32) + bk
        v = jnp.dot(xc, wv, preferred_element_type=jnp.float32) + bv

        head_outs = []
        for h in range(num_heads):                    # short static loop (4)
            sl = slice(h * Dh, (h + 1) * Dh)
            qh = q[:, sl].astype(compute_dtype)       # (R, Dh)
            kh = k[:, sl].astype(compute_dtype)
            vh = v[:, sl].astype(compute_dtype)
            # NT matmul over all rows at once; the block-diagonal additive mask
            # keeps the (spatial/temporal) attention groups independent.
            s = jax.lax.dot_general(qh, kh, (((1,), (1,)), ((), ())),
                                    preferred_element_type=jnp.float32)
            s = s * scale + bias                      # (R, R)
            s = s - jnp.max(s, axis=-1, keepdims=True)
            p = jnp.exp(s)
            denom = jnp.sum(p, axis=-1, keepdims=True)
            p = p * pl.reciprocal(denom, approx=True)  # EUP, not VALU divide
            head_outs.append(
                jnp.dot(p.astype(compute_dtype), vh,
                        preferred_element_type=jnp.float32))
        ctx = jnp.concatenate(head_outs, axis=-1)     # (R, E)
        return jnp.dot(ctx.astype(compute_dtype), wo,
                       preferred_element_type=jnp.float32) + bo

    x = x_ref[...].astype(jnp.float32)
    for li in range(num_layers):
        x = masked_mha(x, li, 0, sbias)   # spatial : groups share the n index
        x = masked_mha(x, li, 1, tbias)   # temporal: groups share the t index
    o_ref[...] = x


def _full_spec(a):
    zeros = (0,) * a.ndim
    return pl.BlockSpec(a.shape, lambda i: zeros)


# ----------------------------------------------------------------------------
# Wrapper: one pallas_call for the whole model.
# ----------------------------------------------------------------------------
def spatio_temporal_significance_scoring(x, params, num_heads,
                                         compute_dtype=jnp.float32):
    b, t, n, e = x.shape
    R = b * t * n
    w = params["w"]                # (L, 2, 4, E, E)
    bias = params["b"]             # (L, 2, 4, 1, E)
    num_layers = w.shape[0]

    # Flat row index r = (bi*t + ti)*n + ni. Group masks replace the module's
    # view/permute: spatial groups share ni, temporal groups share ti.
    r = jnp.arange(R, dtype=jnp.int32)
    ni = r % n
    ti = (r // n) % t
    neg = jnp.float32(-1e30)
    sbias = jnp.where(ni[:, None] == ni[None, :], 0.0, neg).astype(jnp.float32)
    tbias = jnp.where(ti[:, None] == ti[None, :], 0.0, neg).astype(jnp.float32)

    x2 = x.reshape(R, e).astype(jnp.float32)

    kern = functools.partial(_fused_model_kernel, num_heads=num_heads,
                             num_layers=num_layers, compute_dtype=compute_dtype)

    out = pl.pallas_call(
        kern,
        out_shape=jax.ShapeDtypeStruct((R, e), jnp.float32),
        grid=(1,),
        in_specs=[_full_spec(x2), _full_spec(w), _full_spec(bias),
                  _full_spec(sbias), _full_spec(tbias)],
        out_specs=pl.BlockSpec((R, e), lambda i: (0, 0)),
        compiler_params=pltpu.CompilerParams(
            dimension_semantics=("arbitrary",)),
    )(x2, w, bias, sbias, tbias)
    return out.reshape(b, t, n, e)


# ----------------------------------------------------------------------------
# Deterministic parameter init (mirrors nn.MultiheadAttention shapes).
# ----------------------------------------------------------------------------
def init_model_params(key, embed_size, num_layers):
    E = embed_size
    limit_in = math.sqrt(6.0 / (3 * E + E))   # xavier_uniform on (3E, E) in_proj
    limit_out = math.sqrt(6.0 / (2 * E))
    w_layers, b_layers = [], []
    for _ in range(num_layers):
        w_attn, b_attn = [], []
        for _ in range(2):                    # spatial, temporal
            key, k_in, k_out, k_b = jax.random.split(key, 4)
            in_w = jax.random.uniform(k_in, (3 * E, E), jnp.float32,
                                      -limit_in, limit_in)
            out_w = jax.random.uniform(k_out, (E, E), jnp.float32,
                                       -limit_out, limit_out)
            # Stored pre-transposed so the kernel computes x @ W^T as x @ w.
            w_attn.append(jnp.stack([in_w[0:E].T, in_w[E:2 * E].T,
                                     in_w[2 * E:3 * E].T, out_w.T]))
            # _reset_parameters zeroes the biases; use small nonzero values so
            # the bias path is actually exercised by the correctness check.
            b_attn.append(0.02 * jax.random.normal(k_b, (4, 1, E), jnp.float32))
        w_layers.append(jnp.stack(w_attn))    # (2, 4, E, E)
        b_layers.append(jnp.stack(b_attn))    # (2, 4, 1, E)
    return {"w": jnp.stack(w_layers), "b": jnp.stack(b_layers)}


# ----------------------------------------------------------------------------
# Pure-JAX reference: literal translation of the PyTorch forward.
# ----------------------------------------------------------------------------
def _mha_ref(x_lne, w4, b4, num_heads):
    L, N, E = x_lne.shape
    Dh = E // num_heads
    x = jnp.transpose(x_lne, (1, 0, 2))       # (N, L, E)
    q = x @ w4[0] + b4[0]
    k = x @ w4[1] + b4[1]
    v = x @ w4[2] + b4[2]

    def split(a):
        return a.reshape(N, L, num_heads, Dh).transpose(0, 2, 1, 3)

    q, k, v = split(q), split(k), split(v)
    s = jnp.einsum("nhld,nhmd->nhlm", q, k) / math.sqrt(Dh)
    a = jax.nn.softmax(s, axis=-1)
    ctx = jnp.einsum("nhlm,nhmd->nhld", a, v).transpose(0, 2, 1, 3).reshape(N, L, E)
    out = ctx @ w4[3] + b4[3]
    return jnp.transpose(out, (1, 0, 2))


def model_ref(x, params, num_heads):
    w, bias = params["w"], params["b"]
    for li in range(w.shape[0]):
        b_, t_, n_, e_ = x.shape
        xs = _mha_ref(x.reshape(b_ * t_, n_, e_), w[li, 0], bias[li, 0], num_heads)
        x = jnp.transpose(xs.reshape(b_, t_, n_, e_), (0, 2, 1, 3))
        xt = _mha_ref(x.reshape(b_ * n_, t_, e_), w[li, 1], bias[li, 1], num_heads)
        x = jnp.transpose(xt.reshape(b_, n_, t_, e_), (0, 2, 1, 3))
    return x


if __name__ == "__main__":
    # Small shapes: batch b=2, time t=4, tokens n=8, embed e=32, heads=4, layers=2.
    b, t, n, e = 2, 4, 8, 32
    num_heads, num_layers = 4, 2

    key = jax.random.PRNGKey(0)
    k_x, k_p = jax.random.split(key)
    x = jax.random.normal(k_x, (b, t, n, e), jnp.float32)
    params = init_model_params(k_p, e, num_layers)

    fwd = jax.jit(functools.partial(spatio_temporal_significance_scoring,
                                    num_heads=num_heads))
    out = jax.block_until_ready(fwd(x, params))

    ref = model_ref(x, params, num_heads)
    assert out.shape == (b, t, n, e)
    # Tolerance covers the EUP approximate reciprocal used for the softmax denom.
    assert jnp.allclose(out, ref, atol=2e-2, rtol=2e-2), "mismatch vs. reference"

    print("KERNEL_OK")
</pallas_src>

<mosaic_0001>
module attributes {stable_mosaic.version = 11 : i64} {
  func.func @_fused_model_kernel(%arg0: i32, %arg1: memref<64x32xf32, #tpu.memory_space<vmem>>, %arg2: memref<2x2x4x32x32xf32, #tpu.memory_space<vmem>>, %arg3: memref<2x2x4x1x32xf32, #tpu.memory_space<vmem>>, %arg4: memref<64x64xf32, #tpu.memory_space<vmem>>, %arg5: memref<64x64xf32, #tpu.memory_space<vmem>>, %arg6: memref<64x32xf32, #tpu.memory_space<vmem>>) attributes {dimension_semantics = [#tpu.dimension_semantics<arbitrary>], iteration_bounds = array<i64: 1>, scalar_prefetch = 0 : i64, scratch_operands = 0 : i64, tpu.core_type = #tpu.core_type<tc>, window_params = [{pipeline_mode = #tpu.pipeline_mode<synchronous>, transform_indices = @transform_0, window_bounds = array<i64: 64, 32>}, {pipeline_mode = #tpu.pipeline_mode<synchronous>, transform_indices = @transform_1, window_bounds = array<i64: 2, 2, 4, 32, 32>}, {pipeline_mode = #tpu.pipeline_mode<synchronous>, transform_indices = @transform_2, window_bounds = array<i64: 2, 2, 4, 1, 32>}, {pipeline_mode = #tpu.pipeline_mode<synchronous>, transform_indices = @transform_3, window_bounds = array<i64: 64, 64>}, {pipeline_mode = #tpu.pipeline_mode<synchronous>, transform_indices = @transform_4, window_bounds = array<i64: 64, 64>}, {pipeline_mode = #tpu.pipeline_mode<synchronous>, transform_indices = @transform_5, window_bounds = array<i64: 64, 32>}]} {
    %c0 = arith.constant 0 : index
    %c0_0 = arith.constant 0 : index
    %0 = vector.load %arg4[%c0, %c0_0] : memref<64x64xf32, #tpu.memory_space<vmem>>, vector<64x64xf32>
    %c0_1 = arith.constant 0 : index
    %c0_2 = arith.constant 0 : index
    %1 = vector.load %arg5[%c0_1, %c0_2] : memref<64x64xf32, #tpu.memory_space<vmem>>, vector<64x64xf32>
    %c0_3 = arith.constant 0 : index
    %c0_4 = arith.constant 0 : index
    %2 = vector.load %arg1[%c0_3, %c0_4] : memref<64x32xf32, #tpu.memory_space<vmem>>, vector<64x32xf32>
    %c0_5 = arith.constant 0 : index
    %c0_6 = arith.constant 0 : index
    %c0_7 = arith.constant 0 : index
    %c0_8 = arith.constant 0 : index
    %c0_9 = arith.constant 0 : index
    %3 = vector.load %arg2[%c0_5, %c0_6, %c0_7, %c0_8, %c0_9] : memref<2x2x4x32x32xf32, #tpu.memory_space<vmem>>, vector<1x1x1x32x32xf32>
    %4 = vector.shape_cast %3 : vector<1x1x1x32x32xf32> to vector<32x32xf32>
    %c0_10 = arith.constant 0 : index
    %c0_11 = arith.constant 0 : index
    %c1 = arith.constant 1 : index
    %c0_12 = arith.constant 0 : index
    %c0_13 = arith.constant 0 : index
    %5 = vector.load %arg2[%c0_10, %c0_11, %c1, %c0_12, %c0_13] : memref<2x2x4x32x32xf32, #tpu.memory_space<vmem>>, vector<1x1x1x32x32xf32>
    %6 = vector.shape_cast %5 : vector<1x1x1x32x32xf32> to vector<32x32xf32>
    %c0_14 = arith.constant 0 : index
    %c0_15 = arith.constant 0 : index
    %c2 = arith.constant 2 : index
    %c0_16 = arith.constant 0 : index
    %c0_17 = arith.constant 0 : index
    %7 = vector.load %arg2[%c0_14, %c0_15, %c2, %c0_16, %c0_17] : memref<2x2x4x32x32xf32, #tpu.memory_space<vmem>>, vector<1x1x1x32x32xf32>
    %8 = vector.shape_cast %7 : vector<1x1x1x32x32xf32> to vector<32x32xf32>
    %c0_18 = arith.constant 0 : index
    %c0_19 = arith.constant 0 : index
    %c3 = arith.constant 3 : index
    %c0_20 = arith.constant 0 : index
    %c0_21 = arith.constant 0 : index
    %9 = vector.load %arg2[%c0_18, %c0_19, %c3, %c0_20, %c0_21] : memref<2x2x4x32x32xf32, #tpu.memory_space<vmem>>, vector<1x1x1x32x32xf32>
    %10 = vector.shape_cast %9 : vector<1x1x1x32x32xf32> to vector<32x32xf32>
    %c0_22 = arith.constant 0 : index
    %c0_23 = arith.constant 0 : index
    %c0_24 = arith.constant 0 : index
    %c0_25 = arith.constant 0 : index
    %c0_26 = arith.constant 0 : index
    %11 = vector.load %arg3[%c0_22, %c0_23, %c0_24, %c0_25, %c0_26] : memref<2x2x4x1x32xf32, #tpu.memory_space<vmem>>, vector<1x1x1x1x32xf32>
    %12 = vector.shape_cast %11 : vector<1x1x1x1x32xf32> to vector<1x32xf32>
    %c0_27 = arith.constant 0 : index
    %c0_28 = arith.constant 0 : index
    %c1_29 = arith.constant 1 : index
    %c0_30 = arith.constant 0 : index
    %c0_31 = arith.constant 0 : index
    %13 = vector.load %arg3[%c0_27, %c0_28, %c1_29, %c0_30, %c0_31] : memref<2x2x4x1x32xf32, #tpu.memory_space<vmem>>, vector<1x1x1x1x32xf32>
    %14 = vector.shape_cast %13 : vector<1x1x1x1x32xf32> to vector<1x32xf32>
    %c0_32 = arith.constant 0 : index
    %c0_33 = arith.constant 0 : index
    %c2_34 = arith.constant 2 : index
    %c0_35 = arith.constant 0 : index
    %c0_36 = arith.constant 0 : index
    %15 = vector.load %arg3[%c0_32, %c0_33, %c2_34, %c0_35, %c0_36] : memref<2x2x4x1x32xf32, #tpu.memory_space<vmem>>, vector<1x1x1x1x32xf32>
    %16 = vector.shape_cast %15 : vector<1x1x1x1x32xf32> to vector<1x32xf32>
    %c0_37 = arith.constant 0 : index
    %c0_38 = arith.constant 0 : index
    %c3_39 = arith.constant 3 : index
    %c0_40 = arith.constant 0 : index
    %c0_41 = arith.constant 0 : index
    %17 = vector.load %arg3[%c0_37, %c0_38, %c3_39, %c0_40, %c0_41] : memref<2x2x4x1x32xf32, #tpu.memory_space<vmem>>, vector<1x1x1x1x32xf32>
    %18 = vector.shape_cast %17 : vector<1x1x1x1x32xf32> to vector<1x32xf32>
    %cst = arith.constant dense<0.000000e+00> : vector<64x32xf32>
    %19 = tpu.matmul %2, %4, %cst {dimension_numbers = #tpu.dot_dimension_numbers<[1], [0], [0], [1], [0, 0, 1, 1], [], []>} : vector<64x32xf32>, vector<32x32xf32>, vector<64x32xf32> -> vector<64x32xf32>
    %20 = vector.broadcast %12 : vector<1x32xf32> to vector<64x32xf32>
    %21 = arith.addf %19, %20 : vector<64x32xf32>
    %cst_42 = arith.constant dense<0.000000e+00> : vector<64x32xf32>
    %22 = tpu.matmul %2, %6, %cst_42 {dimension_numbers = #tpu.dot_dimension_numbers<[1], [0], [0], [1], [0, 0, 1, 1], [], []>} : vector<64x32xf32>, vector<32x32xf32>, vector<64x32xf32> -> vector<64x32xf32>
    %23 = vector.broadcast %14 : vector<1x32xf32> to vector<64x32xf32>
    %24 = arith.addf %22, %23 : vector<64x32xf32>
    %cst_43 = arith.constant dense<0.000000e+00> : vector<64x32xf32>
    %25 = tpu.matmul %2, %8, %cst_43 {dimension_numbers = #tpu.dot_dimension_numbers<[1], [0], [0], [1], [0, 0, 1, 1], [], []>} : vector<64x32xf32>, vector<32x32xf32>, vector<64x32xf32> -> vector<64x32xf32>
    %26 = vector.broadcast %16 : vector<1x32xf32> to vector<64x32xf32>
    %27 = arith.addf %25, %26 : vector<64x32xf32>
    %28 = vector.extract_strided_slice %21 {offsets = [0, 0], sizes = [64, 8], strides = [1, 1]} : vector<64x32xf32> to vector<64x8xf32>
    %29 = vector.extract_strided_slice %24 {offsets = [0, 0], sizes = [64, 8], strides = [1, 1]} : vector<64x32xf32> to vector<64x8xf32>
    %30 = vector.extract_strided_slice %27 {offsets = [0, 0], sizes = [64, 8], strides = [1, 1]} : vector<64x32xf32> to vector<64x8xf32>
    %cst_44 = arith.constant dense<0.000000e+00> : vector<64x64xf32>
    %31 = tpu.matmul %28, %29, %cst_44 {dimension_numbers = #tpu.dot_dimension_numbers<[1], [1], [0], [0], [0, 0, 1, 0], [], []>} : vector<64x8xf32>, vector<64x8xf32>, vector<64x64xf32> -> vector<64x64xf32>
    %cst_45 = arith.constant 0.353553385 : f32
    %32 = vector.broadcast %cst_45 : f32 to vector<64x64xf32>
    %33 = arith.mulf %31, %32 : vector<64x64xf32>
    %34 = arith.addf %33, %0 : vector<64x64xf32>
    %cst_46 = arith.constant dense<0xFF800000> : vector<64xf32>
    %35 = vector.multi_reduction <maximumf>, %34, %cst_46 [1] : vector<64x64xf32> to vector<64xf32>
    %36 = vector.shape_cast %35 : vector<64xf32> to vector<64x1xf32>
    %37 = vector.broadcast %36 : vector<64x1xf32> to vector<64x64xf32>
    %38 = arith.subf %34, %37 : vector<64x64xf32>
    %39 = math.exp %38 : vector<64x64xf32>
    %cst_47 = arith.constant dense<0.000000e+00> : vector<64xf32>
    %40 = vector.multi_reduction <add>, %39, %cst_47 [1] : vector<64x64xf32> to vector<64xf32>
    %41 = vector.shape_cast %40 : vector<64xf32> to vector<64x1xf32>
    %42 = tpu.reciprocal %41 {approx = true} : vector<64x1xf32> -> vector<64x1xf32>
    %43 = vector.broadcast %42 : vector<64x1xf32> to vector<64x64xf32>
    %44 = arith.mulf %39, %43 : vector<64x64xf32>
    %cst_48 = arith.constant dense<0.000000e+00> : vector<64x8xf32>
    %45 = tpu.matmul %44, %30, %cst_48 {dimension_numbers = #tpu.dot_dimension_numbers<[1], [0], [0], [1], [0, 0, 1, 1], [], []>} : vector<64x64xf32>, vector<64x8xf32>, vector<64x8xf32> -> vector<64x8xf32>
    %46 = vector.extract_strided_slice %21 {offsets = [0, 8], sizes = [64, 8], strides = [1, 1]} : vector<64x32xf32> to vector<64x8xf32>
    %47 = vector.extract_strided_slice %24 {offsets = [0, 8], sizes = [64, 8], strides = [1, 1]} : vector<64x32xf32> to vector<64x8xf32>
    %48 = vector.extract_strided_slice %27 {offsets = [0, 8], sizes = [64, 8], strides = [1, 1]} : vector<64x32xf32> to vector<64x8xf32>
    %cst_49 = arith.constant dense<0.000000e+00> : vector<64x64xf32>
    %49 = tpu.matmul %46, %47, %cst_49 {dimension_numbers = #tpu.dot_dimension_numbers<[1], [1], [0], [0], [0, 0, 1, 0], [], []>} : vector<64x8xf32>, vector<64x8xf32>, vector<64x64xf32> -> vector<64x64xf32>
    %cst_50 = arith.constant 0.353553385 : f32
    %50 = vector.broadcast %cst_50 : f32 to vector<64x64xf32>
    %51 = arith.mulf %49, %50 : vector<64x64xf32>
    %52 = arith.addf %51, %0 : vector<64x64xf32>
    %cst_51 = arith.constant dense<0xFF800000> : vector<64xf32>
    %53 = vector.multi_reduction <maximumf>, %52, %cst_51 [1] : vector<64x64xf32> to vector<64xf32>
    %54 = vector.shape_cast %53 : vector<64xf32> to vector<64x1xf32>
    %55 = vector.broadcast %54 : vector<64x1xf32> to vector<64x64xf32>
    %56 = arith.subf %52, %55 : vector<64x64xf32>
    %57 = math.exp %56 : vector<64x64xf32>
    %cst_52 = arith.constant dense<0.000000e+00> : vector<64xf32>
    %58 = vector.multi_reduction <add>, %57, %cst_52 [1] : vector<64x64xf32> to vector<64xf32>
    %59 = vector.shape_cast %58 : vector<64xf32> to vector<64x1xf32>
    %60 = tpu.reciprocal %59 {approx = true} : vector<64x1xf32> -> vector<64x1xf32>
    %61 = vector.broadcast %60 : vector<64x1xf32> to vector<64x64xf32>
    %62 = arith.mulf %57, %61 : vector<64x64xf32>
    %cst_53 = arith.constant dense<0.000000e+00> : vector<64x8xf32>
    %63 = tpu.matmul %62, %48, %cst_53 {dimension_numbers = #tpu.dot_dimension_numbers<[1], [0], [0], [1], [0, 0, 1, 1], [], []>} : vector<64x64xf32>, vector<64x8xf32>, vector<64x8xf32> -> vector<64x8xf32>
    %64 = vector.extract_strided_slice %21 {offsets = [0, 16], sizes = [64, 8], strides = [1, 1]} : vector<64x32xf32> to vector<64x8xf32>
    %65 = vector.extract_strided_slice %24 {offsets = [0, 16], sizes = [64, 8], strides = [1, 1]} : vector<64x32xf32> to vector<64x8xf32>
    %66 = vector.extract_strided_slice %27 {offsets = [0, 16], sizes = [64, 8], strides = [1, 1]} : vector<64x32xf32> to vector<64x8xf32>
    %cst_54 = arith.constant dense<0.000000e+00> : vector<64x64xf32>
    %67 = tpu.matmul %64, %65, %cst_54 {dimension_numbers = #tpu.dot_dimension_numbers<[1], [1], [0], [0], [0, 0, 1, 0], [], []>} : vector<64x8xf32>, vector<64x8xf32>, vector<64x64xf32> -> vector<64x64xf32>
    %cst_55 = arith.constant 0.353553385 : f32
    %68 = vector.broadcast %cst_55 : f32 to vector<64x64xf32>
    %69 = arith.mulf %67, %68 : vector<64x64xf32>
    %70 = arith.addf %69, %0 : vector<64x64xf32>
    %cst_56 = arith.constant dense<0xFF800000> : vector<64xf32>
    %71 = vector.multi_reduction <maximumf>, %70, %cst_56 [1] : vector<64x64xf32> to vector<64xf32>
    %72 = vector.shape_cast %71 : vector<64xf32> to vector<64x1xf32>
    %73 = vector.broadcast %72 : vector<64x1xf32> to vector<64x64xf32>
    %74 = arith.subf %70, %73 : vector<64x64xf32>
    %75 = math.exp %74 : vector<64x64xf32>
    %cst_57 = arith.constant dense<0.000000e+00> : vector<64xf32>
    %76 = vector.multi_reduction <add>, %75, %cst_57 [1] : vector<64x64xf32> to vector<64xf32>
    %77 = vector.shape_cast %76 : vector<64xf32> to vector<64x1xf32>
    %78 = tpu.reciprocal %77 {approx = true} : vector<64x1xf32> -> vector<64x1xf32>
    %79 = vector.broadcast %78 : vector<64x1xf32> to vector<64x64xf32>
    %80 = arith.mulf %75, %79 : vector<64x64xf32>
    %cst_58 = arith.constant dense<0.000000e+00> : vector<64x8xf32>
    %81 = tpu.matmul %80, %66, %cst_58 {dimension_numbers = #tpu.dot_dimension_numbers<[1], [0], [0], [1], [0, 0, 1, 1], [], []>} : vector<64x64xf32>, vector<64x8xf32>, vector<64x8xf32> -> vector<64x8xf32>
    %82 = vector.extract_strided_slice %21 {offsets = [0, 24], sizes = [64, 8], strides = [1, 1]} : vector<64x32xf32> to vector<64x8xf32>
    %83 = vector.extract_strided_slice %24 {offsets = [0, 24], sizes = [64, 8], strides = [1, 1]} : vector<64x32xf32> to vector<64x8xf32>
    %84 = vector.extract_strided_slice %27 {offsets = [0, 24], sizes = [64, 8], strides = [1, 1]} : vector<64x32xf32> to vector<64x8xf32>
    %cst_59 = arith.constant dense<0.000000e+00> : vector<64x64xf32>
    %85 = tpu.matmul %82, %83, %cst_59 {dimension_numbers = #tpu.dot_dimension_numbers<[1], [1], [0], [0], [0, 0, 1, 0], [], []>} : vector<64x8xf32>, vector<64x8xf32>, vector<64x64xf32> -> vector<64x64xf32>
    %cst_60 = arith.constant 0.353553385 : f32
    %86 = vector.broadcast %cst_60 : f32 to vector<64x64xf32>
    %87 = arith.mulf %85, %86 : vector<64x64xf32>
    %88 = arith.addf %87, %0 : vector<64x64xf32>
    %cst_61 = arith.constant dense<0xFF800000> : vector<64xf32>
    %89 = vector.multi_reduction <maximumf>, %88, %cst_61 [1] : vector<64x64xf32> to vector<64xf32>
    %90 = vector.shape_cast %89 : vector<64xf32> to vector<64x1xf32>
    %91 = vector.broadcast %90 : vector<64x1xf32> to vector<64x64xf32>
    %92 = arith.subf %88, %91 : vector<64x64xf32>
    %93 = math.exp %92 : vector<64x64xf32>
    %cst_62 = arith.constant dense<0.000000e+00> : vector<64xf32>
    %94 = vector.multi_reduction <add>, %93, %cst_62 [1] : vector<64x64xf32> to vector<64xf32>
    %95 = vector.shape_cast %94 : vector<64xf32> to vector<64x1xf32>
    %96 = tpu.reciprocal %95 {approx = true} : vector<64x1xf32> -> vector<64x1xf32>
    %97 = vector.broadcast %96 : vector<64x1xf32> to vector<64x64xf32>
    %98 = arith.mulf %93, %97 : vector<64x64xf32>
    %cst_63 = arith.constant dense<0.000000e+00> : vector<64x8xf32>
    %99 = tpu.matmul %98, %84, %cst_63 {dimension_numbers = #tpu.dot_dimension_numbers<[1], [0], [0], [1], [0, 0, 1, 1], [], []>} : vector<64x64xf32>, vector<64x8xf32>, vector<64x8xf32> -> vector<64x8xf32>
    %100 = tpu.concatenate %45, %63, %81, %99 in 1 : vector<64x8xf32>, vector<64x8xf32>, vector<64x8xf32>, vector<64x8xf32> -> vector<64x32xf32>
    %cst_64 = arith.constant dense<0.000000e+00> : vector<64x32xf32>
    %101 = tpu.matmul %100, %10, %cst_64 {dimension_numbers = #tpu.dot_dimension_numbers<[1], [0], [0], [1], [0, 0, 1, 1], [], []>} : vector<64x32xf32>, vector<32x32xf32>, vector<64x32xf32> -> vector<64x32xf32>
    %102 = vector.broadcast %18 : vector<1x32xf32> to vector<64x32xf32>
    %103 = arith.addf %101, %102 : vector<64x32xf32>
    %c0_65 = arith.constant 0 : index
    %c1_66 = arith.constant 1 : index
    %c0_67 = arith.constant 0 : index
    %c0_68 = arith.constant 0 : index
    %c0_69 = arith.constant 0 : index
    %104 = vector.load %arg2[%c0_65, %c1_66, %c0_67, %c0_68, %c0_69] : memref<2x2x4x32x32xf32, #tpu.memory_space<vmem>>, vector<1x1x1x32x32xf32>
    %105 = vector.shape_cast %104 : vector<1x1x1x32x32xf32> to vector<32x32xf32>
    %c0_70 = arith.constant 0 : index
    %c1_71 = arith.constant 1 : index
    %c1_72 = arith.constant 1 : index
    %c0_73 = arith.constant 0 : index
    %c0_74 = arith.constant 0 : index
    %106 = vector.load %arg2[%c0_70, %c1_71, %c1_72, %c0_73, %c0_74] : memref<2x2x4x32x32xf32, #tpu.memory_space<vmem>>, vector<1x1x1x32x32xf32>
    %107 = vector.shape_cast %106 : vector<1x1x1x32x32xf32> to vector<32x32xf32>
    %c0_75 = arith.constant 0 : index
    %c1_76 = arith.constant 1 : index
    %c2_77 = arith.constant 2 : index
    %c0_78 = arith.constant 0 : index
    %c0_79 = arith.constant 0 : index
    %108 = vector.load %arg2[%c0_75, %c1_76, %c2_77, %c0_78, %c0_79] : memref<2x2x4x32x32xf32, #tpu.memory_space<vmem>>, vector<1x1x1x32x32xf32>
    %109 = vector.shape_cast %108 : vector<1x1x1x32x32xf32> to vector<32x32xf32>
    %c0_80 = arith.constant 0 : index
    %c1_81 = arith.constant 1 : index
    %c3_82 = arith.constant 3 : index
    %c0_83 = arith.constant 0 : index
    %c0_84 = arith.constant 0 : index
    %110 = vector.load %arg2[%c0_80, %c1_81, %c3_82, %c0_83, %c0_84] : memref<2x2x4x32x32xf32, #tpu.memory_space<vmem>>, vector<1x1x1x32x32xf32>
    %111 = vector.shape_cast %110 : vector<1x1x1x32x32xf32> to vector<32x32xf32>
    %c0_85 = arith.constant 0 : index
    %c1_86 = arith.constant 1 : index
    %c0_87 = arith.constant 0 : index
    %c0_88 = arith.constant 0 : index
    %c0_89 = arith.constant 0 : index
    %112 = vector.load %arg3[%c0_85, %c1_86, %c0_87, %c0_88, %c0_89] : memref<2x2x4x1x32xf32, #tpu.memory_space<vmem>>, vector<1x1x1x1x32xf32>
    %113 = vector.shape_cast %112 : vector<1x1x1x1x32xf32> to vector<1x32xf32>
    %c0_90 = arith.constant 0 : index
    %c1_91 = arith.constant 1 : index
    %c1_92 = arith.constant 1 : index
    %c0_93 = arith.constant 0 : index
    %c0_94 = arith.constant 0 : index
    %114 = vector.load %arg3[%c0_90, %c1_91, %c1_92, %c0_93, %c0_94] : memref<2x2x4x1x32xf32, #tpu.memory_space<vmem>>, vector<1x1x1x1x32xf32>
    %115 = vector.shape_cast %114 : vector<1x1x1x1x32xf32> to vector<1x32xf32>
    %c0_95 = arith.constant 0 : index
    %c1_96 = arith.constant 1 : index
    %c2_97 = arith.constant 2 : index
    %c0_98 = arith.constant 0 : index
    %c0_99 = arith.constant 0 : index
    %116 = vector.load %arg3[%c0_95, %c1_96, %c2_97, %c0_98, %c0_99] : memref<2x2x4x1x32xf32, #tpu.memory_space<vmem>>, vector<1x1x1x1x32xf32>
    %117 = vector.shape_cast %116 : vector<1x1x1x1x32xf32> to vector<1x32xf32>
    %c0_100 = arith.constant 0 : index
    %c1_101 = arith.constant 1 : index
    %c3_102 = arith.constant 3 : index
    %c0_103 = arith.constant 0 : index
    %c0_104 = arith.constant 0 : index
    %118 = vector.load %arg3[%c0_100, %c1_101, %c3_102, %c0_103, %c0_104] : memref<2x2x4x1x32xf32, #tpu.memory_space<vmem>>, vector<1x1x1x1x32xf32>
    %119 = vector.shape_cast %118 : vector<1x1x1x1x32xf32> to vector<1x32xf32>
    %cst_105 = arith.constant dense<0.000000e+00> : vector<64x32xf32>
    %120 = tpu.matmul %103, %105, %cst_105 {dimension_numbers = #tpu.dot_dimension_numbers<[1], [0], [0], [1], [0, 0, 1, 1], [], []>} : vector<64x32xf32>, vector<32x32xf32>, vector<64x32xf32> -> vector<64x32xf32>
    %121 = vector.broadcast %113 : vector<1x32xf32> to vector<64x32xf32>
    %122 = arith.addf %120, %121 : vector<64x32xf32>
    %cst_106 = arith.constant dense<0.000000e+00> : vector<64x32xf32>
    %123 = tpu.matmul %103, %107, %cst_106 {dimension_numbers = #tpu.dot_dimension_numbers<[1], [0], [0], [1], [0, 0, 1, 1], [], []>} : vector<64x32xf32>, vector<32x32xf32>, vector<64x32xf32> -> vector<64x32xf32>
    %124 = vector.broadcast %115 : vector<1x32xf32> to vector<64x32xf32>
    %125 = arith.addf %123, %124 : vector<64x32xf32>
    %cst_107 = arith.constant dense<0.000000e+00> : vector<64x32xf32>
    %126 = tpu.matmul %103, %109, %cst_107 {dimension_numbers = #tpu.dot_dimension_numbers<[1], [0], [0], [1], [0, 0, 1, 1], [], []>} : vector<64x32xf32>, vector<32x32xf32>, vector<64x32xf32> -> vector<64x32xf32>
    %127 = vector.broadcast %117 : vector<1x32xf32> to vector<64x32xf32>
    %128 = arith.addf %126, %127 : vector<64x32xf32>
    %129 = vector.extract_strided_slice %122 {offsets = [0, 0], sizes = [64, 8], strides = [1, 1]} : vector<64x32xf32> to vector<64x8xf32>
    %130 = vector.extract_strided_slice %125 {offsets = [0, 0], sizes = [64, 8], strides = [1, 1]} : vector<64x32xf32> to vector<64x8xf32>
    %131 = vector.extract_strided_slice %128 {offsets = [0, 0], sizes = [64, 8], strides = [1, 1]} : vector<64x32xf32> to vector<64x8xf32>
    %cst_108 = arith.constant dense<0.000000e+00> : vector<64x64xf32>
    %132 = tpu.matmul %129, %130, %cst_108 {dimension_numbers = #tpu.dot_dimension_numbers<[1], [1], [0], [0], [0, 0, 1, 0], [], []>} : vector<64x8xf32>, vector<64x8xf32>, vector<64x64xf32> -> vector<64x64xf32>
    %cst_109 = arith.constant 0.353553385 : f32
    %133 = vector.broadcast %cst_109 : f32 to vector<64x64xf32>
    %134 = arith.mulf %132, %133 : vector<64x64xf32>
    %135 = arith.addf %134, %1 : vector<64x64xf32>
    %cst_110 = arith.constant dense<0xFF800000> : vector<64xf32>
    %136 = vector.multi_reduction <maximumf>, %135, %cst_110 [1] : vector<64x64xf32> to vector<64xf32>
    %137 = vector.shape_cast %136 : vector<64xf32> to vector<64x1xf32>
    %138 = vector.broadcast %137 : vector<64x1xf32> to vector<64x64xf32>
    %139 = arith.subf %135, %138 : vector<64x64xf32>
    %140 = math.exp %139 : vector<64x64xf32>
    %cst_111 = arith.constant dense<0.000000e+00> : vector<64xf32>
    %141 = vector.multi_reduction <add>, %140, %cst_111 [1] : vector<64x64xf32> to vector<64xf32>
    %142 = vector.shape_cast %141 : vector<64xf32> to vector<64x1xf32>
    %143 = tpu.reciprocal %142 {approx = true} : vector<64x1xf32> -> vector<64x1xf32>
    %144 = vector.broadcast %143 : vector<64x1xf32> to vector<64x64xf32>
    %145 = arith.mulf %140, %144 : vector<64x64xf32>
    %cst_112 = arith.constant dense<0.000000e+00> : vector<64x8xf32>
    %146 = tpu.matmul %145, %131, %cst_112 {dimension_numbers = #tpu.dot_dimension_numbers<[1], [0], [0], [1], [0, 0, 1, 1], [], []>} : vector<64x64xf32>, vector<64x8xf32>, vector<64x8xf32> -> vector<64x8xf32>
    %147 = vector.extract_strided_slice %122 {offsets = [0, 8], sizes = [64, 8], strides = [1, 1]} : vector<64x32xf32> to vector<64x8xf32>
    %148 = vector.extract_strided_slice %125 {offsets = [0, 8], sizes = [64, 8], strides = [1, 1]} : vector<64x32xf32> to vector<64x8xf32>
    %149 = vector.extract_strided_slice %128 {offsets = [0, 8], sizes = [64, 8], strides = [1, 1]} : vector<64x32xf32> to vector<64x8xf32>
    %cst_113 = arith.constant dense<0.000000e+00> : vector<64x64xf32>
    %150 = tpu.matmul %147, %148, %cst_113 {dimension_numbers = #tpu.dot_dimension_numbers<[1], [1], [0], [0], [0, 0, 1, 0], [], []>} : vector<64x8xf32>, vector<64x8xf32>, vector<64x64xf32> -> vector<64x64xf32>
    %cst_114 = arith.constant 0.353553385 : f32
    %151 = vector.broadcast %cst_114 : f32 to vector<64x64xf32>
    %152 = arith.mulf %150, %151 : vector<64x64xf32>
    %153 = arith.addf %152, %1 : vector<64x64xf32>
    %cst_115 = arith.constant dense<0xFF800000> : vector<64xf32>
    %154 = vector.multi_reduction <maximumf>, %153, %cst_115 [1] : vector<64x64xf32> to vector<64xf32>
    %155 = vector.shape_cast %154 : vector<64xf32> to vector<64x1xf32>
    %156 = vector.broadcast %155 : vector<64x1xf32> to vector<64x64xf32>
    %157 = arith.subf %153, %156 : vector<64x64xf32>
    %158 = math.exp %157 : vector<64x64xf32>
    %cst_116 = arith.constant dense<0.000000e+00> : vector<64xf32>
    %159 = vector.multi_reduction <add>, %158, %cst_116 [1] : vector<64x64xf32> to vector<64xf32>
    %160 = vector.shape_cast %159 : vector<64xf32> to vector<64x1xf32>
    %161 = tpu.reciprocal %160 {approx = true} : vector<64x1xf32> -> vector<64x1xf32>
    %162 = vector.broadcast %161 : vector<64x1xf32> to vector<64x64xf32>
    %163 = arith.mulf %158, %162 : vector<64x64xf32>
    %cst_117 = arith.constant dense<0.000000e+00> : vector<64x8xf32>
    %164 = tpu.matmul %163, %149, %cst_117 {dimension_numbers = #tpu.dot_dimension_numbers<[1], [0], [0], [1], [0, 0, 1, 1], [], []>} : vector<64x64xf32>, vector<64x8xf32>, vector<64x8xf32> -> vector<64x8xf32>
    %165 = vector.extract_strided_slice %122 {offsets = [0, 16], sizes = [64, 8], strides = [1, 1]} : vector<64x32xf32> to vector<64x8xf32>
    %166 = vector.extract_strided_slice %125 {offsets = [0, 16], sizes = [64, 8], strides = [1, 1]} : vector<64x32xf32> to vector<64x8xf32>
    %167 = vector.extract_strided_slice %128 {offsets = [0, 16], sizes = [64, 8], strides = [1, 1]} : vector<64x32xf32> to vector<64x8xf32>
    %cst_118 = arith.constant dense<0.000000e+00> : vector<64x64xf32>
    %168 = tpu.matmul %165, %166, %cst_118 {dimension_numbers = #tpu.dot_dimension_numbers<[1], [1], [0], [0], [0, 0, 1, 0], [], []>} : vector<64x8xf32>, vector<64x8xf32>, vector<64x64xf32> -> vector<64x64xf32>
    %cst_119 = arith.constant 0.353553385 : f32
    %169 = vector.broadcast %cst_119 : f32 to vector<64x64xf32>
    %170 = arith.mulf %168, %169 : vector<64x64xf32>
    %171 = arith.addf %170, %1 : vector<64x64xf32>
    %cst_120 = arith.constant dense<0xFF800000> : vector<64xf32>
    %172 = vector.multi_reduction <maximumf>, %171, %cst_120 [1] : vector<64x64xf32> to vector<64xf32>
    %173 = vector.shape_cast %172 : vector<64xf32> to vector<64x1xf32>
    %174 = vector.broadcast %173 : vector<64x1xf32> to vector<64x64xf32>
    %175 = arith.subf %171, %174 : vector<64x64xf32>
    %176 = math.exp %175 : vector<64x64xf32>
    %cst_121 = arith.constant dense<0.000000e+00> : vector<64xf32>
    %177 = vector.multi_reduction <add>, %176, %cst_121 [1] : vector<64x64xf32> to vector<64xf32>
    %178 = vector.shape_cast %177 : vector<64xf32> to vector<64x1xf32>
    %179 = tpu.reciprocal %178 {approx = true} : vector<64x1xf32> -> vector<64x1xf32>
    %180 = vector.broadcast %179 : vector<64x1xf32> to vector<64x64xf32>
    %181 = arith.mulf %176, %180 : vector<64x64xf32>
    %cst_122 = arith.constant dense<0.000000e+00> : vector<64x8xf32>
    %182 = tpu.matmul %181, %167, %cst_122 {dimension_numbers = #tpu.dot_dimension_numbers<[1], [0], [0], [1], [0, 0, 1, 1], [], []>} : vector<64x64xf32>, vector<64x8xf32>, vector<64x8xf32> -> vector<64x8xf32>
    %183 = vector.extract_strided_slice %122 {offsets = [0, 24], sizes = [64, 8], strides = [1, 1]} : vector<64x32xf32> to vector<64x8xf32>
    %184 = vector.extract_strided_slice %125 {offsets = [0, 24], sizes = [64, 8], strides = [1, 1]} : vector<64x32xf32> to vector<64x8xf32>
    %185 = vector.extract_strided_slice %128 {offsets = [0, 24], sizes = [64, 8], strides = [1, 1]} : vector<64x32xf32> to vector<64x8xf32>
    %cst_123 = arith.constant dense<0.000000e+00> : vector<64x64xf32>
    %186 = tpu.matmul %183, %184, %cst_123 {dimension_numbers = #tpu.dot_dimension_numbers<[1], [1], [0], [0], [0, 0, 1, 0], [], []>} : vector<64x8xf32>, vector<64x8xf32>, vector<64x64xf32> -> vector<64x64xf32>
    %cst_124 = arith.constant 0.353553385 : f32
    %187 = vector.broadcast %cst_124 : f32 to vector<64x64xf32>
    %188 = arith.mulf %186, %187 : vector<64x64xf32>
    %189 = arith.addf %188, %1 : vector<64x64xf32>
    %cst_125 = arith.constant dense<0xFF800000> : vector<64xf32>
    %190 = vector.multi_reduction <maximumf>, %189, %cst_125 [1] : vector<64x64xf32> to vector<64xf32>
    %191 = vector.shape_cast %190 : vector<64xf32> to vector<64x1xf32>
    %192 = vector.broadcast %191 : vector<64x1xf32> to vector<64x64xf32>
    %193 = arith.subf %189, %192 : vector<64x64xf32>
    %194 = math.exp %193 : vector<64x64xf32>
    %cst_126 = arith.constant dense<0.000000e+00> : vector<64xf32>
    %195 = vector.multi_reduction <add>, %194, %cst_126 [1] : vector<64x64xf32> to vector<64xf32>
    %196 = vector.shape_cast %195 : vector<64xf32> to vector<64x1xf32>
    %197 = tpu.reciprocal %196 {approx = true} : vector<64x1xf32> -> vector<64x1xf32>
    %198 = vector.broadcast %197 : vector<64x1xf32> to vector<64x64xf32>
    %199 = arith.mulf %194, %198 : vector<64x64xf32>
    %cst_127 = arith.constant dense<0.000000e+00> : vector<64x8xf32>
    %200 = tpu.matmul %199, %185, %cst_127 {dimension_numbers = #tpu.dot_dimension_numbers<[1], [0], [0], [1], [0, 0, 1, 1], [], []>} : vector<64x64xf32>, vector<64x8xf32>, vector<64x8xf32> -> vector<64x8xf32>
    %201 = tpu.concatenate %146, %164, %182, %200 in 1 : vector<64x8xf32>, vector<64x8xf32>, vector<64x8xf32>, vector<64x8xf32> -> vector<64x32xf32>
    %cst_128 = arith.constant dense<0.000000e+00> : vector<64x32xf32>
    %202 = tpu.matmul %201, %111, %cst_128 {dimension_numbers = #tpu.dot_dimension_numbers<[1], [0], [0], [1], [0, 0, 1, 1], [], []>} : vector<64x32xf32>, vector<32x32xf32>, vector<64x32xf32> -> vector<64x32xf32>
    %203 = vector.broadcast %119 : vector<1x32xf32> to vector<64x32xf32>
    %204 = arith.addf %202, %203 : vector<64x32xf32>
    %c1_129 = arith.constant 1 : index
    %c0_130 = arith.constant 0 : index
    %c0_131 = arith.constant 0 : index
    %c0_132 = arith.constant 0 : index
    %c0_133 = arith.constant 0 : index
    %205 = vector.load %arg2[%c1_129, %c0_130, %c0_131, %c0_132, %c0_133] : memref<2x2x4x32x32xf32, #tpu.memory_space<vmem>>, vector<1x1x1x32x32xf32>
    %206 = vector.shape_cast %205 : vector<1x1x1x32x32xf32> to vector<32x32xf32>
    %c1_134 = arith.constant 1 : index
    %c0_135 = arith.constant 0 : index
    %c1_136 = arith.constant 1 : index
    %c0_137 = arith.constant 0 : index
    %c0_138 = arith.constant 0 : index
    %207 = vector.load %arg2[%c1_134, %c0_135, %c1_136, %c0_137, %c0_138] : memref<2x2x4x32x32xf32, #tpu.memory_space<vmem>>, vector<1x1x1x32x32xf32>
    %208 = vector.shape_cast %207 : vector<1x1x1x32x32xf32> to vector<32x32xf32>
    %c1_139 = arith.constant 1 : index
    %c0_140 = arith.constant 0 : index
    %c2_141 = arith.constant 2 : index
    %c0_142 = arith.constant 0 : index
    %c0_143 = arith.constant 0 : index
    %209 = vector.load %arg2[%c1_139, %c0_140, %c2_141, %c0_142, %c0_143] : memref<2x2x4x32x32xf32, #tpu.memory_space<vmem>>, vector<1x1x1x32x32xf32>
    %210 = vector.shape_cast %209 : vector<1x1x1x32x32xf32> to vector<32x32xf32>
    %c1_144 = arith.constant 1 : index
    %c0_145 = arith.constant 0 : index
    %c3_146 = arith.constant 3 : index
    %c0_147 = arith.constant 0 : index
    %c0_148 = arith.constant 0 : index
    %211 = vector.load %arg2[%c1_144, %c0_145, %c3_146, %c0_147, %c0_148] : memref<2x2x4x32x32xf32, #tpu.memory_space<vmem>>, vector<1x1x1x32x32xf32>
    %212 = vector.shape_cast %211 : vector<1x1x1x32x32xf32> to vector<32x32xf32>
    %c1_149 = arith.constant 1 : index
    %c0_150 = arith.constant 0 : index
    %c0_151 = arith.constant 0 : index
    %c0_152 = arith.constant 0 : index
    %c0_153 = arith.constant 0 : index
    %213 = vector.load %arg3[%c1_149, %c0_150, %c0_151, %c0_152, %c0_153] : memref<2x2x4x1x32xf32, #tpu.memory_space<vmem>>, vector<1x1x1x1x32xf32>
    %214 = vector.shape_cast %213 : vector<1x1x1x1x32xf32> to vector<1x32xf32>
    %c1_154 = arith.constant 1 : index
    %c0_155 = arith.constant 0 : index
    %c1_156 = arith.constant 1 : index
    %c0_157 = arith.constant 0 : index
    %c0_158 = arith.constant 0 : index
    %215 = vector.load %arg3[%c1_154, %c0_155, %c1_156, %c0_157, %c0_158] : memref<2x2x4x1x32xf32, #tpu.memory_space<vmem>>, vector<1x1x1x1x32xf32>
    %216 = vector.shape_cast %215 : vector<1x1x1x1x32xf32> to vector<1x32xf32>
    %c1_159 = arith.constant 1 : index
    %c0_160 = arith.constant 0 : index
    %c2_161 = arith.constant 2 : index
    %c0_162 = arith.constant 0 : index
    %c0_163 = arith.constant 0 : index
    %217 = vector.load %arg3[%c1_159, %c0_160, %c2_161, %c0_162, %c0_163] : memref<2x2x4x1x32xf32, #tpu.memory_space<vmem>>, vector<1x1x1x1x32xf32>
    %218 = vector.shape_cast %217 : vector<1x1x1x1x32xf32> to vector<1x32xf32>
    %c1_164 = arith.constant 1 : index
    %c0_165 = arith.constant 0 : index
    %c3_166 = arith.constant 3 : index
    %c0_167 = arith.constant 0 : index
    %c0_168 = arith.constant 0 : index
    %219 = vector.load %arg3[%c1_164, %c0_165, %c3_166, %c0_167, %c0_168] : memref<2x2x4x1x32xf32, #tpu.memory_space<vmem>>, vector<1x1x1x1x32xf32>
    %220 = vector.shape_cast %219 : vector<1x1x1x1x32xf32> to vector<1x32xf32>
    %cst_169 = arith.constant dense<0.000000e+00> : vector<64x32xf32>
    %221 = tpu.matmul %204, %206, %cst_169 {dimension_numbers = #tpu.dot_dimension_numbers<[1], [0], [0], [1], [0, 0, 1, 1], [], []>} : vector<64x32xf32>, vector<32x32xf32>, vector<64x32xf32> -> vector<64x32xf32>
    %222 = vector.broadcast %214 : vector<1x32xf32> to vector<64x32xf32>
    %223 = arith.addf %221, %222 : vector<64x32xf32>
    %cst_170 = arith.constant dense<0.000000e+00> : vector<64x32xf32>
    %224 = tpu.matmul %204, %208, %cst_170 {dimension_numbers = #tpu.dot_dimension_numbers<[1], [0], [0], [1], [0, 0, 1, 1], [], []>} : vector<64x32xf32>, vector<32x32xf32>, vector<64x32xf32> -> vector<64x32xf32>
    %225 = vector.broadcast %216 : vector<1x32xf32> to vector<64x32xf32>
    %226 = arith.addf %224, %225 : vector<64x32xf32>
    %cst_171 = arith.constant dense<0.000000e+00> : vector<64x32xf32>
    %227 = tpu.matmul %204, %210, %cst_171 {dimension_numbers = #tpu.dot_dimension_numbers<[1], [0], [0], [1], [0, 0, 1, 1], [], []>} : vector<64x32xf32>, vector<32x32xf32>, vector<64x32xf32> -> vector<64x32xf32>
    %228 = vector.broadcast %218 : vector<1x32xf32> to vector<64x32xf32>
    %229 = arith.addf %227, %228 : vector<64x32xf32>
    %230 = vector.extract_strided_slice %223 {offsets = [0, 0], sizes = [64, 8], strides = [1, 1]} : vector<64x32xf32> to vector<64x8xf32>
    %231 = vector.extract_strided_slice %226 {offsets = [0, 0], sizes = [64, 8], strides = [1, 1]} : vector<64x32xf32> to vector<64x8xf32>
    %232 = vector.extract_strided_slice %229 {offsets = [0, 0], sizes = [64, 8], strides = [1, 1]} : vector<64x32xf32> to vector<64x8xf32>
    %cst_172 = arith.constant dense<0.000000e+00> : vector<64x64xf32>
    %233 = tpu.matmul %230, %231, %cst_172 {dimension_numbers = #tpu.dot_dimension_numbers<[1], [1], [0], [0], [0, 0, 1, 0], [], []>} : vector<64x8xf32>, vector<64x8xf32>, vector<64x64xf32> -> vector<64x64xf32>
    %cst_173 = arith.constant 0.353553385 : f32
    %234 = vector.broadcast %cst_173 : f32 to vector<64x64xf32>
    %235 = arith.mulf %233, %234 : vector<64x64xf32>
    %236 = arith.addf %235, %0 : vector<64x64xf32>
    %cst_174 = arith.constant dense<0xFF800000> : vector<64xf32>
    %237 = vector.multi_reduction <maximumf>, %236, %cst_174 [1] : vector<64x64xf32> to vector<64xf32>
    %238 = vector.shape_cast %237 : vector<64xf32> to vector<64x1xf32>
    %239 = vector.broadcast %238 : vector<64x1xf32> to vector<64x64xf32>
    %240 = arith.subf %236, %239 : vector<64x64xf32>
    %241 = math.exp %240 : vector<64x64xf32>
    %cst_175 = arith.constant dense<0.000000e+00> : vector<64xf32>
    %242 = vector.multi_reduction <add>, %241, %cst_175 [1] : vector<64x64xf32> to vector<64xf32>
    %243 = vector.shape_cast %242 : vector<64xf32> to vector<64x1xf32>
    %244 = tpu.reciprocal %243 {approx = true} : vector<64x1xf32> -> vector<64x1xf32>
    %245 = vector.broadcast %244 : vector<64x1xf32> to vector<64x64xf32>
    %246 = arith.mulf %241, %245 : vector<64x64xf32>
    %cst_176 = arith.constant dense<0.000000e+00> : vector<64x8xf32>
    %247 = tpu.matmul %246, %232, %cst_176 {dimension_numbers = #tpu.dot_dimension_numbers<[1], [0], [0], [1], [0, 0, 1, 1], [], []>} : vector<64x64xf32>, vector<64x8xf32>, vector<64x8xf32> -> vector<64x8xf32>
    %248 = vector.extract_strided_slice %223 {offsets = [0, 8], sizes = [64, 8], strides = [1, 1]} : vector<64x32xf32> to vector<64x8xf32>
    %249 = vector.extract_strided_slice %226 {offsets = [0, 8], sizes = [64, 8], strides = [1, 1]} : vector<64x32xf32> to vector<64x8xf32>
    %250 = vector.extract_strided_slice %229 {offsets = [0, 8], sizes = [64, 8], strides = [1, 1]} : vector<64x32xf32> to vector<64x8xf32>
    %cst_177 = arith.constant dense<0.000000e+00> : vector<64x64xf32>
    %251 = tpu.matmul %248, %249, %cst_177 {dimension_numbers = #tpu.dot_dimension_numbers<[1], [1], [0], [0], [0, 0, 1, 0], [], []>} : vector<64x8xf32>, vector<64x8xf32>, vector<64x64xf32> -> vector<64x64xf32>
    %cst_178 = arith.constant 0.353553385 : f32
    %252 = vector.broadcast %cst_178 : f32 to vector<64x64xf32>
    %253 = arith.mulf %251, %252 : vector<64x64xf32>
    %254 = arith.addf %253, %0 : vector<64x64xf32>
    %cst_179 = arith.constant dense<0xFF800000> : vector<64xf32>
    %255 = vector.multi_reduction <maximumf>, %254, %cst_179 [1] : vector<64x64xf32> to vector<64xf32>
    %256 = vector.shape_cast %255 : vector<64xf32> to vector<64x1xf32>
    %257 = vector.broadcast %256 : vector<64x1xf32> to vector<64x64xf32>
    %258 = arith.subf %254, %257 : vector<64x64xf32>
    %259 = math.exp %258 : vector<64x64xf32>
    %cst_180 = arith.constant dense<0.000000e+00> : vector<64xf32>
    %260 = vector.multi_reduction <add>, %259, %cst_180 [1] : vector<64x64xf32> to vector<64xf32>
    %261 = vector.shape_cast %260 : vector<64xf32> to vector<64x1xf32>
    %262 = tpu.reciprocal %261 {approx = true} : vector<64x1xf32> -> vector<64x1xf32>
    %263 = vector.broadcast %262 : vector<64x1xf32> to vector<64x64xf32>
    %264 = arith.mulf %259, %263 : vector<64x64xf32>
    %cst_181 = arith.constant dense<0.000000e+00> : vector<64x8xf32>
    %265 = tpu.matmul %264, %250, %cst_181 {dimension_numbers = #tpu.dot_dimension_numbers<[1], [0], [0], [1], [0, 0, 1, 1], [], []>} : vector<64x64xf32>, vector<64x8xf32>, vector<64x8xf32> -> vector<64x8xf32>
    %266 = vector.extract_strided_slice %223 {offsets = [0, 16], sizes = [64, 8], strides = [1, 1]} : vector<64x32xf32> to vector<64x8xf32>
    %267 = vector.extract_strided_slice %226 {offsets = [0, 16], sizes = [64, 8], strides = [1, 1]} : vector<64x32xf32> to vector<64x8xf32>
    %268 = vector.extract_strided_slice %229 {offsets = [0, 16], sizes = [64, 8], strides = [1, 1]} : vector<64x32xf32> to vector<64x8xf32>
    %cst_182 = arith.constant dense<0.000000e+00> : vector<64x64xf32>
    %269 = tpu.matmul %266, %267, %cst_182 {dimension_numbers = #tpu.dot_dimension_numbers<[1], [1], [0], [0], [0, 0, 1, 0], [], []>} : vector<64x8xf32>, vector<64x8xf32>, vector<64x64xf32> -> vector<64x64xf32>
    %cst_183 = arith.constant 0.353553385 : f32
    %270 = vector.broadcast %cst_183 : f32 to vector<64x64xf32>
    %271 = arith.mulf %269, %270 : vector<64x64xf32>
    %272 = arith.addf %271, %0 : vector<64x64xf32>
    %cst_184 = arith.constant dense<0xFF800000> : vector<64xf32>
    %273 = vector.multi_reduction <maximumf>, %272, %cst_184 [1] : vector<64x64xf32> to vector<64xf32>
    %274 = vector.shape_cast %273 : vector<64xf32> to vector<64x1xf32>
    %275 = vector.broadcast %274 : vector<64x1xf32> to vector<64x64xf32>
    %276 = arith.subf %272, %275 : vector<64x64xf32>
    %277 = math.exp %276 : vector<64x64xf32>
    %cst_185 = arith.constant dense<0.000000e+00> : vector<64xf32>
    %278 = vector.multi_reduction <add>, %277, %cst_185 [1] : vector<64x64xf32> to vector<64xf32>
    %279 = vector.shape_cast %278 : vector<64xf32> to vector<64x1xf32>
    %280 = tpu.reciprocal %279 {approx = true} : vector<64x1xf32> -> vector<64x1xf32>
    %281 = vector.broadcast %280 : vector<64x1xf32> to vector<64x64xf32>
    %282 = arith.mulf %277, %281 : vector<64x64xf32>
    %cst_186 = arith.constant dense<0.000000e+00> : vector<64x8xf32>
    %283 = tpu.matmul %282, %268, %cst_186 {dimension_numbers = #tpu.dot_dimension_numbers<[1], [0], [0], [1], [0, 0, 1, 1], [], []>} : vector<64x64xf32>, vector<64x8xf32>, vector<64x8xf32> -> vector<64x8xf32>
    %284 = vector.extract_strided_slice %223 {offsets = [0, 24], sizes = [64, 8], strides = [1, 1]} : vector<64x32xf32> to vector<64x8xf32>
    %285 = vector.extract_strided_slice %226 {offsets = [0, 24], sizes = [64, 8], strides = [1, 1]} : vector<64x32xf32> to vector<64x8xf32>
    %286 = vector.extract_strided_slice %229 {offsets = [0, 24], sizes = [64, 8], strides = [1, 1]} : vector<64x32xf32> to vector<64x8xf32>
    %cst_187 = arith.constant dense<0.000000e+00> : vector<64x64xf32>
    %287 = tpu.matmul %284, %285, %cst_187 {dimension_numbers = #tpu.dot_dimension_numbers<[1], [1], [0], [0], [0, 0, 1, 0], [], []>} : vector<64x8xf32>, vector<64x8xf32>, vector<64x64xf32> -> vector<64x64xf32>
    %cst_188 = arith.constant 0.353553385 : f32
    %288 = vector.broadcast %cst_188 : f32 to vector<64x64xf32>
    %289 = arith.mulf %287, %288 : vector<64x64xf32>
    %290 = arith.addf %289, %0 : vector<64x64xf32>
    %cst_189 = arith.constant dense<0xFF800000> : vector<64xf32>
    %291 = vector.multi_reduction <maximumf>, %290, %cst_189 [1] : vector<64x64xf32> to vector<64xf32>
    %292 = vector.shape_cast %291 : vector<64xf32> to vector<64x1xf32>
    %293 = vector.broadcast %292 : vector<64x1xf32> to vector<64x64xf32>
    %294 = arith.subf %290, %293 : vector<64x64xf32>
    %295 = math.exp %294 : vector<64x64xf32>
    %cst_190 = arith.constant dense<0.000000e+00> : vector<64xf32>
    %296 = vector.multi_reduction <add>, %295, %cst_190 [1] : vector<64x64xf32> to vector<64xf32>
    %297 = vector.shape_cast %296 : vector<64xf32> to vector<64x1xf32>
    %298 = tpu.reciprocal %297 {approx = true} : vector<64x1xf32> -> vector<64x1xf32>
    %299 = vector.broadcast %298 : vector<64x1xf32> to vector<64x64xf32>
    %300 = arith.mulf %295, %299 : vector<64x64xf32>
    %cst_191 = arith.constant dense<0.000000e+00> : vector<64x8xf32>
    %301 = tpu.matmul %300, %286, %cst_191 {dimension_numbers = #tpu.dot_dimension_numbers<[1], [0], [0], [1], [0, 0, 1, 1], [], []>} : vector<64x64xf32>, vector<64x8xf32>, vector<64x8xf32> -> vector<64x8xf32>
    %302 = tpu.concatenate %247, %265, %283, %301 in 1 : vector<64x8xf32>, vector<64x8xf32>, vector<64x8xf32>, vector<64x8xf32> -> vector<64x32xf32>
    %cst_192 = arith.constant dense<0.000000e+00> : vector<64x32xf32>
    %303 = tpu.matmul %302, %212, %cst_192 {dimension_numbers = #tpu.dot_dimension_numbers<[1], [0], [0], [1], [0, 0, 1, 1], [], []>} : vector<64x32xf32>, vector<32x32xf32>, vector<64x32xf32> -> vector<64x32xf32>
    %304 = vector.broadcast %220 : vector<1x32xf32> to vector<64x32xf32>
    %305 = arith.addf %303, %304 : vector<64x32xf32>
    %c1_193 = arith.constant 1 : index
    %c1_194 = arith.constant 1 : index
    %c0_195 = arith.constant 0 : index
    %c0_196 = arith.constant 0 : index
    %c0_197 = arith.constant 0 : index
    %306 = vector.load %arg2[%c1_193, %c1_194, %c0_195, %c0_196, %c0_197] : memref<2x2x4x32x32xf32, #tpu.memory_space<vmem>>, vector<1x1x1x32x32xf32>
    %307 = vector.shape_cast %306 : vector<1x1x1x32x32xf32> to vector<32x32xf32>
    %c1_198 = arith.constant 1 : index
    %c1_199 = arith.constant 1 : index
    %c1_200 = arith.constant 1 : index
    %c0_201 = arith.constant 0 : index
    %c0_202 = arith.constant 0 : index
    %308 = vector.load %arg2[%c1_198, %c1_199, %c1_200, %c0_201, %c0_202] : memref<2x2x4x32x32xf32, #tpu.memory_space<vmem>>, vector<1x1x1x32x32xf32>
    %309 = vector.shape_cast %308 : vector<1x1x1x32x32xf32> to vector<32x32xf32>
    %c1_203 = arith.constant 1 : index
    %c1_204 = arith.constant 1 : index
    %c2_205 = arith.constant 2 : index
    %c0_206 = arith.constant 0 : index
    %c0_207 = arith.constant 0 : index
    %310 = vector.load %arg2[%c1_203, %c1_204, %c2_205, %c0_206, %c0_207] : memref<2x2x4x32x32xf32, #tpu.memory_space<vmem>>, vector<1x1x1x32x32xf32>
    %311 = vector.shape_cast %310 : vector<1x1x1x32x32xf32> to vector<32x32xf32>
    %c1_208 = arith.constant 1 : index
    %c1_209 = arith.constant 1 : index
    %c3_210 = arith.constant 3 : index
    %c0_211 = arith.constant 0 : index
    %c0_212 = arith.constant 0 : index
    %312 = vector.load %arg2[%c1_208, %c1_209, %c3_210, %c0_211, %c0_212] : memref<2x2x4x32x32xf32, #tpu.memory_space<vmem>>, vector<1x1x1x32x32xf32>
    %313 = vector.shape_cast %312 : vector<1x1x1x32x32xf32> to vector<32x32xf32>
    %c1_213 = arith.constant 1 : index
    %c1_214 = arith.constant 1 : index
    %c0_215 = arith.constant 0 : index
    %c0_216 = arith.constant 0 : index
    %c0_217 = arith.constant 0 : index
    %314 = vector.load %arg3[%c1_213, %c1_214, %c0_215, %c0_216, %c0_217] : memref<2x2x4x1x32xf32, #tpu.memory_space<vmem>>, vector<1x1x1x1x32xf32>
    %315 = vector.shape_cast %314 : vector<1x1x1x1x32xf32> to vector<1x32xf32>
    %c1_218 = arith.constant 1 : index
    %c1_219 = arith.constant 1 : index
    %c1_220 = arith.constant 1 : index
    %c0_221 = arith.constant 0 : index
    %c0_222 = arith.constant 0 : index
    %316 = vector.load %arg3[%c1_218, %c1_219, %c1_220, %c0_221, %c0_222] : memref<2x2x4x1x32xf32, #tpu.memory_space<vmem>>, vector<1x1x1x1x32xf32>
    %317 = vector.shape_cast %316 : vector<1x1x1x1x32xf32> to vector<1x32xf32>
    %c1_223 = arith.constant 1 : index
    %c1_224 = arith.constant 1 : index
    %c2_225 = arith.constant 2 : index
    %c0_226 = arith.constant 0 : index
    %c0_227 = arith.constant 0 : index
    %318 = vector.load %arg3[%c1_223, %c1_224, %c2_225, %c0_226, %c0_227] : memref<2x2x4x1x32xf32, #tpu.memory_space<vmem>>, vector<1x1x1x1x32xf32>
    %319 = vector.shape_cast %318 : vector<1x1x1x1x32xf32> to vector<1x32xf32>
    %c1_228 = arith.constant 1 : index
    %c1_229 = arith.constant 1 : index
    %c3_230 = arith.constant 3 : index
    %c0_231 = arith.constant 0 : index
    %c0_232 = arith.constant 0 : index
    %320 = vector.load %arg3[%c1_228, %c1_229, %c3_230, %c0_231, %c0_232] : memref<2x2x4x1x32xf32, #tpu.memory_space<vmem>>, vector<1x1x1x1x32xf32>
    %321 = vector.shape_cast %320 : vector<1x1x1x1x32xf32> to vector<1x32xf32>
    %cst_233 = arith.constant dense<0.000000e+00> : vector<64x32xf32>
    %322 = tpu.matmul %305, %307, %cst_233 {dimension_numbers = #tpu.dot_dimension_numbers<[1], [0], [0], [1], [0, 0, 1, 1], [], []>} : vector<64x32xf32>, vector<32x32xf32>, vector<64x32xf32> -> vector<64x32xf32>
    %323 = vector.broadcast %315 : vector<1x32xf32> to vector<64x32xf32>
    %324 = arith.addf %322, %323 : vector<64x32xf32>
    %cst_234 = arith.constant dense<0.000000e+00> : vector<64x32xf32>
    %325 = tpu.matmul %305, %309, %cst_234 {dimension_numbers = #tpu.dot_dimension_numbers<[1], [0], [0], [1], [0, 0, 1, 1], [], []>} : vector<64x32xf32>, vector<32x32xf32>, vector<64x32xf32> -> vector<64x32xf32>
    %326 = vector.broadcast %317 : vector<1x32xf32> to vector<64x32xf32>
    %327 = arith.addf %325, %326 : vector<64x32xf32>
    %cst_235 = arith.constant dense<0.000000e+00> : vector<64x32xf32>
    %328 = tpu.matmul %305, %311, %cst_235 {dimension_numbers = #tpu.dot_dimension_numbers<[1], [0], [0], [1], [0, 0, 1, 1], [], []>} : vector<64x32xf32>, vector<32x32xf32>, vector<64x32xf32> -> vector<64x32xf32>
    %329 = vector.broadcast %319 : vector<1x32xf32> to vector<64x32xf32>
    %330 = arith.addf %328, %329 : vector<64x32xf32>
    %331 = vector.extract_strided_slice %324 {offsets = [0, 0], sizes = [64, 8], strides = [1, 1]} : vector<64x32xf32> to vector<64x8xf32>
    %332 = vector.extract_strided_slice %327 {offsets = [0, 0], sizes = [64, 8], strides = [1, 1]} : vector<64x32xf32> to vector<64x8xf32>
    %333 = vector.extract_strided_slice %330 {offsets = [0, 0], sizes = [64, 8], strides = [1, 1]} : vector<64x32xf32> to vector<64x8xf32>
    %cst_236 = arith.constant dense<0.000000e+00> : vector<64x64xf32>
    %334 = tpu.matmul %331, %332, %cst_236 {dimension_numbers = #tpu.dot_dimension_numbers<[1], [1], [0], [0], [0, 0, 1, 0], [], []>} : vector<64x8xf32>, vector<64x8xf32>, vector<64x64xf32> -> vector<64x64xf32>
    %cst_237 = arith.constant 0.353553385 : f32
    %335 = vector.broadcast %cst_237 : f32 to vector<64x64xf32>
    %336 = arith.mulf %334, %335 : vector<64x64xf32>
    %337 = arith.addf %336, %1 : vector<64x64xf32>
    %cst_238 = arith.constant dense<0xFF800000> : vector<64xf32>
    %338 = vector.multi_reduction <maximumf>, %337, %cst_238 [1] : vector<64x64xf32> to vector<64xf32>
    %339 = vector.shape_cast %338 : vector<64xf32> to vector<64x1xf32>
    %340 = vector.broadcast %339 : vector<64x1xf32> to vector<64x64xf32>
    %341 = arith.subf %337, %340 : vector<64x64xf32>
    %342 = math.exp %341 : vector<64x64xf32>
    %cst_239 = arith.constant dense<0.000000e+00> : vector<64xf32>
    %343 = vector.multi_reduction <add>, %342, %cst_239 [1] : vector<64x64xf32> to vector<64xf32>
    %344 = vector.shape_cast %343 : vector<64xf32> to vector<64x1xf32>
    %345 = tpu.reciprocal %344 {approx = true} : vector<64x1xf32> -> vector<64x1xf32>
    %346 = vector.broadcast %345 : vector<64x1xf32> to vector<64x64xf32>
    %347 = arith.mulf %342, %346 : vector<64x64xf32>
    %cst_240 = arith.constant dense<0.000000e+00> : vector<64x8xf32>
    %348 = tpu.matmul %347, %333, %cst_240 {dimension_numbers = #tpu.dot_dimension_numbers<[1], [0], [0], [1], [0, 0, 1, 1], [], []>} : vector<64x64xf32>, vector<64x8xf32>, vector<64x8xf32> -> vector<64x8xf32>
    %349 = vector.extract_strided_slice %324 {offsets = [0, 8], sizes = [64, 8], strides = [1, 1]} : vector<64x32xf32> to vector<64x8xf32>
    %350 = vector.extract_strided_slice %327 {offsets = [0, 8], sizes = [64, 8], strides = [1, 1]} : vector<64x32xf32> to vector<64x8xf32>
    %351 = vector.extract_strided_slice %330 {offsets = [0, 8], sizes = [64, 8], strides = [1, 1]} : vector<64x32xf32> to vector<64x8xf32>
    %cst_241 = arith.constant dense<0.000000e+00> : vector<64x64xf32>
    %352 = tpu.matmul %349, %350, %cst_241 {dimension_numbers = #tpu.dot_dimension_numbers<[1], [1], [0], [0], [0, 0, 1, 0], [], []>} : vector<64x8xf32>, vector<64x8xf32>, vector<64x64xf32> -> vector<64x64xf32>
    %cst_242 = arith.constant 0.353553385 : f32
    %353 = vector.broadcast %cst_242 : f32 to vector<64x64xf32>
    %354 = arith.mulf %352, %353 : vector<64x64xf32>
    %355 = arith.addf %354, %1 : vector<64x64xf32>
    %cst_243 = arith.constant dense<0xFF800000> : vector<64xf32>
    %356 = vector.multi_reduction <maximumf>, %355, %cst_243 [1] : vector<64x64xf32> to vector<64xf32>
    %357 = vector.shape_cast %356 : vector<64xf32> to vector<64x1xf32>
    %358 = vector.broadcast %357 : vector<64x1xf32> to vector<64x64xf32>
    %359 = arith.subf %355, %358 : vector<64x64xf32>
    %360 = math.exp %359 : vector<64x64xf32>
    %cst_244 = arith.constant dense<0.000000e+00> : vector<64xf32>
    %361 = vector.multi_reduction <add>, %360, %cst_244 [1] : vector<64x64xf32> to vector<64xf32>
    %362 = vector.shape_cast %361 : vector<64xf32> to vector<64x1xf32>
    %363 = tpu.reciprocal %362 {approx = true} : vector<64x1xf32> -> vector<64x1xf32>
    %364 = vector.broadcast %363 : vector<64x1xf32> to vector<64x64xf32>
    %365 = arith.mulf %360, %364 : vector<64x64xf32>
    %cst_245 = arith.constant dense<0.000000e+00> : vector<64x8xf32>
    %366 = tpu.matmul %365, %351, %cst_245 {dimension_numbers = #tpu.dot_dimension_numbers<[1], [0], [0], [1], [0, 0, 1, 1], [], []>} : vector<64x64xf32>, vector<64x8xf32>, vector<64x8xf32> -> vector<64x8xf32>
    %367 = vector.extract_strided_slice %324 {offsets = [0, 16], sizes = [64, 8], strides = [1, 1]} : vector<64x32xf32> to vector<64x8xf32>
    %368 = vector.extract_strided_slice %327 {offsets = [0, 16], sizes = [64, 8], strides = [1, 1]} : vector<64x32xf32> to vector<64x8xf32>
    %369 = vector.extract_strided_slice %330 {offsets = [0, 16], sizes = [64, 8], strides = [1, 1]} : vector<64x32xf32> to vector<64x8xf32>
    %cst_246 = arith.constant dense<0.000000e+00> : vector<64x64xf32>
    %370 = tpu.matmul %367, %368, %cst_246 {dimension_numbers = #tpu.dot_dimension_numbers<[1], [1], [0], [0], [0, 0, 1, 0], [], []>} : vector<64x8xf32>, vector<64x8xf32>, vector<64x64xf32> -> vector<64x64xf32>
    %cst_247 = arith.constant 0.353553385 : f32
    %371 = vector.broadcast %cst_247 : f32 to vector<64x64xf32>
    %372 = arith.mulf %370, %371 : vector<64x64xf32>
    %373 = arith.addf %372, %1 : vector<64x64xf32>
    %cst_248 = arith.constant dense<0xFF800000> : vector<64xf32>
    %374 = vector.multi_reduction <maximumf>, %373, %cst_248 [1] : vector<64x64xf32> to vector<64xf32>
    %375 = vector.shape_cast %374 : vector<64xf32> to vector<64x1xf32>
    %376 = vector.broadcast %375 : vector<64x1xf32> to vector<64x64xf32>
    %377 = arith.subf %373, %376 : vector<64x64xf32>
    %378 = math.exp %377 : vector<64x64xf32>
    %cst_249 = arith.constant dense<0.000000e+00> : vector<64xf32>
    %379 = vector.multi_reduction <add>, %378, %cst_249 [1] : vector<64x64xf32> to vector<64xf32>
    %380 = vector.shape_cast %379 : vector<64xf32> to vector<64x1xf32>
    %381 = tpu.reciprocal %380 {approx = true} : vector<64x1xf32> -> vector<64x1xf32>
    %382 = vector.broadcast %381 : vector<64x1xf32> to vector<64x64xf32>
    %383 = arith.mulf %378, %382 : vector<64x64xf32>
    %cst_250 = arith.constant dense<0.000000e+00> : vector<64x8xf32>
    %384 = tpu.matmul %383, %369, %cst_250 {dimension_numbers = #tpu.dot_dimension_numbers<[1], [0], [0], [1], [0, 0, 1, 1], [], []>} : vector<64x64xf32>, vector<64x8xf32>, vector<64x8xf32> -> vector<64x8xf32>
    %385 = vector.extract_strided_slice %324 {offsets = [0, 24], sizes = [64, 8], strides = [1, 1]} : vector<64x32xf32> to vector<64x8xf32>
    %386 = vector.extract_strided_slice %327 {offsets = [0, 24], sizes = [64, 8], strides = [1, 1]} : vector<64x32xf32> to vector<64x8xf32>
    %387 = vector.extract_strided_slice %330 {offsets = [0, 24], sizes = [64, 8], strides = [1, 1]} : vector<64x32xf32> to vector<64x8xf32>
    %cst_251 = arith.constant dense<0.000000e+00> : vector<64x64xf32>
    %388 = tpu.matmul %385, %386, %cst_251 {dimension_numbers = #tpu.dot_dimension_numbers<[1], [1], [0], [0], [0, 0, 1, 0], [], []>} : vector<64x8xf32>, vector<64x8xf32>, vector<64x64xf32> -> vector<64x64xf32>
    %cst_252 = arith.constant 0.353553385 : f32
    %389 = vector.broadcast %cst_252 : f32 to vector<64x64xf32>
    %390 = arith.mulf %388, %389 : vector<64x64xf32>
    %391 = arith.addf %390, %1 : vector<64x64xf32>
    %cst_253 = arith.constant dense<0xFF800000> : vector<64xf32>
    %392 = vector.multi_reduction <maximumf>, %391, %cst_253 [1] : vector<64x64xf32> to vector<64xf32>
    %393 = vector.shape_cast %392 : vector<64xf32> to vector<64x1xf32>
    %394 = vector.broadcast %393 : vector<64x1xf32> to vector<64x64xf32>
    %395 = arith.subf %391, %394 : vector<64x64xf32>
    %396 = math.exp %395 : vector<64x64xf32>
    %cst_254 = arith.constant dense<0.000000e+00> : vector<64xf32>
    %397 = vector.multi_reduction <add>, %396, %cst_254 [1] : vector<64x64xf32> to vector<64xf32>
    %398 = vector.shape_cast %397 : vector<64xf32> to vector<64x1xf32>
    %399 = tpu.reciprocal %398 {approx = true} : vector<64x1xf32> -> vector<64x1xf32>
    %400 = vector.broadcast %399 : vector<64x1xf32> to vector<64x64xf32>
    %401 = arith.mulf %396, %400 : vector<64x64xf32>
    %cst_255 = arith.constant dense<0.000000e+00> : vector<64x8xf32>
    %402 = tpu.matmul %401, %387, %cst_255 {dimension_numbers = #tpu.dot_dimension_numbers<[1], [0], [0], [1], [0, 0, 1, 1], [], []>} : vector<64x64xf32>, vector<64x8xf32>, vector<64x8xf32> -> vector<64x8xf32>
    %403 = tpu.concatenate %348, %366, %384, %402 in 1 : vector<64x8xf32>, vector<64x8xf32>, vector<64x8xf32>, vector<64x8xf32> -> vector<64x32xf32>
    %cst_256 = arith.constant dense<0.000000e+00> : vector<64x32xf32>
    %404 = tpu.matmul %403, %313, %cst_256 {dimension_numbers = #tpu.dot_dimension_numbers<[1], [0], [0], [1], [0, 0, 1, 1], [], []>} : vector<64x32xf32>, vector<32x32xf32>, vector<64x32xf32> -> vector<64x32xf32>
    %405 = vector.broadcast %321 : vector<1x32xf32> to vector<64x32xf32>
    %406 = arith.addf %404, %405 : vector<64x32xf32>
    %c0_257 = arith.constant 0 : index
    %c0_258 = arith.constant 0 : index
    %407 = vector.load %arg6[%c0_257, %c0_258] : memref<64x32xf32, #tpu.memory_space<vmem>>, vector<64x32xf32>
    tpu.vector_store %arg6[%c0_257, %c0_258], %406 {strides = array<i32>} : memref<64x32xf32, #tpu.memory_space<vmem>>, vector<64x32xf32>,
    return
  }
  func.func @transform_0(%arg0: i32) -> (i32, i32) {
    %c0_i32 = arith.constant 0 : i32
    %c0_i32_0 = arith.constant 0 : i32
    %c0_i32_1 = arith.constant 0 : i32
    return %c0_i32, %c0_i32_0 : i32, i32
  }
  func.func @transform_1(%arg0: i32) -> (i32, i32, i32, i32, i32) {
    %c0_i32 = arith.constant 0 : i32
    %c0_i32_0 = arith.constant 0 : i32
    %c0_i32_1 = arith.constant 0 : i32
    %c0_i32_2 = arith.constant 0 : i32
    %c0_i32_3 = arith.constant 0 : i32
    %c0_i32_4 = arith.constant 0 : i32
    return %c0_i32, %c0_i32_0, %c0_i32_1, %c0_i32_2, %c0_i32_3 : i32, i32, i32, i32, i32
  }
  func.func @transform_2(%arg0: i32) -> (i32, i32, i32, i32, i32) {
    %c0_i32 = arith.constant 0 : i32
    %c0_i32_0 = arith.constant 0 : i32
    %c0_i32_1 = arith.constant 0 : i32
    %c0_i32_2 = arith.constant 0 : i32
    %c0_i32_3 = arith.constant 0 : i32
    %c0_i32_4 = arith.constant 0 : i32
    return %c0_i32, %c0_i32_0, %c0_i32_1, %c0_i32_2, %c0_i32_3 : i32, i32, i32, i32, i32
  }
  func.func @transform_3(%arg0: i32) -> (i32, i32) {
    %c0_i32 = arith.constant 0 : i32
    %c0_i32_0 = arith.constant 0 : i32
    %c0_i32_1 = arith.constant 0 : i32
    return %c0_i32, %c0_i32_0 : i32, i32
  }
  func.func @transform_4(%arg0: i32) -> (i32, i32) {
    %c0_i32 = arith.constant 0 : i32
    %c0_i32_0 = arith.constant 0 : i32
    %c0_i32_1 = arith.constant 0 : i32
    return %c0_i32, %c0_i32_0 : i32, i32
  }
  func.func @transform_5(%arg0: i32) -> (i32, i32) {
    %c0_i32 = arith.constant 0 : i32
    %c0_i32_0 = arith.constant 0 : i32
    %c0_i32_1 = arith.constant 0 : i32
    return %c0_i32, %c0_i32_0 : i32, i32
  }
}

</mosaic_0001>

<bundles_post_ra>
// kernel: spatio_temporal_significance_scoring.1
= control target key start
LH: loop header
LB: loop body
LE: loop exit
PB: predicated region body
PF: predicated region fallthrough
CT: control target
= control target key end

     0   :  { %10 = vsyncpa [#allocation3], 0  ;;  %s16811_s0 = inlined_call_operand.vmem [shape: f32[64,32], index: 0, kind: input, shape index: {}]   ;;  %s16812_s1 = inlined_call_operand.hbm [shape: f32[2,2,4,32,32], index: 1, kind: input, shape index: {}]   ;;  %s16813_s2 = inlined_call_operand.vmem [shape: f32[2,2,4,1,32], index: 2, kind: input, shape index: {}]   ;;  %s16814_s3 = inlined_call_operand.vmem [shape: f32[64,64], index: 3, kind: input, shape index: {}]   ;;  %s16815_s4 = inlined_call_operand.vmem [shape: f32[64,64], index: 4, kind: input, shape index: {}]   ;;  %s16816_s5 = inlined_call_operand.hbm [shape: f32[64,32], index: 5, kind: output, shape index: {}]  }
   0x1   :  { %11 = vsyncpa [#allocation4], 0  ;;  %s13663_s18 = smov [#allocation2]   ;;  %s13615_s22 = scalar_lea.hbm %s16812_s1, 8192 }
   0x2   :  { %s19_s19 = sshll.u32 %s13663_s18, 4  ;;  %p13616_p0 = scmp.ne.s32.totalorder %s16812_s1, %s13615_s22  ;;  %s20_s19 = int_to_ptr.vmem [resolvable:$true] %s19_s19 }
   0x3   :  { %p13619_p1 = scmp.lt.u32.totalorder %s13615_s22, %s16812_s1 }
   0x5   :  { %p13621_p2 = pnand %p13619_p1, %p13616_p0 }
   0x7   :  { %13624 = shalt.err (!%p13621_p2)
}
   0x8   :  { %s13625_s27 = scalar_lea.vmem %s20_s19, 8192  ;;  %p13630_p4 = scmp.lt.s32.totalorder %s20_s19, %s20_s19 }
   0x9   :  { %p13626_p3 = scmp.ne.s32.totalorder %s20_s19, %s13625_s27  ;;  %p13631_p5 = scmp.lt.s32.totalorder %s13625_s27, %s13625_s27 }
   0xb   :  { %p13632_p6 = por %p13631_p5, %p13630_p4 }
   0xd   :  { %p13633_p7 = pnand %p13632_p6, %p13626_p3 }
   0xf   :  { %13636 = shalt.err (!%p13633_p7)
}
  0x10   :  { %s13664_s28 = smov 128   ;;  %s13665_s29 = smov 8  }
  0x11   :  { %25 = dma.hbm_to_vmem [thread:$0]  %s16812_s1, 8192, %s20_s19, [#allocation3], %s13664_s28, %s13664_s28, %s13665_s29  }
  0x12   :  { %13659 = dma.done.wait [#allocation3], 8192  }
  0x13   :  { %13660 = vsyncadd [#allocation3], 4294959104  ;;  %vm91_vm0 = vcmask 261120   ;;  %v64_v0 = vld [vmem:[#allocation2 + $0x20] sm:$0xff]  ;;  %v65_v1 = vld [vmem:[#allocation2 + $0x28] sm:$0xff]  ;;  %vm443_vm1 = vcmask 64512  }
  0x14   :  { %v66_v2 = vld [vmem:[#allocation2 + $0x30] sm:$0xff]  ;;  %v11806_v3 = vpack.c.bf16 %v65_v1, %v64_v0  ;;  %v67_v4 = vld [vmem:[#allocation2 + $0x38] sm:$0xff]  ;;  %v51_v5 = vld [vmem:[%s16811_s0] sm:$0xff]  ;;  %vm613_vm3 = vcmask 523264   ;;  %s13666_s19 = smov 120   ;;  %s13667_s20 = smov 112  }
  0x15   :  { %v11810_v6 = vpack.c.bf16 %v67_v4, %v66_v2  ;;  %10610 = vmatprep.mubr.msk.f32.mxu1 %vm91_vm0, %v51_v5  ;;  %10590 = vmatprep.mubr.msk.f32.mxu0 %vm91_vm0, %v51_v5  ;;  %v59_v7 = vld [vmem:[#allocation2] sm:$0xff]  ;;  %v60_v8 = vld [vmem:[#allocation2 + $0x8] sm:$0xff]  ;;  %v61_v9 = vld [vmem:[#allocation2 + $0x10] sm:$0xff]  ;;  %s13668_s21 = smov 104   ;;  %s13669_s13 = smov 16   ;;  %vm2221_vm4 = vcmask 130048  }
  0x16   :  { %11807 = vmatprep.subr.bf16.mxu1 %v11806_v3  ;;  %v11798_v10 = vpack.c.bf16 %v60_v8, %v59_v7  ;;  %v62_v11 = vld [vmem:[#allocation2 + $0x18] sm:$0xff]  ;;  %v13725_v13 = vld [vmem:[%s16811_s0 + $0x8] sm:$0xff]  ;;  %v13730_v14 = vld [vmem:[%s16811_s0 + $0x10] sm:$0xff]  ;;  %s13670_s14 = smov 24   ;;  %vm2230_vm5 = vcmask 195584  }
  0x17   :  { %11809 = vmatpush3.bf16.msra.mxu1 %v11806_v3  ;;  %v11802_v12 = vpack.c.bf16 %v62_v11, %v61_v9  ;;  %v13739_v15 = vld [vmem:[%s16811_s0 + $0x18] sm:$0xff]  ;;  %v13744_v16 = vld [vmem:[%s16811_s0 + $0x20] sm:$0xff]  ;;  %v13755_v17 = vld [vmem:[%s16811_s0 + $0x28] sm:$0xff] }
  0x18   :  { %11811 = vmatprep.subr.bf16.mxu1 %v11810_v6  ;;  %11799 = vmatprep.subr.bf16.mxu0 %v11798_v10  ;;  %v13762_v18 = vld [vmem:[%s16811_s0 + $0x30] sm:$0xff]  ;;  %v13773_v19 = vld [vmem:[%s16811_s0 + $0x38] sm:$0xff]  ;;  %v9347_v20 = vld [vmem:[%s16813_s2 + $0x1] ss:$0 sm:$0xff] }
  0x19   :  { %11801 = vmatpush3.bf16.msra.mxu0 %v11798_v10  ;;  %vm13791_vm2 = vmpackc.low %vm443_vm1, %vm443_vm1  ;;  %v9338_v26 = vld [vmem:[%s16813_s2] ss:$0 sm:$0xff]  ;;  %v70_v0 = vld [vmem:[#allocation2 + $0x48] sm:$0xff] }
  0x1a   :  { %11803 = vmatprep.subr.bf16.mxu0 %v11802_v12  ;;  %v69_v63 = vld [vmem:[#allocation2 + $0x40] sm:$0xff]  ;;  %v71_v1 = vld [vmem:[#allocation2 + $0x50] sm:$0xff]  ;;  %v72_v3 = vld [vmem:[#allocation2 + $0x58] sm:$0xff] }
  0x1b   :  { %11813 = vmatpush3.bf16.msra.mxu1 %v11810_v6  ;;  %v11814_v2 = vpack.c.bf16 %v70_v0, %v69_v63  ;;  %v11818_v4 = vpack.c.bf16 %v72_v3, %v71_v1  ;;  %v13871_v7 = vld [vmem:[%s16814_s3] sm:$0xff]  ;;  %v13876_v10 = vld [vmem:[%s16814_s3 + $0x8] sm:$0xff] }
  0x1d   :  { %11805 = vmatpush3.bf16.msra.mxu0 %v11802_v12 }
  0x1e   :  { %10611 = vmatmul.mubr.msk.f32.vlgmr.msra.gmra.mrb[0].mxu1 %vm91_vm0, %v13725_v13  ;;  %11815 = vmatprep.subr.bf16.mxu0 %v11814_v2 }
  0x1f   :  { %10613 = vmatprep.mubr.msk.f32.mxu1 %vm91_vm0, %v13730_v14 }
  0x20   :  { %10591 = vmatmul.mubr.msk.f32.vlgmr.msra.gmra.mrb[0].mxu0 %vm91_vm0, %v13725_v13 }
  0x21   :  { %10593 = vmatprep.mubr.msk.f32.mxu0 %vm91_vm0, %v13730_v14  ;;  %11817 = vmatpush3.bf16.msra.mxu0 %v11814_v2 }
  0x22   :  { %10614 = vmatmul.mubr.msk.f32.gmra.mrb[2].mxu1 %vm91_vm0, %v13739_v15  ;;  %11819 = vmatprep.subr.bf16.mxu0 %v11818_v4 }
  0x23   :  { %10616 = vmatprep.mubr.msk.f32.mxu1 %vm91_vm0, %v13744_v16 }
  0x24   :  { %10594 = vmatmul.mubr.msk.f32.gmra.mrb[2].mxu0 %vm91_vm0, %v13739_v15 }
  0x25   :  { %10596 = vmatprep.mubr.msk.f32.mxu0 %vm91_vm0, %v13744_v16  ;;  %11821 = vmatpush3.bf16.msra.mxu0 %v11818_v4 }
  0x26   :  { %10617 = vmatmul.mubr.msk.f32.gmra.mrb[4].mxu1 %vm91_vm0, %v13755_v17 }
  0x27   :  { %10619 = vmatprep.mubr.msk.f32.mxu1 %vm91_vm0, %v13762_v18 }
  0x28   :  { %10597 = vmatmul.mubr.msk.f32.gmra.mrb[4].mxu0 %vm91_vm0, %v13755_v17 }
  0x29   :  { %10599 = vmatprep.mubr.msk.f32.mxu0 %vm91_vm0, %v13762_v18 }
  0x2a   :  { %10620 = vmatmul.mubr.msk.f32.gmra.mrb[6].mxu1 %vm91_vm0, %v13773_v19 }
  0x2c   :  { %10600 = vmatmul.mubr.msk.f32.gmra.mrb[6].mxu0 %vm91_vm0, %v13773_v19 }
  0x2d   :  { %10630 = vmatprep.mubr.msk.f32.mxu0 %vm91_vm0, %v51_v5 }
  0x30   :  { %10631 = vmatmul.mubr.msk.f32.vlgmr.msra.gmra.mrb[8].mxu0 %vm91_vm0, %v13725_v13  ;;  %v13882_v13 = vld [vmem:[%s16814_s3 + $0x18] sm:$0xff] }
  0x31   :  { %10633 = vmatprep.mubr.msk.f32.mxu0 %vm91_vm0, %v13730_v14 }
  0x34   :  { %10634 = vmatmul.mubr.msk.f32.gmra.mrb[10].mxu0 %vm91_vm0, %v13739_v15 }
  0x35   :  { %10636 = vmatprep.mubr.msk.f32.mxu0 %vm91_vm0, %v13744_v16  ;;  %v13887_v16 = vld [vmem:[%s16814_s3 + $0x10] sm:$0xff] }
  0x38   :  { %10637 = vmatmul.mubr.msk.f32.gmra.mrb[12].mxu0 %vm91_vm0, %v13755_v17 }
  0x39   :  { %10639 = vmatprep.mubr.msk.f32.mxu0 %vm91_vm0, %v13762_v18 }
  0x3c   :  { %10640 = vmatmul.mubr.msk.f32.gmra.mrb[14].mxu0 %vm91_vm0, %v13773_v19 }
  0xf1   :  { %v10612_v21 = vpop.f32.mrb[0].mxu1 }
  0xf2   :  { %v299_v22 = vadd.f32 %v10612_v21, %v9347_v20  ;;  %v293_v23 = vpop.f32.mrb[1].mxu1 }
  0xf3   :  { %v294_v24 = vadd.f32 %v9347_v20, %v293_v23  ;;  %v10592_v29 = vpop.f32.mrb[0].mxu0  ;;  %v13900_v23 = vld [vmem:[%s16814_s3 + $0x28] sm:$0xff] }
  0xf4   :  { %v182_v33 = vpop.f32.mrb[1].mxu0  ;;  %v13828_v57 = vadd.f32 %v10592_v29, %v9338_v26 }
  0xf5   :  { %v11822_v27 = vpack.c.bf16 %v299_v22, %v294_v24  ;;  %v10615_v28 = vpop.f32.mrb[2].mxu1  ;;  %v13798_v30 = vpack.i.bf16 %v299_v22, %v294_v24  ;;  %v13802_v35 = vadd.f32 %v9338_v26, %v182_v33 }
  0xf6   :  { %v309_v31 = vadd.f32 %v10615_v28, %v9347_v20  ;;  %v303_v32 = vpop.f32.mrb[3].mxu1  ;;  %v13907_v28 = vld [vmem:[%s16814_s3 + $0x20] sm:$0xff] }
  0xf7   :  { %11824 = vmatprep.subr.msk.bf16.mxu1 %vm13791_vm2, %v11822_v27  ;;  %v304_v34 = vadd.f32 %v9347_v20, %v303_v32  ;;  %10658 = vmatprep.mubr.msk.f32.mxu1 %vm443_vm1, %v13802_v35  ;;  %v10595_v38 = vpop.f32.mrb[2].mxu0 }
  0xf8   :  { %11827 = vmatpush3.bf16.xpose.msk.msra.mxu1 %vm13791_vm2, %v11822_v27  ;;  %v192_v42 = vpop.f32.mrb[3].mxu0  ;;  %v13830_v58 = vadd.f32 %v10595_v38, %v9338_v26 }
  0xf9   :  { %v11828_v36 = vpack.c.bf16 %v309_v31, %v304_v34  ;;  %v10618_v37 = vpop.f32.mrb[4].mxu1  ;;  %v13808_v39 = vpack.i.bf16 %v309_v31, %v304_v34  ;;  %v13826_v56 = vadd.f32 %v9338_v26, %v192_v42 }
  0xfa   :  { %v319_v40 = vadd.f32 %v10618_v37, %v9347_v20  ;;  %v313_v41 = vpop.f32.mrb[5].mxu1  ;;  %v13921_v37 = vld [vmem:[%s16814_s3 + $0x38] sm:$0xff] }
  0xfb   :  { %11830 = vmatprep.subr.msk.bf16.mxu1 %vm13791_vm2, %v11828_v36  ;;  %v314_v43 = vadd.f32 %v9347_v20, %v313_v41  ;;  %v10598_v46 = vpop.f32.mrb[4].mxu0  ;;  %v13926_v41 = vld [vmem:[%s16814_s3 + $0x30] sm:$0xff] }
  0xfc   :  { %v202_v50 = vpop.f32.mrb[5].mxu0  ;;  %v13838_v60 = vadd.f32 %v10598_v46, %v9338_v26 }
  0xfd   :  { %v11834_v44 = vpack.c.bf16 %v319_v40, %v314_v43  ;;  %v10621_v45 = vpop.f32.mrb[6].mxu1  ;;  %v13812_v47 = vpack.i.bf16 %v319_v40, %v314_v43  ;;  %v13836_v59 = vadd.f32 %v9338_v26, %v202_v50 }
  0xfe   :  { %v329_v48 = vadd.f32 %v10621_v45, %v9347_v20  ;;  %v323_v49 = vpop.f32.mrb[7].mxu1 }
  0xff   :  { %v324_v51 = vadd.f32 %v9347_v20, %v323_v49  ;;  %v10601_v53 = vpop.f32.mrb[6].mxu0 }
 0x100   :  { %11833 = vmatpush3.bf16.xpose.msk.msra.mxu1 %vm13791_vm2, %v11828_v36  ;;  %v212_v55 = vpop.f32.mrb[7].mxu0  ;;  %v13846_v62 = vadd.f32 %v10601_v53, %v9338_v26 }
 0x101   :  { %11836 = vmatprep.subr.msk.bf16.mxu1 %vm13791_vm2, %v11834_v44  ;;  %v11840_v52 = vpack.c.bf16 %v329_v48, %v324_v51  ;;  %v13818_v54 = vpack.i.bf16 %v329_v48, %v324_v51  ;;  %v13844_v61 = vadd.f32 %v9338_v26, %v212_v55 }
 0x103   :  { %v10632_v0 = vpop.f32.mrb[8].mxu0 }
 0x104   :  { %v404_v1 = vpop.f32.mrb[9].mxu0 }
 0x107   :  { %v10635_v2 = vpop.f32.mrb[10].mxu0 }
 0x108   :  { %11839 = vmatpush3.bf16.xpose.msk.msra.mxu1 %vm13791_vm2, %v11834_v44  ;;  %v414_v3 = vpop.f32.mrb[11].mxu0 }
 0x109   :  { %11842 = vmatprep.subr.msk.bf16.mxu1 %vm13791_vm2, %v11840_v52 }
 0x110   :  { %11845 = vmatpush3.bf16.xpose.msk.msra.mxu1 %vm13791_vm2, %v11840_v52 }
 0x117   :  { %10659 = vmatmul.mubr.msk.f32.vlgmr.msra.gmra.mrb[8].mxu1 %vm443_vm1, %v13828_v57 }
 0x118   :  { %10661 = vmatprep.mubr.msk.f32.mxu1 %vm443_vm1, %v13826_v56 }
 0x11b   :  { %10662 = vmatmul.mubr.msk.f32.gmra.mrb[10].mxu1 %vm443_vm1, %v13830_v58 }
 0x11c   :  { %10664 = vmatprep.mubr.msk.f32.mxu1 %vm443_vm1, %v13836_v59 }
 0x11f   :  { %10665 = vmatmul.mubr.msk.f32.gmra.mrb[12].mxu1 %vm443_vm1, %v13838_v60 }
 0x120   :  { %10667 = vmatprep.mubr.msk.f32.mxu1 %vm443_vm1, %v13844_v61 }
 0x123   :  { %10668 = vmatmul.mubr.msk.f32.gmra.mrb[14].mxu1 %vm443_vm1, %v13846_v62 }
 0x1ea   :  { %v10660_v5 = vpop.f32.mrb[8].mxu1 }
 0x1eb   :  { %v558_v6 = vpop.f32.mrb[9].mxu1  ;;  %v598_v8 = vmul.f32 0.35355338, %v10660_v5 }
 0x1ec   :  { %v597_v9 = vmul.f32 0.35355338, %v558_v6  ;;  %v9356_v6 = vld [vmem:[%s16813_s2 + $0x2] ss:$0 sm:$0xff] }
 0x1ed   :  { %v606_v19 = vadd.f32 %v598_v8, %v13876_v10 }
 0x1ee   :  { %v10663_v11 = vpop.f32.mrb[10].mxu1  ;;  %v605_v12 = vadd.f32 %v597_v9, %v13871_v7  ;;  %v13951_v9 = vadd.f32 %v10632_v0, %v9356_v6 }
 0x1ef   :  { %v600_v14 = vmul.f32 0.35355338, %v10663_v11  ;;  %v568_v15 = vpop.f32.mrb[11].mxu1  ;;  %v617_v31 = vsel %vm613_vm3, %v606_v19, -inf  ;;  %v13953_v11 = vadd.f32 %v9356_v6, %v404_v1 }
 0x1f0   :  { %v599_v17 = vmul.f32 0.35355338, %v568_v15  ;;  %v614_v18 = vsel %vm613_vm3, %v605_v12, -inf  ;;  %v13959_v15 = vadd.f32 %v9356_v6, %v414_v3 }
 0x1f1   :  { %615 = vmax.xlane.f32.xlu0 %v614_v18  ;;  %v13892_v20 = vadd.f32 %v600_v14, %v13882_v13  ;;  %v13957_v14 = vadd.f32 %v10635_v2, %v9356_v6  ;;  %v10638_v18 = vpop.f32.mrb[12].mxu0 }
 0x1f2   :  { %v10666_v21 = vpop.f32.mrb[12].mxu1  ;;  %v13895_v22 = vadd.f32 %v599_v17, %v13887_v16  ;;  %v11846_v17 = vpack.c.bf16 %v13951_v9, %v13953_v11 }
 0x1f3   :  { %v602_v24 = vmul.f32 0.35355338, %v10666_v21  ;;  %v578_v26 = vpop.f32.mrb[13].mxu1  ;;  %v623_v27 = vsel %vm613_vm3, %v13892_v20, -inf  ;;  %v13963_v21 = vadd.f32 %v10638_v18, %v9356_v6 }
 0x1f4   :  { %v601_v29 = vmul.f32 0.35355338, %v578_v26  ;;  %624 = vmax.xlane.f32.xlu1 %v623_v27  ;;  %v620_v32 = vsel %vm613_vm3, %v13895_v22, -inf  ;;  %11847 = vmatprep.subr.bf16.mxu0 %v11846_v17  ;;  %v11850_v26 = vpack.c.bf16 %v13957_v14, %v13959_v15 }
 0x1f5   :  { %618 = vmax.xlane.f32.xlu0 %v617_v31  ;;  %v13913_v33 = vadd.f32 %v602_v24, %v13900_v23  ;;  %11849 = vmatpush3.bf16.msra.mxu0 %v11846_v17 }
 0x1f6   :  { %v10669_v34 = vpop.f32.mrb[14].mxu1  ;;  %v13916_v36 = vadd.f32 %v601_v29, %v13907_v28  ;;  %11851 = vmatprep.subr.bf16.mxu0 %v11850_v26 }
 0x1f7   :  { %v604_v38 = vmul.f32 0.35355338, %v10669_v34  ;;  %v588_v40 = vpop.f32.mrb[15].mxu1  ;;  %v629_v44 = vsel %vm613_vm3, %v13913_v33, -inf }
 0x1f8   :  { %v603_v42 = vmul.f32 0.35355338, %v588_v40  ;;  %621 = vmax.xlane.f32.xlu1 %v620_v32  ;;  %v626_v43 = vsel %vm613_vm3, %v13916_v36, -inf }
 0x1f9   :  { %627 = vmax.xlane.f32.xlu0 %v626_v43  ;;  %v13933_v45 = vadd.f32 %v604_v38, %v13921_v37  ;;  %11853 = vmatpush3.bf16.msra.mxu0 %v11850_v26 }
 0x1fa   :  { %v13936_v46 = vadd.f32 %v603_v42, %v13926_v41 }
 0x1fb   :  { %v635_v49 = vsel %vm613_vm3, %v13933_v45, -inf }
 0x1fc   :  { %630 = vmax.xlane.f32.xlu1 %v629_v44  ;;  %v632_v48 = vsel %vm613_vm3, %v13936_v46, -inf }
 0x1fd   :  { %633 = vmax.xlane.f32.xlu0 %v632_v48 }
 0x200   :  { %636 = vmax.xlane.f32.xlu1 %v635_v49 }
 0x27e   :  { %v616_v50 = vpop.xlane.xlu0 %615 }
 0x27f   :  { %v638_v51 = vsub.f32 %v605_v12, %v616_v50 }
 0x281   :  { %v646_v52 = vmul.f32 1.442695, %v638_v51  ;;  %v625_v40 = vpop.xlane.xlu1 %624 }
 0x282   :  { %v619_v53 = vpop.xlane.xlu0 %618  ;;  %v641_v48 = vsub.f32 %v13892_v20, %v625_v40 }
 0x283   :  { %13055 = vpow2.f32 %v646_v52  ;;  %v639_v55 = vsub.f32 %v606_v19, %v619_v53  ;;  %v424_v19 = vpop.f32.mrb[13].mxu0 }
 0x284   :  { %v13965_v24 = vadd.f32 %v9356_v6, %v424_v19  ;;  %v10641_v27 = vpop.f32.mrb[14].mxu0  ;;  %v652_v52 = vmul.f32 1.442695, %v641_v48 }
 0x285   :  { %v648_v63 = vmul.f32 1.442695, %v639_v55  ;;  %v13971_v31 = vadd.f32 %v10641_v27, %v9356_v6  ;;  %v434_v32 = vpop.f32.mrb[15].mxu0  ;;  %v622_v42 = vpop.xlane.xlu1 %621 }
 0x286   :  { %v11854_v29 = vpack.c.bf16 %v13963_v21, %v13965_v24  ;;  %v13973_v34 = vadd.f32 %v9356_v6, %v434_v32  ;;  %v640_v43 = vsub.f32 %v13895_v22, %v622_v42  ;;  %v628_v44 = vpop.xlane.xlu0 %627 }
 0x287   :  { %13057 = vpow2.f32 %v648_v63  ;;  %v642_v50 = vsub.f32 %v13916_v36, %v628_v44 }
 0x288   :  { %11855 = vmatprep.subr.bf16.mxu0 %v11854_v29  ;;  %v11858_v38 = vpack.c.bf16 %v13971_v31, %v13973_v34  ;;  %v650_v49 = vmul.f32 1.442695, %v640_v43 }
 0x289   :  { %11857 = vmatpush3.bf16.msra.mxu0 %v11854_v29  ;;  %v631_v51 = vpop.xlane.xlu1 %630  ;;  %v654_v53 = vmul.f32 1.442695, %v642_v50 }
 0x28a   :  { %11859 = vmatprep.subr.bf16.mxu0 %v11858_v38  ;;  %13059 = vpow2.f32 %v650_v49  ;;  %v643_v55 = vsub.f32 %v13913_v33, %v631_v51 }
 0x28b   :  { %13061 = vpow2.f32 %v652_v52 }
 0x28c   :  { %13063 = vpow2.f32 %v654_v53  ;;  %v656_v63 = vmul.f32 1.442695, %v643_v55 }
 0x28d   :  { %v13942_v4 = vpop.eup %13055  ;;  %11861 = vmatpush3.bf16.msra.mxu0 %v11858_v38 }
 0x28e   :  { %v662_v5 = vsel %vm613_vm3, %v13942_v4, 0.0  ;;  %13065 = vpow2.f32 %v656_v63 }
 0x28f   :  { %663 = vadd.xlane.f32.xlu0 %v662_v5  ;;  %v637_v5 = vpop.xlane.xlu1 %636 }
 0x290   :  { %v645_v6 = vsub.f32 %v13933_v45, %v637_v5 }
 0x291   :  { %v13949_v8 = vpop.eup %13057 }
 0x292   :  { %v665_v12 = vsel %vm613_vm3, %v13949_v8, 0.0  ;;  %v660_v18 = vmul.f32 1.442695, %v645_v6 }
 0x293   :  { %666 = vadd.xlane.f32.xlu1 %v665_v12  ;;  %v634_v12 = vpop.xlane.xlu0 %633 }
 0x294   :  { %v13985_v0 = vpop.eup %13059  ;;  %v644_v17 = vsub.f32 %v13936_v46, %v634_v12  ;;  %13067 = vpow2.f32 %v660_v18 }
 0x295   :  { %v13987_v1 = vpop.eup %13061  ;;  %v668_v20 = vsel %vm613_vm3, %v13985_v0, 0.0 }
 0x296   :  { %v13991_v22 = vpop.eup %13063  ;;  %v671_v36 = vsel %vm613_vm3, %v13987_v1, 0.0  ;;  %v658_v19 = vmul.f32 1.442695, %v644_v17 }
 0x297   :  { %v674_v33 = vsel %vm613_vm3, %v13991_v22, 0.0 }
 0x298   :  { %v13997_v2 = vpop.eup %13065  ;;  %13069 = vpow2.f32 %v658_v19 }
 0x299   :  { %v677_v3 = vsel %vm613_vm3, %v13997_v2, 0.0 }
 0x29e   :  { %v14015_v26 = vpop.eup %13067 }
 0x29f   :  { %v683_v27 = vsel %vm613_vm3, %v14015_v26, 0.0 }
 0x2a2   :  { %v14019_v29 = vpop.eup %13069 }
 0x2a3   :  { %v680_v45 = vsel %vm613_vm3, %v14019_v29, 0.0 }
 0x2a4   :  { %12581 = vrot.lane.b32.xlu1 %v13808_v39, %s13666_s19 }
 0x2a5   :  { %12576 = vrot.lane.b32.xlu0 %v13798_v30, %s13666_s19 }
 0x2c4   :  { %669 = vadd.xlane.f32.xlu0 %v668_v20 }
 0x2c8   :  { %672 = vadd.xlane.f32.xlu1 %v671_v36  ;;  %675 = vadd.xlane.f32.xlu0 %v674_v33 }
 0x2cc   :  { %678 = vadd.xlane.f32.xlu1 %v677_v3 }
 0x2dd   :  { %12591 = vrot.lane.b32.xlu1 %v13818_v54, %s13666_s19 }
 0x2de   :  { %12586 = vrot.lane.b32.xlu0 %v13812_v47, %s13666_s19 }
 0x2e2   :  { %831 = vrot.lane.b32.xlu0 %v13802_v35, %s13666_s19 }
 0x2e6   :  { %835 = vrot.lane.b32.xlu0 %v13826_v56, %s13666_s19 }
 0x2ea   :  { %839 = vrot.lane.b32.xlu0 %v13836_v59, %s13666_s19 }
 0x2ee   :  { %843 = vrot.lane.b32.xlu0 %v13844_v61, %s13666_s19 }
 0x301   :  { %684 = vadd.xlane.f32.xlu1 %v683_v27 }
 0x305   :  { %681 = vadd.xlane.f32.xlu1 %v680_v45 }
 0x316   :  { %833 = vrot.lane.b32.xlu1 %v13828_v57, %s13666_s19 }
 0x31a   :  { %837 = vrot.lane.b32.xlu1 %v13830_v58, %s13666_s19 }
 0x31c   :  { %v664_v46 = vpop.xlane.xlu0 %663 }
 0x31d   :  { %13071 = vrcp.f32 %v664_v46 }
 0x31e   :  { %841 = vrot.lane.b32.xlu1 %v13838_v60, %s13666_s19 }
 0x320   :  { %v667_v32 = vpop.xlane.xlu1 %666  ;;  %v12577_v38 = vpop.permute.xlu0 %12576 }
 0x321   :  { %13073 = vrcp.f32 %v667_v32  ;;  %v12579_v40 = vunpack.i.h.bf16 %v12577_v38  ;;  %v12578_v42 = vunpack.i.l.bf16 %v12577_v38 }
 0x322   :  { %845 = vrot.lane.b32.xlu1 %v13846_v62, %s13666_s19 }
 0x323   :  { %v11862_v43 = vpack.c.bf16 %v12579_v40, %v12578_v42 }
 0x324   :  { %v12582_v48 = vpop.permute.xlu1 %12581 }
 0x325   :  { %11864 = vmatprep.subr.msk.bf16.mxu0 %vm13791_vm2, %v11862_v43  ;;  %v12584_v50 = vunpack.i.h.bf16 %v12582_v48  ;;  %v12583_v51 = vunpack.i.l.bf16 %v12582_v48 }
 0x327   :  { %v13072_v44 = vpop.eup %13071  ;;  %v11868_v55 = vpack.c.bf16 %v12584_v50, %v12583_v51 }
 0x328   :  { %v694_v49 = vmul.f32 %v13072_v44, %v13942_v4 }
 0x32a   :  { %10686 = vmatprep.mubr.msk.f32.mxu0 %vm613_vm3, %v694_v49 }
 0x32b   :  { %v13074_v52 = vpop.eup %13073 }
 0x32c   :  { %v695_v53 = vmul.f32 %v13074_v52, %v13949_v8 }
 0x32e   :  { %10687 = vmatmul.mubr.msk.f32.vlgmr.msra.gmra.mrb[16].mxu0 %vm613_vm3, %v695_v53 }
 0x32f   :  { %11867 = vmatpush3.bf16.xpose.msk.msra.mxu0 %vm13791_vm2, %v11862_v43 }
 0x330   :  { %11870 = vmatprep.subr.msk.bf16.mxu0 %vm13791_vm2, %v11868_v55 }
 0x337   :  { %11873 = vmatpush3.bf16.xpose.msk.msra.mxu0 %vm13791_vm2, %v11868_v55 }
 0x351   :  { %v670_v4 = vpop.xlane.xlu0 %669 }
 0x352   :  { %13075 = vrcp.f32 %v670_v4 }
 0x355   :  { %v673_v63 = vpop.xlane.xlu1 %672  ;;  %v676_v20 = vpop.xlane.xlu0 %675 }
 0x356   :  { %13077 = vrcp.f32 %v673_v63 }
 0x357   :  { %13079 = vrcp.f32 %v676_v20 }
 0x359   :  { %v679_v36 = vpop.xlane.xlu1 %678  ;;  %v12587_v8 = vpop.permute.xlu0 %12586 }
 0x35a   :  { %13081 = vrcp.f32 %v679_v36  ;;  %v12589_v33 = vunpack.i.h.bf16 %v12587_v8  ;;  %v12588_v3 = vunpack.i.l.bf16 %v12587_v8 }
 0x35c   :  { %v13076_v5 = vpop.eup %13075  ;;  %v11874_v6 = vpack.c.bf16 %v12589_v33, %v12588_v3 }
 0x35d   :  { %v12592_v12 = vpop.permute.xlu1 %12591  ;;  %v696_v17 = vmul.f32 %v13076_v5, %v13985_v0  ;;  %v832_v43 = vpop.permute.xlu0 %831 }
 0x35e   :  { %v12594_v18 = vunpack.i.h.bf16 %v12592_v12  ;;  %v12593_v19 = vunpack.i.l.bf16 %v12592_v12  ;;  %11876 = vmatprep.subr.msk.bf16.mxu0 %vm13791_vm2, %v11874_v6 }
 0x35f   :  { %10689 = vmatprep.mubr.msk.f32.mxu0 %vm613_vm3, %v696_v17  ;;  %11879 = vmatpush3.bf16.xpose.msk.msra.mxu0 %vm13791_vm2, %v11874_v6 }
 0x360   :  { %v13078_v27 = vpop.eup %13077  ;;  %v11880_v45 = vpack.c.bf16 %v12594_v18, %v12593_v19 }
 0x361   :  { %v13080_v46 = vpop.eup %13079  ;;  %v697_v32 = vmul.f32 %v13078_v27, %v13987_v1 }
 0x362   :  { %11882 = vmatprep.subr.msk.bf16.mxu0 %vm13791_vm2, %v11880_v45  ;;  %v698_v0 = vmul.f32 %v13080_v46, %v13991_v22 }
 0x363   :  { %10690 = vmatmul.mubr.msk.f32.gmra.mrb[18].mxu0 %vm613_vm3, %v697_v32 }
 0x364   :  { %v13082_v38 = vpop.eup %13081  ;;  %10692 = vmatprep.mubr.msk.f32.mxu0 %vm613_vm3, %v698_v0 }
 0x365   :  { %v699_v40 = vmul.f32 %v13082_v38, %v13997_v2  ;;  %v836_v2 = vpop.permute.xlu0 %835 }
 0x367   :  { %10693 = vmatmul.mubr.msk.f32.gmra.mrb[20].mxu0 %vm613_vm3, %v699_v40 }
 0x368   :  { %11885 = vmatpush3.bf16.xpose.msk.msra.mxu0 %vm13791_vm2, %v11880_v45 }
 0x369   :  { %v840_v52 = vpop.permute.xlu0 %839 }
 0x38e   :  { %v685_v42 = vpop.xlane.xlu1 %684 }
 0x38f   :  { %13083 = vrcp.f32 %v685_v42 }
 0x392   :  { %v682_v1 = vpop.xlane.xlu1 %681 }
 0x393   :  { %13085 = vrcp.f32 %v682_v1 }
 0x396   :  { %v834_v22 = vpop.permute.xlu1 %833 }
 0x399   :  { %v13084_v44 = vpop.eup %13083 }
 0x39a   :  { %v701_v50 = vmul.f32 %v13084_v44, %v14015_v26  ;;  %v838_v51 = vpop.permute.xlu1 %837 }
 0x39d   :  { %v13086_v48 = vpop.eup %13085 }
 0x39e   :  { %v700_v49 = vmul.f32 %v13086_v48, %v14019_v29  ;;  %v842_v53 = vpop.permute.xlu1 %841  ;;  %v844_v29 = vpop.permute.xlu0 %843 }
 0x3a0   :  { %10695 = vmatprep.mubr.msk.f32.mxu0 %vm613_vm3, %v700_v49 }
 0x3a1   :  { %10696 = vmatmul.mubr.msk.f32.gmra.mrb[22].mxu0 %vm613_vm3, %v701_v50 }
 0x3a2   :  { %10714 = vmatprep.mubr.msk.f32.mxu0 %vm443_vm1, %v832_v43  ;;  %v846_v26 = vpop.permute.xlu1 %845 }
 0x3a5   :  { %10715 = vmatmul.mubr.msk.f32.vlgmr.msra.gmra.mrb[24].mxu0 %vm443_vm1, %v834_v22 }
 0x3a6   :  { %10717 = vmatprep.mubr.msk.f32.mxu0 %vm443_vm1, %v836_v2 }
 0x3a9   :  { %10718 = vmatmul.mubr.msk.f32.gmra.mrb[26].mxu0 %vm443_vm1, %v838_v51 }
 0x3aa   :  { %10720 = vmatprep.mubr.msk.f32.mxu0 %vm443_vm1, %v840_v52 }
 0x3ad   :  { %10721 = vmatmul.mubr.msk.f32.gmra.mrb[28].mxu0 %vm443_vm1, %v842_v53 }
 0x3ae   :  { %10723 = vmatprep.mubr.msk.f32.mxu0 %vm443_vm1, %v844_v29 }
 0x3b1   :  { %10724 = vmatmul.mubr.msk.f32.gmra.mrb[30].mxu0 %vm443_vm1, %v846_v26 }
 0x401   :  { %v14071_v55 = vpop.f32.mrb[16].mxu0 }
 0x402   :  { %v14073_v4 = vpop.f32.mrb[17].mxu0 }
 0x436   :  { %v14075_v63 = vpop.f32.mrb[18].mxu0 }
 0x437   :  { %v14077_v20 = vpop.f32.mrb[19].mxu0 }
 0x43a   :  { %v14079_v36 = vpop.f32.mrb[20].mxu0 }
 0x43b   :  { %v14081_v8 = vpop.f32.mrb[21].mxu0 }
 0x474   :  { %v14083_v33 = vpop.f32.mrb[22].mxu0 }
 0x475   :  { %v14085_v3 = vpop.f32.mrb[23].mxu0 }
 0x478   :  { %v10716_v5 = vpop.f32.mrb[24].mxu0 }
 0x479   :  { %v1001_v6 = vmul.f32 0.35355338, %v10716_v5  ;;  %v961_v12 = vpop.f32.mrb[25].mxu0 }
 0x47a   :  { %v1000_v17 = vmul.f32 0.35355338, %v961_v12 }
 0x47b   :  { %v1009_v18 = vadd.f32 %v1001_v6, %v13876_v10 }
 0x47c   :  { %v10719_v19 = vpop.f32.mrb[26].mxu0  ;;  %v1008_v27 = vadd.f32 %v1000_v17, %v13871_v7 }
 0x47d   :  { %v1003_v45 = vmul.f32 0.35355338, %v10719_v19  ;;  %v971_v46 = vpop.f32.mrb[27].mxu0  ;;  %v1019_v32 = vsel %vm613_vm3, %v1009_v18, -inf }
 0x47e   :  { %v1002_v0 = vmul.f32 0.35355338, %v971_v46  ;;  %1020 = vmax.xlane.f32.xlu1 %v1019_v32  ;;  %v1016_v38 = vsel %vm613_vm3, %v1008_v27, -inf  ;;  %v14117_v46 = vpack.i.bf16 %v13963_v21, %v13965_v24  ;;  %v14123_v32 = vpack.i.bf16 %v13971_v31, %v13973_v34 }
 0x47f   :  { %1017 = vmax.xlane.f32.xlu0 %v1016_v38  ;;  %v1011_v40 = vadd.f32 %v1003_v45, %v13882_v13  ;;  %v14111_v45 = vpack.i.bf16 %v13957_v14, %v13959_v15  ;;  %v14129_v14 = vpack.i.bf16 %v13951_v9, %v13953_v11 }
 0x480   :  { %v10722_v42 = vpop.f32.mrb[28].mxu0  ;;  %v1010_v22 = vadd.f32 %v1002_v0, %v13887_v16 }
 0x481   :  { %v1005_v1 = vmul.f32 0.35355338, %v10722_v42  ;;  %v981_v43 = vpop.f32.mrb[29].mxu0  ;;  %v1025_v44 = vsel %vm613_vm3, %v1011_v40, -inf }
 0x482   :  { %v1004_v48 = vmul.f32 0.35355338, %v981_v43  ;;  %v1022_v29 = vsel %vm613_vm3, %v1010_v22, -inf }
 0x483   :  { %1026 = vmax.xlane.f32.xlu0 %v1025_v44  ;;  %v1013_v49 = vadd.f32 %v1005_v1, %v13900_v23 }
 0x484   :  { %v10725_v50 = vpop.f32.mrb[30].mxu0  ;;  %v1012_v26 = vadd.f32 %v1004_v48, %v13907_v28 }
 0x485   :  { %v1007_v2 = vmul.f32 0.35355338, %v10725_v50  ;;  %v991_v51 = vpop.f32.mrb[31].mxu0  ;;  %v1031_v52 = vsel %vm613_vm3, %v1013_v49, -inf }
 0x486   :  { %v1006_v53 = vmul.f32 0.35355338, %v991_v51  ;;  %1032 = vmax.xlane.f32.xlu1 %v1031_v52  ;;  %v1028_v12 = vsel %vm613_vm3, %v1012_v26, -inf }
 0x487   :  { %1023 = vmax.xlane.f32.xlu0 %v1022_v29  ;;  %v14099_v5 = vadd.f32 %v1007_v2, %v13921_v37 }
 0x488   :  { %v14105_v17 = vadd.f32 %v1006_v53, %v13926_v41 }
 0x489   :  { %v1037_v6 = vsel %vm613_vm3, %v14099_v5, -inf }
 0x48a   :  { %1038 = vmax.xlane.f32.xlu1 %v1037_v6  ;;  %v1034_v19 = vsel %vm613_vm3, %v14105_v17, -inf }
 0x48b   :  { %1029 = vmax.xlane.f32.xlu0 %v1028_v12 }
 0x48f   :  { %1035 = vmax.xlane.f32.xlu0 %v1034_v19 }
 0x49b   :  { %12601 = vrot.lane.b32.xlu1 %v14111_v45, %s13666_s19 }
 0x49f   :  { %12606 = vrot.lane.b32.xlu1 %v14117_v46, %s13666_s19 }
 0x4a3   :  { %12611 = vrot.lane.b32.xlu1 %v14123_v32, %s13666_s19 }
 0x4a5   :  { %12596 = vrot.lane.b32.xlu0 %v14129_v14, %s13666_s19 }
 0x4a7   :  { %12621 = vrot.lane.b32.xlu1 %v13808_v39, %s13667_s20 }
 0x4a9   :  { %12616 = vrot.lane.b32.xlu0 %v13798_v30, %s13667_s20 }
 0x50b   :  { %v1021_v15 = vpop.xlane.xlu1 %1020 }
 0x50c   :  { %v1041_v21 = vsub.f32 %v1009_v18, %v1021_v15  ;;  %v1018_v24 = vpop.xlane.xlu0 %1017 }
 0x50d   :  { %v1040_v31 = vsub.f32 %v1008_v27, %v1018_v24 }
 0x50e   :  { %v1050_v34 = vmul.f32 1.442695, %v1041_v21 }
 0x50f   :  { %v1048_v0 = vmul.f32 1.442695, %v1040_v31 }
 0x510   :  { %13087 = vpow2.f32 %v1050_v34  ;;  %v1027_v38 = vpop.xlane.xlu0 %1026 }
 0x511   :  { %13089 = vpow2.f32 %v1048_v0  ;;  %v1043_v9 = vsub.f32 %v1011_v40, %v1027_v38 }
 0x513   :  { %v1054_v11 = vmul.f32 1.442695, %v1043_v9  ;;  %v1033_v42 = vpop.xlane.xlu1 %1032 }
 0x514   :  { %v1045_v1 = vsub.f32 %v1013_v49, %v1033_v42  ;;  %v1024_v43 = vpop.xlane.xlu0 %1023 }
 0x515   :  { %13091 = vpow2.f32 %v1054_v11  ;;  %v1042_v44 = vsub.f32 %v1010_v22, %v1024_v43 }
 0x516   :  { %v1058_v48 = vmul.f32 1.442695, %v1045_v1 }
 0x517   :  { %v1052_v50 = vmul.f32 1.442695, %v1042_v44  ;;  %v1039_v2 = vpop.xlane.xlu1 %1038 }
 0x518   :  { %v1030_v51 = vpop.xlane.xlu0 %1029 }
 0x519   :  { %13093 = vpow2.f32 %v1052_v50  ;;  %v1044_v18 = vsub.f32 %v1012_v26, %v1030_v51 }
 0x51a   :  { %v14137_v52 = vpop.eup %13087  ;;  %13095 = vpow2.f32 %v1058_v48 }
 0x51b   :  { %v14139_v27 = vpop.eup %13089  ;;  %v1056_v53 = vmul.f32 1.442695, %v1044_v18  ;;  %v12602_v29 = vpop.permute.xlu1 %12601  ;;  %v1067_v40 = vsel %vm613_vm3, %v14137_v52, 0.0 }
 0x51c   :  { %1068 = vadd.xlane.f32.xlu1 %v1067_v40  ;;  %v1036_v49 = vpop.xlane.xlu0 %1035  ;;  %v1064_v22 = vsel %vm613_vm3, %v14139_v27, 0.0  ;;  %v12604_v15 = vunpack.i.h.bf16 %v12602_v29  ;;  %v12603_v21 = vunpack.i.l.bf16 %v12602_v29 }
 0x51d   :  { %1065 = vadd.xlane.f32.xlu0 %v1064_v22  ;;  %13097 = vpow2.f32 %v1056_v53 }
 0x51e   :  { %v11890_v1 = vpack.c.bf16 %v12604_v15, %v12603_v21  ;;  %v1046_v21 = vsub.f32 %v14105_v17, %v1036_v49 }
 0x51f   :  { %v14145_v6 = vpop.eup %13091  ;;  %v12607_v26 = vpop.permute.xlu1 %12606 }
 0x520   :  { %v12597_v12 = vpop.permute.xlu0 %12596  ;;  %v1073_v19 = vsel %vm613_vm3, %v14145_v6, 0.0  ;;  %v12609_v11 = vunpack.i.h.bf16 %v12607_v26  ;;  %v12608_v42 = vunpack.i.l.bf16 %v12607_v26 }
 0x521   :  { %v12599_v24 = vunpack.i.h.bf16 %v12597_v12  ;;  %v12598_v31 = vunpack.i.l.bf16 %v12597_v12  ;;  %1074 = vadd.xlane.f32.xlu1 %v1073_v19  ;;  %v1047_v19 = vsub.f32 %v14099_v5, %v1039_v2 }
 0x522   :  { %v11894_v18 = vpack.c.bf16 %v12609_v11, %v12608_v42 }
 0x523   :  { %v14149_v34 = vpop.eup %13093  ;;  %v11886_v0 = vpack.c.bf16 %v12599_v24, %v12598_v31  ;;  %v12612_v43 = vpop.permute.xlu1 %12611  ;;  %v1062_v15 = vmul.f32 1.442695, %v1047_v19  ;;  %v1060_v24 = vmul.f32 1.442695, %v1046_v21 }
 0x524   :  { %v1070_v38 = vsel %vm613_vm3, %v14149_v34, 0.0  ;;  %v14153_v9 = vpop.eup %13095  ;;  %v12614_v50 = vunpack.i.h.bf16 %v12612_v43  ;;  %v12613_v51 = vunpack.i.l.bf16 %v12612_v43  ;;  %v12617_v53 = vpop.permute.xlu0 %12616 }
 0x525   :  { %1071 = vadd.xlane.f32.xlu0 %v1070_v38  ;;  %11887 = vmatprep.subr.bf16.mxu1 %v11886_v0  ;;  %v1079_v44 = vsel %vm613_vm3, %v14153_v9, 0.0  ;;  %v12619_v40 = vunpack.i.h.bf16 %v12617_v53  ;;  %v12618_v22 = vunpack.i.l.bf16 %v12617_v53  ;;  %13099 = vpow2.f32 %v1062_v15 }
 0x526   :  { %11889 = vmatpush3.bf16.msra.mxu1 %v11886_v0  ;;  %v11898_v26 = vpack.c.bf16 %v12614_v50, %v12613_v51  ;;  %13101 = vpow2.f32 %v1060_v24 }
 0x527   :  { %11891 = vmatprep.subr.bf16.mxu1 %v11890_v1  ;;  %v14157_v48 = vpop.eup %13097  ;;  %v11902_v12 = vpack.c.bf16 %v12619_v40, %v12618_v22  ;;  %v12622_v49 = vpop.permute.xlu1 %12621 }
 0x528   :  { %v1076_v29 = vsel %vm613_vm3, %v14157_v48, 0.0  ;;  %v12623_v50 = vunpack.i.l.bf16 %v12622_v49 }
 0x529   :  { %1080 = vadd.xlane.f32.xlu0 %v1079_v44  ;;  %v12624_v44 = vunpack.i.h.bf16 %v12622_v49 }
 0x52a   :  { %11893 = vmatpush3.bf16.msra.mxu1 %v11890_v1 }
 0x52b   :  { %11895 = vmatprep.subr.bf16.mxu1 %v11894_v18 }
 0x52d   :  { %1077 = vadd.xlane.f32.xlu0 %v1076_v29  ;;  %v11908_v29 = vpack.c.bf16 %v12624_v44, %v12623_v50 }
 0x52e   :  { %11897 = vmatpush3.bf16.msra.mxu1 %v11894_v18 }
 0x52f   :  { %11899 = vmatprep.subr.bf16.mxu1 %v11898_v26  ;;  %v14175_v31 = vpop.eup %13099 }
 0x530   :  { %v1085_v5 = vsel %vm613_vm3, %v14175_v31, 0.0  ;;  %v14181_v17 = vpop.eup %13101 }
 0x531   :  { %v1082_v2 = vsel %vm613_vm3, %v14181_v17, 0.0 }
 0x532   :  { %12631 = vrot.lane.b32.xlu1 %v13818_v54, %s13667_s20  ;;  %11901 = vmatpush3.bf16.msra.mxu1 %v11898_v26 }
 0x533   :  { %11904 = vmatprep.subr.msk.bf16.mxu1 %vm13791_vm2, %v11902_v12 }
 0x543   :  { %12626 = vrot.lane.b32.xlu0 %v13812_v47, %s13667_s20 }
 0x547   :  { %1265 = vrot.lane.b32.xlu0 %v13802_v35, %s13667_s20 }
 0x54b   :  { %1269 = vrot.lane.b32.xlu0 %v13826_v56, %s13667_s20 }
 0x54f   :  { %1273 = vrot.lane.b32.xlu0 %v13836_v59, %s13667_s20 }
 0x553   :  { %1277 = vrot.lane.b32.xlu0 %v13844_v61, %s13667_s20 }
 0x556   :  { %1086 = vadd.xlane.f32.xlu1 %v1085_v5 }
 0x55a   :  { %1083 = vadd.xlane.f32.xlu1 %v1082_v2 }
 0x56b   :  { %1267 = vrot.lane.b32.xlu1 %v13828_v57, %s13667_s20 }
 0x56f   :  { %1271 = vrot.lane.b32.xlu1 %v13830_v58, %s13667_s20 }
 0x573   :  { %1275 = vrot.lane.b32.xlu1 %v13838_v60, %s13667_s20 }
 0x577   :  { %1279 = vrot.lane.b32.xlu1 %v13846_v62, %s13667_s20 }
 0x5a9   :  { %v1069_v0 = vpop.xlane.xlu1 %1068 }
 0x5aa   :  { %13103 = vrcp.f32 %v1069_v0  ;;  %v1066_v38 = vpop.xlane.xlu0 %1065 }
 0x5ab   :  { %13105 = vrcp.f32 %v1066_v38 }
 0x5ae   :  { %v1075_v11 = vpop.xlane.xlu1 %1074 }
 0x5af   :  { %13107 = vrcp.f32 %v1075_v11 }
 0x5b2   :  { %v1072_v42 = vpop.xlane.xlu0 %1071 }
 0x5b3   :  { %13109 = vrcp.f32 %v1072_v42 }
 0x5b4   :  { %v13104_v1 = vpop.eup %13103 }
 0x5b5   :  { %v13106_v43 = vpop.eup %13105  ;;  %v1097_v53 = vmul.f32 %v13104_v1, %v14137_v52 }
 0x5b6   :  { %v1081_v51 = vpop.xlane.xlu0 %1080  ;;  %v1096_v18 = vmul.f32 %v13106_v43, %v14139_v27 }
 0x5b7   :  { %13111 = vrcp.f32 %v1081_v51 }
 0x5b8   :  { %10742 = vmatprep.mubr.msk.f32.mxu1 %vm613_vm3, %v1096_v18 }
 0x5b9   :  { %10743 = vmatmul.mubr.msk.f32.vlgmr.msra.gmra.mrb[16].mxu1 %vm613_vm3, %v1097_v53  ;;  %v13108_v22 = vpop.eup %13107 }
 0x5ba   :  { %11907 = vmatpush3.bf16.xpose.msk.msra.mxu1 %vm13791_vm2, %v11902_v12  ;;  %v1078_v40 = vpop.xlane.xlu0 %1077  ;;  %v1099_v21 = vmul.f32 %v13108_v22, %v14145_v6  ;;  %v12632_v12 = vpop.permute.xlu1 %12631 }
 0x5bb   :  { %13113 = vrcp.f32 %v1078_v40  ;;  %11910 = vmatprep.subr.msk.bf16.mxu1 %vm13791_vm2, %v11908_v29  ;;  %v12634_v49 = vunpack.i.h.bf16 %v12632_v12 }
 0x5bd   :  { %v13110_v26 = vpop.eup %13109 }
 0x5be   :  { %v12627_v19 = vpop.permute.xlu0 %12626  ;;  %v1098_v27 = vmul.f32 %v13110_v26, %v14149_v34  ;;  %v12633_v34 = vunpack.i.l.bf16 %v12632_v12 }
 0x5bf   :  { %v12629_v52 = vunpack.i.h.bf16 %v12627_v19  ;;  %v12628_v15 = vunpack.i.l.bf16 %v12627_v19 }
 0x5c0   :  { %10745 = vmatprep.mubr.msk.f32.mxu1 %vm613_vm3, %v1098_v27  ;;  %v11920_v38 = vpack.c.bf16 %v12634_v49, %v12633_v34 }
 0x5c1   :  { %v11914_v24 = vpack.c.bf16 %v12629_v52, %v12628_v15  ;;  %10746 = vmatmul.mubr.msk.f32.gmra.mrb[18].mxu1 %vm613_vm3, %v1099_v21  ;;  %v13112_v5 = vpop.eup %13111 }
 0x5c2   :  { %11913 = vmatpush3.bf16.xpose.msk.msra.mxu1 %vm13791_vm2, %v11908_v29  ;;  %v1101_v6 = vmul.f32 %v13112_v5, %v14153_v9 }
 0x5c3   :  { %11916 = vmatprep.subr.msk.bf16.mxu1 %vm13791_vm2, %v11914_v24 }
 0x5c5   :  { %v13114_v2 = vpop.eup %13113 }
 0x5c6   :  { %v1100_v0 = vmul.f32 %v13114_v2, %v14157_v48  ;;  %v1266_v48 = vpop.permute.xlu0 %1265 }
 0x5c8   :  { %10748 = vmatprep.mubr.msk.f32.mxu1 %vm613_vm3, %v1100_v0 }
 0x5c9   :  { %10749 = vmatmul.mubr.msk.f32.gmra.mrb[20].mxu1 %vm613_vm3, %v1101_v6 }
 0x5ca   :  { %11919 = vmatpush3.bf16.xpose.msk.msra.mxu1 %vm13791_vm2, %v11914_v24  ;;  %v1270_v51 = vpop.permute.xlu0 %1269 }
 0x5cb   :  { %11922 = vmatprep.subr.msk.bf16.mxu1 %vm13791_vm2, %v11920_v38 }
 0x5ce   :  { %v1274_v53 = vpop.permute.xlu0 %1273 }
 0x5d2   :  { %11925 = vmatpush3.bf16.xpose.msk.msra.mxu1 %vm13791_vm2, %v11920_v38 }
 0x5e3   :  { %v1087_v11 = vpop.xlane.xlu1 %1086 }
 0x5e4   :  { %13115 = vrcp.f32 %v1087_v11 }
 0x5e7   :  { %v1084_v42 = vpop.xlane.xlu1 %1083 }
 0x5e8   :  { %13117 = vrcp.f32 %v1084_v42 }
 0x5eb   :  { %v1268_v43 = vpop.permute.xlu1 %1267 }
 0x5ee   :  { %v13116_v9 = vpop.eup %13115 }
 0x5ef   :  { %v1103_v50 = vmul.f32 %v13116_v9, %v14175_v31  ;;  %v1272_v18 = vpop.permute.xlu1 %1271 }
 0x5f2   :  { %v13118_v1 = vpop.eup %13117 }
 0x5f3   :  { %v1102_v44 = vmul.f32 %v13118_v1, %v14181_v17  ;;  %v1276_v29 = vpop.permute.xlu1 %1275  ;;  %v1278_v17 = vpop.permute.xlu0 %1277 }
 0x5f5   :  { %10751 = vmatprep.mubr.msk.f32.mxu1 %vm613_vm3, %v1102_v44 }
 0x5f6   :  { %10752 = vmatmul.mubr.msk.f32.gmra.mrb[22].mxu1 %vm613_vm3, %v1103_v50 }
 0x5f7   :  { %10770 = vmatprep.mubr.msk.f32.mxu1 %vm443_vm1, %v1266_v48  ;;  %v1280_v31 = vpop.permute.xlu1 %1279 }
 0x5fa   :  { %10771 = vmatmul.mubr.msk.f32.vlgmr.msra.gmra.mrb[24].mxu1 %vm443_vm1, %v1268_v43 }
 0x5fb   :  { %10773 = vmatprep.mubr.msk.f32.mxu1 %vm443_vm1, %v1270_v51 }
 0x5fe   :  { %10774 = vmatmul.mubr.msk.f32.gmra.mrb[26].mxu1 %vm443_vm1, %v1272_v18 }
 0x5ff   :  { %10776 = vmatprep.mubr.msk.f32.mxu1 %vm443_vm1, %v1274_v53 }
 0x602   :  { %10777 = vmatmul.mubr.msk.f32.gmra.mrb[28].mxu1 %vm443_vm1, %v1276_v29 }
 0x603   :  { %10779 = vmatprep.mubr.msk.f32.mxu1 %vm443_vm1, %v1278_v17 }
 0x606   :  { %10780 = vmatmul.mubr.msk.f32.gmra.mrb[30].mxu1 %vm443_vm1, %v1280_v31 }
 0x68c   :  { %v14231_v40 = vpop.f32.mrb[16].mxu1 }
 0x68d   :  { %v14233_v22 = vpop.f32.mrb[17].mxu1 }
 0x694   :  { %v14235_v26 = vpop.f32.mrb[18].mxu1 }
 0x695   :  { %v14237_v19 = vpop.f32.mrb[19].mxu1 }
 0x69c   :  { %v14239_v27 = vpop.f32.mrb[20].mxu1 }
 0x69d   :  { %v14241_v52 = vpop.f32.mrb[21].mxu1 }
 0x6c9   :  { %v14243_v15 = vpop.f32.mrb[22].mxu1 }
 0x6ca   :  { %v14245_v21 = vpop.f32.mrb[23].mxu1 }
 0x6cd   :  { %v10772_v24 = vpop.f32.mrb[24].mxu1 }
 0x6ce   :  { %v1435_v12 = vmul.f32 0.35355338, %v10772_v24  ;;  %v1395_v5 = vpop.f32.mrb[25].mxu1 }
 0x6cf   :  { %v1434_v2 = vmul.f32 0.35355338, %v1395_v5 }
 0x6d0   :  { %v1443_v49 = vadd.f32 %v1435_v12, %v13876_v10 }
 0x6d1   :  { %v10775_v34 = vpop.f32.mrb[26].mxu1  ;;  %v1442_v0 = vadd.f32 %v1434_v2, %v13871_v7 }
 0x6d2   :  { %v1437_v6 = vmul.f32 0.35355338, %v10775_v34  ;;  %v1405_v38 = vpop.f32.mrb[27].mxu1  ;;  %v1453_v11 = vsel %vm613_vm3, %v1443_v49, -inf }
 0x6d3   :  { %v1436_v42 = vmul.f32 0.35355338, %v1405_v38  ;;  %1454 = vmax.xlane.f32.xlu1 %v1453_v11  ;;  %v1450_v48 = vsel %vm613_vm3, %v1442_v0, -inf }
 0x6d4   :  { %1451 = vmax.xlane.f32.xlu0 %v1450_v48  ;;  %v1445_v9 = vadd.f32 %v1437_v6, %v13882_v13 }
 0x6d5   :  { %v10778_v1 = vpop.f32.mrb[28].mxu1  ;;  %v1444_v51 = vadd.f32 %v1436_v42, %v13887_v16 }
 0x6d6   :  { %v1439_v43 = vmul.f32 0.35355338, %v10778_v1  ;;  %v1415_v44 = vpop.f32.mrb[29].mxu1  ;;  %v1459_v50 = vsel %vm613_vm3, %v1445_v9, -inf }
 0x6d7   :  { %v1438_v10 = vmul.f32 0.35355338, %v1415_v44  ;;  %v1456_v13 = vsel %vm613_vm3, %v1444_v51, -inf }
 0x6d8   :  { %1460 = vmax.xlane.f32.xlu0 %v1459_v50  ;;  %v1447_v7 = vadd.f32 %v1439_v43, %v13900_v23 }
 0x6d9   :  { %v10781_v18 = vpop.f32.mrb[30].mxu1  ;;  %v1446_v24 = vadd.f32 %v1438_v10, %v13907_v28 }
 0x6da   :  { %v1441_v53 = vmul.f32 0.35355338, %v10781_v18  ;;  %v1425_v29 = vpop.f32.mrb[31].mxu1  ;;  %v1465_v17 = vsel %vm613_vm3, %v1447_v7, -inf }
 0x6db   :  { %v1440_v31 = vmul.f32 0.35355338, %v1425_v29  ;;  %1466 = vmax.xlane.f32.xlu1 %v1465_v17  ;;  %v1462_v23 = vsel %vm613_vm3, %v1446_v24, -inf }
 0x6dc   :  { %1457 = vmax.xlane.f32.xlu0 %v1456_v13  ;;  %v14259_v12 = vadd.f32 %v1441_v53, %v13921_v37 }
 0x6dd   :  { %v14265_v5 = vadd.f32 %v1440_v31, %v13926_v41 }
 0x6de   :  { %v1471_v16 = vsel %vm613_vm3, %v14259_v12, -inf }
 0x6df   :  { %1472 = vmax.xlane.f32.xlu1 %v1471_v16  ;;  %v1468_v2 = vsel %vm613_vm3, %v14265_v5, -inf }
 0x6e0   :  { %1463 = vmax.xlane.f32.xlu0 %v1462_v23 }
 0x6e4   :  { %1469 = vmax.xlane.f32.xlu0 %v1468_v2 }
 0x6f0   :  { %12641 = vrot.lane.b32.xlu1 %v14111_v45, %s13667_s20 }
 0x6f4   :  { %12646 = vrot.lane.b32.xlu1 %v14117_v46, %s13667_s20 }
 0x6f8   :  { %12651 = vrot.lane.b32.xlu1 %v14123_v32, %s13667_s20 }
 0x6fa   :  { %12636 = vrot.lane.b32.xlu0 %v14129_v14, %s13667_s20 }
 0x6fc   :  { %12661 = vrot.lane.b32.xlu1 %v13808_v39, %s13668_s21 }
 0x6fe   :  { %12656 = vrot.lane.b32.xlu0 %v13798_v30, %s13668_s21 }
 0x760   :  { %v1455_v28 = vpop.xlane.xlu1 %1454 }
 0x761   :  { %v1475_v37 = vsub.f32 %v1443_v49, %v1455_v28  ;;  %v1452_v41 = vpop.xlane.xlu0 %1451 }
 0x762   :  { %v1474_v34 = vsub.f32 %v1442_v0, %v1452_v41 }
 0x763   :  { %v1484_v6 = vmul.f32 1.442695, %v1475_v37 }
 0x764   :  { %v1482_v38 = vmul.f32 1.442695, %v1474_v34 }
 0x765   :  { %13119 = vpow2.f32 %v1484_v6  ;;  %v1461_v11 = vpop.xlane.xlu0 %1460 }
 0x766   :  { %13121 = vpow2.f32 %v1482_v38  ;;  %v1477_v42 = vsub.f32 %v1445_v9, %v1461_v11 }
 0x768   :  { %v1488_v48 = vmul.f32 1.442695, %v1477_v42  ;;  %v1467_v1 = vpop.xlane.xlu1 %1466 }
 0x769   :  { %v1479_v43 = vsub.f32 %v1447_v7, %v1467_v1  ;;  %v1458_v44 = vpop.xlane.xlu0 %1457 }
 0x76a   :  { %13123 = vpow2.f32 %v1488_v48  ;;  %v1476_v50 = vsub.f32 %v1444_v51, %v1458_v44 }
 0x76b   :  { %v1492_v39 = vmul.f32 1.442695, %v1479_v43 }
 0x76c   :  { %v1486_v10 = vmul.f32 1.442695, %v1476_v50  ;;  %v1473_v18 = vpop.xlane.xlu1 %1472 }
 0x76d   :  { %v1464_v30 = vpop.xlane.xlu0 %1463 }
 0x76e   :  { %13125 = vpow2.f32 %v1486_v10  ;;  %v1478_v49 = vsub.f32 %v1446_v24, %v1464_v30 }
 0x76f   :  { %v14281_v53 = vpop.eup %13119  ;;  %13127 = vpow2.f32 %v1492_v39 }
 0x770   :  { %v14283_v0 = vpop.eup %13121  ;;  %v1490_v29 = vmul.f32 1.442695, %v1478_v49  ;;  %v12642_v17 = vpop.permute.xlu1 %12641  ;;  %v1501_v9 = vsel %vm613_vm3, %v14281_v53, 0.0 }
 0x771   :  { %1502 = vadd.xlane.f32.xlu1 %v1501_v9  ;;  %v1470_v7 = vpop.xlane.xlu0 %1469  ;;  %v1498_v51 = vsel %vm613_vm3, %v14283_v0, 0.0  ;;  %v12644_v23 = vunpack.i.h.bf16 %v12642_v17  ;;  %v12643_v2 = vunpack.i.l.bf16 %v12642_v17 }
 0x772   :  { %1499 = vadd.xlane.f32.xlu0 %v1498_v51  ;;  %13129 = vpow2.f32 %v1490_v29 }
 0x773   :  { %v11930_v48 = vpack.c.bf16 %v12644_v23, %v12643_v2 }
 0x774   :  { %v14289_v31 = vpop.eup %13123  ;;  %v12647_v13 = vpop.permute.xlu1 %12646 }
 0x775   :  { %v12637_v24 = vpop.permute.xlu0 %12636  ;;  %v1507_v16 = vsel %vm613_vm3, %v14289_v31, 0.0  ;;  %v12649_v11 = vunpack.i.h.bf16 %v12647_v13  ;;  %v12648_v42 = vunpack.i.l.bf16 %v12647_v13  ;;  %v1481_v13 = vsub.f32 %v14259_v12, %v1473_v18 }
 0x776   :  { %v12639_v28 = vunpack.i.h.bf16 %v12637_v24  ;;  %v12638_v37 = vunpack.i.l.bf16 %v12637_v24  ;;  %1508 = vadd.xlane.f32.xlu1 %v1507_v16  ;;  %v1480_v16 = vsub.f32 %v14265_v5, %v1470_v7 }
 0x777   :  { %v11934_v10 = vpack.c.bf16 %v12649_v11, %v12648_v42  ;;  %v1496_v24 = vmul.f32 1.442695, %v1481_v13 }
 0x778   :  { %v14293_v41 = vpop.eup %13125  ;;  %v11926_v34 = vpack.c.bf16 %v12639_v28, %v12638_v37  ;;  %v12652_v1 = vpop.permute.xlu1 %12651  ;;  %v1494_v23 = vmul.f32 1.442695, %v1480_v16 }
 0x779   :  { %v1504_v6 = vsel %vm613_vm3, %v14293_v41, 0.0  ;;  %v14297_v38 = vpop.eup %13127  ;;  %v12654_v50 = vunpack.i.h.bf16 %v12652_v1  ;;  %v12653_v39 = vunpack.i.l.bf16 %v12652_v1  ;;  %v12657_v30 = vpop.permute.xlu0 %12656  ;;  %13131 = vpow2.f32 %v1496_v24 }
 0x77a   :  { %1505 = vadd.xlane.f32.xlu0 %v1504_v6  ;;  %11927 = vmatprep.subr.bf16.mxu0 %v11926_v34  ;;  %v1513_v43 = vsel %vm613_vm3, %v14297_v38, 0.0  ;;  %v12659_v29 = vunpack.i.h.bf16 %v12657_v30  ;;  %v12658_v17 = vunpack.i.l.bf16 %v12657_v30  ;;  %13133 = vpow2.f32 %v1494_v23 }
 0x77b   :  { %11929 = vmatpush3.bf16.msra.mxu0 %v11926_v34  ;;  %v11938_v9 = vpack.c.bf16 %v12654_v50, %v12653_v39 }
 0x77c   :  { %11931 = vmatprep.subr.bf16.mxu0 %v11930_v48  ;;  %v14301_v44 = vpop.eup %13129  ;;  %v11942_v51 = vpack.c.bf16 %v12659_v29, %v12658_v17 }
 0x77d   :  { %v1510_v49 = vsel %vm613_vm3, %v14301_v44, 0.0 }
 0x77e   :  { %1514 = vadd.xlane.f32.xlu0 %v1513_v43 }
 0x77f   :  { %11933 = vmatpush3.bf16.msra.mxu0 %v11930_v48 }
 0x780   :  { %11935 = vmatprep.subr.bf16.mxu0 %v11934_v10 }
 0x782   :  { %1511 = vadd.xlane.f32.xlu0 %v1510_v49 }
 0x783   :  { %11937 = vmatpush3.bf16.msra.mxu0 %v11934_v10 }
 0x784   :  { %11939 = vmatprep.subr.bf16.mxu0 %v11938_v9 }
 0x787   :  { %12671 = vrot.lane.b32.xlu1 %v13818_v54, %s13668_s21  ;;  %11941 = vmatpush3.bf16.msra.mxu0 %v11938_v9  ;;  %v14319_v54 = vpop.eup %13131 }
 0x788   :  { %11944 = vmatprep.subr.msk.bf16.mxu0 %vm13791_vm2, %v11942_v51  ;;  %v14325_v12 = vpop.eup %13133 }
 0x798   :  { %12666 = vrot.lane.b32.xlu0 %v13812_v47, %s13668_s21  ;;  %v1519_v47 = vsel %vm613_vm3, %v14319_v54, 0.0 }
 0x79c   :  { %1691 = vrot.lane.b32.xlu0 %v13802_v35, %s13668_s21  ;;  %v1516_v35 = vsel %vm613_vm3, %v14325_v12, 0.0 }
 0x7a0   :  { %1695 = vrot.lane.b32.xlu0 %v13826_v56, %s13668_s21  ;;  %v12662_v56 = vpop.permute.xlu1 %12661 }
 0x7a1   :  { %v12664_v2 = vunpack.i.h.bf16 %v12662_v56  ;;  %v12663_v28 = vunpack.i.l.bf16 %v12662_v56 }
 0x7a4   :  { %1699 = vrot.lane.b32.xlu0 %v13836_v59, %s13668_s21 }
 0x7a8   :  { %1703 = vrot.lane.b32.xlu0 %v13844_v61, %s13668_s21 }
 0x7ab   :  { %1520 = vadd.xlane.f32.xlu1 %v1519_v47 }
 0x7af   :  { %1517 = vadd.xlane.f32.xlu1 %v1516_v35 }
 0x7c0   :  { %1693 = vrot.lane.b32.xlu1 %v13828_v57, %s13668_s21 }
 0x7c4   :  { %1697 = vrot.lane.b32.xlu1 %v13830_v58, %s13668_s21 }
 0x7c8   :  { %1701 = vrot.lane.b32.xlu1 %v13838_v60, %s13668_s21 }
 0x7cc   :  { %1705 = vrot.lane.b32.xlu1 %v13846_v62, %s13668_s21  ;;  %v11948_v62 = vpack.c.bf16 %v12664_v2, %v12663_v28 }
 0x7fe   :  { %v1503_v59 = vpop.xlane.xlu1 %1502 }
 0x7ff   :  { %13135 = vrcp.f32 %v1503_v59  ;;  %v1500_v61 = vpop.xlane.xlu0 %1499 }
 0x800   :  { %13137 = vrcp.f32 %v1500_v61 }
 0x803   :  { %v1509_v5 = vpop.xlane.xlu1 %1508 }
 0x804   :  { %13139 = vrcp.f32 %v1509_v5 }
 0x807   :  { %v1506_v18 = vpop.xlane.xlu0 %1505  ;;  %v12672_v50 = vpop.permute.xlu1 %12671 }
 0x808   :  { %13141 = vrcp.f32 %v1506_v18  ;;  %v12674_v30 = vunpack.i.h.bf16 %v12672_v50 }
 0x809   :  { %v13136_v7 = vpop.eup %13135 }
 0x80a   :  { %v13138_v57 = vpop.eup %13137  ;;  %v1531_v60 = vmul.f32 %v13136_v7, %v14281_v53 }
 0x80b   :  { %v1515_v58 = vpop.xlane.xlu0 %1514  ;;  %v1530_v37 = vmul.f32 %v13138_v57, %v14283_v0 }
 0x80c   :  { %13143 = vrcp.f32 %v1515_v58 }
 0x80d   :  { %10798 = vmatprep.mubr.msk.f32.mxu0 %vm613_vm3, %v1530_v37 }
 0x80e   :  { %10799 = vmatmul.mubr.msk.f32.vlgmr.msra.gmra.mrb[32].mxu0 %vm613_vm3, %v1531_v60  ;;  %v13140_v6 = vpop.eup %13139 }
 0x80f   :  { %11947 = vmatpush3.bf16.xpose.msk.msra.mxu0 %vm13791_vm2, %v11942_v51  ;;  %v1512_v34 = vpop.xlane.xlu0 %1511  ;;  %v1533_v1 = vmul.f32 %v13140_v6, %v14289_v31 }
 0x810   :  { %13145 = vrcp.f32 %v1512_v34  ;;  %11950 = vmatprep.subr.msk.bf16.mxu0 %vm13791_vm2, %v11948_v62  ;;  %v13567_v34 = vld [vmem:[%s16814_s3 + $0x8] sm:$0xff] }
 0x812   :  { %v13142_v11 = vpop.eup %13141 }
 0x813   :  { %v12667_v42 = vpop.permute.xlu0 %12666  ;;  %v1532_v0 = vmul.f32 %v13142_v11, %v14293_v41  ;;  %v12673_v41 = vunpack.i.l.bf16 %v12672_v50 }
 0x814   :  { %v12669_v53 = vunpack.i.h.bf16 %v12667_v42  ;;  %v12668_v48 = vunpack.i.l.bf16 %v12667_v42  ;;  %v13568_v42 = vld [vmem:[%s16814_s3] sm:$0xff] }
 0x815   :  { %10801 = vmatprep.mubr.msk.f32.mxu0 %vm613_vm3, %v1532_v0  ;;  %v11960_v29 = vpack.c.bf16 %v12674_v30, %v12673_v41 }
 0x816   :  { %v11954_v43 = vpack.c.bf16 %v12669_v53, %v12668_v48  ;;  %10802 = vmatmul.mubr.msk.f32.gmra.mrb[34].mxu0 %vm613_vm3, %v1533_v1  ;;  %v13144_v39 = vpop.eup %13143 }
 0x817   :  { %11953 = vmatpush3.bf16.xpose.msk.msra.mxu0 %vm13791_vm2, %v11948_v62  ;;  %v1535_v31 = vmul.f32 %v13144_v39, %v14297_v38  ;;  %v13569_v39 = vld [vmem:[%s16814_s3 + $0x18] sm:$0xff] }
 0x818   :  { %11956 = vmatprep.subr.msk.bf16.mxu0 %vm13791_vm2, %v11954_v43 }
 0x81a   :  { %v13146_v10 = vpop.eup %13145 }
 0x81b   :  { %v1534_v49 = vmul.f32 %v13146_v10, %v14301_v44  ;;  %v1692_v44 = vpop.permute.xlu0 %1691 }
 0x81d   :  { %10804 = vmatprep.mubr.msk.f32.mxu0 %vm613_vm3, %v1534_v49 }
 0x81e   :  { %10805 = vmatmul.mubr.msk.f32.gmra.mrb[36].mxu0 %vm613_vm3, %v1535_v31 }
 0x81f   :  { %11959 = vmatpush3.bf16.xpose.msk.msra.mxu0 %vm13791_vm2, %v11954_v43  ;;  %v1696_v23 = vpop.permute.xlu0 %1695 }
 0x820   :  { %11962 = vmatprep.subr.msk.bf16.mxu0 %vm13791_vm2, %v11960_v29 }
 0x823   :  { %v1700_v35 = vpop.permute.xlu0 %1699 }
 0x827   :  { %11965 = vmatpush3.bf16.xpose.msk.msra.mxu0 %vm13791_vm2, %v11960_v29 }
 0x838   :  { %v1521_v17 = vpop.xlane.xlu1 %1520 }
 0x839   :  { %13147 = vrcp.f32 %v1521_v17  ;;  %v13570_v17 = vld [vmem:[%s16814_s3 + $0x10] sm:$0xff] }
 0x83c   :  { %v1518_v9 = vpop.xlane.xlu1 %1517 }
 0x83d   :  { %13149 = vrcp.f32 %v1518_v9 }
 0x840   :  { %v1694_v13 = vpop.permute.xlu1 %1693 }
 0x843   :  { %v13148_v38 = vpop.eup %13147 }
 0x844   :  { %v1537_v16 = vmul.f32 %v13148_v38, %v14319_v54  ;;  %v1698_v47 = vpop.permute.xlu1 %1697 }
 0x847   :  { %v13150_v51 = vpop.eup %13149 }
 0x848   :  { %v1536_v24 = vmul.f32 %v13150_v51, %v14325_v12  ;;  %v1702_v56 = vpop.permute.xlu1 %1701  ;;  %v1704_v12 = vpop.permute.xlu0 %1703 }
 0x84a   :  { %10807 = vmatprep.mubr.msk.f32.mxu0 %vm613_vm3, %v1536_v24 }
 0x84b   :  { %10808 = vmatmul.mubr.msk.f32.gmra.mrb[38].mxu0 %vm613_vm3, %v1537_v16 }
 0x84c   :  { %10826 = vmatprep.mubr.msk.f32.mxu0 %vm443_vm1, %v1692_v44  ;;  %v1706_v54 = vpop.permute.xlu1 %1705  ;;  %v13571_v44 = vld [vmem:[%s16814_s3 + $0x28] sm:$0xff] }
 0x84f   :  { %10827 = vmatmul.mubr.msk.f32.vlgmr.msra.gmra.mrb[40].mxu0 %vm443_vm1, %v1694_v13 }
 0x850   :  { %10829 = vmatprep.mubr.msk.f32.mxu0 %vm443_vm1, %v1696_v23 }
 0x853   :  { %10830 = vmatmul.mubr.msk.f32.gmra.mrb[42].mxu0 %vm443_vm1, %v1698_v47 }
 0x854   :  { %10832 = vmatprep.mubr.msk.f32.mxu0 %vm443_vm1, %v1700_v35  ;;  %v13572_v35 = vld [vmem:[%s16814_s3 + $0x20] sm:$0xff] }
 0x857   :  { %10833 = vmatmul.mubr.msk.f32.gmra.mrb[44].mxu0 %vm443_vm1, %v1702_v56 }
 0x858   :  { %10835 = vmatprep.mubr.msk.f32.mxu0 %vm443_vm1, %v1704_v12  ;;  %v13573_v12 = vld [vmem:[%s16814_s3 + $0x38] sm:$0xff] }
 0x85b   :  { %10836 = vmatmul.mubr.msk.f32.gmra.mrb[46].mxu0 %vm443_vm1, %v1706_v54 }
 0x8e1   :  { %v14375_v59 = vpop.f32.mrb[32].mxu0 }
 0x8e2   :  { %v14377_v61 = vpop.f32.mrb[33].mxu0 }
 0x8e9   :  { %v14379_v5 = vpop.f32.mrb[34].mxu0 }
 0x8ea   :  { %v14381_v18 = vpop.f32.mrb[35].mxu0 }
 0x8f1   :  { %v14383_v7 = vpop.f32.mrb[36].mxu0 }
 0x8f2   :  { %v14385_v57 = vpop.f32.mrb[37].mxu0 }
 0x91e   :  { %v14387_v2 = vpop.f32.mrb[38].mxu0 }
 0x91f   :  { %v14389_v28 = vpop.f32.mrb[39].mxu0 }
 0x922   :  { %v10828_v58 = vpop.f32.mrb[40].mxu0 }
 0x923   :  { %v1861_v37 = vmul.f32 0.35355338, %v10828_v58  ;;  %v1821_v60 = vpop.f32.mrb[41].mxu0 }
 0x924   :  { %v1860_v62 = vmul.f32 0.35355338, %v1821_v60 }
 0x925   :  { %v1869_v6 = vadd.f32 %v13567_v34, %v1861_v37  ;;  %v13574_v37 = vld [vmem:[%s16814_s3 + $0x30] sm:$0xff] }
 0x926   :  { %v10831_v11 = vpop.f32.mrb[42].mxu0  ;;  %v1868_v0 = vadd.f32 %v13568_v42, %v1860_v62 }
 0x927   :  { %v1863_v53 = vmul.f32 0.35355338, %v10831_v11  ;;  %v1831_v48 = vpop.f32.mrb[43].mxu0  ;;  %v1879_v1 = vsel %vm613_vm3, %v1869_v6, -inf }
 0x928   :  { %v1862_v43 = vmul.f32 0.35355338, %v1831_v48  ;;  %1880 = vmax.xlane.f32.xlu1 %v1879_v1  ;;  %v1876_v50 = vsel %vm613_vm3, %v1868_v0, -inf }
 0x929   :  { %1877 = vmax.xlane.f32.xlu0 %v1876_v50  ;;  %v1871_v10 = vadd.f32 %v13569_v39, %v1863_v53 }
 0x92a   :  { %v10834_v30 = vpop.f32.mrb[44].mxu0  ;;  %v1870_v9 = vadd.f32 %v13570_v17, %v1862_v43 }
 0x92b   :  { %v1865_v41 = vmul.f32 0.35355338, %v10834_v30  ;;  %v1841_v49 = vpop.f32.mrb[45].mxu0  ;;  %v1885_v31 = vsel %vm613_vm3, %v1871_v10, -inf }
 0x92c   :  { %v1864_v29 = vmul.f32 0.35355338, %v1841_v49  ;;  %v1882_v47 = vsel %vm613_vm3, %v1870_v9, -inf }
 0x92d   :  { %1886 = vmax.xlane.f32.xlu0 %v1885_v31  ;;  %v1873_v38 = vadd.f32 %v13571_v44, %v1865_v41 }
 0x92e   :  { %v10837_v51 = vpop.f32.mrb[46].mxu0  ;;  %v1872_v56 = vadd.f32 %v13572_v35, %v1864_v29 }
 0x92f   :  { %v1867_v13 = vmul.f32 0.35355338, %v10837_v51  ;;  %v1851_v24 = vpop.f32.mrb[47].mxu0  ;;  %v1891_v16 = vsel %vm613_vm3, %v1873_v38, -inf }
 0x930   :  { %v1866_v23 = vmul.f32 0.35355338, %v1851_v24  ;;  %1892 = vmax.xlane.f32.xlu1 %v1891_v16  ;;  %v1888_v62 = vsel %vm613_vm3, %v1872_v56, -inf }
 0x931   :  { %v14417_v54 = vadd.f32 %v13573_v12, %v1867_v13  ;;  %1883 = vmax.xlane.f32.xlu0 %v1882_v47 }
 0x932   :  { %v14424_v60 = vadd.f32 %v13574_v37, %v1866_v23 }
 0x933   :  { %v1897_v58 = vsel %vm613_vm3, %v14417_v54, -inf }
 0x934   :  { %1898 = vmax.xlane.f32.xlu1 %v1897_v58  ;;  %v1894_v34 = vsel %vm613_vm3, %v14424_v60, -inf }
 0x935   :  { %1889 = vmax.xlane.f32.xlu0 %v1888_v62 }
 0x939   :  { %1895 = vmax.xlane.f32.xlu0 %v1894_v34 }
 0x945   :  { %12681 = vrot.lane.b32.xlu1 %v14111_v45, %s13668_s21 }
 0x94f   :  { %12676 = vrot.lane.b32.xlu0 %v14129_v14, %s13668_s21 }
 0x9b5   :  { %v1881_v11 = vpop.xlane.xlu1 %1880 }
 0x9b6   :  { %v1901_v42 = vsub.f32 %v1869_v6, %v1881_v11  ;;  %v1878_v53 = vpop.xlane.xlu0 %1877 }
 0x9b7   :  { %v1900_v48 = vsub.f32 %v1868_v0, %v1878_v53 }
 0x9b8   :  { %v1910_v1 = vmul.f32 1.442695, %v1901_v42 }
 0x9b9   :  { %v1908_v43 = vmul.f32 1.442695, %v1900_v48 }
 0x9ba   :  { %13151 = vpow2.f32 %v1910_v1  ;;  %v1887_v50 = vpop.xlane.xlu0 %1886 }
 0x9bb   :  { %13153 = vpow2.f32 %v1908_v43  ;;  %v1903_v39 = vsub.f32 %v1871_v10, %v1887_v50 }
 0x9bd   :  { %v1914_v30 = vmul.f32 1.442695, %v1903_v39  ;;  %v1893_v41 = vpop.xlane.xlu1 %1892 }
 0x9be   :  { %v1905_v49 = vsub.f32 %v1873_v38, %v1893_v41  ;;  %v1884_v31 = vpop.xlane.xlu0 %1883 }
 0x9bf   :  { %13155 = vpow2.f32 %v1914_v30  ;;  %v1902_v29 = vsub.f32 %v1870_v9, %v1884_v31 }
 0x9c0   :  { %v1918_v45 = vmul.f32 1.442695, %v1905_v49 }
 0x9c1   :  { %v1912_v17 = vmul.f32 1.442695, %v1902_v29  ;;  %v1899_v44 = vpop.xlane.xlu1 %1898 }
 0x9c2   :  { %v1890_v14 = vpop.xlane.xlu0 %1889  ;;  %v1907_v43 = vsub.f32 %v14417_v54, %v1899_v44 }
 0x9c3   :  { %13157 = vpow2.f32 %v1912_v17  ;;  %v1904_v6 = vsub.f32 %v1872_v56, %v1890_v14 }
 0x9c4   :  { %v14433_v51 = vpop.eup %13151  ;;  %13159 = vpow2.f32 %v1918_v45  ;;  %v1922_v39 = vmul.f32 1.442695, %v1907_v43 }
 0x9c5   :  { %v14435_v0 = vpop.eup %13153  ;;  %v1916_v13 = vmul.f32 1.442695, %v1904_v6  ;;  %v1927_v10 = vsel %vm613_vm3, %v14433_v51, 0.0  ;;  %v12682_v24 = vpop.permute.xlu1 %12681 }
 0x9c6   :  { %1928 = vadd.xlane.f32.xlu1 %v1927_v10  ;;  %v1896_v38 = vpop.xlane.xlu0 %1895  ;;  %v1924_v9 = vsel %vm613_vm3, %v14435_v0, 0.0  ;;  %v12684_v35 = vunpack.i.h.bf16 %v12682_v24  ;;  %v12683_v56 = vunpack.i.l.bf16 %v12682_v24 }
 0x9c7   :  { %13161 = vpow2.f32 %v1916_v13  ;;  %1925 = vadd.xlane.f32.xlu0 %v1924_v9  ;;  %v1906_v50 = vsub.f32 %v14424_v60, %v1896_v38 }
 0x9c8   :  { %v11970_v42 = vpack.c.bf16 %v12684_v35, %v12683_v56  ;;  %13163 = vpow2.f32 %v1922_v39 }
 0x9c9   :  { %v14441_v16 = vpop.eup %13155  ;;  %v1920_v30 = vmul.f32 1.442695, %v1906_v50 }
 0x9ca   :  { %v12677_v23 = vpop.permute.xlu0 %12676  ;;  %v1933_v47 = vsel %vm613_vm3, %v14441_v16, 0.0 }
 0x9cb   :  { %v12679_v12 = vunpack.i.h.bf16 %v12677_v23  ;;  %v12678_v58 = vunpack.i.l.bf16 %v12677_v23  ;;  %1934 = vadd.xlane.f32.xlu1 %v1933_v47  ;;  %13165 = vpow2.f32 %v1920_v30  ;;  %v2380_v30 = vld [vmem:[#allocation2 + $0xa0] sm:$0xff] }
 0x9cd   :  { %v14445_v37 = vpop.eup %13157  ;;  %v11966_v62 = vpack.c.bf16 %v12679_v12, %v12678_v58  ;;  %v74_v58 = vld [vmem:[#allocation2 + $0x60] sm:$0xff] }
 0x9ce   :  { %v1930_v34 = vsel %vm613_vm3, %v14445_v37, 0.0  ;;  %v14449_v11 = vpop.eup %13159 }
 0x9cf   :  { %1931 = vadd.xlane.f32.xlu0 %v1930_v34  ;;  %11967 = vmatprep.subr.bf16.mxu1 %v11966_v62  ;;  %v1939_v1 = vsel %vm613_vm3, %v14449_v11, 0.0 }
 0x9d0   :  { %11969 = vmatpush3.bf16.msra.mxu1 %v11966_v62  ;;  %v76_v62 = vld [vmem:[#allocation2 + $0x70] sm:$0xff] }
 0x9d1   :  { %v14451_v53 = vpop.eup %13161  ;;  %11971 = vmatprep.subr.bf16.mxu1 %v11970_v42 }
 0x9d2   :  { %v1936_v48 = vsel %vm613_vm3, %v14451_v53, 0.0  ;;  %v14463_v41 = vpop.eup %13163 }
 0x9d3   :  { %1937 = vadd.xlane.f32.xlu1 %v1936_v48  ;;  %1940 = vadd.xlane.f32.xlu0 %v1939_v1  ;;  %v1945_v31 = vsel %vm613_vm3, %v14463_v41, 0.0 }
 0x9d4   :  { %11973 = vmatpush3.bf16.msra.mxu1 %v11970_v42 }
 0x9d5   :  { %v14465_v49 = vpop.eup %13165 }
 0x9e4   :  { %12691 = vrot.lane.b32.xlu1 %v14123_v32, %s13668_s21  ;;  %v1942_v32 = vsel %vm613_vm3, %v14465_v49, 0.0 }
 0x9e9   :  { %12686 = vrot.lane.b32.xlu0 %v14117_v46, %s13668_s21 }
 0xa08   :  { %1946 = vadd.xlane.f32.xlu0 %v1945_v31  ;;  %1943 = vadd.xlane.f32.xlu1 %v1942_v32 }
 0xa19   :  { %2127 = vrot.lane.b32.xlu1 %v14231_v40, %s13665_s29 }
 0xa1d   :  { %2157 = vrot.lane.b32.xlu1 %v14377_v61, %s13669_s13 }
 0xa1e   :  { %2125 = vrot.lane.b32.xlu0 %v14233_v22, %s13665_s29 }
 0xa21   :  { %2159 = vrot.lane.b32.xlu1 %v14375_v59, %s13669_s13 }
 0xa22   :  { %2129 = vrot.lane.b32.xlu0 %v14237_v19, %s13665_s29 }
 0xa25   :  { %2131 = vrot.lane.b32.xlu1 %v14235_v26, %s13665_s29 }
 0xa26   :  { %2161 = vrot.lane.b32.xlu0 %v14381_v18, %s13669_s13 }
 0xa29   :  { %2163 = vrot.lane.b32.xlu1 %v14379_v5, %s13669_s13 }
 0xa2a   :  { %2133 = vrot.lane.b32.xlu0 %v14241_v52, %s13665_s29 }
 0xa2d   :  { %2135 = vrot.lane.b32.xlu1 %v14239_v27, %s13665_s29 }
 0xa53   :  { %v1929_v40 = vpop.xlane.xlu1 %1928 }
 0xa54   :  { %v1926_v46 = vpop.xlane.xlu0 %1925 }
 0xa55   :  { %13167 = vrcp.f32 %v1926_v46 }
 0xa56   :  { %13169 = vrcp.f32 %v1929_v40 }
 0xa58   :  { %v1935_v22 = vpop.xlane.xlu1 %1934 }
 0xa5c   :  { %v1932_v19 = vpop.xlane.xlu0 %1931 }
 0xa5d   :  { %13171 = vrcp.f32 %v1932_v19 }
 0xa5e   :  { %13173 = vrcp.f32 %v1935_v22 }
 0xa5f   :  { %v13168_v59 = vpop.eup %13167 }
 0xa60   :  { %v1938_v61 = vpop.xlane.xlu1 %1937  ;;  %v1941_v26 = vpop.xlane.xlu0 %1940  ;;  %v1956_v54 = vmul.f32 %v13168_v59, %v14435_v0 }
 0xa61   :  { %13175 = vrcp.f32 %v1938_v61  ;;  %v13170_v44 = vpop.eup %13169 }
 0xa62   :  { %10854 = vmatprep.mubr.msk.f32.mxu1 %vm613_vm3, %v1956_v54  ;;  %13177 = vrcp.f32 %v1941_v26  ;;  %v1957_v6 = vmul.f32 %v13170_v44, %v14433_v51 }
 0xa64   :  { %v12692_v5 = vpop.permute.xlu1 %12691  ;;  %v12687_v18 = vpop.permute.xlu0 %12686 }
 0xa65   :  { %v12694_v52 = vunpack.i.h.bf16 %v12692_v5  ;;  %v12693_v60 = vunpack.i.l.bf16 %v12692_v5  ;;  %v12689_v29 = vunpack.i.h.bf16 %v12687_v18  ;;  %v12688_v27 = vunpack.i.l.bf16 %v12687_v18 }
 0xa67   :  { %v11974_v45 = vpack.c.bf16 %v12689_v29, %v12688_v27  ;;  %v11978_v17 = vpack.c.bf16 %v12694_v52, %v12693_v60  ;;  %v13172_v14 = vpop.eup %13171 }
 0xa68   :  { %v13174_v0 = vpop.eup %13173  ;;  %v1958_v13 = vmul.f32 %v13172_v14, %v14445_v37  ;;  %v75_v37 = vld [vmem:[#allocation2 + $0x68] sm:$0xff] }
 0xa69   :  { %11975 = vmatprep.subr.bf16.mxu1 %v11974_v45  ;;  %v1959_v38 = vmul.f32 %v13174_v0, %v14441_v16  ;;  %v11982_v34 = vpack.c.bf16 %v75_v37, %v74_v58 }
 0xa6a   :  { %11977 = vmatpush3.bf16.msra.mxu1 %v11974_v45 }
 0xa6b   :  { %11979 = vmatprep.subr.bf16.mxu1 %v11978_v17  ;;  %v13176_v10 = vpop.eup %13175 }
 0xa6c   :  { %v13178_v9 = vpop.eup %13177  ;;  %v1960_v24 = vmul.f32 %v13176_v10, %v14451_v53 }
 0xa6d   :  { %v1961_v23 = vmul.f32 %v13178_v9, %v14449_v11  ;;  %v77_v11 = vld [vmem:[#allocation2 + $0x78] sm:$0xff] }
 0xa6e   :  { %11981 = vmatpush3.bf16.msra.mxu1 %v11978_v17  ;;  %v11986_v42 = vpack.c.bf16 %v77_v11, %v76_v62 }
 0xa6f   :  { %11983 = vmatprep.subr.bf16.mxu1 %v11982_v34 }
 0xa71   :  { %10855 = vmatmul.mubr.msk.f32.vlgmr.msra.gmra.mrb[32].mxu1 %vm613_vm3, %v1957_v6 }
 0xa72   :  { %10857 = vmatprep.mubr.msk.f32.mxu1 %vm613_vm3, %v1958_v13  ;;  %11985 = vmatpush3.bf16.msra.mxu1 %v11982_v34 }
 0xa73   :  { %11987 = vmatprep.subr.bf16.mxu1 %v11986_v42 }
 0xa75   :  { %10858 = vmatmul.mubr.msk.f32.gmra.mrb[34].mxu1 %vm613_vm3, %v1959_v38 }
 0xa76   :  { %10860 = vmatprep.mubr.msk.f32.mxu1 %vm613_vm3, %v1960_v24  ;;  %11989 = vmatpush3.bf16.msra.mxu1 %v11986_v42 }
 0xa79   :  { %10861 = vmatmul.mubr.msk.f32.gmra.mrb[36].mxu1 %vm613_vm3, %v1961_v23 }
 0xa95   :  { %v1944_v51 = vpop.xlane.xlu1 %1943  ;;  %v1947_v47 = vpop.xlane.xlu0 %1946 }
 0xa96   :  { %13179 = vrcp.f32 %v1944_v51 }
 0xa97   :  { %13181 = vrcp.f32 %v1947_v47 }
 0xa99   :  { %v2128_v32 = vpop.permute.xlu1 %2127  ;;  %v2126_v40 = vpop.permute.xlu0 %2125 }
 0xa9a   :  { %v2213_v54 = vsel %vm443_vm1, %v14073_v4, %v2126_v40  ;;  %v2214_v18 = vsel %vm443_vm1, %v14071_v55, %v2128_v32 }
 0xa9d   :  { %v2130_v22 = vpop.permute.xlu0 %2129 }
 0xa9e   :  { %v2215_v4 = vsel %vm443_vm1, %v14077_v20, %v2130_v22 }
 0xaa0   :  { %v13180_v35 = vpop.eup %13179 }
 0xaa1   :  { %v13182_v56 = vpop.eup %13181  ;;  %v1962_v12 = vmul.f32 %v13180_v35, %v14465_v49  ;;  %v2381_v49 = vld [vmem:[#allocation2 + $0xa8] sm:$0xff]  ;;  %v2162_v59 = vpop.permute.xlu0 %2161 }
 0xaa2   :  { %v1963_v16 = vmul.f32 %v13182_v56, %v14463_v41  ;;  %v11998_v31 = vpack.c.bf16 %v2381_v49, %v2380_v30  ;;  %v2224_v14 = vsel %vm2221_vm4, %v2215_v4, %v2162_v59  ;;  %v9461_v30 = vld [vmem:[%s16813_s2 + $0x3] ss:$0 sm:$0xff]  ;;  %v2387_v49 = vld [vmem:[#allocation2 + $0xd0] sm:$0xff] }
 0xaa3   :  { %10863 = vmatprep.mubr.msk.f32.mxu1 %vm613_vm3, %v1962_v12 }
 0xaa4   :  { %10864 = vmatmul.mubr.msk.f32.gmra.mrb[38].mxu1 %vm613_vm3, %v1963_v16  ;;  %11999 = vmatprep.subr.bf16.mxu1 %v11998_v31 }
 0xaa5   :  { %v2134_v26 = vpop.permute.xlu0 %2133 }
 0xaa6   :  { %v2217_v20 = vsel %vm443_vm1, %v14081_v8, %v2134_v26 }
 0xb44   :  { %v10856_v53 = vpop.f32.mrb[32].mxu1 }
 0xb45   :  { %2191 = vrot.lane.b32.xlu1 %v10856_v53, %s13670_s14  ;;  %v2078_v48 = vpop.f32.mrb[33].mxu1 }
 0xb46   :  { %2189 = vrot.lane.b32.xlu0 %v2078_v48, %s13670_s14  ;;  %v2377_v48 = vld [vmem:[#allocation2 + $0x90] sm:$0xff] }
 0xb48   :  { %v10859_v1 = vpop.f32.mrb[34].mxu1 }
 0xb49   :  { %2167 = vrot.lane.b32.xlu1 %v14383_v7, %s13669_s13  ;;  %v2088_v43 = vpop.f32.mrb[35].mxu1  ;;  %v2375_v7 = vld [vmem:[#allocation2 + $0x80] sm:$0xff] }
 0xb4a   :  { %2165 = vrot.lane.b32.xlu0 %v14385_v57, %s13669_s13  ;;  %v2376_v57 = vld [vmem:[#allocation2 + $0x88] sm:$0xff] }
 0xb4b   :  { %v11990_v41 = vpack.c.bf16 %v2376_v57, %v2375_v7  ;;  %v2386_v7 = vld [vmem:[#allocation2 + $0xc8] sm:$0xff] }
 0xb4c   :  { %v10862_v50 = vpop.f32.mrb[36].mxu1 }
 0xb4d   :  { %2195 = vrot.lane.b32.xlu1 %v10859_v1, %s13670_s14  ;;  %v2098_v39 = vpop.f32.mrb[37].mxu1  ;;  %11991 = vmatprep.subr.bf16.mxu0 %v11990_v41  ;;  %v2378_v1 = vld [vmem:[#allocation2 + $0x98] sm:$0xff] }
 0xb4e   :  { %2193 = vrot.lane.b32.xlu0 %v2088_v43, %s13670_s14  ;;  %11993 = vmatpush3.bf16.msra.mxu0 %v11990_v41  ;;  %v11994_v43 = vpack.c.bf16 %v2378_v1, %v2377_v48 }
 0xb50   :  { %11995 = vmatprep.subr.bf16.mxu0 %v11994_v43 }
 0xb51   :  { %2139 = vrot.lane.b32.xlu1 %v14243_v15, %s13665_s29 }
 0xb52   :  { %2137 = vrot.lane.b32.xlu0 %v14245_v21, %s13665_s29  ;;  %11997 = vmatpush3.bf16.msra.mxu0 %v11994_v43 }
 0xb55   :  { %2199 = vrot.lane.b32.xlu1 %v10862_v50, %s13670_s14  ;;  %v2383_v50 = vld [vmem:[#allocation2 + $0xb8] sm:$0xff] }
 0xb56   :  { %2197 = vrot.lane.b32.xlu0 %v2098_v39, %s13670_s14 }
 0xb59   :  { %2171 = vrot.lane.b32.xlu1 %v14387_v2, %s13669_s13  ;;  %v2158_v2 = vpop.permute.xlu1 %2157 }
 0xb5a   :  { %2169 = vrot.lane.b32.xlu0 %v14389_v28, %s13669_s13  ;;  %v2222_v52 = vsel %vm2221_vm4, %v2213_v54, %v2158_v2 }
 0xb5d   :  { %v2160_v46 = vpop.permute.xlu1 %2159 }
 0xb5e   :  { %v2223_v29 = vsel %vm2221_vm4, %v2214_v18, %v2160_v46 }
 0xb61   :  { %v2132_v28 = vpop.permute.xlu1 %2131 }
 0xb62   :  { %v2216_v6 = vsel %vm443_vm1, %v14075_v63, %v2132_v28 }
 0xb65   :  { %v2164_v19 = vpop.permute.xlu1 %2163 }
 0xb66   :  { %v2225_v13 = vsel %vm2221_vm4, %v2216_v6, %v2164_v19 }
 0xb69   :  { %v2136_v61 = vpop.permute.xlu1 %2135 }
 0xb6a   :  { %v2218_v63 = vsel %vm443_vm1, %v14079_v36, %v2136_v61 }
 0xb77   :  { %v10865_v15 = vpop.f32.mrb[38].mxu1 }
 0xb78   :  { %2203 = vrot.lane.b32.xlu1 %v10865_v15, %s13670_s14  ;;  %v2108_v21 = vpop.f32.mrb[39].mxu1 }
 0xb79   :  { %2201 = vrot.lane.b32.xlu0 %v2108_v21, %s13670_s14 }
 0xbb7   :  { %v2192_v5 = vpop.permute.xlu1 %2191 }
 0xbb8   :  { %v2190_v60 = vpop.permute.xlu0 %2189  ;;  %v2232_v45 = vsel %vm2230_vm5, %v2223_v29, %v2192_v5  ;;  %v14600_v29 = vld [vmem:[%s16813_s2 + $0x4] ss:$0 sm:$0xff] }
 0xbb9   :  { %v2231_v27 = vsel %vm2230_vm5, %v2222_v52, %v2190_v60  ;;  %v9483_v60 = vld [vmem:[%s16813_s2 + $0x5] ss:$0 sm:$0xff] }
 0xbba   :  { %10874 = vmatprep.mubr.msk.f32.mxu1 %vm91_vm0, %v2231_v27 }
 0xbbb   :  { %v2168_v17 = vpop.permute.xlu1 %2167  ;;  %10875 = vmatmul.mubr.msk.f32.vlgmr.msra.gmra.mrb[40].mxu1 %vm91_vm0, %v2232_v45 }
 0xbbc   :  { %v2166_v44 = vpop.permute.xlu0 %2165  ;;  %12001 = vmatpush3.bf16.msra.mxu1 %v11998_v31  ;;  %v2227_v35 = vsel %vm2221_vm4, %v2218_v63, %v2168_v17  ;;  %v2388_v31 = vld [vmem:[#allocation2 + $0xd8] sm:$0xff] }
 0xbbd   :  { %v2226_v51 = vsel %vm2221_vm4, %v2217_v20, %v2166_v44  ;;  %v12010_v2 = vpack.c.bf16 %v2388_v31, %v2387_v49 }
 0xbbf   :  { %v2196_v55 = vpop.permute.xlu1 %2195 }
 0xbc0   :  { %v2194_v0 = vpop.permute.xlu0 %2193  ;;  %v2234_v38 = vsel %vm2230_vm5, %v2225_v13, %v2196_v55 }
 0xbc1   :  { %v2233_v10 = vsel %vm2230_vm5, %v2224_v14, %v2194_v0 }
 0xbc2   :  { %10877 = vmatprep.mubr.msk.f32.mxu1 %vm91_vm0, %v2233_v10 }
 0xbc3   :  { %v2140_v9 = vpop.permute.xlu1 %2139  ;;  %10878 = vmatmul.mubr.msk.f32.gmra.mrb[42].mxu1 %vm91_vm0, %v2234_v38 }
 0xbc4   :  { %v2138_v24 = vpop.permute.xlu0 %2137  ;;  %v2220_v36 = vsel %vm443_vm1, %v14083_v33, %v2140_v9  ;;  %v2385_v33 = vld [vmem:[#allocation2 + $0xc0] sm:$0xff] }
 0xbc5   :  { %v2219_v8 = vsel %vm443_vm1, %v14085_v3, %v2138_v24  ;;  %v2382_v3 = vld [vmem:[#allocation2 + $0xb0] sm:$0xff]  ;;  %v12006_v57 = vpack.c.bf16 %v2386_v7, %v2385_v33 }
 0xbc6   :  { %v12002_v39 = vpack.c.bf16 %v2383_v50, %v2382_v3  ;;  %v9492_v50 = vld [vmem:[%s16813_s2 + $0x6] ss:$0 sm:$0xff] }
 0xbc7   :  { %v2200_v23 = vpop.permute.xlu1 %2199  ;;  %12007 = vmatprep.subr.bf16.mxu0 %v12006_v57 }
 0xbc8   :  { %v2198_v47 = vpop.permute.xlu0 %2197  ;;  %v2236_v12 = vsel %vm2230_vm5, %v2227_v35, %v2200_v23  ;;  %12003 = vmatprep.subr.bf16.mxu1 %v12002_v39 }
 0xbc9   :  { %v2235_v56 = vsel %vm2230_vm5, %v2226_v51, %v2198_v47  ;;  %12005 = vmatpush3.bf16.msra.mxu1 %v12002_v39 }
 0xbca   :  { %10880 = vmatprep.mubr.msk.f32.mxu1 %vm91_vm0, %v2235_v56 }
 0xbcb   :  { %10881 = vmatmul.mubr.msk.f32.gmra.mrb[44].mxu1 %vm91_vm0, %v2236_v12  ;;  %v2172_v16 = vpop.permute.xlu1 %2171 }
 0xbcc   :  { %v2170_v58 = vpop.permute.xlu0 %2169  ;;  %v2229_v11 = vsel %vm2221_vm4, %v2220_v36, %v2172_v16 }
 0xbcd   :  { %v2228_v62 = vsel %vm2221_vm4, %v2219_v8, %v2170_v58 }
 0xbea   :  { %v2204_v37 = vpop.permute.xlu1 %2203 }
 0xbeb   :  { %v2202_v34 = vpop.permute.xlu0 %2201  ;;  %v2238_v53 = vsel %vm2230_vm5, %v2229_v11, %v2204_v37 }
 0xbec   :  { %v2237_v42 = vsel %vm2230_vm5, %v2228_v62, %v2202_v34 }
 0xbed   :  { %10883 = vmatprep.mubr.msk.f32.mxu1 %vm91_vm0, %v2237_v42 }
 0xbee   :  { %10884 = vmatmul.mubr.msk.f32.gmra.mrb[46].mxu1 %vm91_vm0, %v2238_v53 }
 0xc8e   :  { %v10876_v41 = vpop.f32.mrb[40].mxu1 }
 0xc8f   :  { %v2335_v15 = vpop.f32.mrb[41].mxu1  ;;  %v2341_v32 = vadd.f32 %v10876_v41, %v9461_v30 }
 0xc90   :  { %v2336_v21 = vadd.f32 %v9461_v30, %v2335_v15 }
 0xc92   :  { %10894 = vmatprep.mubr.msk.f32.mxu0 %vm91_vm0, %v2336_v21  ;;  %10914 = vmatprep.mubr.msk.f32.mxu1 %vm91_vm0, %v2336_v21 }
 0xc93   :  { %10895 = vmatmul.mubr.msk.f32.vlgmr.msra.gmra.mrb[48].mxu0 %vm91_vm0, %v2341_v32  ;;  %10915 = vmatmul.mubr.msk.f32.vlgmr.msra.gmra.mrb[48].mxu1 %vm91_vm0, %v2341_v32 }
 0xc94   :  { %12009 = vmatpush3.bf16.msra.mxu0 %v12006_v57 }
 0xc95   :  { %12011 = vmatprep.subr.bf16.mxu0 %v12010_v2 }
 0xc96   :  { %v10879_v46 = vpop.f32.mrb[42].mxu1 }
 0xc97   :  { %v2345_v40 = vpop.f32.mrb[43].mxu1  ;;  %v2351_v22 = vadd.f32 %v10879_v46, %v9461_v30 }
 0xc98   :  { %v2346_v28 = vadd.f32 %v9461_v30, %v2345_v40  ;;  %12013 = vmatpush3.bf16.msra.mxu0 %v12010_v2 }
 0xc9a   :  { %10897 = vmatprep.mubr.msk.f32.mxu0 %vm91_vm0, %v2346_v28  ;;  %10917 = vmatprep.mubr.msk.f32.mxu1 %vm91_vm0, %v2346_v28 }
 0xc9b   :  { %10898 = vmatmul.mubr.msk.f32.gmra.mrb[50].mxu0 %vm91_vm0, %v2351_v22  ;;  %10918 = vmatmul.mubr.msk.f32.gmra.mrb[50].mxu1 %vm91_vm0, %v2351_v22 }
 0xc9e   :  { %v10882_v19 = vpop.f32.mrb[44].mxu1 }
 0xc9f   :  { %v2355_v59 = vpop.f32.mrb[45].mxu1  ;;  %v2361_v26 = vadd.f32 %v10882_v19, %v9461_v30 }
 0xca0   :  { %v2356_v61 = vadd.f32 %v9461_v30, %v2355_v59 }
 0xca2   :  { %10900 = vmatprep.mubr.msk.f32.mxu0 %vm91_vm0, %v2356_v61  ;;  %10920 = vmatprep.mubr.msk.f32.mxu1 %vm91_vm0, %v2356_v61 }
 0xca3   :  { %10901 = vmatmul.mubr.msk.f32.gmra.mrb[52].mxu0 %vm91_vm0, %v2361_v26  ;;  %10921 = vmatmul.mubr.msk.f32.gmra.mrb[52].mxu1 %vm91_vm0, %v2361_v26 }
 0xcc1   :  { %v10885_v54 = vpop.f32.mrb[46].mxu1 }
 0xcc2   :  { %v2365_v5 = vpop.f32.mrb[47].mxu1  ;;  %v2371_v52 = vadd.f32 %v10885_v54, %v9461_v30 }
 0xcc3   :  { %v2366_v18 = vadd.f32 %v9461_v30, %v2365_v5 }
 0xcc5   :  { %10903 = vmatprep.mubr.msk.f32.mxu0 %vm91_vm0, %v2366_v18  ;;  %10923 = vmatprep.mubr.msk.f32.mxu1 %vm91_vm0, %v2366_v18 }
 0xcc6   :  { %10904 = vmatmul.mubr.msk.f32.gmra.mrb[54].mxu0 %vm91_vm0, %v2371_v52  ;;  %10924 = vmatmul.mubr.msk.f32.gmra.mrb[54].mxu1 %vm91_vm0, %v2371_v52 }
 0xcc7   :  { %10934 = vmatprep.mubr.msk.f32.mxu0 %vm91_vm0, %v2336_v21 }
 0xcca   :  { %10935 = vmatmul.mubr.msk.f32.vlgmr.msra.gmra.mrb[56].mxu0 %vm91_vm0, %v2341_v32 }
 0xccb   :  { %10937 = vmatprep.mubr.msk.f32.mxu0 %vm91_vm0, %v2346_v28 }
 0xcce   :  { %10938 = vmatmul.mubr.msk.f32.gmra.mrb[58].mxu0 %vm91_vm0, %v2351_v22 }
 0xccf   :  { %10940 = vmatprep.mubr.msk.f32.mxu0 %vm91_vm0, %v2356_v61 }
 0xcd2   :  { %10941 = vmatmul.mubr.msk.f32.gmra.mrb[60].mxu0 %vm91_vm0, %v2361_v26 }
 0xcd3   :  { %10943 = vmatprep.mubr.msk.f32.mxu0 %vm91_vm0, %v2366_v18 }
 0xcd6   :  { %10944 = vmatmul.mubr.msk.f32.gmra.mrb[62].mxu0 %vm91_vm0, %v2371_v52 }
 0xd66   :  { %v10896_v27 = vpop.f32.mrb[48].mxu0  ;;  %v10916_v45 = vpop.f32.mrb[48].mxu1 }
 0xd67   :  { %v2615_v17 = vadd.f32 %v10916_v45, %v9483_v60  ;;  %v2498_v44 = vpop.f32.mrb[49].mxu0  ;;  %v2609_v4 = vpop.f32.mrb[49].mxu1  ;;  %v14652_v46 = vadd.f32 %v10896_v27, %v14600_v29 }
 0xd68   :  { %v14603_v55 = vadd.f32 %v14600_v29, %v2498_v44  ;;  %v2610_v14 = vadd.f32 %v9483_v60, %v2609_v4 }
 0xd6a   :  { %10962 = vmatprep.mubr.msk.f32.mxu1 %vm443_vm1, %v14603_v55  ;;  %v12014_v6 = vpack.c.bf16 %v2615_v17, %v2610_v14  ;;  %v14607_v0 = vpack.i.bf16 %v2615_v17, %v2610_v14  ;;  %v14680_v17 = vld [vmem:[%s16815_s4 + $0x8] sm:$0xff]  ;;  %v14685_v14 = vld [vmem:[%s16815_s4] sm:$0xff] }
 0xd6c   :  { %12016 = vmatprep.subr.msk.bf16.mxu1 %vm13791_vm2, %v12014_v6 }
 0xd6d   :  { %12019 = vmatpush3.bf16.xpose.msk.msra.mxu1 %vm13791_vm2, %v12014_v6 }
 0xd6e   :  { %v10899_v13 = vpop.f32.mrb[50].mxu0  ;;  %v10919_v10 = vpop.f32.mrb[50].mxu1 }
 0xd6f   :  { %v14614_v38 = vadd.f32 %v10899_v13, %v14600_v29  ;;  %v2625_v9 = vadd.f32 %v10919_v10, %v9483_v60  ;;  %v2508_v24 = vpop.f32.mrb[51].mxu0  ;;  %v2619_v20 = vpop.f32.mrb[51].mxu1 }
 0xd70   :  { %v2620_v23 = vadd.f32 %v9483_v60, %v2619_v20  ;;  %v14657_v19 = vadd.f32 %v14600_v29, %v2508_v24  ;;  %v14692_v24 = vld [vmem:[%s16815_s4 + $0x18] sm:$0xff] }
 0xd72   :  { %v12020_v63 = vpack.c.bf16 %v2625_v9, %v2620_v23  ;;  %v14616_v51 = vpack.i.bf16 %v2625_v9, %v2620_v23 }
 0xd74   :  { %12022 = vmatprep.subr.msk.bf16.mxu1 %vm13791_vm2, %v12020_v63 }
 0xd75   :  { %12025 = vmatpush3.bf16.xpose.msk.msra.mxu1 %vm13791_vm2, %v12020_v63 }
 0xd76   :  { %v10902_v47 = vpop.f32.mrb[52].mxu0  ;;  %v10922_v35 = vpop.f32.mrb[52].mxu1 }
 0xd77   :  { %v14623_v56 = vadd.f32 %v10902_v47, %v14600_v29  ;;  %v2635_v12 = vadd.f32 %v10922_v35, %v9483_v60  ;;  %v2518_v16 = vpop.f32.mrb[53].mxu0  ;;  %v2629_v58 = vpop.f32.mrb[53].mxu1 }
 0xd78   :  { %v14626_v8 = vadd.f32 %v14600_v29, %v2518_v16  ;;  %v2630_v37 = vadd.f32 %v9483_v60, %v2629_v58  ;;  %v14700_v58 = vld [vmem:[%s16815_s4 + $0x10] sm:$0xff] }
 0xd7a   :  { %v12026_v36 = vpack.c.bf16 %v2635_v12, %v2630_v37  ;;  %v14628_v62 = vpack.i.bf16 %v2635_v12, %v2630_v37  ;;  %v14705_v37 = vld [vmem:[%s16815_s4 + $0x28] sm:$0xff] }
 0xd7c   :  { %12028 = vmatprep.subr.msk.bf16.mxu1 %vm13791_vm2, %v12026_v36 }
 0xd7d   :  { %12031 = vmatpush3.bf16.xpose.msk.msra.mxu1 %vm13791_vm2, %v12026_v36 }
 0xd99   :  { %v10905_v34 = vpop.f32.mrb[54].mxu0  ;;  %v10925_v11 = vpop.f32.mrb[54].mxu1 }
 0xd9a   :  { %v14635_v42 = vadd.f32 %v10905_v34, %v14600_v29  ;;  %v2645_v53 = vadd.f32 %v10925_v11, %v9483_v60  ;;  %v2528_v48 = vpop.f32.mrb[55].mxu0  ;;  %v2639_v1 = vpop.f32.mrb[55].mxu1 }
 0xd9b   :  { %v14638_v3 = vadd.f32 %v14600_v29, %v2528_v48  ;;  %v2640_v43 = vadd.f32 %v9483_v60, %v2639_v1 }
 0xd9d   :  { %v10936_v39 = vpop.f32.mrb[56].mxu0  ;;  %v12032_v33 = vpack.c.bf16 %v2645_v53, %v2640_v43  ;;  %v14643_v7 = vpack.i.bf16 %v2645_v53, %v2640_v43 }
 0xd9e   :  { %v2726_v57 = vadd.f32 %v10936_v39, %v9492_v50  ;;  %v2720_v30 = vpop.f32.mrb[57].mxu0  ;;  %v14718_v39 = vld [vmem:[%s16815_s4 + $0x38] sm:$0xff] }
 0xd9f   :  { %v2721_v41 = vadd.f32 %v9492_v50, %v2720_v30  ;;  %12034 = vmatprep.subr.msk.bf16.mxu1 %vm13791_vm2, %v12032_v33 }
 0xda0   :  { %12037 = vmatpush3.bf16.xpose.msk.msra.mxu1 %vm13791_vm2, %v12032_v33 }
 0xda1   :  { %v10939_v49 = vpop.f32.mrb[58].mxu0  ;;  %v12038_v31 = vpack.c.bf16 %v2726_v57, %v2721_v41  ;;  %v14649_v15 = vpack.i.bf16 %v2726_v57, %v2721_v41 }
 0xda2   :  { %v2736_v21 = vadd.f32 %v10939_v49, %v9492_v50  ;;  %v2730_v32 = vpop.f32.mrb[59].mxu0 }
 0xda3   :  { %v2731_v2 = vadd.f32 %v9492_v50, %v2730_v32  ;;  %12039 = vmatprep.subr.bf16.mxu0 %v12038_v31 }
 0xda4   :  { %12041 = vmatpush3.bf16.msra.mxu0 %v12038_v31 }
 0xda5   :  { %v10942_v40 = vpop.f32.mrb[60].mxu0  ;;  %v12042_v28 = vpack.c.bf16 %v2736_v21, %v2731_v2  ;;  %v14654_v22 = vpack.i.bf16 %v2736_v21, %v2731_v2  ;;  %v14727_v2 = vld [vmem:[%s16815_s4 + $0x30] sm:$0xff] }
 0xda6   :  { %v2746_v59 = vadd.f32 %v10942_v40, %v9492_v50  ;;  %v2740_v61 = vpop.f32.mrb[61].mxu0 }
 0xda7   :  { %v2741_v26 = vadd.f32 %v9492_v50, %v2740_v61  ;;  %10963 = vmatmul.mubr.msk.f32.vlgmr.msra.gmra.mrb[56].mxu1 %vm443_vm1, %v14652_v46  ;;  %12043 = vmatprep.subr.bf16.mxu0 %v12042_v28 }
 0xda8   :  { %10965 = vmatprep.mubr.msk.f32.mxu1 %vm443_vm1, %v14657_v19  ;;  %12045 = vmatpush3.bf16.msra.mxu0 %v12042_v28 }
 0xda9   :  { %v10945_v54 = vpop.f32.mrb[62].mxu0  ;;  %v12046_v5 = vpack.c.bf16 %v2746_v59, %v2741_v26  ;;  %v14663_v18 = vpack.i.bf16 %v2746_v59, %v2741_v26 }
 0xdaa   :  { %v2756_v52 = vadd.f32 %v10945_v54, %v9492_v50  ;;  %v2750_v60 = vpop.f32.mrb[63].mxu0 }
 0xdab   :  { %v2751_v27 = vadd.f32 %v9492_v50, %v2750_v60  ;;  %10966 = vmatmul.mubr.msk.f32.gmra.mrb[58].mxu1 %vm443_vm1, %v14614_v38  ;;  %12047 = vmatprep.subr.bf16.mxu0 %v12046_v5  ;;  %v14713_v50 = vld [vmem:[%s16815_s4 + $0x20] sm:$0xff] }
 0xdac   :  { %10968 = vmatprep.mubr.msk.f32.mxu1 %vm443_vm1, %v14626_v8  ;;  %12049 = vmatpush3.bf16.msra.mxu0 %v12046_v5 }
 0xdad   :  { %v12050_v29 = vpack.c.bf16 %v2756_v52, %v2751_v27  ;;  %v14669_v45 = vpack.i.bf16 %v2756_v52, %v2751_v27 }
 0xdaf   :  { %10969 = vmatmul.mubr.msk.f32.gmra.mrb[60].mxu1 %vm443_vm1, %v14623_v56  ;;  %12051 = vmatprep.subr.bf16.mxu0 %v12050_v29 }
 0xdb0   :  { %10971 = vmatprep.mubr.msk.f32.mxu1 %vm443_vm1, %v14638_v3  ;;  %12053 = vmatpush3.bf16.msra.mxu0 %v12050_v29 }
 0xdb3   :  { %10972 = vmatmul.mubr.msk.f32.gmra.mrb[62].mxu1 %vm443_vm1, %v14635_v42 }
 0xe7a   :  { %v10964_v44 = vpop.f32.mrb[56].mxu1 }
 0xe7b   :  { %v2913_v4 = vmul.f32 0.35355338, %v10964_v44  ;;  %v2873_v6 = vpop.f32.mrb[57].mxu1 }
 0xe7c   :  { %v2912_v13 = vmul.f32 0.35355338, %v2873_v6 }
 0xe7d   :  { %v2921_v10 = vadd.f32 %v2913_v4, %v14680_v17 }
 0xe7e   :  { %v2920_v9 = vadd.f32 %v2912_v13, %v14685_v14  ;;  %v10967_v20 = vpop.f32.mrb[58].mxu1 }
 0xe7f   :  { %v2915_v23 = vmul.f32 0.35355338, %v10967_v20  ;;  %v2883_v63 = vpop.f32.mrb[59].mxu1  ;;  %v2931_v47 = vsel %vm613_vm3, %v2921_v10, -inf }
 0xe80   :  { %v2914_v35 = vmul.f32 0.35355338, %v2883_v63  ;;  %2932 = vmax.xlane.f32.xlu1 %v2931_v47  ;;  %v2928_v12 = vsel %vm613_vm3, %v2920_v9, -inf }
 0xe81   :  { %v2923_v16 = vadd.f32 %v2915_v23, %v14692_v24  ;;  %2929 = vmax.xlane.f32.xlu0 %v2928_v12 }
 0xe82   :  { %v10970_v36 = vpop.f32.mrb[60].mxu1  ;;  %v2922_v48 = vadd.f32 %v2914_v35, %v14700_v58 }
 0xe83   :  { %v2917_v34 = vmul.f32 0.35355338, %v10970_v36  ;;  %v2893_v11 = vpop.f32.mrb[61].mxu1  ;;  %v2937_v53 = vsel %vm613_vm3, %v2923_v16, -inf }
 0xe84   :  { %v2916_v1 = vmul.f32 0.35355338, %v2893_v11  ;;  %v2934_v21 = vsel %vm613_vm3, %v2922_v48, -inf }
 0xe85   :  { %v2925_v43 = vadd.f32 %v2917_v34, %v14705_v37  ;;  %2938 = vmax.xlane.f32.xlu0 %v2937_v53 }
 0xe86   :  { %v10973_v33 = vpop.f32.mrb[62].mxu1  ;;  %v2924_v49 = vadd.f32 %v2916_v1, %v14713_v50 }
 0xe87   :  { %v2919_v57 = vmul.f32 0.35355338, %v10973_v33  ;;  %v2903_v30 = vpop.f32.mrb[63].mxu1  ;;  %v2943_v41 = vsel %vm613_vm3, %v2925_v43, -inf }
 0xe88   :  { %v2918_v31 = vmul.f32 0.35355338, %v2903_v30  ;;  %2944 = vmax.xlane.f32.xlu1 %v2943_v41  ;;  %v2940_v59 = vsel %vm613_vm3, %v2924_v49, -inf }
 0xe89   :  { %v2927_v32 = vadd.f32 %v2919_v57, %v14718_v39  ;;  %2935 = vmax.xlane.f32.xlu0 %v2934_v21 }
 0xe8a   :  { %v2926_v28 = vadd.f32 %v2918_v31, %v14727_v2 }
 0xe8b   :  { %v2949_v40 = vsel %vm613_vm3, %v2927_v32, -inf }
 0xe8c   :  { %2950 = vmax.xlane.f32.xlu1 %v2949_v40  ;;  %v2946_v61 = vsel %vm613_vm3, %v2926_v28, -inf }
 0xe8d   :  { %2941 = vmax.xlane.f32.xlu0 %v2940_v59 }
 0xe91   :  { %2947 = vmax.xlane.f32.xlu0 %v2946_v61 }
 0xf0d   :  { %v2933_v26 = vpop.xlane.xlu1 %2932 }
 0xf0e   :  { %v2953_v54 = vsub.f32 %v2921_v10, %v2933_v26  ;;  %v2930_v5 = vpop.xlane.xlu0 %2929 }
 0xf0f   :  { %v2952_v52 = vsub.f32 %v2920_v9, %v2930_v5 }
 0xf10   :  { %v2962_v60 = vmul.f32 1.442695, %v2953_v54 }
 0xf11   :  { %v2960_v27 = vmul.f32 1.442695, %v2952_v52 }
 0xf12   :  { %13183 = vpow2.f32 %v2962_v60  ;;  %v2939_v13 = vpop.xlane.xlu0 %2938 }
 0xf13   :  { %13185 = vpow2.f32 %v2960_v27  ;;  %v2955_v9 = vsub.f32 %v2923_v16, %v2939_v13 }
 0xf15   :  { %v2945_v20 = vpop.xlane.xlu1 %2944  ;;  %v2966_v47 = vmul.f32 1.442695, %v2955_v9 }
 0xf16   :  { %v2936_v10 = vpop.xlane.xlu0 %2935  ;;  %v2957_v35 = vsub.f32 %v2925_v43, %v2945_v20 }
 0xf17   :  { %v2954_v23 = vsub.f32 %v2922_v48, %v2936_v10  ;;  %13187 = vpow2.f32 %v2966_v47 }
 0xf18   :  { %v2970_v34 = vmul.f32 1.442695, %v2957_v35 }
 0xf19   :  { %v2964_v12 = vmul.f32 1.442695, %v2954_v23  ;;  %v2951_v41 = vpop.xlane.xlu1 %2950 }
 0xf1a   :  { %v2942_v63 = vpop.xlane.xlu0 %2941 }
 0xf1b   :  { %v2956_v36 = vsub.f32 %v2924_v49, %v2942_v63  ;;  %13189 = vpow2.f32 %v2964_v12  ;;  %v2959_v49 = vsub.f32 %v2927_v32, %v2951_v41 }
 0xf1c   :  { %v14733_v29 = vpop.eup %13183  ;;  %13191 = vpow2.f32 %v2970_v34 }
 0xf1d   :  { %v14735_v44 = vpop.eup %13185  ;;  %v2979_v4 = vsel %vm613_vm3, %v14733_v29, 0.0  ;;  %v2968_v11 = vmul.f32 1.442695, %v2956_v36  ;;  %v2974_v21 = vmul.f32 1.442695, %v2959_v49 }
 0xf1e   :  { %2980 = vadd.xlane.f32.xlu1 %v2979_v4  ;;  %v2976_v6 = vsel %vm613_vm3, %v14735_v44, 0.0  ;;  %v2948_v31 = vpop.xlane.xlu0 %2947 }
 0xf1f   :  { %2977 = vadd.xlane.f32.xlu0 %v2976_v6  ;;  %13193 = vpow2.f32 %v2968_v11  ;;  %v2958_v40 = vsub.f32 %v2926_v28, %v2948_v31 }
 0xf20   :  { %13195 = vpow2.f32 %v2974_v21 }
 0xf21   :  { %v14745_v53 = vpop.eup %13187  ;;  %v2972_v59 = vmul.f32 1.442695, %v2958_v40 }
 0xf22   :  { %v2985_v16 = vsel %vm613_vm3, %v14745_v53, 0.0 }
 0xf23   :  { %13197 = vpow2.f32 %v2972_v59 }
 0xf25   :  { %v14747_v1 = vpop.eup %13189 }
 0xf26   :  { %v14751_v33 = vpop.eup %13191  ;;  %v2982_v48 = vsel %vm613_vm3, %v14747_v1, 0.0 }
 0xf27   :  { %v2991_v57 = vsel %vm613_vm3, %v14751_v33, 0.0 }
 0xf29   :  { %v14755_v43 = vpop.eup %13193 }
 0xf2a   :  { %v2988_v30 = vsel %vm613_vm3, %v14755_v43, 0.0  ;;  %v14773_v61 = vpop.eup %13195 }
 0xf2b   :  { %v2997_v32 = vsel %vm613_vm3, %v14773_v61, 0.0 }
 0xf2d   :  { %v14777_v26 = vpop.eup %13197 }
 0xf2e   :  { %v2994_v28 = vsel %vm613_vm3, %v14777_v26, 0.0 }
 0xf2f   :  { %12701 = vrot.lane.b32.xlu1 %v14616_v51, %s13666_s19 }
 0xf35   :  { %12696 = vrot.lane.b32.xlu0 %v14607_v0, %s13666_s19 }
 0xf53   :  { %2986 = vadd.xlane.f32.xlu1 %v2985_v16 }
 0xf54   :  { %2983 = vadd.xlane.f32.xlu0 %v2982_v48 }
 0xf57   :  { %2992 = vadd.xlane.f32.xlu1 %v2991_v57 }
 0xf58   :  { %2989 = vadd.xlane.f32.xlu0 %v2988_v30 }
 0xf68   :  { %12711 = vrot.lane.b32.xlu1 %v14643_v7, %s13666_s19 }
 0xf6e   :  { %12706 = vrot.lane.b32.xlu0 %v14628_v62, %s13666_s19 }
 0xf72   :  { %3145 = vrot.lane.b32.xlu0 %v14603_v55, %s13666_s19 }
 0xf76   :  { %3149 = vrot.lane.b32.xlu0 %v14657_v19, %s13666_s19 }
 0xf7a   :  { %3153 = vrot.lane.b32.xlu0 %v14626_v8, %s13666_s19 }
 0xf7e   :  { %3157 = vrot.lane.b32.xlu0 %v14638_v3, %s13666_s19 }
 0xf8c   :  { %2998 = vadd.xlane.f32.xlu1 %v2997_v32 }
 0xf90   :  { %2995 = vadd.xlane.f32.xlu1 %v2994_v28 }
 0xfa1   :  { %3147 = vrot.lane.b32.xlu1 %v14652_v46, %s13666_s19 }
 0xfa5   :  { %3151 = vrot.lane.b32.xlu1 %v14614_v38, %s13666_s19 }
 0xfa9   :  { %3155 = vrot.lane.b32.xlu1 %v14623_v56, %s13666_s19 }
 0xfab   :  { %v2981_v54 = vpop.xlane.xlu1 %2980 }
 0xfac   :  { %13199 = vrcp.f32 %v2981_v54  ;;  %v2978_v5 = vpop.xlane.xlu0 %2977 }
 0xfad   :  { %13201 = vrcp.f32 %v2978_v5  ;;  %3159 = vrot.lane.b32.xlu1 %v14635_v42, %s13666_s19 }
 0xfaf   :  { %v12702_v6 = vpop.permute.xlu1 %12701 }
 0xfb0   :  { %v12697_v52 = vpop.permute.xlu0 %12696  ;;  %v12704_v9 = vunpack.i.h.bf16 %v12702_v6  ;;  %v12703_v20 = vunpack.i.l.bf16 %v12702_v6 }
 0xfb1   :  { %v12699_v60 = vunpack.i.h.bf16 %v12697_v52  ;;  %v12698_v27 = vunpack.i.l.bf16 %v12697_v52 }
 0xfb2   :  { %v12060_v47 = vpack.c.bf16 %v12704_v9, %v12703_v20 }
 0xfb3   :  { %v12054_v4 = vpack.c.bf16 %v12699_v60, %v12698_v27 }
 0xfb5   :  { %12056 = vmatprep.subr.msk.bf16.mxu0 %vm13791_vm2, %v12054_v4 }
 0xfb6   :  { %v13200_v13 = vpop.eup %13199 }
 0xfb7   :  { %v13202_v10 = vpop.eup %13201  ;;  %v3009_v63 = vmul.f32 %v13200_v13, %v14733_v29 }
 0xfb8   :  { %v3008_v23 = vmul.f32 %v13202_v10, %v14735_v44 }
 0xfba   :  { %10990 = vmatprep.mubr.msk.f32.mxu0 %vm613_vm3, %v3008_v23 }
 0xfbb   :  { %10991 = vmatmul.mubr.msk.f32.vlgmr.msra.gmra.mrb[64].mxu0 %vm613_vm3, %v3009_v63 }
 0xfbc   :  { %12059 = vmatpush3.bf16.xpose.msk.msra.mxu0 %vm13791_vm2, %v12054_v4 }
 0xfbd   :  { %12062 = vmatprep.subr.msk.bf16.mxu0 %vm13791_vm2, %v12060_v47 }
 0xfc4   :  { %12065 = vmatpush3.bf16.xpose.msk.msra.mxu0 %vm13791_vm2, %v12060_v47 }
 0xfe0   :  { %v2987_v35 = vpop.xlane.xlu1 %2986 }
 0xfe1   :  { %13203 = vrcp.f32 %v2987_v35  ;;  %v2984_v12 = vpop.xlane.xlu0 %2983 }
 0xfe2   :  { %13205 = vrcp.f32 %v2984_v12 }
 0xfe4   :  { %v2993_v44 = vpop.xlane.xlu1 %2992 }
 0xfe5   :  { %13207 = vrcp.f32 %v2993_v44  ;;  %v2990_v29 = vpop.xlane.xlu0 %2989 }
 0xfe6   :  { %13209 = vrcp.f32 %v2990_v29 }
 0xfe8   :  { %v12712_v36 = vpop.permute.xlu1 %12711 }
 0xfe9   :  { %v12707_v34 = vpop.permute.xlu0 %12706  ;;  %v12714_v11 = vunpack.i.h.bf16 %v12712_v36  ;;  %v12713_v16 = vunpack.i.l.bf16 %v12712_v36 }
 0xfea   :  { %v12709_v48 = vunpack.i.h.bf16 %v12707_v34  ;;  %v12708_v57 = vunpack.i.l.bf16 %v12707_v34 }
 0xfeb   :  { %v13204_v30 = vpop.eup %13203  ;;  %v12072_v21 = vpack.c.bf16 %v12714_v11, %v12713_v16 }
 0xfec   :  { %v13206_v41 = vpop.eup %13205  ;;  %v12066_v49 = vpack.c.bf16 %v12709_v48, %v12708_v57  ;;  %v3011_v40 = vmul.f32 %v13204_v30, %v14745_v53 }
 0xfed   :  { %v3010_v31 = vmul.f32 %v13206_v41, %v14747_v1  ;;  %v3146_v5 = vpop.permute.xlu0 %3145 }
 0xfee   :  { %12068 = vmatprep.subr.msk.bf16.mxu0 %vm13791_vm2, %v12066_v49 }
 0xfef   :  { %v13208_v59 = vpop.eup %13207  ;;  %10993 = vmatprep.mubr.msk.f32.mxu0 %vm613_vm3, %v3010_v31  ;;  %12071 = vmatpush3.bf16.xpose.msk.msra.mxu0 %vm13791_vm2, %v12066_v49 }
 0xff0   :  { %v13210_v32 = vpop.eup %13209  ;;  %10994 = vmatmul.mubr.msk.f32.gmra.mrb[66].mxu0 %vm613_vm3, %v3011_v40  ;;  %12074 = vmatprep.subr.msk.bf16.mxu0 %vm13791_vm2, %v12072_v21  ;;  %v3013_v28 = vmul.f32 %v13208_v59, %v14751_v33 }
 0xff1   :  { %v3012_v1 = vmul.f32 %v13210_v32, %v14755_v43  ;;  %v3150_v33 = vpop.permute.xlu0 %3149 }
 0xff3   :  { %10996 = vmatprep.mubr.msk.f32.mxu0 %vm613_vm3, %v3012_v1 }
 0xff4   :  { %10997 = vmatmul.mubr.msk.f32.gmra.mrb[68].mxu0 %vm613_vm3, %v3013_v28 }
 0xff5   :  { %v3154_v13 = vpop.permute.xlu0 %3153 }
 0xff7   :  { %12077 = vmatpush3.bf16.xpose.msk.msra.mxu0 %vm13791_vm2, %v12072_v21 }
0x1019   :  { %v2999_v53 = vpop.xlane.xlu1 %2998 }
0x101a   :  { %13211 = vrcp.f32 %v2999_v53 }
0x101d   :  { %v2996_v54 = vpop.xlane.xlu1 %2995 }
0x101e   :  { %13213 = vrcp.f32 %v2996_v54 }
0x1021   :  { %v3148_v27 = vpop.permute.xlu1 %3147 }
0x1024   :  { %v13212_v52 = vpop.eup %13211 }
0x1025   :  { %v3015_v43 = vmul.f32 %v13212_v52, %v14773_v61  ;;  %v3152_v6 = vpop.permute.xlu1 %3151 }
0x1028   :  { %v13214_v60 = vpop.eup %13213 }
0x1029   :  { %v3014_v4 = vmul.f32 %v13214_v60, %v14777_v26  ;;  %v3156_v10 = vpop.permute.xlu1 %3155  ;;  %v3158_v26 = vpop.permute.xlu0 %3157 }
0x102b   :  { %10999 = vmatprep.mubr.msk.f32.mxu0 %vm613_vm3, %v3014_v4 }
0x102c   :  { %11000 = vmatmul.mubr.msk.f32.gmra.mrb[70].mxu0 %vm613_vm3, %v3015_v43 }
0x102d   :  { %11018 = vmatprep.mubr.msk.f32.mxu0 %vm443_vm1, %v3146_v5  ;;  %v3160_v61 = vpop.permute.xlu1 %3159 }
0x1030   :  { %11019 = vmatmul.mubr.msk.f32.vlgmr.msra.gmra.mrb[72].mxu0 %vm443_vm1, %v3148_v27 }
0x1031   :  { %11021 = vmatprep.mubr.msk.f32.mxu0 %vm443_vm1, %v3150_v33 }
0x1034   :  { %11022 = vmatmul.mubr.msk.f32.gmra.mrb[74].mxu0 %vm443_vm1, %v3152_v6 }
0x1035   :  { %11024 = vmatprep.mubr.msk.f32.mxu0 %vm443_vm1, %v3154_v13 }
0x1038   :  { %11025 = vmatmul.mubr.msk.f32.gmra.mrb[76].mxu0 %vm443_vm1, %v3156_v10 }
0x1039   :  { %11027 = vmatprep.mubr.msk.f32.mxu0 %vm443_vm1, %v3158_v26 }
0x103c   :  { %11028 = vmatmul.mubr.msk.f32.gmra.mrb[78].mxu0 %vm443_vm1, %v3160_v61 }
0x108e   :  { %v14829_v9 = vpop.f32.mrb[64].mxu0 }
0x108f   :  { %v14831_v20 = vpop.f32.mrb[65].mxu0 }
0x10c3   :  { %v14833_v23 = vpop.f32.mrb[66].mxu0 }
0x10c4   :  { %v14835_v63 = vpop.f32.mrb[67].mxu0 }
0x10c7   :  { %v14837_v47 = vpop.f32.mrb[68].mxu0 }
0x10c8   :  { %v14839_v35 = vpop.f32.mrb[69].mxu0 }
0x10ff   :  { %v14841_v12 = vpop.f32.mrb[70].mxu0 }
0x1100   :  { %v14843_v44 = vpop.f32.mrb[71].mxu0 }
0x1103   :  { %v11020_v29 = vpop.f32.mrb[72].mxu0 }
0x1104   :  { %v3315_v36 = vmul.f32 0.35355338, %v11020_v29  ;;  %v3275_v34 = vpop.f32.mrb[73].mxu0 }
0x1105   :  { %v3314_v11 = vmul.f32 0.35355338, %v3275_v34 }
0x1106   :  { %v3323_v16 = vadd.f32 %v3315_v36, %v14680_v17 }
0x1107   :  { %v3322_v48 = vadd.f32 %v3314_v11, %v14685_v14  ;;  %v11023_v57 = vpop.f32.mrb[74].mxu0 }
0x1108   :  { %v3317_v30 = vmul.f32 0.35355338, %v11023_v57  ;;  %v3285_v41 = vpop.f32.mrb[75].mxu0  ;;  %v3333_v49 = vsel %vm613_vm3, %v3323_v16, -inf }
0x1109   :  { %v3316_v31 = vmul.f32 0.35355338, %v3285_v41  ;;  %3334 = vmax.xlane.f32.xlu1 %v3333_v49  ;;  %v3330_v21 = vsel %vm613_vm3, %v3322_v48, -inf }
0x110a   :  { %v3325_v40 = vadd.f32 %v3317_v30, %v14692_v24  ;;  %3331 = vmax.xlane.f32.xlu0 %v3330_v21 }
0x110b   :  { %v11026_v59 = vpop.f32.mrb[76].mxu0  ;;  %v3324_v53 = vadd.f32 %v3316_v31, %v14700_v58 }
0x110c   :  { %v3319_v32 = vmul.f32 0.35355338, %v11026_v59  ;;  %v3295_v1 = vpop.f32.mrb[77].mxu0  ;;  %v3339_v28 = vsel %vm613_vm3, %v3325_v40, -inf }
0x110d   :  { %v3318_v54 = vmul.f32 0.35355338, %v3295_v1  ;;  %v3336_v6 = vsel %vm613_vm3, %v3324_v53, -inf }
0x110e   :  { %v3327_v5 = vadd.f32 %v3319_v32, %v14705_v37  ;;  %3340 = vmax.xlane.f32.xlu0 %v3339_v28 }
0x110f   :  { %v11029_v52 = vpop.f32.mrb[78].mxu0  ;;  %v3326_v43 = vadd.f32 %v3318_v54, %v14713_v50 }
0x1110   :  { %v3321_v60 = vmul.f32 0.35355338, %v11029_v52  ;;  %v3305_v27 = vpop.f32.mrb[79].mxu0  ;;  %v3345_v4 = vsel %vm613_vm3, %v3327_v5, -inf }
0x1111   :  { %v3320_v33 = vmul.f32 0.35355338, %v3305_v27  ;;  %3346 = vmax.xlane.f32.xlu1 %v3345_v4  ;;  %v3342_v61 = vsel %vm613_vm3, %v3326_v43, -inf }
0x1112   :  { %v14857_v13 = vadd.f32 %v3321_v60, %v14718_v39  ;;  %3337 = vmax.xlane.f32.xlu0 %v3336_v6 }
0x1113   :  { %v14862_v26 = vadd.f32 %v3320_v33, %v14727_v2 }
0x1114   :  { %v3351_v10 = vsel %vm613_vm3, %v14857_v13, -inf }
0x1115   :  { %3352 = vmax.xlane.f32.xlu1 %v3351_v10  ;;  %v3348_v29 = vsel %vm613_vm3, %v14862_v26, -inf }
0x1116   :  { %3343 = vmax.xlane.f32.xlu0 %v3342_v61 }
0x111a   :  { %3349 = vmax.xlane.f32.xlu0 %v3348_v29 }
0x1126   :  { %12721 = vrot.lane.b32.xlu1 %v14654_v22, %s13666_s19 }
0x112a   :  { %12726 = vrot.lane.b32.xlu1 %v14663_v18, %s13666_s19 }
0x112e   :  { %12731 = vrot.lane.b32.xlu1 %v14669_v45, %s13666_s19 }
0x1130   :  { %12716 = vrot.lane.b32.xlu0 %v14649_v15, %s13666_s19 }
0x1132   :  { %12741 = vrot.lane.b32.xlu1 %v14616_v51, %s13667_s20 }
0x1134   :  { %12736 = vrot.lane.b32.xlu0 %v14607_v0, %s13667_s20 }
0x1196   :  { %v3335_v36 = vpop.xlane.xlu1 %3334 }
0x1197   :  { %v3355_v34 = vsub.f32 %v3323_v16, %v3335_v36  ;;  %v3332_v11 = vpop.xlane.xlu0 %3331 }
0x1198   :  { %v3354_v57 = vsub.f32 %v3322_v48, %v3332_v11 }
0x1199   :  { %v3364_v30 = vmul.f32 1.442695, %v3355_v34 }
0x119a   :  { %v3362_v41 = vmul.f32 1.442695, %v3354_v57 }
0x119b   :  { %13215 = vpow2.f32 %v3364_v30  ;;  %v3341_v49 = vpop.xlane.xlu0 %3340 }
0x119c   :  { %13217 = vpow2.f32 %v3362_v41  ;;  %v3357_v31 = vsub.f32 %v3325_v40, %v3341_v49 }
0x119e   :  { %v3368_v21 = vmul.f32 1.442695, %v3357_v31  ;;  %v3347_v59 = vpop.xlane.xlu1 %3346 }
0x119f   :  { %v3359_v32 = vsub.f32 %v3327_v5, %v3347_v59  ;;  %v3338_v1 = vpop.xlane.xlu0 %3337 }
0x11a0   :  { %13219 = vpow2.f32 %v3368_v21  ;;  %v3356_v28 = vsub.f32 %v3324_v53, %v3338_v1 }
0x11a1   :  { %v3372_v54 = vmul.f32 1.442695, %v3359_v32 }
0x11a2   :  { %v3366_v52 = vmul.f32 1.442695, %v3356_v28  ;;  %v3353_v60 = vpop.xlane.xlu1 %3352 }
0x11a3   :  { %v3344_v27 = vpop.xlane.xlu0 %3343 }
0x11a4   :  { %13221 = vpow2.f32 %v3366_v52  ;;  %v3358_v16 = vsub.f32 %v3326_v43, %v3344_v27 }
0x11a5   :  { %v14879_v4 = vpop.eup %13215  ;;  %13223 = vpow2.f32 %v3372_v54 }
0x11a6   :  { %v14881_v48 = vpop.eup %13217  ;;  %v3370_v33 = vmul.f32 1.442695, %v3358_v16  ;;  %v12722_v6 = vpop.permute.xlu1 %12721  ;;  %v3381_v40 = vsel %vm613_vm3, %v14879_v4, 0.0 }
0x11a7   :  { %3382 = vadd.xlane.f32.xlu1 %v3381_v40  ;;  %v3350_v5 = vpop.xlane.xlu0 %3349  ;;  %v3378_v53 = vsel %vm613_vm3, %v14881_v48, 0.0  ;;  %v12724_v36 = vunpack.i.h.bf16 %v12722_v6  ;;  %v12723_v34 = vunpack.i.l.bf16 %v12722_v6 }
0x11a8   :  { %3379 = vadd.xlane.f32.xlu0 %v3378_v53  ;;  %13225 = vpow2.f32 %v3370_v33 }
0x11a9   :  { %v12082_v32 = vpack.c.bf16 %v12724_v36, %v12723_v34  ;;  %v3360_v34 = vsub.f32 %v14862_v26, %v3350_v5 }
0x11aa   :  { %v14887_v10 = vpop.eup %13219  ;;  %v12727_v43 = vpop.permute.xlu1 %12726 }
0x11ab   :  { %v12717_v61 = vpop.permute.xlu0 %12716  ;;  %v3387_v29 = vsel %vm613_vm3, %v14887_v10, 0.0  ;;  %v12729_v21 = vunpack.i.h.bf16 %v12727_v43  ;;  %v12728_v59 = vunpack.i.l.bf16 %v12727_v43 }
0x11ac   :  { %v12719_v11 = vunpack.i.h.bf16 %v12717_v61  ;;  %v12718_v57 = vunpack.i.l.bf16 %v12717_v61  ;;  %3388 = vadd.xlane.f32.xlu1 %v3387_v29  ;;  %v3361_v29 = vsub.f32 %v14857_v13, %v3353_v60 }
0x11ad   :  { %v12086_v16 = vpack.c.bf16 %v12729_v21, %v12728_v59 }
0x11ae   :  { %v14891_v30 = vpop.eup %13221  ;;  %v12078_v41 = vpack.c.bf16 %v12719_v11, %v12718_v57  ;;  %v12732_v1 = vpop.permute.xlu1 %12731  ;;  %v3376_v36 = vmul.f32 1.442695, %v3361_v29  ;;  %v3374_v11 = vmul.f32 1.442695, %v3360_v34 }
0x11af   :  { %v3384_v49 = vsel %vm613_vm3, %v14891_v30, 0.0  ;;  %v14895_v31 = vpop.eup %13223  ;;  %v12734_v52 = vunpack.i.h.bf16 %v12732_v1  ;;  %v12733_v27 = vunpack.i.l.bf16 %v12732_v1  ;;  %v12737_v33 = vpop.permute.xlu0 %12736 }
0x11b0   :  { %3385 = vadd.xlane.f32.xlu0 %v3384_v49  ;;  %12079 = vmatprep.subr.bf16.mxu1 %v12078_v41  ;;  %v3393_v28 = vsel %vm613_vm3, %v14895_v31, 0.0  ;;  %v12739_v40 = vunpack.i.h.bf16 %v12737_v33  ;;  %v12738_v53 = vunpack.i.l.bf16 %v12737_v33  ;;  %13227 = vpow2.f32 %v3376_v36 }
0x11b1   :  { %12081 = vmatpush3.bf16.msra.mxu1 %v12078_v41  ;;  %v12090_v43 = vpack.c.bf16 %v12734_v52, %v12733_v27  ;;  %13229 = vpow2.f32 %v3374_v11 }
0x11b2   :  { %12083 = vmatprep.subr.bf16.mxu1 %v12082_v32  ;;  %v14899_v54 = vpop.eup %13225  ;;  %v12094_v61 = vpack.c.bf16 %v12739_v40, %v12738_v53  ;;  %v12742_v5 = vpop.permute.xlu1 %12741 }
0x11b3   :  { %v3390_v6 = vsel %vm613_vm3, %v14899_v54, 0.0  ;;  %v12743_v52 = vunpack.i.l.bf16 %v12742_v5 }
0x11b4   :  { %3394 = vadd.xlane.f32.xlu0 %v3393_v28  ;;  %v12744_v28 = vunpack.i.h.bf16 %v12742_v5 }
0x11b5   :  { %12085 = vmatpush3.bf16.msra.mxu1 %v12082_v32 }
0x11b6   :  { %12087 = vmatprep.subr.bf16.mxu1 %v12086_v16 }
0x11b8   :  { %3391 = vadd.xlane.f32.xlu0 %v3390_v6  ;;  %v12100_v6 = vpack.c.bf16 %v12744_v28, %v12743_v52 }
0x11b9   :  { %12089 = vmatpush3.bf16.msra.mxu1 %v12086_v16 }
0x11ba   :  { %12091 = vmatprep.subr.bf16.mxu1 %v12090_v43  ;;  %v14917_v57 = vpop.eup %13227 }
0x11bb   :  { %v3399_v13 = vsel %vm613_vm3, %v14917_v57, 0.0  ;;  %v14923_v26 = vpop.eup %13229 }
0x11bc   :  { %v3396_v60 = vsel %vm613_vm3, %v14923_v26, 0.0 }
0x11bd   :  { %12751 = vrot.lane.b32.xlu1 %v14643_v7, %s13667_s20  ;;  %12093 = vmatpush3.bf16.msra.mxu1 %v12090_v43 }
0x11be   :  { %12096 = vmatprep.subr.msk.bf16.mxu1 %vm13791_vm2, %v12094_v61 }
0x11ce   :  { %12746 = vrot.lane.b32.xlu0 %v14628_v62, %s13667_s20 }
0x11d2   :  { %3579 = vrot.lane.b32.xlu0 %v14603_v55, %s13667_s20 }
0x11d6   :  { %3583 = vrot.lane.b32.xlu0 %v14657_v19, %s13667_s20 }
0x11da   :  { %3587 = vrot.lane.b32.xlu0 %v14626_v8, %s13667_s20 }
0x11de   :  { %3591 = vrot.lane.b32.xlu0 %v14638_v3, %s13667_s20 }
0x11e1   :  { %3400 = vadd.xlane.f32.xlu1 %v3399_v13 }
0x11e5   :  { %3397 = vadd.xlane.f32.xlu1 %v3396_v60 }
0x11f6   :  { %3581 = vrot.lane.b32.xlu1 %v14652_v46, %s13667_s20 }
0x11fa   :  { %3585 = vrot.lane.b32.xlu1 %v14614_v38, %s13667_s20 }
0x11fe   :  { %3589 = vrot.lane.b32.xlu1 %v14623_v56, %s13667_s20 }
0x1202   :  { %3593 = vrot.lane.b32.xlu1 %v14635_v42, %s13667_s20 }
0x1234   :  { %v3383_v41 = vpop.xlane.xlu1 %3382 }
0x1235   :  { %13231 = vrcp.f32 %v3383_v41  ;;  %v3380_v49 = vpop.xlane.xlu0 %3379 }
0x1236   :  { %13233 = vrcp.f32 %v3380_v49 }
0x1239   :  { %v3389_v21 = vpop.xlane.xlu1 %3388 }
0x123a   :  { %13235 = vrcp.f32 %v3389_v21 }
0x123d   :  { %v3386_v59 = vpop.xlane.xlu0 %3385 }
0x123e   :  { %13237 = vrcp.f32 %v3386_v59 }
0x123f   :  { %v13232_v32 = vpop.eup %13231 }
0x1240   :  { %v13234_v1 = vpop.eup %13233  ;;  %v3411_v33 = vmul.f32 %v13232_v32, %v14879_v4 }
0x1241   :  { %v3395_v27 = vpop.xlane.xlu0 %3394  ;;  %v3410_v16 = vmul.f32 %v13234_v1, %v14881_v48 }
0x1242   :  { %13239 = vrcp.f32 %v3395_v27 }
0x1243   :  { %11046 = vmatprep.mubr.msk.f32.mxu1 %vm613_vm3, %v3410_v16 }
0x1244   :  { %11047 = vmatmul.mubr.msk.f32.vlgmr.msra.gmra.mrb[64].mxu1 %vm613_vm3, %v3411_v33  ;;  %v13236_v53 = vpop.eup %13235 }
0x1245   :  { %12099 = vmatpush3.bf16.xpose.msk.msra.mxu1 %vm13791_vm2, %v12094_v61  ;;  %v3392_v40 = vpop.xlane.xlu0 %3391  ;;  %v3413_v34 = vmul.f32 %v13236_v53, %v14887_v10  ;;  %v12752_v61 = vpop.permute.xlu1 %12751 }
0x1246   :  { %13241 = vrcp.f32 %v3392_v40  ;;  %12102 = vmatprep.subr.msk.bf16.mxu1 %vm13791_vm2, %v12100_v6  ;;  %v12754_v5 = vunpack.i.h.bf16 %v12752_v61 }
0x1248   :  { %v13238_v43 = vpop.eup %13237 }
0x1249   :  { %v12747_v29 = vpop.permute.xlu0 %12746  ;;  %v3412_v48 = vmul.f32 %v13238_v43, %v14891_v30  ;;  %v12753_v30 = vunpack.i.l.bf16 %v12752_v61 }
0x124a   :  { %v12749_v4 = vunpack.i.h.bf16 %v12747_v29  ;;  %v12748_v36 = vunpack.i.l.bf16 %v12747_v29 }
0x124b   :  { %11049 = vmatprep.mubr.msk.f32.mxu1 %vm613_vm3, %v3412_v48  ;;  %v12112_v49 = vpack.c.bf16 %v12754_v5, %v12753_v30 }
0x124c   :  { %v12106_v11 = vpack.c.bf16 %v12749_v4, %v12748_v36  ;;  %11050 = vmatmul.mubr.msk.f32.gmra.mrb[66].mxu1 %vm613_vm3, %v3413_v34  ;;  %v13240_v13 = vpop.eup %13239 }
0x124d   :  { %12105 = vmatpush3.bf16.xpose.msk.msra.mxu1 %vm13791_vm2, %v12100_v6  ;;  %v3415_v10 = vmul.f32 %v13240_v13, %v14895_v31 }
0x124e   :  { %12108 = vmatprep.subr.msk.bf16.mxu1 %vm13791_vm2, %v12106_v11 }
0x1250   :  { %v13242_v60 = vpop.eup %13241 }
0x1251   :  { %v3414_v41 = vmul.f32 %v13242_v60, %v14899_v54  ;;  %v3580_v54 = vpop.permute.xlu0 %3579 }
0x1253   :  { %11052 = vmatprep.mubr.msk.f32.mxu1 %vm613_vm3, %v3414_v41 }
0x1254   :  { %11053 = vmatmul.mubr.msk.f32.gmra.mrb[68].mxu1 %vm613_vm3, %v3415_v10 }
0x1255   :  { %12111 = vmatpush3.bf16.xpose.msk.msra.mxu1 %vm13791_vm2, %v12106_v11  ;;  %v3584_v27 = vpop.permute.xlu0 %3583 }
0x1256   :  { %12114 = vmatprep.subr.msk.bf16.mxu1 %vm13791_vm2, %v12112_v49 }
0x1259   :  { %v3588_v33 = vpop.permute.xlu0 %3587 }
0x125d   :  { %12117 = vmatpush3.bf16.xpose.msk.msra.mxu1 %vm13791_vm2, %v12112_v49 }
0x126e   :  { %v3401_v21 = vpop.xlane.xlu1 %3400 }
0x126f   :  { %13243 = vrcp.f32 %v3401_v21 }
0x1272   :  { %v3398_v59 = vpop.xlane.xlu1 %3397 }
0x1273   :  { %13245 = vrcp.f32 %v3398_v59 }
0x1276   :  { %v3582_v1 = vpop.permute.xlu1 %3581 }
0x1279   :  { %v13244_v31 = vpop.eup %13243 }
0x127a   :  { %v3417_v52 = vmul.f32 %v13244_v31, %v14917_v57  ;;  %v3586_v16 = vpop.permute.xlu1 %3585 }
0x127d   :  { %v13246_v32 = vpop.eup %13245 }
0x127e   :  { %v3416_v28 = vmul.f32 %v13246_v32, %v14923_v26  ;;  %v3590_v6 = vpop.permute.xlu1 %3589  ;;  %v3592_v26 = vpop.permute.xlu0 %3591 }
0x1280   :  { %11055 = vmatprep.mubr.msk.f32.mxu1 %vm613_vm3, %v3416_v28 }
0x1281   :  { %11056 = vmatmul.mubr.msk.f32.gmra.mrb[70].mxu1 %vm613_vm3, %v3417_v52 }
0x1282   :  { %11074 = vmatprep.mubr.msk.f32.mxu1 %vm443_vm1, %v3580_v54  ;;  %v3594_v57 = vpop.permute.xlu1 %3593 }
0x1285   :  { %11075 = vmatmul.mubr.msk.f32.vlgmr.msra.gmra.mrb[72].mxu1 %vm443_vm1, %v3582_v1 }
0x1286   :  { %11077 = vmatprep.mubr.msk.f32.mxu1 %vm443_vm1, %v3584_v27 }
0x1289   :  { %11078 = vmatmul.mubr.msk.f32.gmra.mrb[74].mxu1 %vm443_vm1, %v3586_v16 }
0x128a   :  { %11080 = vmatprep.mubr.msk.f32.mxu1 %vm443_vm1, %v3588_v33 }
0x128d   :  { %11081 = vmatmul.mubr.msk.f32.gmra.mrb[76].mxu1 %vm443_vm1, %v3590_v6 }
0x128e   :  { %11083 = vmatprep.mubr.msk.f32.mxu1 %vm443_vm1, %v3592_v26 }
0x1291   :  { %11084 = vmatmul.mubr.msk.f32.gmra.mrb[78].mxu1 %vm443_vm1, %v3594_v57 }
0x1317   :  { %v14973_v40 = vpop.f32.mrb[64].mxu1 }
0x1318   :  { %v14975_v53 = vpop.f32.mrb[65].mxu1 }
0x131f   :  { %v14977_v43 = vpop.f32.mrb[66].mxu1 }
0x1320   :  { %v14979_v29 = vpop.f32.mrb[67].mxu1 }
0x1327   :  { %v14981_v48 = vpop.f32.mrb[68].mxu1 }
0x1328   :  { %v14983_v4 = vpop.f32.mrb[69].mxu1 }
0x1354   :  { %v14985_v36 = vpop.f32.mrb[70].mxu1 }
0x1355   :  { %v14987_v34 = vpop.f32.mrb[71].mxu1 }
0x1358   :  { %v11076_v11 = vpop.f32.mrb[72].mxu1 }
0x1359   :  { %v3749_v61 = vmul.f32 0.35355338, %v11076_v11  ;;  %v3709_v13 = vpop.f32.mrb[73].mxu1 }
0x135a   :  { %v3748_v60 = vmul.f32 0.35355338, %v3709_v13 }
0x135b   :  { %v3757_v5 = vadd.f32 %v3749_v61, %v14680_v17 }
0x135c   :  { %v3756_v30 = vadd.f32 %v3748_v60, %v14685_v14  ;;  %v11079_v41 = vpop.f32.mrb[74].mxu1 }
0x135d   :  { %v3751_v10 = vmul.f32 0.35355338, %v11079_v41  ;;  %v3719_v49 = vpop.f32.mrb[75].mxu1  ;;  %v3767_v21 = vsel %vm613_vm3, %v3757_v5, -inf }
0x135e   :  { %v3750_v59 = vmul.f32 0.35355338, %v3719_v49  ;;  %3768 = vmax.xlane.f32.xlu1 %v3767_v21  ;;  %v3764_v54 = vsel %vm613_vm3, %v3756_v30, -inf }
0x135f   :  { %v3759_v31 = vadd.f32 %v3751_v10, %v14692_v24  ;;  %3765 = vmax.xlane.f32.xlu0 %v3764_v54 }
0x1360   :  { %v11082_v32 = vpop.f32.mrb[76].mxu1  ;;  %v3758_v17 = vadd.f32 %v3750_v59, %v14700_v58 }
0x1361   :  { %v3753_v1 = vmul.f32 0.35355338, %v11082_v32  ;;  %v3729_v28 = vpop.f32.mrb[77].mxu1  ;;  %v3773_v52 = vsel %vm613_vm3, %v3759_v31, -inf }
0x1362   :  { %v3752_v14 = vmul.f32 0.35355338, %v3729_v28  ;;  %v3770_v11 = vsel %vm613_vm3, %v3758_v17, -inf }
0x1363   :  { %v3761_v27 = vadd.f32 %v3753_v1, %v14705_v37  ;;  %3774 = vmax.xlane.f32.xlu0 %v3773_v52 }
0x1364   :  { %v11085_v16 = vpop.f32.mrb[78].mxu1  ;;  %v3760_v57 = vadd.f32 %v3752_v14, %v14713_v50 }
0x1365   :  { %v3755_v33 = vmul.f32 0.35355338, %v11085_v16  ;;  %v3739_v6 = vpop.f32.mrb[79].mxu1  ;;  %v3779_v26 = vsel %vm613_vm3, %v3761_v27, -inf }
0x1366   :  { %v3754_v24 = vmul.f32 0.35355338, %v3739_v6  ;;  %3780 = vmax.xlane.f32.xlu1 %v3779_v26  ;;  %v3776_v13 = vsel %vm613_vm3, %v3760_v57, -inf }
0x1367   :  { %v15001_v61 = vadd.f32 %v3755_v33, %v14718_v39  ;;  %3771 = vmax.xlane.f32.xlu0 %v3770_v11 }
0x1368   :  { %v15006_v37 = vadd.f32 %v3754_v24, %v14727_v2 }
0x1369   :  { %v3785_v58 = vsel %vm613_vm3, %v15001_v61, -inf }
0x136a   :  { %3786 = vmax.xlane.f32.xlu1 %v3785_v58  ;;  %v3782_v50 = vsel %vm613_vm3, %v15006_v37, -inf }
0x136b   :  { %3777 = vmax.xlane.f32.xlu0 %v3776_v13 }
0x136f   :  { %3783 = vmax.xlane.f32.xlu0 %v3782_v50 }
0x137b   :  { %12761 = vrot.lane.b32.xlu1 %v14654_v22, %s13667_s20 }
0x137f   :  { %12766 = vrot.lane.b32.xlu1 %v14663_v18, %s13667_s20 }
0x1383   :  { %12771 = vrot.lane.b32.xlu1 %v14669_v45, %s13667_s20 }
0x1385   :  { %12756 = vrot.lane.b32.xlu0 %v14649_v15, %s13667_s20 }
0x1387   :  { %12781 = vrot.lane.b32.xlu1 %v14616_v51, %s13668_s21 }
0x1389   :  { %12776 = vrot.lane.b32.xlu0 %v14607_v0, %s13668_s21 }
0x13eb   :  { %v3769_v39 = vpop.xlane.xlu1 %3768 }
0x13ec   :  { %v3789_v2 = vsub.f32 %v3757_v5, %v3769_v39  ;;  %v3766_v60 = vpop.xlane.xlu0 %3765 }
0x13ed   :  { %v3788_v41 = vsub.f32 %v3756_v30, %v3766_v60 }
0x13ee   :  { %v3798_v10 = vmul.f32 1.442695, %v3789_v2 }
0x13ef   :  { %v3796_v49 = vmul.f32 1.442695, %v3788_v41 }
0x13f0   :  { %13247 = vpow2.f32 %v3798_v10  ;;  %v3775_v21 = vpop.xlane.xlu0 %3774 }
0x13f1   :  { %13249 = vpow2.f32 %v3796_v49  ;;  %v3791_v59 = vsub.f32 %v3759_v31, %v3775_v21 }
0x13f3   :  { %v3802_v54 = vmul.f32 1.442695, %v3791_v59  ;;  %v3781_v32 = vpop.xlane.xlu1 %3780 }
0x13f4   :  { %v3793_v1 = vsub.f32 %v3761_v27, %v3781_v32  ;;  %v3772_v28 = vpop.xlane.xlu0 %3771 }
0x13f5   :  { %13251 = vpow2.f32 %v3802_v54  ;;  %v3790_v52 = vsub.f32 %v3758_v17, %v3772_v28 }
0x13f6   :  { %v3806_v51 = vmul.f32 1.442695, %v3793_v1 }
0x13f7   :  { %v3800_v14 = vmul.f32 1.442695, %v3790_v52  ;;  %v3787_v16 = vpop.xlane.xlu1 %3786 }
0x13f8   :  { %v3778_v0 = vpop.xlane.xlu0 %3777 }
0x13f9   :  { %13253 = vpow2.f32 %v3800_v14  ;;  %v3792_v5 = vsub.f32 %v3760_v57, %v3778_v0 }
0x13fa   :  { %v15023_v33 = vpop.eup %13247  ;;  %13255 = vpow2.f32 %v3806_v51 }
0x13fb   :  { %v15025_v30 = vpop.eup %13249  ;;  %v3804_v6 = vmul.f32 1.442695, %v3792_v5  ;;  %v12762_v26 = vpop.permute.xlu1 %12761  ;;  %v3815_v31 = vsel %vm613_vm3, %v15023_v33, 0.0 }
0x13fc   :  { %3816 = vadd.xlane.f32.xlu1 %v3815_v31  ;;  %v3784_v27 = vpop.xlane.xlu0 %3783  ;;  %v3812_v17 = vsel %vm613_vm3, %v15025_v30, 0.0  ;;  %v12764_v13 = vunpack.i.h.bf16 %v12762_v26  ;;  %v12763_v50 = vunpack.i.l.bf16 %v12762_v26 }
0x13fd   :  { %3813 = vadd.xlane.f32.xlu0 %v3812_v17  ;;  %13257 = vpow2.f32 %v3804_v6 }
0x13fe   :  { %v12122_v54 = vpack.c.bf16 %v12764_v13, %v12763_v50 }
0x13ff   :  { %v15031_v24 = vpop.eup %13251  ;;  %v12767_v57 = vpop.permute.xlu1 %12766 }
0x1400   :  { %v12757_v11 = vpop.permute.xlu0 %12756  ;;  %v3821_v58 = vsel %vm613_vm3, %v15031_v24, 0.0  ;;  %v12769_v21 = vunpack.i.h.bf16 %v12767_v57  ;;  %v12768_v59 = vunpack.i.l.bf16 %v12767_v57  ;;  %v3795_v57 = vsub.f32 %v15001_v61, %v3787_v16 }
0x1401   :  { %v12759_v39 = vunpack.i.h.bf16 %v12757_v11  ;;  %v12758_v2 = vunpack.i.l.bf16 %v12757_v11  ;;  %3822 = vadd.xlane.f32.xlu1 %v3821_v58  ;;  %v3794_v58 = vsub.f32 %v15006_v37, %v3784_v27 }
0x1402   :  { %v12126_v14 = vpack.c.bf16 %v12769_v21, %v12768_v59  ;;  %v3810_v11 = vmul.f32 1.442695, %v3795_v57 }
0x1403   :  { %v15035_v60 = vpop.eup %13253  ;;  %v12118_v41 = vpack.c.bf16 %v12759_v39, %v12758_v2  ;;  %v12772_v32 = vpop.permute.xlu1 %12771  ;;  %v3808_v13 = vmul.f32 1.442695, %v3794_v58 }
0x1404   :  { %v3818_v10 = vsel %vm613_vm3, %v15035_v60, 0.0  ;;  %v15039_v49 = vpop.eup %13255  ;;  %v12774_v52 = vunpack.i.h.bf16 %v12772_v32  ;;  %v12773_v51 = vunpack.i.l.bf16 %v12772_v32  ;;  %v12777_v0 = vpop.permute.xlu0 %12776  ;;  %13259 = vpow2.f32 %v3810_v11 }
0x1405   :  { %3819 = vadd.xlane.f32.xlu0 %v3818_v10  ;;  %12119 = vmatprep.subr.bf16.mxu0 %v12118_v41  ;;  %v3827_v1 = vsel %vm613_vm3, %v15039_v49, 0.0  ;;  %v12779_v6 = vunpack.i.h.bf16 %v12777_v0  ;;  %v12778_v26 = vunpack.i.l.bf16 %v12777_v0  ;;  %13261 = vpow2.f32 %v3808_v13 }
0x1406   :  { %12121 = vmatpush3.bf16.msra.mxu0 %v12118_v41  ;;  %v12130_v31 = vpack.c.bf16 %v12774_v52, %v12773_v51 }
0x1407   :  { %12123 = vmatprep.subr.bf16.mxu0 %v12122_v54  ;;  %v15043_v28 = vpop.eup %13257  ;;  %v12134_v17 = vpack.c.bf16 %v12779_v6, %v12778_v26 }
0x1408   :  { %v3824_v5 = vsel %vm613_vm3, %v15043_v28, 0.0 }
0x1409   :  { %3828 = vadd.xlane.f32.xlu0 %v3827_v1 }
0x140a   :  { %12125 = vmatpush3.bf16.msra.mxu0 %v12122_v54 }
0x140b   :  { %12127 = vmatprep.subr.bf16.mxu0 %v12126_v14 }
0x140d   :  { %3825 = vadd.xlane.f32.xlu0 %v3824_v5 }
0x140e   :  { %12129 = vmatpush3.bf16.msra.mxu0 %v12126_v14 }
0x140f   :  { %12131 = vmatprep.subr.bf16.mxu0 %v12130_v31 }
0x1412   :  { %12791 = vrot.lane.b32.xlu1 %v14643_v7, %s13668_s21  ;;  %12133 = vmatpush3.bf16.msra.mxu0 %v12130_v31  ;;  %v15061_v7 = vpop.eup %13259 }
0x1413   :  { %12136 = vmatprep.subr.msk.bf16.mxu0 %vm13791_vm2, %v12134_v17  ;;  %v15067_v61 = vpop.eup %13261 }
0x1423   :  { %12786 = vrot.lane.b32.xlu0 %v14628_v62, %s13668_s21  ;;  %v3833_v62 = vsel %vm613_vm3, %v15061_v7, 0.0 }
0x1427   :  { %4005 = vrot.lane.b32.xlu0 %v14603_v55, %s13668_s21  ;;  %v3830_v55 = vsel %vm613_vm3, %v15067_v61, 0.0 }
0x142b   :  { %4009 = vrot.lane.b32.xlu0 %v14657_v19, %s13668_s21 }
0x142f   :  { %4013 = vrot.lane.b32.xlu0 %v14626_v8, %s13668_s21  ;;  %v12782_v8 = vpop.permute.xlu1 %12781 }
0x1430   :  { %v12784_v50 = vunpack.i.h.bf16 %v12782_v8  ;;  %v12783_v39 = vunpack.i.l.bf16 %v12782_v8 }
0x1433   :  { %4017 = vrot.lane.b32.xlu0 %v14638_v3, %s13668_s21 }
0x1436   :  { %3834 = vadd.xlane.f32.xlu1 %v3833_v62 }
0x143a   :  { %3831 = vadd.xlane.f32.xlu1 %v3830_v55 }
0x144b   :  { %4007 = vrot.lane.b32.xlu1 %v14652_v46, %s13668_s21 }
0x144f   :  { %4011 = vrot.lane.b32.xlu1 %v14614_v38, %s13668_s21 }
0x1453   :  { %4015 = vrot.lane.b32.xlu1 %v14623_v56, %s13668_s21 }
0x1457   :  { %4019 = vrot.lane.b32.xlu1 %v14635_v42, %s13668_s21  ;;  %v12140_v42 = vpack.c.bf16 %v12784_v50, %v12783_v39 }
0x1489   :  { %v3817_v3 = vpop.xlane.xlu1 %3816 }
0x148a   :  { %13263 = vrcp.f32 %v3817_v3  ;;  %v3814_v19 = vpop.xlane.xlu0 %3813 }
0x148b   :  { %13265 = vrcp.f32 %v3814_v19 }
0x148e   :  { %v3823_v37 = vpop.xlane.xlu1 %3822 }
0x148f   :  { %13267 = vrcp.f32 %v3823_v37 }
0x1492   :  { %v3820_v16 = vpop.xlane.xlu0 %3819  ;;  %v12792_v52 = vpop.permute.xlu1 %12791 }
0x1493   :  { %13269 = vrcp.f32 %v3820_v16  ;;  %v12794_v0 = vunpack.i.h.bf16 %v12792_v52 }
0x1494   :  { %v13264_v27 = vpop.eup %13263 }
0x1495   :  { %v13266_v46 = vpop.eup %13265  ;;  %v3845_v56 = vmul.f32 %v13264_v27, %v15023_v33 }
0x1496   :  { %v3829_v38 = vpop.xlane.xlu0 %3828  ;;  %v3844_v2 = vmul.f32 %v13266_v46, %v15025_v30 }
0x1497   :  { %13271 = vrcp.f32 %v3829_v38 }
0x1498   :  { %11102 = vmatprep.mubr.msk.f32.mxu0 %vm613_vm3, %v3844_v2 }
0x1499   :  { %11103 = vmatmul.mubr.msk.f32.vlgmr.msra.gmra.mrb[80].mxu0 %vm613_vm3, %v3845_v56  ;;  %v13268_v10 = vpop.eup %13267 }
0x149a   :  { %12139 = vmatpush3.bf16.xpose.msk.msra.mxu0 %vm13791_vm2, %v12134_v17  ;;  %v3826_v41 = vpop.xlane.xlu0 %3825  ;;  %v3847_v32 = vmul.f32 %v13268_v10, %v15031_v24 }
0x149b   :  { %13273 = vrcp.f32 %v3826_v41  ;;  %12142 = vmatprep.subr.msk.bf16.mxu0 %vm13791_vm2, %v12140_v42  ;;  %v13575_v41 = vld [vmem:[%s16815_s4 + $0x8] sm:$0xff] }
0x149d   :  { %v13270_v21 = vpop.eup %13269 }
0x149e   :  { %v12787_v59 = vpop.permute.xlu0 %12786  ;;  %v3846_v30 = vmul.f32 %v13270_v21, %v15035_v60  ;;  %v12793_v60 = vunpack.i.l.bf16 %v12792_v52  ;;  %v13576_v21 = vld [vmem:[%s16815_s4] sm:$0xff] }
0x149f   :  { %v12789_v33 = vunpack.i.h.bf16 %v12787_v59  ;;  %v12788_v54 = vunpack.i.l.bf16 %v12787_v59 }
0x14a0   :  { %11105 = vmatprep.mubr.msk.f32.mxu0 %vm613_vm3, %v3846_v30  ;;  %v12152_v6 = vpack.c.bf16 %v12794_v0, %v12793_v60 }
0x14a1   :  { %v12146_v1 = vpack.c.bf16 %v12789_v33, %v12788_v54  ;;  %11106 = vmatmul.mubr.msk.f32.gmra.mrb[82].mxu0 %vm613_vm3, %v3847_v32  ;;  %v13272_v51 = vpop.eup %13271 }
0x14a2   :  { %12145 = vmatpush3.bf16.xpose.msk.msra.mxu0 %vm13791_vm2, %v12140_v42  ;;  %v3849_v24 = vmul.f32 %v13272_v51, %v15039_v49  ;;  %v13577_v51 = vld [vmem:[%s16815_s4 + $0x18] sm:$0xff] }
0x14a3   :  { %12148 = vmatprep.subr.msk.bf16.mxu0 %vm13791_vm2, %v12146_v1 }
0x14a5   :  { %v13274_v14 = vpop.eup %13273 }
0x14a6   :  { %v3848_v5 = vmul.f32 %v13274_v14, %v15043_v28  ;;  %v4006_v28 = vpop.permute.xlu0 %4005 }
0x14a8   :  { %11108 = vmatprep.mubr.msk.f32.mxu0 %vm613_vm3, %v3848_v5 }
0x14a9   :  { %11109 = vmatmul.mubr.msk.f32.gmra.mrb[84].mxu0 %vm613_vm3, %v3849_v24 }
0x14aa   :  { %12151 = vmatpush3.bf16.xpose.msk.msra.mxu0 %vm13791_vm2, %v12146_v1  ;;  %v4010_v13 = vpop.permute.xlu0 %4009 }
0x14ab   :  { %12154 = vmatprep.subr.msk.bf16.mxu0 %vm13791_vm2, %v12152_v6 }
0x14ae   :  { %v4014_v55 = vpop.permute.xlu0 %4013 }
0x14b2   :  { %12157 = vmatpush3.bf16.xpose.msk.msra.mxu0 %vm13791_vm2, %v12152_v6  ;;  %v13578_v6 = vld [vmem:[%s16815_s4 + $0x10] sm:$0xff] }
0x14c3   :  { %v3835_v26 = vpop.xlane.xlu1 %3834 }
0x14c4   :  { %13275 = vrcp.f32 %v3835_v26 }
0x14c7   :  { %v3832_v31 = vpop.xlane.xlu1 %3831 }
0x14c8   :  { %13277 = vrcp.f32 %v3832_v31 }
0x14cb   :  { %v4008_v57 = vpop.permute.xlu1 %4007 }
0x14ce   :  { %v13276_v49 = vpop.eup %13275 }
0x14cf   :  { %v3851_v58 = vmul.f32 %v13276_v49, %v15061_v7  ;;  %v4012_v62 = vpop.permute.xlu1 %4011 }
0x14d2   :  { %v13278_v17 = vpop.eup %13277 }
0x14d3   :  { %v3850_v11 = vmul.f32 %v13278_v17, %v15067_v61  ;;  %v4016_v8 = vpop.permute.xlu1 %4015  ;;  %v4018_v61 = vpop.permute.xlu0 %4017 }
0x14d5   :  { %11111 = vmatprep.mubr.msk.f32.mxu0 %vm613_vm3, %v3850_v11 }
0x14d6   :  { %11112 = vmatmul.mubr.msk.f32.gmra.mrb[86].mxu0 %vm613_vm3, %v3851_v58 }
0x14d7   :  { %11130 = vmatprep.mubr.msk.f32.mxu0 %vm443_vm1, %v4006_v28  ;;  %v4020_v7 = vpop.permute.xlu1 %4019  ;;  %v13579_v28 = vld [vmem:[%s16815_s4 + $0x28] sm:$0xff] }
0x14da   :  { %11131 = vmatmul.mubr.msk.f32.vlgmr.msra.gmra.mrb[88].mxu0 %vm443_vm1, %v4008_v57 }
0x14db   :  { %11133 = vmatprep.mubr.msk.f32.mxu0 %vm443_vm1, %v4010_v13  ;;  %v13580_v13 = vld [vmem:[%s16815_s4 + $0x20] sm:$0xff] }
0x14de   :  { %11134 = vmatmul.mubr.msk.f32.gmra.mrb[90].mxu0 %vm443_vm1, %v4012_v62 }
0x14df   :  { %11136 = vmatprep.mubr.msk.f32.mxu0 %vm443_vm1, %v4014_v55 }
0x14e2   :  { %11137 = vmatmul.mubr.msk.f32.gmra.mrb[92].mxu0 %vm443_vm1, %v4016_v8 }
0x14e3   :  { %11139 = vmatprep.mubr.msk.f32.mxu0 %vm443_vm1, %v4018_v61  ;;  %v13581_v61 = vld [vmem:[%s16815_s4 + $0x38] sm:$0xff] }
0x14e6   :  { %11140 = vmatmul.mubr.msk.f32.gmra.mrb[94].mxu0 %vm443_vm1, %v4020_v7 }
0x156c   :  { %v15117_v3 = vpop.f32.mrb[80].mxu0 }
0x156d   :  { %v15119_v19 = vpop.f32.mrb[81].mxu0 }
0x1574   :  { %v15121_v37 = vpop.f32.mrb[82].mxu0 }
0x1575   :  { %v15123_v16 = vpop.f32.mrb[83].mxu0 }
0x157c   :  { %v15125_v27 = vpop.f32.mrb[84].mxu0 }
0x157d   :  { %v15127_v46 = vpop.f32.mrb[85].mxu0 }
0x15a9   :  { %v15129_v50 = vpop.f32.mrb[86].mxu0 }
0x15aa   :  { %v15131_v39 = vpop.f32.mrb[87].mxu0 }
0x15ad   :  { %v11132_v38 = vpop.f32.mrb[88].mxu0 }
0x15ae   :  { %v4175_v2 = vmul.f32 0.35355338, %v11132_v38  ;;  %v4135_v56 = vpop.f32.mrb[89].mxu0 }
0x15af   :  { %v4174_v42 = vmul.f32 0.35355338, %v4135_v56 }
0x15b0   :  { %v4183_v10 = vadd.f32 %v13575_v41, %v4175_v2  ;;  %v13582_v2 = vld [vmem:[%s16815_s4 + $0x30] sm:$0xff] }
0x15b1   :  { %v4182_v59 = vadd.f32 %v13576_v21, %v4174_v42  ;;  %v11135_v30 = vpop.f32.mrb[90].mxu0 }
0x15b2   :  { %v4177_v33 = vmul.f32 0.35355338, %v11135_v30  ;;  %v4145_v54 = vpop.f32.mrb[91].mxu0  ;;  %v4193_v32 = vsel %vm613_vm3, %v4183_v10, -inf }
0x15b3   :  { %v4176_v1 = vmul.f32 0.35355338, %v4145_v54  ;;  %4194 = vmax.xlane.f32.xlu1 %v4193_v32  ;;  %v4190_v52 = vsel %vm613_vm3, %v4182_v59, -inf }
0x15b4   :  { %v4185_v14 = vadd.f32 %v13577_v51, %v4177_v33  ;;  %4191 = vmax.xlane.f32.xlu0 %v4190_v52 }
0x15b5   :  { %v11138_v0 = vpop.f32.mrb[92].mxu0  ;;  %v4184_v26 = vadd.f32 %v13578_v6, %v4176_v1 }
0x15b6   :  { %v4179_v60 = vmul.f32 0.35355338, %v11138_v0  ;;  %v4155_v5 = vpop.f32.mrb[93].mxu0  ;;  %v4199_v24 = vsel %vm613_vm3, %v4185_v14, -inf }
0x15b7   :  { %v4178_v31 = vmul.f32 0.35355338, %v4155_v5  ;;  %v4196_v8 = vsel %vm613_vm3, %v4184_v26, -inf }
0x15b8   :  { %v4187_v49 = vadd.f32 %v13579_v28, %v4179_v60  ;;  %4200 = vmax.xlane.f32.xlu0 %v4199_v24 }
0x15b9   :  { %v11141_v17 = vpop.f32.mrb[94].mxu0  ;;  %v4186_v62 = vadd.f32 %v13580_v13, %v4178_v31 }
0x15ba   :  { %v4181_v57 = vmul.f32 0.35355338, %v11141_v17  ;;  %v4165_v11 = vpop.f32.mrb[95].mxu0  ;;  %v4205_v58 = vsel %vm613_vm3, %v4187_v49, -inf }
0x15bb   :  { %v4180_v55 = vmul.f32 0.35355338, %v4165_v11  ;;  %4206 = vmax.xlane.f32.xlu1 %v4205_v58  ;;  %v4202_v42 = vsel %vm613_vm3, %v4186_v62, -inf }
0x15bc   :  { %v15159_v7 = vadd.f32 %v13581_v61, %v4181_v57  ;;  %4197 = vmax.xlane.f32.xlu0 %v4196_v8 }
0x15bd   :  { %v15166_v56 = vadd.f32 %v13582_v2, %v4180_v55 }
0x15be   :  { %v4211_v38 = vsel %vm613_vm3, %v15159_v7, -inf }
0x15bf   :  { %4212 = vmax.xlane.f32.xlu1 %v4211_v38  ;;  %v4208_v41 = vsel %vm613_vm3, %v15166_v56, -inf }
0x15c0   :  { %4203 = vmax.xlane.f32.xlu0 %v4202_v42 }
0x15c4   :  { %4209 = vmax.xlane.f32.xlu0 %v4208_v41 }
0x15d0   :  { %12801 = vrot.lane.b32.xlu1 %v14654_v22, %s13668_s21 }
0x15da   :  { %12796 = vrot.lane.b32.xlu0 %v14649_v15, %s13668_s21 }
0x1640   :  { %v4195_v21 = vpop.xlane.xlu1 %4194 }
0x1641   :  { %v4215_v30 = vsub.f32 %v4183_v10, %v4195_v21  ;;  %v4192_v33 = vpop.xlane.xlu0 %4191 }
0x1642   :  { %v4214_v54 = vsub.f32 %v4182_v59, %v4192_v33 }
0x1643   :  { %v4224_v32 = vmul.f32 1.442695, %v4215_v30 }
0x1644   :  { %v4222_v1 = vmul.f32 1.442695, %v4214_v54 }
0x1645   :  { %13279 = vpow2.f32 %v4224_v32  ;;  %v4201_v52 = vpop.xlane.xlu0 %4200 }
0x1646   :  { %13281 = vpow2.f32 %v4222_v1  ;;  %v4217_v51 = vsub.f32 %v4185_v14, %v4201_v52 }
0x1648   :  { %v4228_v0 = vmul.f32 1.442695, %v4217_v51  ;;  %v4207_v60 = vpop.xlane.xlu1 %4206 }
0x1649   :  { %v4219_v5 = vsub.f32 %v4187_v49, %v4207_v60  ;;  %v4198_v24 = vpop.xlane.xlu0 %4197 }
0x164a   :  { %13283 = vpow2.f32 %v4228_v0  ;;  %v4216_v6 = vsub.f32 %v4184_v26, %v4198_v24 }
0x164b   :  { %v4232_v22 = vmul.f32 1.442695, %v4219_v5 }
0x164c   :  { %v4226_v31 = vmul.f32 1.442695, %v4216_v6  ;;  %v4213_v28 = vpop.xlane.xlu1 %4212 }
0x164d   :  { %v4204_v15 = vpop.xlane.xlu0 %4203  ;;  %v4221_v1 = vsub.f32 %v15159_v7, %v4213_v28 }
0x164e   :  { %13285 = vpow2.f32 %v4226_v31  ;;  %v4218_v10 = vsub.f32 %v4186_v62, %v4204_v15 }
0x164f   :  { %v15175_v17 = vpop.eup %13279  ;;  %13287 = vpow2.f32 %v4232_v22  ;;  %v4236_v51 = vmul.f32 1.442695, %v4221_v1 }
0x1650   :  { %v15177_v59 = vpop.eup %13281  ;;  %v4230_v57 = vmul.f32 1.442695, %v4218_v10  ;;  %v4241_v14 = vsel %vm613_vm3, %v15175_v17, 0.0  ;;  %v12802_v11 = vpop.permute.xlu1 %12801 }
0x1651   :  { %4242 = vadd.xlane.f32.xlu1 %v4241_v14  ;;  %v4210_v49 = vpop.xlane.xlu0 %4209  ;;  %v4238_v26 = vsel %vm613_vm3, %v15177_v59, 0.0  ;;  %v12804_v55 = vunpack.i.h.bf16 %v12802_v11  ;;  %v12803_v8 = vunpack.i.l.bf16 %v12802_v11 }
0x1652   :  { %13289 = vpow2.f32 %v4230_v57  ;;  %4239 = vadd.xlane.f32.xlu0 %v4238_v26  ;;  %v4220_v52 = vsub.f32 %v15166_v56, %v4210_v49 }
0x1653   :  { %v12162_v30 = vpack.c.bf16 %v12804_v55, %v12803_v8  ;;  %13291 = vpow2.f32 %v4236_v51 }
0x1654   :  { %v15183_v58 = vpop.eup %13283  ;;  %v4234_v0 = vmul.f32 1.442695, %v4220_v52 }
0x1655   :  { %v12797_v13 = vpop.permute.xlu0 %12796  ;;  %v4247_v62 = vsel %vm613_vm3, %v15183_v58, 0.0 }
0x1656   :  { %v12799_v61 = vunpack.i.h.bf16 %v12797_v13  ;;  %v12798_v38 = vunpack.i.l.bf16 %v12797_v13  ;;  %4248 = vadd.xlane.f32.xlu1 %v4247_v62  ;;  %13293 = vpow2.f32 %v4234_v0  ;;  %v4692_v0 = vld [vmem:[#allocation2 + $0x120] sm:$0xff] }
0x1658   :  { %v15187_v2 = vpop.eup %13285  ;;  %v12158_v42 = vpack.c.bf16 %v12799_v61, %v12798_v38  ;;  %v2390_v38 = vld [vmem:[#allocation2 + $0xe0] sm:$0xff] }
0x1659   :  { %v4244_v41 = vsel %vm613_vm3, %v15187_v2, 0.0  ;;  %v15191_v21 = vpop.eup %13287 }
0x165a   :  { %4245 = vadd.xlane.f32.xlu0 %v4244_v41  ;;  %12159 = vmatprep.subr.bf16.mxu1 %v12158_v42  ;;  %v4253_v32 = vsel %vm613_vm3, %v15191_v21, 0.0 }
0x165b   :  { %12161 = vmatpush3.bf16.msra.mxu1 %v12158_v42  ;;  %v2392_v42 = vld [vmem:[#allocation2 + $0xf0] sm:$0xff] }
0x165c   :  { %v15193_v33 = vpop.eup %13289  ;;  %12163 = vmatprep.subr.bf16.mxu1 %v12162_v30 }
0x165d   :  { %v4250_v54 = vsel %vm613_vm3, %v15193_v33, 0.0  ;;  %v15205_v60 = vpop.eup %13291 }
0x165e   :  { %4251 = vadd.xlane.f32.xlu1 %v4250_v54  ;;  %4254 = vadd.xlane.f32.xlu0 %v4253_v32  ;;  %v4259_v24 = vsel %vm613_vm3, %v15205_v60, 0.0 }
0x165f   :  { %12165 = vmatpush3.bf16.msra.mxu1 %v12162_v30 }
0x1660   :  { %v15207_v5 = vpop.eup %13293 }
0x166f   :  { %12811 = vrot.lane.b32.xlu1 %v14669_v45, %s13668_s21  ;;  %v4256_v45 = vsel %vm613_vm3, %v15207_v5, 0.0 }
0x1674   :  { %12806 = vrot.lane.b32.xlu0 %v14663_v18, %s13668_s21 }
0x1693   :  { %4260 = vadd.xlane.f32.xlu0 %v4259_v24  ;;  %4257 = vadd.xlane.f32.xlu1 %v4256_v45 }
0x16a4   :  { %4441 = vrot.lane.b32.xlu1 %v14973_v40, %s13665_s29 }
0x16a8   :  { %4471 = vrot.lane.b32.xlu1 %v15119_v19, %s13669_s13 }
0x16a9   :  { %4439 = vrot.lane.b32.xlu0 %v14975_v53, %s13665_s29 }
0x16ac   :  { %4473 = vrot.lane.b32.xlu1 %v15117_v3, %s13669_s13 }
0x16ad   :  { %4443 = vrot.lane.b32.xlu0 %v14979_v29, %s13665_s29 }
0x16b0   :  { %4445 = vrot.lane.b32.xlu1 %v14977_v43, %s13665_s29 }
0x16b1   :  { %4475 = vrot.lane.b32.xlu0 %v15123_v16, %s13669_s13 }
0x16b4   :  { %4477 = vrot.lane.b32.xlu1 %v15121_v37, %s13669_s13 }
0x16b5   :  { %4447 = vrot.lane.b32.xlu0 %v14983_v4, %s13665_s29 }
0x16b8   :  { %4449 = vrot.lane.b32.xlu1 %v14981_v48, %s13665_s29 }
0x16de   :  { %v4243_v40 = vpop.xlane.xlu1 %4242 }
0x16df   :  { %v4240_v18 = vpop.xlane.xlu0 %4239 }
0x16e0   :  { %13295 = vrcp.f32 %v4240_v18 }
0x16e1   :  { %13297 = vrcp.f32 %v4243_v40 }
0x16e3   :  { %v4249_v53 = vpop.xlane.xlu1 %4248 }
0x16e7   :  { %v4246_v29 = vpop.xlane.xlu0 %4245 }
0x16e8   :  { %13299 = vrcp.f32 %v4246_v29 }
0x16e9   :  { %13301 = vrcp.f32 %v4249_v53 }
0x16ea   :  { %v13296_v3 = vpop.eup %13295 }
0x16eb   :  { %v4252_v19 = vpop.xlane.xlu1 %4251  ;;  %v4255_v43 = vpop.xlane.xlu0 %4254  ;;  %v4270_v7 = vmul.f32 %v13296_v3, %v15177_v59 }
0x16ec   :  { %13303 = vrcp.f32 %v4252_v19  ;;  %v13298_v28 = vpop.eup %13297 }
0x16ed   :  { %11158 = vmatprep.mubr.msk.f32.mxu1 %vm613_vm3, %v4270_v7  ;;  %13305 = vrcp.f32 %v4255_v43  ;;  %v4271_v10 = vmul.f32 %v13298_v28, %v15175_v17 }
0x16ef   :  { %v12812_v37 = vpop.permute.xlu1 %12811  ;;  %v12807_v16 = vpop.permute.xlu0 %12806 }
0x16f0   :  { %v12814_v4 = vunpack.i.h.bf16 %v12812_v37  ;;  %v12813_v56 = vunpack.i.l.bf16 %v12812_v37  ;;  %v12809_v6 = vunpack.i.h.bf16 %v12807_v16  ;;  %v12808_v48 = vunpack.i.l.bf16 %v12807_v16 }
0x16f2   :  { %v12166_v22 = vpack.c.bf16 %v12809_v6, %v12808_v48  ;;  %v12170_v31 = vpack.c.bf16 %v12814_v4, %v12813_v56  ;;  %v13300_v15 = vpop.eup %13299 }
0x16f3   :  { %v13302_v59 = vpop.eup %13301  ;;  %v4272_v57 = vmul.f32 %v13300_v15, %v15187_v2  ;;  %v2391_v2 = vld [vmem:[#allocation2 + $0xe8] sm:$0xff] }
0x16f4   :  { %12167 = vmatprep.subr.bf16.mxu1 %v12166_v22  ;;  %v4273_v49 = vmul.f32 %v13302_v59, %v15183_v58  ;;  %v12174_v41 = vpack.c.bf16 %v2391_v2, %v2390_v38 }
0x16f5   :  { %12169 = vmatpush3.bf16.msra.mxu1 %v12166_v22 }
0x16f6   :  { %12171 = vmatprep.subr.bf16.mxu1 %v12170_v31  ;;  %v13304_v14 = vpop.eup %13303 }
0x16f7   :  { %v13306_v26 = vpop.eup %13305  ;;  %v4274_v11 = vmul.f32 %v13304_v14, %v15193_v33 }
0x16f8   :  { %v4275_v13 = vmul.f32 %v13306_v26, %v15191_v21  ;;  %v2393_v21 = vld [vmem:[#allocation2 + $0xf8] sm:$0xff] }
0x16f9   :  { %12173 = vmatpush3.bf16.msra.mxu1 %v12170_v31  ;;  %v12178_v30 = vpack.c.bf16 %v2393_v21, %v2392_v42 }
0x16fa   :  { %12175 = vmatprep.subr.bf16.mxu1 %v12174_v41 }
0x16fc   :  { %11159 = vmatmul.mubr.msk.f32.vlgmr.msra.gmra.mrb[80].mxu1 %vm613_vm3, %v4271_v10 }
0x16fd   :  { %11161 = vmatprep.mubr.msk.f32.mxu1 %vm613_vm3, %v4272_v57  ;;  %12177 = vmatpush3.bf16.msra.mxu1 %v12174_v41 }
0x16fe   :  { %12179 = vmatprep.subr.bf16.mxu1 %v12178_v30 }
0x1700   :  { %11162 = vmatmul.mubr.msk.f32.gmra.mrb[82].mxu1 %vm613_vm3, %v4273_v49 }
0x1701   :  { %11164 = vmatprep.mubr.msk.f32.mxu1 %vm613_vm3, %v4274_v11  ;;  %12181 = vmatpush3.bf16.msra.mxu1 %v12178_v30 }
0x1704   :  { %11165 = vmatmul.mubr.msk.f32.gmra.mrb[84].mxu1 %vm613_vm3, %v4275_v13 }
0x1720   :  { %v4258_v17 = vpop.xlane.xlu1 %4257  ;;  %v4261_v62 = vpop.xlane.xlu0 %4260 }
0x1721   :  { %13307 = vrcp.f32 %v4258_v17 }
0x1722   :  { %13309 = vrcp.f32 %v4261_v62 }
0x1724   :  { %v4442_v45 = vpop.permute.xlu1 %4441  ;;  %v4440_v40 = vpop.permute.xlu0 %4439 }
0x1725   :  { %v4527_v7 = vsel %vm443_vm1, %v14831_v20, %v4440_v40  ;;  %v4528_v16 = vsel %vm443_vm1, %v14829_v9, %v4442_v45 }
0x1728   :  { %v4444_v53 = vpop.permute.xlu0 %4443 }
0x1729   :  { %v4529_v20 = vsel %vm443_vm1, %v14835_v63, %v4444_v53 }
0x172b   :  { %v13308_v55 = vpop.eup %13307 }
0x172c   :  { %v13310_v8 = vpop.eup %13309  ;;  %v4276_v61 = vmul.f32 %v13308_v55, %v15207_v5  ;;  %v4693_v5 = vld [vmem:[#allocation2 + $0x128] sm:$0xff]  ;;  %v4476_v3 = vpop.permute.xlu0 %4475 }
0x172d   :  { %v4277_v58 = vmul.f32 %v13310_v8, %v15205_v60  ;;  %v12190_v24 = vpack.c.bf16 %v4693_v5, %v4692_v0  ;;  %v4537_v15 = vsel %vm2221_vm4, %v4529_v20, %v4476_v3  ;;  %v9597_v0 = vld [vmem:[%s16813_s2 + $0x7] ss:$0 sm:$0xff]  ;;  %v4699_v5 = vld [vmem:[#allocation2 + $0x150] sm:$0xff] }
0x172e   :  { %11167 = vmatprep.mubr.msk.f32.mxu1 %vm613_vm3, %v4276_v61 }
0x172f   :  { %11168 = vmatmul.mubr.msk.f32.gmra.mrb[86].mxu1 %vm613_vm3, %v4277_v58  ;;  %12191 = vmatprep.subr.bf16.mxu1 %v12190_v24 }
0x1730   :  { %v4448_v43 = vpop.permute.xlu0 %4447 }
0x1731   :  { %v4531_v63 = vsel %vm443_vm1, %v14839_v35, %v4448_v43 }
0x17cf   :  { %v11160_v33 = vpop.f32.mrb[80].mxu1 }
0x17d0   :  { %4505 = vrot.lane.b32.xlu1 %v11160_v33, %s13670_s14  ;;  %v4392_v54 = vpop.f32.mrb[81].mxu1 }
0x17d1   :  { %4503 = vrot.lane.b32.xlu0 %v4392_v54, %s13670_s14  ;;  %v4689_v54 = vld [vmem:[#allocation2 + $0x110] sm:$0xff] }
0x17d3   :  { %v11163_v32 = vpop.f32.mrb[82].mxu1 }
0x17d4   :  { %4481 = vrot.lane.b32.xlu1 %v15125_v27, %s13669_s13  ;;  %v4402_v1 = vpop.f32.mrb[83].mxu1  ;;  %v4687_v27 = vld [vmem:[#allocation2 + $0x100] sm:$0xff] }
0x17d5   :  { %4479 = vrot.lane.b32.xlu0 %v15127_v46, %s13669_s13  ;;  %v4688_v46 = vld [vmem:[#allocation2 + $0x108] sm:$0xff] }
0x17d6   :  { %v12182_v60 = vpack.c.bf16 %v4688_v46, %v4687_v27  ;;  %v4698_v27 = vld [vmem:[#allocation2 + $0x148] sm:$0xff] }
0x17d7   :  { %v11166_v52 = vpop.f32.mrb[84].mxu1 }
0x17d8   :  { %4509 = vrot.lane.b32.xlu1 %v11163_v32, %s13670_s14  ;;  %v4412_v51 = vpop.f32.mrb[85].mxu1  ;;  %12183 = vmatprep.subr.bf16.mxu0 %v12182_v60  ;;  %v4690_v32 = vld [vmem:[#allocation2 + $0x118] sm:$0xff] }
0x17d9   :  { %4507 = vrot.lane.b32.xlu0 %v4402_v1, %s13670_s14  ;;  %12185 = vmatpush3.bf16.msra.mxu0 %v12182_v60  ;;  %v12186_v1 = vpack.c.bf16 %v4690_v32, %v4689_v54 }
0x17db   :  { %12187 = vmatprep.subr.bf16.mxu0 %v12186_v1 }
0x17dc   :  { %4453 = vrot.lane.b32.xlu1 %v14985_v36, %s13665_s29 }
0x17dd   :  { %4451 = vrot.lane.b32.xlu0 %v14987_v34, %s13665_s29  ;;  %12189 = vmatpush3.bf16.msra.mxu0 %v12186_v1 }
0x17e0   :  { %4513 = vrot.lane.b32.xlu1 %v11166_v52, %s13670_s14  ;;  %v4695_v52 = vld [vmem:[#allocation2 + $0x138] sm:$0xff] }
0x17e1   :  { %4511 = vrot.lane.b32.xlu0 %v4412_v51, %s13670_s14 }
0x17e4   :  { %4485 = vrot.lane.b32.xlu1 %v15129_v50, %s13669_s13  ;;  %v4472_v50 = vpop.permute.xlu1 %4471 }
0x17e5   :  { %4483 = vrot.lane.b32.xlu0 %v15131_v39, %s13669_s13  ;;  %v4535_v4 = vsel %vm2221_vm4, %v4527_v7, %v4472_v50 }
0x17e8   :  { %v4474_v18 = vpop.permute.xlu1 %4473 }
0x17e9   :  { %v4536_v6 = vsel %vm2221_vm4, %v4528_v16, %v4474_v18 }
0x17ec   :  { %v4446_v39 = vpop.permute.xlu1 %4445 }
0x17ed   :  { %v4530_v10 = vsel %vm443_vm1, %v14833_v23, %v4446_v39 }
0x17f0   :  { %v4478_v29 = vpop.permute.xlu1 %4477 }
0x17f1   :  { %v4538_v57 = vsel %vm2221_vm4, %v4530_v10, %v4478_v29 }
0x17f4   :  { %v4450_v19 = vpop.permute.xlu1 %4449 }
0x17f5   :  { %v4532_v23 = vsel %vm443_vm1, %v14837_v47, %v4450_v19 }
0x1802   :  { %v11169_v36 = vpop.f32.mrb[86].mxu1 }
0x1803   :  { %4517 = vrot.lane.b32.xlu1 %v11169_v36, %s13670_s14  ;;  %v4422_v34 = vpop.f32.mrb[87].mxu1 }
0x1804   :  { %4515 = vrot.lane.b32.xlu0 %v4422_v34, %s13670_s14 }
0x1842   :  { %v4506_v37 = vpop.permute.xlu1 %4505 }
0x1843   :  { %v4504_v56 = vpop.permute.xlu0 %4503  ;;  %v4544_v22 = vsel %vm2230_vm5, %v4536_v6, %v4506_v37  ;;  %v15342_v6 = vld [vmem:[%s16813_s2 + $0x8] ss:$0 sm:$0xff] }
0x1844   :  { %v4543_v48 = vsel %vm2230_vm5, %v4535_v4, %v4504_v56  ;;  %v9619_v56 = vld [vmem:[%s16813_s2 + $0x9] ss:$0 sm:$0xff] }
0x1845   :  { %11178 = vmatprep.mubr.msk.f32.mxu1 %vm91_vm0, %v4543_v48 }
0x1846   :  { %v4482_v31 = vpop.permute.xlu1 %4481  ;;  %11179 = vmatmul.mubr.msk.f32.vlgmr.msra.gmra.mrb[88].mxu1 %vm91_vm0, %v4544_v22 }
0x1847   :  { %v4480_v28 = vpop.permute.xlu0 %4479  ;;  %12193 = vmatpush3.bf16.msra.mxu1 %v12190_v24  ;;  %v4540_v55 = vsel %vm2221_vm4, %v4532_v23, %v4482_v31  ;;  %v4700_v24 = vld [vmem:[#allocation2 + $0x158] sm:$0xff] }
0x1848   :  { %v4539_v17 = vsel %vm2221_vm4, %v4531_v63, %v4480_v28  ;;  %v12202_v50 = vpack.c.bf16 %v4700_v24, %v4699_v5 }
0x184a   :  { %v4510_v9 = vpop.permute.xlu1 %4509 }
0x184b   :  { %v4508_v59 = vpop.permute.xlu0 %4507  ;;  %v4546_v49 = vsel %vm2230_vm5, %v4538_v57, %v4510_v9 }
0x184c   :  { %v4545_v14 = vsel %vm2230_vm5, %v4537_v15, %v4508_v59 }
0x184d   :  { %11181 = vmatprep.mubr.msk.f32.mxu1 %vm91_vm0, %v4545_v14 }
0x184e   :  { %v4454_v26 = vpop.permute.xlu1 %4453  ;;  %11182 = vmatmul.mubr.msk.f32.gmra.mrb[90].mxu1 %vm91_vm0, %v4546_v49 }
0x184f   :  { %v4452_v11 = vpop.permute.xlu0 %4451  ;;  %v4534_v47 = vsel %vm443_vm1, %v14841_v12, %v4454_v26  ;;  %v4697_v12 = vld [vmem:[#allocation2 + $0x140] sm:$0xff] }
0x1850   :  { %v4533_v35 = vsel %vm443_vm1, %v14843_v44, %v4452_v11  ;;  %v4694_v44 = vld [vmem:[#allocation2 + $0x130] sm:$0xff]  ;;  %v12198_v46 = vpack.c.bf16 %v4698_v27, %v4697_v12 }
0x1851   :  { %v12194_v51 = vpack.c.bf16 %v4695_v52, %v4694_v44  ;;  %v9628_v52 = vld [vmem:[%s16813_s2 + $0xa] ss:$0 sm:$0xff] }
0x1852   :  { %v4514_v13 = vpop.permute.xlu1 %4513  ;;  %12199 = vmatprep.subr.bf16.mxu0 %v12198_v46 }
0x1853   :  { %v4512_v62 = vpop.permute.xlu0 %4511  ;;  %v4548_v61 = vsel %vm2230_vm5, %v4540_v55, %v4514_v13  ;;  %12195 = vmatprep.subr.bf16.mxu1 %v12194_v51 }
0x1854   :  { %v4547_v8 = vsel %vm2230_vm5, %v4539_v17, %v4512_v62  ;;  %12197 = vmatpush3.bf16.msra.mxu1 %v12194_v51 }
0x1855   :  { %11184 = vmatprep.mubr.msk.f32.mxu1 %vm91_vm0, %v4547_v8 }
0x1856   :  { %11185 = vmatmul.mubr.msk.f32.gmra.mrb[92].mxu1 %vm91_vm0, %v4548_v61  ;;  %v4486_v58 = vpop.permute.xlu1 %4485 }
0x1857   :  { %v4484_v38 = vpop.permute.xlu0 %4483  ;;  %v4542_v21 = vsel %vm2221_vm4, %v4534_v47, %v4486_v58 }
0x1858   :  { %v4541_v42 = vsel %vm2221_vm4, %v4533_v35, %v4484_v38 }
0x1875   :  { %v4518_v2 = vpop.permute.xlu1 %4517 }
0x1876   :  { %v4516_v41 = vpop.permute.xlu0 %4515  ;;  %v4550_v33 = vsel %vm2230_vm5, %v4542_v21, %v4518_v2 }
0x1877   :  { %v4549_v30 = vsel %vm2230_vm5, %v4541_v42, %v4516_v41 }
0x1878   :  { %11187 = vmatprep.mubr.msk.f32.mxu1 %vm91_vm0, %v4549_v30 }
0x1879   :  { %11188 = vmatmul.mubr.msk.f32.gmra.mrb[94].mxu1 %vm91_vm0, %v4550_v33 }
0x1919   :  { %v11180_v60 = vpop.f32.mrb[88].mxu1 }
0x191a   :  { %v4647_v36 = vpop.f32.mrb[89].mxu1  ;;  %v4653_v45 = vadd.f32 %v11180_v60, %v9597_v0 }
0x191b   :  { %v4648_v34 = vadd.f32 %v9597_v0, %v4647_v36 }
0x191d   :  { %11198 = vmatprep.mubr.msk.f32.mxu0 %vm91_vm0, %v4648_v34  ;;  %11218 = vmatprep.mubr.msk.f32.mxu1 %vm91_vm0, %v4648_v34 }
0x191e   :  { %11199 = vmatmul.mubr.msk.f32.vlgmr.msra.gmra.mrb[96].mxu0 %vm91_vm0, %v4653_v45  ;;  %11219 = vmatmul.mubr.msk.f32.vlgmr.msra.gmra.mrb[96].mxu1 %vm91_vm0, %v4653_v45 }
0x191f   :  { %12201 = vmatpush3.bf16.msra.mxu0 %v12198_v46 }
0x1920   :  { %12203 = vmatprep.subr.bf16.mxu0 %v12202_v50 }
0x1921   :  { %v11183_v18 = vpop.f32.mrb[90].mxu1 }
0x1922   :  { %v4657_v40 = vpop.f32.mrb[91].mxu1  ;;  %v4663_v53 = vadd.f32 %v11183_v18, %v9597_v0 }
0x1923   :  { %v4658_v39 = vadd.f32 %v9597_v0, %v4657_v40  ;;  %12205 = vmatpush3.bf16.msra.mxu0 %v12202_v50 }
0x1925   :  { %11201 = vmatprep.mubr.msk.f32.mxu0 %vm91_vm0, %v4658_v39  ;;  %11221 = vmatprep.mubr.msk.f32.mxu1 %vm91_vm0, %v4658_v39 }
0x1926   :  { %11202 = vmatmul.mubr.msk.f32.gmra.mrb[98].mxu0 %vm91_vm0, %v4663_v53  ;;  %11222 = vmatmul.mubr.msk.f32.gmra.mrb[98].mxu1 %vm91_vm0, %v4663_v53 }
0x1929   :  { %v11186_v29 = vpop.f32.mrb[92].mxu1 }
0x192a   :  { %v4667_v3 = vpop.f32.mrb[93].mxu1  ;;  %v4673_v43 = vadd.f32 %v11186_v29, %v9597_v0 }
0x192b   :  { %v4668_v19 = vadd.f32 %v9597_v0, %v4667_v3 }
0x192d   :  { %11204 = vmatprep.mubr.msk.f32.mxu0 %vm91_vm0, %v4668_v19  ;;  %11224 = vmatprep.mubr.msk.f32.mxu1 %vm91_vm0, %v4668_v19 }
0x192e   :  { %11205 = vmatmul.mubr.msk.f32.gmra.mrb[100].mxu0 %vm91_vm0, %v4673_v43  ;;  %11225 = vmatmul.mubr.msk.f32.gmra.mrb[100].mxu1 %vm91_vm0, %v4673_v43 }
0x194c   :  { %v11189_v7 = vpop.f32.mrb[94].mxu1 }
0x194d   :  { %v4677_v37 = vpop.f32.mrb[95].mxu1  ;;  %v4683_v4 = vadd.f32 %v11189_v7, %v9597_v0 }
0x194e   :  { %v4678_v16 = vadd.f32 %v9597_v0, %v4677_v37 }
0x1950   :  { %11207 = vmatprep.mubr.msk.f32.mxu0 %vm91_vm0, %v4678_v16  ;;  %11227 = vmatprep.mubr.msk.f32.mxu1 %vm91_vm0, %v4678_v16 }
0x1951   :  { %11208 = vmatmul.mubr.msk.f32.gmra.mrb[102].mxu0 %vm91_vm0, %v4683_v4  ;;  %11228 = vmatmul.mubr.msk.f32.gmra.mrb[102].mxu1 %vm91_vm0, %v4683_v4 }
0x1952   :  { %11238 = vmatprep.mubr.msk.f32.mxu0 %vm91_vm0, %v4648_v34 }
0x1955   :  { %11239 = vmatmul.mubr.msk.f32.vlgmr.msra.gmra.mrb[104].mxu0 %vm91_vm0, %v4653_v45 }
0x1956   :  { %11241 = vmatprep.mubr.msk.f32.mxu0 %vm91_vm0, %v4658_v39 }
0x1959   :  { %11242 = vmatmul.mubr.msk.f32.gmra.mrb[106].mxu0 %vm91_vm0, %v4663_v53 }
0x195a   :  { %11244 = vmatprep.mubr.msk.f32.mxu0 %vm91_vm0, %v4668_v19 }
0x195d   :  { %11245 = vmatmul.mubr.msk.f32.gmra.mrb[108].mxu0 %vm91_vm0, %v4673_v43 }
0x195e   :  { %11247 = vmatprep.mubr.msk.f32.mxu0 %vm91_vm0, %v4678_v16 }
0x1961   :  { %11248 = vmatmul.mubr.msk.f32.gmra.mrb[110].mxu0 %vm91_vm0, %v4683_v4 }
0x19f1   :  { %v11200_v48 = vpop.f32.mrb[96].mxu0  ;;  %v11220_v22 = vpop.f32.mrb[96].mxu1 }
0x19f2   :  { %v4927_v31 = vadd.f32 %v11220_v22, %v9619_v56  ;;  %v4810_v28 = vpop.f32.mrb[97].mxu0  ;;  %v4921_v20 = vpop.f32.mrb[97].mxu1  ;;  %v15394_v18 = vadd.f32 %v11200_v48, %v15342_v6 }
0x19f3   :  { %v15345_v9 = vadd.f32 %v15342_v6, %v4810_v28  ;;  %v4922_v15 = vadd.f32 %v9619_v56, %v4921_v20 }
0x19f5   :  { %11266 = vmatprep.mubr.msk.f32.mxu1 %vm443_vm1, %v15345_v9  ;;  %v12206_v10 = vpack.c.bf16 %v4927_v31, %v4922_v15  ;;  %v15349_v59 = vpack.i.bf16 %v4927_v31, %v4922_v15 }
0x19f7   :  { %12208 = vmatprep.subr.msk.bf16.mxu1 %vm13791_vm2, %v12206_v10 }
0x19f8   :  { %12211 = vmatpush3.bf16.xpose.msk.msra.mxu1 %vm13791_vm2, %v12206_v10  ;;  %v15422_v10 = vld [vmem:[%s16814_s3 + $0x8] sm:$0xff] }
0x19f9   :  { %v11203_v57 = vpop.f32.mrb[98].mxu0  ;;  %v11223_v14 = vpop.f32.mrb[98].mxu1 }
0x19fa   :  { %v15356_v49 = vadd.f32 %v11203_v57, %v15342_v6  ;;  %v4937_v26 = vadd.f32 %v11223_v14, %v9619_v56  ;;  %v4820_v11 = vpop.f32.mrb[99].mxu0  ;;  %v4931_v63 = vpop.f32.mrb[99].mxu1  ;;  %v15428_v14 = vld [vmem:[%s16814_s3] sm:$0xff] }
0x19fb   :  { %v4932_v13 = vadd.f32 %v9619_v56, %v4931_v63  ;;  %v15399_v29 = vadd.f32 %v15342_v6, %v4820_v11 }
0x19fd   :  { %v12212_v23 = vpack.c.bf16 %v4937_v26, %v4932_v13  ;;  %v15358_v17 = vpack.i.bf16 %v4937_v26, %v4932_v13 }
0x19ff   :  { %12214 = vmatprep.subr.msk.bf16.mxu1 %vm13791_vm2, %v12212_v23 }
0x1a00   :  { %12217 = vmatpush3.bf16.xpose.msk.msra.mxu1 %vm13791_vm2, %v12212_v23 }
0x1a01   :  { %v11206_v62 = vpop.f32.mrb[100].mxu0  ;;  %v11226_v55 = vpop.f32.mrb[100].mxu1 }
0x1a02   :  { %v15365_v8 = vadd.f32 %v11206_v62, %v15342_v6  ;;  %v4947_v61 = vadd.f32 %v11226_v55, %v9619_v56  ;;  %v4830_v58 = vpop.f32.mrb[101].mxu0  ;;  %v4941_v38 = vpop.f32.mrb[101].mxu1 }
0x1a03   :  { %v15368_v35 = vadd.f32 %v15342_v6, %v4830_v58  ;;  %v4942_v2 = vadd.f32 %v9619_v56, %v4941_v38 }
0x1a05   :  { %v12218_v47 = vpack.c.bf16 %v4947_v61, %v4942_v2  ;;  %v15370_v42 = vpack.i.bf16 %v4947_v61, %v4942_v2  ;;  %v15436_v61 = vld [vmem:[%s16814_s3 + $0x18] sm:$0xff] }
0x1a07   :  { %12220 = vmatprep.subr.msk.bf16.mxu1 %vm13791_vm2, %v12218_v47 }
0x1a08   :  { %12223 = vmatpush3.bf16.xpose.msk.msra.mxu1 %vm13791_vm2, %v12218_v47 }
0x1a24   :  { %v11209_v41 = vpop.f32.mrb[102].mxu0  ;;  %v11229_v21 = vpop.f32.mrb[102].mxu1 }
0x1a25   :  { %v15377_v30 = vadd.f32 %v11209_v41, %v15342_v6  ;;  %v4957_v33 = vadd.f32 %v11229_v21, %v9619_v56  ;;  %v4840_v54 = vpop.f32.mrb[103].mxu0  ;;  %v4951_v32 = vpop.f32.mrb[103].mxu1  ;;  %v15443_v21 = vld [vmem:[%s16814_s3 + $0x10] sm:$0xff] }
0x1a26   :  { %v15380_v44 = vadd.f32 %v15342_v6, %v4840_v54  ;;  %v4952_v1 = vadd.f32 %v9619_v56, %v4951_v32  ;;  %v15449_v32 = vld [vmem:[%s16814_s3 + $0x28] sm:$0xff] }
0x1a28   :  { %v11240_v51 = vpop.f32.mrb[104].mxu0  ;;  %v12224_v12 = vpack.c.bf16 %v4957_v33, %v4952_v1  ;;  %v15385_v27 = vpack.i.bf16 %v4957_v33, %v4952_v1 }
0x1a29   :  { %v5038_v46 = vadd.f32 %v11240_v51, %v9628_v52  ;;  %v5032_v0 = vpop.f32.mrb[105].mxu0 }
0x1a2a   :  { %v5033_v60 = vadd.f32 %v9628_v52, %v5032_v0  ;;  %12226 = vmatprep.subr.msk.bf16.mxu1 %vm13791_vm2, %v12224_v12  ;;  %v15456_v0 = vld [vmem:[%s16814_s3 + $0x20] sm:$0xff] }
0x1a2b   :  { %12229 = vmatpush3.bf16.xpose.msk.msra.mxu1 %vm13791_vm2, %v12224_v12 }
0x1a2c   :  { %v11243_v5 = vpop.f32.mrb[106].mxu0  ;;  %v12230_v24 = vpack.c.bf16 %v5038_v46, %v5033_v60  ;;  %v15391_v36 = vpack.i.bf16 %v5038_v46, %v5033_v60 }
0x1a2d   :  { %v5048_v34 = vadd.f32 %v11243_v5, %v9628_v52  ;;  %v5042_v45 = vpop.f32.mrb[107].mxu0 }
0x1a2e   :  { %v5043_v50 = vadd.f32 %v9628_v52, %v5042_v45  ;;  %12231 = vmatprep.subr.bf16.mxu0 %v12230_v24 }
0x1a2f   :  { %12233 = vmatpush3.bf16.msra.mxu0 %v12230_v24 }
0x1a30   :  { %v11246_v40 = vpop.f32.mrb[108].mxu0  ;;  %v12234_v39 = vpack.c.bf16 %v5048_v34, %v5043_v50  ;;  %v15396_v53 = vpack.i.bf16 %v5048_v34, %v5043_v50  ;;  %v15463_v34 = vld [vmem:[%s16814_s3 + $0x38] sm:$0xff] }
0x1a31   :  { %v5058_v3 = vadd.f32 %v11246_v40, %v9628_v52  ;;  %v5052_v19 = vpop.f32.mrb[109].mxu0  ;;  %v15470_v40 = vld [vmem:[%s16814_s3 + $0x30] sm:$0xff] }
0x1a32   :  { %v5053_v43 = vadd.f32 %v9628_v52, %v5052_v19  ;;  %11267 = vmatmul.mubr.msk.f32.vlgmr.msra.gmra.mrb[104].mxu1 %vm443_vm1, %v15394_v18  ;;  %12235 = vmatprep.subr.bf16.mxu0 %v12234_v39 }
0x1a33   :  { %11269 = vmatprep.mubr.msk.f32.mxu1 %vm443_vm1, %v15399_v29  ;;  %12237 = vmatpush3.bf16.msra.mxu0 %v12234_v39 }
0x1a34   :  { %v11249_v7 = vpop.f32.mrb[110].mxu0  ;;  %v12238_v37 = vpack.c.bf16 %v5058_v3, %v5053_v43  ;;  %v15405_v16 = vpack.i.bf16 %v5058_v3, %v5053_v43 }
0x1a35   :  { %v5068_v4 = vadd.f32 %v11249_v7, %v9628_v52  ;;  %v5062_v56 = vpop.f32.mrb[111].mxu0 }
0x1a36   :  { %v5063_v48 = vadd.f32 %v9628_v52, %v5062_v56  ;;  %11270 = vmatmul.mubr.msk.f32.gmra.mrb[106].mxu1 %vm443_vm1, %v15356_v49  ;;  %12239 = vmatprep.subr.bf16.mxu0 %v12238_v37 }
0x1a37   :  { %11272 = vmatprep.mubr.msk.f32.mxu1 %vm443_vm1, %v15368_v35  ;;  %12241 = vmatpush3.bf16.msra.mxu0 %v12238_v37 }
0x1a38   :  { %v12242_v6 = vpack.c.bf16 %v5068_v4, %v5063_v48  ;;  %v15411_v22 = vpack.i.bf16 %v5068_v4, %v5063_v48 }
0x1a3a   :  { %11273 = vmatmul.mubr.msk.f32.gmra.mrb[108].mxu1 %vm443_vm1, %v15365_v8  ;;  %12243 = vmatprep.subr.bf16.mxu0 %v12242_v6 }
0x1a3b   :  { %11275 = vmatprep.mubr.msk.f32.mxu1 %vm443_vm1, %v15380_v44  ;;  %12245 = vmatpush3.bf16.msra.mxu0 %v12242_v6 }
0x1a3e   :  { %11276 = vmatmul.mubr.msk.f32.gmra.mrb[110].mxu1 %vm443_vm1, %v15377_v30 }
0x1b05   :  { %v11268_v31 = vpop.f32.mrb[104].mxu1 }
0x1b06   :  { %v5225_v28 = vmul.f32 0.35355338, %v11268_v31  ;;  %v5185_v20 = vpop.f32.mrb[105].mxu1 }
0x1b07   :  { %v5224_v15 = vmul.f32 0.35355338, %v5185_v20 }
0x1b08   :  { %v5233_v57 = vadd.f32 %v15422_v10, %v5225_v28 }
0x1b09   :  { %v5232_v26 = vadd.f32 %v15428_v14, %v5224_v15  ;;  %v11271_v11 = vpop.f32.mrb[106].mxu1 }
0x1b0a   :  { %v5227_v63 = vmul.f32 0.35355338, %v11271_v11  ;;  %v5195_v13 = vpop.f32.mrb[107].mxu1  ;;  %v5243_v23 = vsel %vm613_vm3, %v5233_v57, -inf }
0x1b0b   :  { %v5226_v62 = vmul.f32 0.35355338, %v5195_v13  ;;  %5244 = vmax.xlane.f32.xlu1 %v5243_v23  ;;  %v5240_v55 = vsel %vm613_vm3, %v5232_v26, -inf }
0x1b0c   :  { %v5235_v58 = vadd.f32 %v15436_v61, %v5227_v63  ;;  %5241 = vmax.xlane.f32.xlu0 %v5240_v55 }
0x1b0d   :  { %v11274_v38 = vpop.f32.mrb[108].mxu1  ;;  %v5234_v33 = vadd.f32 %v15443_v21, %v5226_v62 }
0x1b0e   :  { %v5229_v2 = vmul.f32 0.35355338, %v11274_v38  ;;  %v5205_v47 = vpop.f32.mrb[109].mxu1  ;;  %v5249_v41 = vsel %vm613_vm3, %v5235_v58, -inf }
0x1b0f   :  { %v5228_v54 = vmul.f32 0.35355338, %v5205_v47  ;;  %v5246_v24 = vsel %vm613_vm3, %v5234_v33, -inf }
0x1b10   :  { %v5237_v1 = vadd.f32 %v15449_v32, %v5229_v2  ;;  %5250 = vmax.xlane.f32.xlu0 %v5249_v41 }
0x1b11   :  { %v11277_v52 = vpop.f32.mrb[110].mxu1  ;;  %v5236_v60 = vadd.f32 %v15456_v0, %v5228_v54 }
0x1b12   :  { %v5231_v51 = vmul.f32 0.35355338, %v11277_v52  ;;  %v5215_v12 = vpop.f32.mrb[111].mxu1  ;;  %v5255_v46 = vsel %vm613_vm3, %v5237_v1, -inf }
0x1b13   :  { %v5230_v5 = vmul.f32 0.35355338, %v5215_v12  ;;  %5256 = vmax.xlane.f32.xlu1 %v5255_v46  ;;  %v5252_v3 = vsel %vm613_vm3, %v5236_v60, -inf }
0x1b14   :  { %v5239_v45 = vadd.f32 %v15463_v34, %v5231_v51  ;;  %5247 = vmax.xlane.f32.xlu0 %v5246_v24 }
0x1b15   :  { %v5238_v39 = vadd.f32 %v15470_v40, %v5230_v5 }
0x1b16   :  { %v5261_v50 = vsel %vm613_vm3, %v5239_v45, -inf }
0x1b17   :  { %5262 = vmax.xlane.f32.xlu1 %v5261_v50  ;;  %v5258_v19 = vsel %vm613_vm3, %v5238_v39, -inf }
0x1b18   :  { %5253 = vmax.xlane.f32.xlu0 %v5252_v3 }
0x1b1c   :  { %5259 = vmax.xlane.f32.xlu0 %v5258_v19 }
0x1b98   :  { %v5245_v43 = vpop.xlane.xlu1 %5244 }
0x1b99   :  { %v5265_v7 = vsub.f32 %v5233_v57, %v5245_v43  ;;  %v5242_v37 = vpop.xlane.xlu0 %5241 }
0x1b9a   :  { %v5264_v4 = vsub.f32 %v5232_v26, %v5242_v37 }
0x1b9b   :  { %v5274_v56 = vmul.f32 1.442695, %v5265_v7 }
0x1b9c   :  { %v5272_v48 = vmul.f32 1.442695, %v5264_v4 }
0x1b9d   :  { %13311 = vpow2.f32 %v5274_v56  ;;  %v5251_v15 = vpop.xlane.xlu0 %5250 }
0x1b9e   :  { %13313 = vpow2.f32 %v5272_v48  ;;  %v5267_v26 = vsub.f32 %v5235_v58, %v5251_v15 }
0x1ba0   :  { %v5257_v11 = vpop.xlane.xlu1 %5256  ;;  %v5278_v23 = vmul.f32 1.442695, %v5267_v26 }
0x1ba1   :  { %v5248_v57 = vpop.xlane.xlu0 %5247  ;;  %v5269_v62 = vsub.f32 %v5237_v1, %v5257_v11 }
0x1ba2   :  { %v5266_v63 = vsub.f32 %v5234_v33, %v5248_v57  ;;  %13315 = vpow2.f32 %v5278_v23 }
0x1ba3   :  { %v5282_v2 = vmul.f32 1.442695, %v5269_v62 }
0x1ba4   :  { %v5276_v55 = vmul.f32 1.442695, %v5266_v63  ;;  %v5263_v46 = vpop.xlane.xlu1 %5262 }
0x1ba5   :  { %v5254_v13 = vpop.xlane.xlu0 %5253 }
0x1ba6   :  { %v5268_v38 = vsub.f32 %v5236_v60, %v5254_v13  ;;  %13317 = vpow2.f32 %v5276_v55  ;;  %v5271_v60 = vsub.f32 %v5239_v45, %v5263_v46 }
0x1ba7   :  { %v15475_v6 = vpop.eup %13311  ;;  %13319 = vpow2.f32 %v5282_v2 }
0x1ba8   :  { %v15477_v31 = vpop.eup %13313  ;;  %v5291_v28 = vsel %vm613_vm3, %v15475_v6, 0.0  ;;  %v5280_v47 = vmul.f32 1.442695, %v5268_v38  ;;  %v5286_v24 = vmul.f32 1.442695, %v5271_v60 }
0x1ba9   :  { %5292 = vadd.xlane.f32.xlu1 %v5291_v28  ;;  %v5288_v20 = vsel %vm613_vm3, %v15477_v31, 0.0  ;;  %v5260_v5 = vpop.xlane.xlu0 %5259 }
0x1baa   :  { %5289 = vadd.xlane.f32.xlu0 %v5288_v20  ;;  %13321 = vpow2.f32 %v5280_v47  ;;  %v5270_v50 = vsub.f32 %v5238_v39, %v5260_v5 }
0x1bab   :  { %13323 = vpow2.f32 %v5286_v24 }
0x1bac   :  { %v15487_v41 = vpop.eup %13315  ;;  %v5284_v3 = vmul.f32 1.442695, %v5270_v50 }
0x1bad   :  { %v5297_v58 = vsel %vm613_vm3, %v15487_v41, 0.0 }
0x1bae   :  { %13325 = vpow2.f32 %v5284_v3 }
0x1bb0   :  { %v15489_v54 = vpop.eup %13317 }
0x1bb1   :  { %v15493_v52 = vpop.eup %13319  ;;  %v5294_v33 = vsel %vm613_vm3, %v15489_v54, 0.0 }
0x1bb2   :  { %v5303_v51 = vsel %vm613_vm3, %v15493_v52, 0.0 }
0x1bb4   :  { %v15497_v1 = vpop.eup %13321 }
0x1bb5   :  { %v5300_v12 = vsel %vm613_vm3, %v15497_v1, 0.0  ;;  %v15515_v19 = vpop.eup %13323 }
0x1bb6   :  { %v5309_v45 = vsel %vm613_vm3, %v15515_v19, 0.0 }
0x1bb8   :  { %v15519_v43 = vpop.eup %13325 }
0x1bb9   :  { %v5306_v39 = vsel %vm613_vm3, %v15519_v43, 0.0 }
0x1bba   :  { %12821 = vrot.lane.b32.xlu1 %v15358_v17, %s13666_s19 }
0x1bc0   :  { %12816 = vrot.lane.b32.xlu0 %v15349_v59, %s13666_s19 }
0x1bde   :  { %5298 = vadd.xlane.f32.xlu1 %v5297_v58 }
0x1bdf   :  { %5295 = vadd.xlane.f32.xlu0 %v5294_v33 }
0x1be2   :  { %5304 = vadd.xlane.f32.xlu1 %v5303_v51 }
0x1be3   :  { %5301 = vadd.xlane.f32.xlu0 %v5300_v12 }
0x1bf3   :  { %12831 = vrot.lane.b32.xlu1 %v15385_v27, %s13666_s19 }
0x1bf9   :  { %12826 = vrot.lane.b32.xlu0 %v15370_v42, %s13666_s19 }
0x1bfd   :  { %5457 = vrot.lane.b32.xlu0 %v15345_v9, %s13666_s19 }
0x1c01   :  { %5461 = vrot.lane.b32.xlu0 %v15399_v29, %s13666_s19 }
0x1c05   :  { %5465 = vrot.lane.b32.xlu0 %v15368_v35, %s13666_s19 }
0x1c09   :  { %5469 = vrot.lane.b32.xlu0 %v15380_v44, %s13666_s19 }
0x1c17   :  { %5310 = vadd.xlane.f32.xlu1 %v5309_v45 }
0x1c1b   :  { %5307 = vadd.xlane.f32.xlu1 %v5306_v39 }
0x1c2c   :  { %5459 = vrot.lane.b32.xlu1 %v15394_v18, %s13666_s19 }
0x1c30   :  { %5463 = vrot.lane.b32.xlu1 %v15356_v49, %s13666_s19 }
0x1c34   :  { %5467 = vrot.lane.b32.xlu1 %v15365_v8, %s13666_s19 }
0x1c36   :  { %v5293_v7 = vpop.xlane.xlu1 %5292 }
0x1c37   :  { %13327 = vrcp.f32 %v5293_v7  ;;  %v5290_v37 = vpop.xlane.xlu0 %5289 }
0x1c38   :  { %13329 = vrcp.f32 %v5290_v37  ;;  %5471 = vrot.lane.b32.xlu1 %v15377_v30, %s13666_s19 }
0x1c3a   :  { %v12822_v20 = vpop.permute.xlu1 %12821 }
0x1c3b   :  { %v12817_v4 = vpop.permute.xlu0 %12816  ;;  %v12824_v26 = vunpack.i.h.bf16 %v12822_v20  ;;  %v12823_v11 = vunpack.i.l.bf16 %v12822_v20 }
0x1c3c   :  { %v12819_v56 = vunpack.i.h.bf16 %v12817_v4  ;;  %v12818_v48 = vunpack.i.l.bf16 %v12817_v4 }
0x1c3d   :  { %v12252_v23 = vpack.c.bf16 %v12824_v26, %v12823_v11 }
0x1c3e   :  { %v12246_v28 = vpack.c.bf16 %v12819_v56, %v12818_v48 }
0x1c40   :  { %12248 = vmatprep.subr.msk.bf16.mxu0 %vm13791_vm2, %v12246_v28 }
0x1c41   :  { %v13328_v15 = vpop.eup %13327 }
0x1c42   :  { %v13330_v57 = vpop.eup %13329  ;;  %v5321_v13 = vmul.f32 %v13328_v15, %v15475_v6 }
0x1c43   :  { %v5320_v63 = vmul.f32 %v13330_v57, %v15477_v31 }
0x1c45   :  { %11294 = vmatprep.mubr.msk.f32.mxu0 %vm613_vm3, %v5320_v63 }
0x1c46   :  { %11295 = vmatmul.mubr.msk.f32.vlgmr.msra.gmra.mrb[112].mxu0 %vm613_vm3, %v5321_v13 }
0x1c47   :  { %12251 = vmatpush3.bf16.xpose.msk.msra.mxu0 %vm13791_vm2, %v12246_v28 }
0x1c48   :  { %12254 = vmatprep.subr.msk.bf16.mxu0 %vm13791_vm2, %v12252_v23 }
0x1c4f   :  { %12257 = vmatpush3.bf16.xpose.msk.msra.mxu0 %vm13791_vm2, %v12252_v23 }
0x1c6b   :  { %v5299_v62 = vpop.xlane.xlu1 %5298 }
0x1c6c   :  { %13331 = vrcp.f32 %v5299_v62  ;;  %v5296_v55 = vpop.xlane.xlu0 %5295 }
0x1c6d   :  { %13333 = vrcp.f32 %v5296_v55 }
0x1c6f   :  { %v5305_v31 = vpop.xlane.xlu1 %5304 }
0x1c70   :  { %13335 = vrcp.f32 %v5305_v31  ;;  %v5302_v6 = vpop.xlane.xlu0 %5301 }
0x1c71   :  { %13337 = vrcp.f32 %v5302_v6 }
0x1c73   :  { %v12832_v38 = vpop.permute.xlu1 %12831 }
0x1c74   :  { %v12827_v2 = vpop.permute.xlu0 %12826  ;;  %v12834_v47 = vunpack.i.h.bf16 %v12832_v38  ;;  %v12833_v58 = vunpack.i.l.bf16 %v12832_v38 }
0x1c75   :  { %v12829_v33 = vunpack.i.h.bf16 %v12827_v2  ;;  %v12828_v51 = vunpack.i.l.bf16 %v12827_v2 }
0x1c76   :  { %v13332_v12 = vpop.eup %13331  ;;  %v12264_v24 = vpack.c.bf16 %v12834_v47, %v12833_v58 }
0x1c77   :  { %v13334_v46 = vpop.eup %13333  ;;  %v12258_v60 = vpack.c.bf16 %v12829_v33, %v12828_v51  ;;  %v5323_v50 = vmul.f32 %v13332_v12, %v15487_v41 }
0x1c78   :  { %v5322_v5 = vmul.f32 %v13334_v46, %v15489_v54  ;;  %v5458_v37 = vpop.permute.xlu0 %5457 }
0x1c79   :  { %12260 = vmatprep.subr.msk.bf16.mxu0 %vm13791_vm2, %v12258_v60 }
0x1c7a   :  { %v13336_v3 = vpop.eup %13335  ;;  %11297 = vmatprep.mubr.msk.f32.mxu0 %vm613_vm3, %v5322_v5  ;;  %12263 = vmatpush3.bf16.xpose.msk.msra.mxu0 %vm13791_vm2, %v12258_v60 }
0x1c7b   :  { %v13338_v45 = vpop.eup %13337  ;;  %11298 = vmatmul.mubr.msk.f32.gmra.mrb[114].mxu0 %vm613_vm3, %v5323_v50  ;;  %12266 = vmatprep.subr.msk.bf16.mxu0 %vm13791_vm2, %v12264_v24  ;;  %v5325_v39 = vmul.f32 %v13336_v3, %v15493_v52 }
0x1c7c   :  { %v5324_v54 = vmul.f32 %v13338_v45, %v15497_v1  ;;  %v5462_v52 = vpop.permute.xlu0 %5461 }
0x1c7e   :  { %11300 = vmatprep.mubr.msk.f32.mxu0 %vm613_vm3, %v5324_v54 }
0x1c7f   :  { %11301 = vmatmul.mubr.msk.f32.gmra.mrb[116].mxu0 %vm613_vm3, %v5325_v39 }
0x1c80   :  { %v5466_v15 = vpop.permute.xlu0 %5465 }
0x1c82   :  { %12269 = vmatpush3.bf16.xpose.msk.msra.mxu0 %vm13791_vm2, %v12264_v24 }
0x1ca4   :  { %v5311_v41 = vpop.xlane.xlu1 %5310 }
0x1ca5   :  { %13339 = vrcp.f32 %v5311_v41 }
0x1ca8   :  { %v5308_v7 = vpop.xlane.xlu1 %5307 }
0x1ca9   :  { %13341 = vrcp.f32 %v5308_v7 }
0x1cac   :  { %v5460_v48 = vpop.permute.xlu1 %5459 }
0x1caf   :  { %v13340_v4 = vpop.eup %13339 }
0x1cb0   :  { %v5327_v1 = vmul.f32 %v13340_v4, %v15515_v19  ;;  %v5464_v20 = vpop.permute.xlu1 %5463 }
0x1cb3   :  { %v13342_v56 = vpop.eup %13341 }
0x1cb4   :  { %v5326_v28 = vmul.f32 %v13342_v56, %v15519_v43  ;;  %v5468_v57 = vpop.permute.xlu1 %5467  ;;  %v5470_v43 = vpop.permute.xlu0 %5469 }
0x1cb6   :  { %11303 = vmatprep.mubr.msk.f32.mxu0 %vm613_vm3, %v5326_v28 }
0x1cb7   :  { %11304 = vmatmul.mubr.msk.f32.gmra.mrb[118].mxu0 %vm613_vm3, %v5327_v1 }
0x1cb8   :  { %11322 = vmatprep.mubr.msk.f32.mxu0 %vm443_vm1, %v5458_v37  ;;  %v5472_v19 = vpop.permute.xlu1 %5471 }
0x1cbb   :  { %11323 = vmatmul.mubr.msk.f32.vlgmr.msra.gmra.mrb[120].mxu0 %vm443_vm1, %v5460_v48 }
0x1cbc   :  { %11325 = vmatprep.mubr.msk.f32.mxu0 %vm443_vm1, %v5462_v52 }
0x1cbf   :  { %11326 = vmatmul.mubr.msk.f32.gmra.mrb[122].mxu0 %vm443_vm1, %v5464_v20 }
0x1cc0   :  { %11328 = vmatprep.mubr.msk.f32.mxu0 %vm443_vm1, %v5466_v15 }
0x1cc3   :  { %11329 = vmatmul.mubr.msk.f32.gmra.mrb[124].mxu0 %vm443_vm1, %v5468_v57 }
0x1cc4   :  { %11331 = vmatprep.mubr.msk.f32.mxu0 %vm443_vm1, %v5470_v43 }
0x1cc7   :  { %11332 = vmatmul.mubr.msk.f32.gmra.mrb[126].mxu0 %vm443_vm1, %v5472_v19 }
0x1d19   :  { %v15571_v26 = vpop.f32.mrb[112].mxu0 }
0x1d1a   :  { %v15573_v11 = vpop.f32.mrb[113].mxu0 }
0x1d4e   :  { %v15575_v63 = vpop.f32.mrb[114].mxu0 }
0x1d4f   :  { %v15577_v13 = vpop.f32.mrb[115].mxu0 }
0x1d52   :  { %v15579_v23 = vpop.f32.mrb[116].mxu0 }
0x1d53   :  { %v15581_v62 = vpop.f32.mrb[117].mxu0 }
0x1d8a   :  { %v15583_v55 = vpop.f32.mrb[118].mxu0 }
0x1d8b   :  { %v15585_v31 = vpop.f32.mrb[119].mxu0 }
0x1d8e   :  { %v11324_v6 = vpop.f32.mrb[120].mxu0 }
0x1d8f   :  { %v5627_v38 = vmul.f32 0.35355338, %v11324_v6  ;;  %v5587_v2 = vpop.f32.mrb[121].mxu0 }
0x1d90   :  { %v5626_v47 = vmul.f32 0.35355338, %v5587_v2 }
0x1d91   :  { %v5635_v58 = vadd.f32 %v15422_v10, %v5627_v38 }
0x1d92   :  { %v5634_v33 = vadd.f32 %v15428_v14, %v5626_v47  ;;  %v11327_v51 = vpop.f32.mrb[122].mxu0 }
0x1d93   :  { %v5629_v12 = vmul.f32 0.35355338, %v11327_v51  ;;  %v5597_v46 = vpop.f32.mrb[123].mxu0  ;;  %v5645_v60 = vsel %vm613_vm3, %v5635_v58, -inf }
0x1d94   :  { %v5628_v5 = vmul.f32 0.35355338, %v5597_v46  ;;  %5646 = vmax.xlane.f32.xlu1 %v5645_v60  ;;  %v5642_v24 = vsel %vm613_vm3, %v5634_v33, -inf }
0x1d95   :  { %v5637_v50 = vadd.f32 %v15436_v61, %v5629_v12  ;;  %5643 = vmax.xlane.f32.xlu0 %v5642_v24 }
0x1d96   :  { %v11330_v3 = vpop.f32.mrb[124].mxu0  ;;  %v5636_v41 = vadd.f32 %v15443_v21, %v5628_v5 }
0x1d97   :  { %v5631_v45 = vmul.f32 0.35355338, %v11330_v3  ;;  %v5607_v54 = vpop.f32.mrb[125].mxu0  ;;  %v5651_v39 = vsel %vm613_vm3, %v5637_v50, -inf }
0x1d98   :  { %v5630_v7 = vmul.f32 0.35355338, %v5607_v54  ;;  %v5648_v20 = vsel %vm613_vm3, %v5636_v41, -inf }
0x1d99   :  { %v5639_v37 = vadd.f32 %v15449_v32, %v5631_v45  ;;  %5652 = vmax.xlane.f32.xlu0 %v5651_v39 }
0x1d9a   :  { %v11333_v4 = vpop.f32.mrb[126].mxu0  ;;  %v5638_v1 = vadd.f32 %v15456_v0, %v5630_v7 }
0x1d9b   :  { %v5633_v56 = vmul.f32 0.35355338, %v11333_v4  ;;  %v5617_v48 = vpop.f32.mrb[127].mxu0  ;;  %v5657_v28 = vsel %vm613_vm3, %v5639_v37, -inf }
0x1d9c   :  { %v5632_v52 = vmul.f32 0.35355338, %v5617_v48  ;;  %5658 = vmax.xlane.f32.xlu1 %v5657_v28  ;;  %v5654_v19 = vsel %vm613_vm3, %v5638_v1, -inf }
0x1d9d   :  { %v15599_v15 = vadd.f32 %v15463_v34, %v5633_v56  ;;  %5649 = vmax.xlane.f32.xlu0 %v5648_v20 }
0x1d9e   :  { %v15604_v43 = vadd.f32 %v15470_v40, %v5632_v52 }
0x1d9f   :  { %v5663_v57 = vsel %vm613_vm3, %v15599_v15, -inf }
0x1da0   :  { %5664 = vmax.xlane.f32.xlu1 %v5663_v57  ;;  %v5660_v6 = vsel %vm613_vm3, %v15604_v43, -inf }
0x1da1   :  { %5655 = vmax.xlane.f32.xlu0 %v5654_v19 }
0x1da5   :  { %5661 = vmax.xlane.f32.xlu0 %v5660_v6 }
0x1db1   :  { %12841 = vrot.lane.b32.xlu1 %v15396_v53, %s13666_s19 }
0x1db5   :  { %12846 = vrot.lane.b32.xlu1 %v15405_v16, %s13666_s19 }
0x1db9   :  { %12851 = vrot.lane.b32.xlu1 %v15411_v22, %s13666_s19 }
0x1dbb   :  { %12836 = vrot.lane.b32.xlu0 %v15391_v36, %s13666_s19 }
0x1dbd   :  { %12861 = vrot.lane.b32.xlu1 %v15358_v17, %s13667_s20 }
0x1dbf   :  { %12856 = vrot.lane.b32.xlu0 %v15349_v59, %s13667_s20 }
0x1e21   :  { %v5647_v38 = vpop.xlane.xlu1 %5646 }
0x1e22   :  { %v5667_v2 = vsub.f32 %v5635_v58, %v5647_v38  ;;  %v5644_v47 = vpop.xlane.xlu0 %5643 }
0x1e23   :  { %v5666_v51 = vsub.f32 %v5634_v33, %v5644_v47 }
0x1e24   :  { %v5676_v12 = vmul.f32 1.442695, %v5667_v2 }
0x1e25   :  { %v5674_v46 = vmul.f32 1.442695, %v5666_v51 }
0x1e26   :  { %13343 = vpow2.f32 %v5676_v12  ;;  %v5653_v60 = vpop.xlane.xlu0 %5652 }
0x1e27   :  { %13345 = vpow2.f32 %v5674_v46  ;;  %v5669_v5 = vsub.f32 %v5637_v50, %v5653_v60 }
0x1e29   :  { %v5680_v24 = vmul.f32 1.442695, %v5669_v5  ;;  %v5659_v3 = vpop.xlane.xlu1 %5658 }
0x1e2a   :  { %v5671_v45 = vsub.f32 %v5639_v37, %v5659_v3  ;;  %v5650_v54 = vpop.xlane.xlu0 %5649 }
0x1e2b   :  { %13347 = vpow2.f32 %v5680_v24  ;;  %v5668_v39 = vsub.f32 %v5636_v41, %v5650_v54 }
0x1e2c   :  { %v5684_v7 = vmul.f32 1.442695, %v5671_v45 }
0x1e2d   :  { %v5678_v4 = vmul.f32 1.442695, %v5668_v39  ;;  %v5665_v56 = vpop.xlane.xlu1 %5664 }
0x1e2e   :  { %v5656_v48 = vpop.xlane.xlu0 %5655 }
0x1e2f   :  { %13349 = vpow2.f32 %v5678_v4  ;;  %v5670_v58 = vsub.f32 %v5638_v1, %v5656_v48 }
0x1e30   :  { %v15621_v28 = vpop.eup %13343  ;;  %13351 = vpow2.f32 %v5684_v7 }
0x1e31   :  { %v15623_v33 = vpop.eup %13345  ;;  %v5682_v52 = vmul.f32 1.442695, %v5670_v58  ;;  %v12842_v20 = vpop.permute.xlu1 %12841  ;;  %v5693_v50 = vsel %vm613_vm3, %v15621_v28, 0.0 }
0x1e32   :  { %5694 = vadd.xlane.f32.xlu1 %v5693_v50  ;;  %v5662_v37 = vpop.xlane.xlu0 %5661  ;;  %v5690_v41 = vsel %vm613_vm3, %v15623_v33, 0.0  ;;  %v12844_v38 = vunpack.i.h.bf16 %v12842_v20  ;;  %v12843_v2 = vunpack.i.l.bf16 %v12842_v20 }
0x1e33   :  { %5691 = vadd.xlane.f32.xlu0 %v5690_v41  ;;  %13353 = vpow2.f32 %v5682_v52 }
0x1e34   :  { %v12274_v45 = vpack.c.bf16 %v12844_v38, %v12843_v2  ;;  %v5672_v2 = vsub.f32 %v15604_v43, %v5662_v37 }
0x1e35   :  { %v15629_v57 = vpop.eup %13347  ;;  %v12847_v1 = vpop.permute.xlu1 %12846 }
0x1e36   :  { %v12837_v19 = vpop.permute.xlu0 %12836  ;;  %v5699_v6 = vsel %vm613_vm3, %v15629_v57, 0.0  ;;  %v12849_v24 = vunpack.i.h.bf16 %v12847_v1  ;;  %v12848_v3 = vunpack.i.l.bf16 %v12847_v1 }
0x1e37   :  { %v12839_v47 = vunpack.i.h.bf16 %v12837_v19  ;;  %v12838_v51 = vunpack.i.l.bf16 %v12837_v19  ;;  %5700 = vadd.xlane.f32.xlu1 %v5699_v6  ;;  %v5673_v6 = vsub.f32 %v15599_v15, %v5665_v56 }
0x1e38   :  { %v12278_v58 = vpack.c.bf16 %v12849_v24, %v12848_v3 }
0x1e39   :  { %v15633_v12 = vpop.eup %13349  ;;  %v12270_v46 = vpack.c.bf16 %v12839_v47, %v12838_v51  ;;  %v12852_v54 = vpop.permute.xlu1 %12851  ;;  %v5688_v38 = vmul.f32 1.442695, %v5673_v6  ;;  %v5686_v47 = vmul.f32 1.442695, %v5672_v2 }
0x1e3a   :  { %v5696_v60 = vsel %vm613_vm3, %v15633_v12, 0.0  ;;  %v15637_v5 = vpop.eup %13351  ;;  %v12854_v4 = vunpack.i.h.bf16 %v12852_v54  ;;  %v12853_v48 = vunpack.i.l.bf16 %v12852_v54  ;;  %v12857_v52 = vpop.permute.xlu0 %12856 }
0x1e3b   :  { %5697 = vadd.xlane.f32.xlu0 %v5696_v60  ;;  %12271 = vmatprep.subr.bf16.mxu1 %v12270_v46  ;;  %v5705_v39 = vsel %vm613_vm3, %v15637_v5, 0.0  ;;  %v12859_v50 = vunpack.i.h.bf16 %v12857_v52  ;;  %v12858_v41 = vunpack.i.l.bf16 %v12857_v52  ;;  %13355 = vpow2.f32 %v5688_v38 }
0x1e3c   :  { %12273 = vmatpush3.bf16.msra.mxu1 %v12270_v46  ;;  %v12282_v1 = vpack.c.bf16 %v12854_v4, %v12853_v48  ;;  %13357 = vpow2.f32 %v5686_v47 }
0x1e3d   :  { %12275 = vmatprep.subr.bf16.mxu1 %v12274_v45  ;;  %v15641_v7 = vpop.eup %13353  ;;  %v12286_v19 = vpack.c.bf16 %v12859_v50, %v12858_v41  ;;  %v12862_v37 = vpop.permute.xlu1 %12861 }
0x1e3e   :  { %v5702_v20 = vsel %vm613_vm3, %v15641_v7, 0.0  ;;  %v12863_v4 = vunpack.i.l.bf16 %v12862_v37 }
0x1e3f   :  { %5706 = vadd.xlane.f32.xlu0 %v5705_v39  ;;  %v12864_v39 = vunpack.i.h.bf16 %v12862_v37 }
0x1e40   :  { %12277 = vmatpush3.bf16.msra.mxu1 %v12274_v45 }
0x1e41   :  { %12279 = vmatprep.subr.bf16.mxu1 %v12278_v58 }
0x1e43   :  { %5703 = vadd.xlane.f32.xlu0 %v5702_v20  ;;  %v12292_v20 = vpack.c.bf16 %v12864_v39, %v12863_v4 }
0x1e44   :  { %12281 = vmatpush3.bf16.msra.mxu1 %v12278_v58 }
0x1e45   :  { %12283 = vmatprep.subr.bf16.mxu1 %v12282_v1  ;;  %v15659_v51 = vpop.eup %13355 }
0x1e46   :  { %v5711_v15 = vsel %vm613_vm3, %v15659_v51, 0.0  ;;  %v15665_v43 = vpop.eup %13357 }
0x1e47   :  { %v5708_v56 = vsel %vm613_vm3, %v15665_v43, 0.0 }
0x1e48   :  { %12871 = vrot.lane.b32.xlu1 %v15385_v27, %s13667_s20  ;;  %12285 = vmatpush3.bf16.msra.mxu1 %v12282_v1 }
0x1e49   :  { %12288 = vmatprep.subr.msk.bf16.mxu1 %vm13791_vm2, %v12286_v19 }
0x1e59   :  { %12866 = vrot.lane.b32.xlu0 %v15370_v42, %s13667_s20 }
0x1e5d   :  { %5891 = vrot.lane.b32.xlu0 %v15345_v9, %s13667_s20 }
0x1e61   :  { %5895 = vrot.lane.b32.xlu0 %v15399_v29, %s13667_s20 }
0x1e65   :  { %5899 = vrot.lane.b32.xlu0 %v15368_v35, %s13667_s20 }
0x1e69   :  { %5903 = vrot.lane.b32.xlu0 %v15380_v44, %s13667_s20 }
0x1e6c   :  { %5712 = vadd.xlane.f32.xlu1 %v5711_v15 }
0x1e70   :  { %5709 = vadd.xlane.f32.xlu1 %v5708_v56 }
0x1e81   :  { %5893 = vrot.lane.b32.xlu1 %v15394_v18, %s13667_s20 }
0x1e85   :  { %5897 = vrot.lane.b32.xlu1 %v15356_v49, %s13667_s20 }
0x1e89   :  { %5901 = vrot.lane.b32.xlu1 %v15365_v8, %s13667_s20 }
0x1e8d   :  { %5905 = vrot.lane.b32.xlu1 %v15377_v30, %s13667_s20 }
0x1ebf   :  { %v5695_v46 = vpop.xlane.xlu1 %5694 }
0x1ec0   :  { %13359 = vrcp.f32 %v5695_v46  ;;  %v5692_v60 = vpop.xlane.xlu0 %5691 }
0x1ec1   :  { %13361 = vrcp.f32 %v5692_v60 }
0x1ec4   :  { %v5701_v24 = vpop.xlane.xlu1 %5700 }
0x1ec5   :  { %13363 = vrcp.f32 %v5701_v24 }
0x1ec8   :  { %v5698_v3 = vpop.xlane.xlu0 %5697 }
0x1ec9   :  { %13365 = vrcp.f32 %v5698_v3 }
0x1eca   :  { %v13360_v45 = vpop.eup %13359 }
0x1ecb   :  { %v13362_v54 = vpop.eup %13361  ;;  %v5723_v52 = vmul.f32 %v13360_v45, %v15621_v28 }
0x1ecc   :  { %v5707_v48 = vpop.xlane.xlu0 %5706  ;;  %v5722_v58 = vmul.f32 %v13362_v54, %v15623_v33 }
0x1ecd   :  { %13367 = vrcp.f32 %v5707_v48 }
0x1ece   :  { %11350 = vmatprep.mubr.msk.f32.mxu1 %vm613_vm3, %v5722_v58 }
0x1ecf   :  { %11351 = vmatmul.mubr.msk.f32.vlgmr.msra.gmra.mrb[112].mxu1 %vm613_vm3, %v5723_v52  ;;  %v13364_v41 = vpop.eup %13363 }
0x1ed0   :  { %12291 = vmatpush3.bf16.xpose.msk.msra.mxu1 %vm13791_vm2, %v12286_v19  ;;  %v5704_v50 = vpop.xlane.xlu0 %5703  ;;  %v5725_v2 = vmul.f32 %v13364_v41, %v15629_v57  ;;  %v12872_v19 = vpop.permute.xlu1 %12871 }
0x1ed1   :  { %13369 = vrcp.f32 %v5704_v50  ;;  %12294 = vmatprep.subr.msk.bf16.mxu1 %vm13791_vm2, %v12292_v20  ;;  %v12874_v37 = vunpack.i.h.bf16 %v12872_v19 }
0x1ed3   :  { %v13366_v1 = vpop.eup %13365 }
0x1ed4   :  { %v12867_v6 = vpop.permute.xlu0 %12866  ;;  %v5724_v33 = vmul.f32 %v13366_v1, %v15633_v12  ;;  %v12873_v12 = vunpack.i.l.bf16 %v12872_v19 }
0x1ed5   :  { %v12869_v28 = vunpack.i.h.bf16 %v12867_v6  ;;  %v12868_v38 = vunpack.i.l.bf16 %v12867_v6 }
0x1ed6   :  { %11353 = vmatprep.mubr.msk.f32.mxu1 %vm613_vm3, %v5724_v33  ;;  %v12304_v60 = vpack.c.bf16 %v12874_v37, %v12873_v12 }
0x1ed7   :  { %v12298_v47 = vpack.c.bf16 %v12869_v28, %v12868_v38  ;;  %11354 = vmatmul.mubr.msk.f32.gmra.mrb[114].mxu1 %vm613_vm3, %v5725_v2  ;;  %v13368_v15 = vpop.eup %13367 }
0x1ed8   :  { %12297 = vmatpush3.bf16.xpose.msk.msra.mxu1 %vm13791_vm2, %v12292_v20  ;;  %v5727_v57 = vmul.f32 %v13368_v15, %v15637_v5 }
0x1ed9   :  { %12300 = vmatprep.subr.msk.bf16.mxu1 %vm13791_vm2, %v12298_v47 }
0x1edb   :  { %v13370_v56 = vpop.eup %13369 }
0x1edc   :  { %v5726_v46 = vmul.f32 %v13370_v56, %v15641_v7  ;;  %v5892_v7 = vpop.permute.xlu0 %5891 }
0x1ede   :  { %11356 = vmatprep.mubr.msk.f32.mxu1 %vm613_vm3, %v5726_v46 }
0x1edf   :  { %11357 = vmatmul.mubr.msk.f32.gmra.mrb[116].mxu1 %vm613_vm3, %v5727_v57 }
0x1ee0   :  { %12303 = vmatpush3.bf16.xpose.msk.msra.mxu1 %vm13791_vm2, %v12298_v47  ;;  %v5896_v48 = vpop.permute.xlu0 %5895 }
0x1ee1   :  { %12306 = vmatprep.subr.msk.bf16.mxu1 %vm13791_vm2, %v12304_v60 }
0x1ee4   :  { %v5900_v52 = vpop.permute.xlu0 %5899 }
0x1ee8   :  { %12309 = vmatpush3.bf16.xpose.msk.msra.mxu1 %vm13791_vm2, %v12304_v60 }
0x1ef9   :  { %v5713_v24 = vpop.xlane.xlu1 %5712 }
0x1efa   :  { %13371 = vrcp.f32 %v5713_v24 }
0x1efd   :  { %v5710_v3 = vpop.xlane.xlu1 %5709 }
0x1efe   :  { %13373 = vrcp.f32 %v5710_v3 }
0x1f01   :  { %v5894_v54 = vpop.permute.xlu1 %5893 }
0x1f04   :  { %v13372_v5 = vpop.eup %13371 }
0x1f05   :  { %v5729_v4 = vmul.f32 %v13372_v5, %v15659_v51  ;;  %v5898_v58 = vpop.permute.xlu1 %5897 }
0x1f08   :  { %v13374_v45 = vpop.eup %13373 }
0x1f09   :  { %v5728_v39 = vmul.f32 %v13374_v45, %v15665_v43  ;;  %v5902_v20 = vpop.permute.xlu1 %5901  ;;  %v5904_v43 = vpop.permute.xlu0 %5903 }
0x1f0b   :  { %11359 = vmatprep.mubr.msk.f32.mxu1 %vm613_vm3, %v5728_v39 }
0x1f0c   :  { %11360 = vmatmul.mubr.msk.f32.gmra.mrb[118].mxu1 %vm613_vm3, %v5729_v4 }
0x1f0d   :  { %11378 = vmatprep.mubr.msk.f32.mxu1 %vm443_vm1, %v5892_v7  ;;  %v5906_v51 = vpop.permute.xlu1 %5905 }
0x1f10   :  { %11379 = vmatmul.mubr.msk.f32.vlgmr.msra.gmra.mrb[120].mxu1 %vm443_vm1, %v5894_v54 }
0x1f11   :  { %11381 = vmatprep.mubr.msk.f32.mxu1 %vm443_vm1, %v5896_v48 }
0x1f14   :  { %11382 = vmatmul.mubr.msk.f32.gmra.mrb[122].mxu1 %vm443_vm1, %v5898_v58 }
0x1f15   :  { %11384 = vmatprep.mubr.msk.f32.mxu1 %vm443_vm1, %v5900_v52 }
0x1f18   :  { %11385 = vmatmul.mubr.msk.f32.gmra.mrb[124].mxu1 %vm443_vm1, %v5902_v20 }
0x1f19   :  { %11387 = vmatprep.mubr.msk.f32.mxu1 %vm443_vm1, %v5904_v43 }
0x1f1c   :  { %11388 = vmatmul.mubr.msk.f32.gmra.mrb[126].mxu1 %vm443_vm1, %v5906_v51 }
0x1fa2   :  { %v15715_v50 = vpop.f32.mrb[112].mxu1 }
0x1fa3   :  { %v15717_v41 = vpop.f32.mrb[113].mxu1 }
0x1faa   :  { %v15719_v1 = vpop.f32.mrb[114].mxu1 }
0x1fab   :  { %v15721_v6 = vpop.f32.mrb[115].mxu1 }
0x1fb2   :  { %v15723_v33 = vpop.f32.mrb[116].mxu1 }
0x1fb3   :  { %v15725_v28 = vpop.f32.mrb[117].mxu1 }
0x1fdf   :  { %v15727_v38 = vpop.f32.mrb[118].mxu1 }
0x1fe0   :  { %v15729_v2 = vpop.f32.mrb[119].mxu1 }
0x1fe3   :  { %v11380_v47 = vpop.f32.mrb[120].mxu1 }
0x1fe4   :  { %v6061_v19 = vmul.f32 0.35355338, %v11380_v47  ;;  %v6021_v15 = vpop.f32.mrb[121].mxu1 }
0x1fe5   :  { %v6060_v56 = vmul.f32 0.35355338, %v6021_v15 }
0x1fe6   :  { %v6069_v37 = vadd.f32 %v15422_v10, %v6061_v19 }
0x1fe7   :  { %v6068_v12 = vadd.f32 %v15428_v14, %v6060_v56  ;;  %v11383_v46 = vpop.f32.mrb[122].mxu1 }
0x1fe8   :  { %v6063_v57 = vmul.f32 0.35355338, %v11383_v46  ;;  %v6031_v60 = vpop.f32.mrb[123].mxu1  ;;  %v6079_v24 = vsel %vm613_vm3, %v6069_v37, -inf }
0x1fe9   :  { %v6062_v3 = vmul.f32 0.35355338, %v6031_v60  ;;  %6080 = vmax.xlane.f32.xlu1 %v6079_v24  ;;  %v6076_v7 = vsel %vm613_vm3, %v6068_v12, -inf }
0x1fea   :  { %v6071_v5 = vadd.f32 %v15436_v61, %v6063_v57  ;;  %6077 = vmax.xlane.f32.xlu0 %v6076_v7 }
0x1feb   :  { %v11386_v45 = vpop.f32.mrb[124].mxu1  ;;  %v6070_v10 = vadd.f32 %v15443_v21, %v6062_v3 }
0x1fec   :  { %v6065_v54 = vmul.f32 0.35355338, %v11386_v45  ;;  %v6041_v39 = vpop.f32.mrb[125].mxu1  ;;  %v6085_v4 = vsel %vm613_vm3, %v6071_v5, -inf }
0x1fed   :  { %v6064_v14 = vmul.f32 0.35355338, %v6041_v39  ;;  %v6082_v47 = vsel %vm613_vm3, %v6070_v10, -inf }
0x1fee   :  { %v6073_v48 = vadd.f32 %v15449_v32, %v6065_v54  ;;  %6086 = vmax.xlane.f32.xlu0 %v6085_v4 }
0x1fef   :  { %v11389_v58 = vpop.f32.mrb[126].mxu1  ;;  %v6072_v51 = vadd.f32 %v15456_v0, %v6064_v14 }
0x1ff0   :  { %v6067_v52 = vmul.f32 0.35355338, %v11389_v58  ;;  %v6051_v20 = vpop.f32.mrb[127].mxu1  ;;  %v6091_v43 = vsel %vm613_vm3, %v6073_v48, -inf }
0x1ff1   :  { %v6066_v61 = vmul.f32 0.35355338, %v6051_v20  ;;  %6092 = vmax.xlane.f32.xlu1 %v6091_v43  ;;  %v6088_v15 = vsel %vm613_vm3, %v6072_v51, -inf }
0x1ff2   :  { %v15743_v19 = vadd.f32 %v15463_v34, %v6067_v52  ;;  %6083 = vmax.xlane.f32.xlu0 %v6082_v47 }
0x1ff3   :  { %v15748_v32 = vadd.f32 %v15470_v40, %v6066_v61 }
0x1ff4   :  { %v6097_v21 = vsel %vm613_vm3, %v15743_v19, -inf }
0x1ff5   :  { %6098 = vmax.xlane.f32.xlu1 %v6097_v21  ;;  %v6094_v0 = vsel %vm613_vm3, %v15748_v32, -inf }
0x1ff6   :  { %6089 = vmax.xlane.f32.xlu0 %v6088_v15 }
0x1ffa   :  { %6095 = vmax.xlane.f32.xlu0 %v6094_v0 }
0x2006   :  { %12881 = vrot.lane.b32.xlu1 %v15396_v53, %s13667_s20 }
0x200a   :  { %12886 = vrot.lane.b32.xlu1 %v15405_v16, %s13667_s20 }
0x200e   :  { %12891 = vrot.lane.b32.xlu1 %v15411_v22, %s13667_s20 }
0x2010   :  { %12876 = vrot.lane.b32.xlu0 %v15391_v36, %s13667_s20 }
0x2012   :  { %12901 = vrot.lane.b32.xlu1 %v15358_v17, %s13668_s21 }
0x2014   :  { %12896 = vrot.lane.b32.xlu0 %v15349_v59, %s13668_s21 }
0x2076   :  { %v6081_v34 = vpop.xlane.xlu1 %6080 }
0x2077   :  { %v6101_v40 = vsub.f32 %v6069_v37, %v6081_v34  ;;  %v6078_v56 = vpop.xlane.xlu0 %6077 }
0x2078   :  { %v6100_v46 = vsub.f32 %v6068_v12, %v6078_v56 }
0x2079   :  { %v6110_v57 = vmul.f32 1.442695, %v6101_v40 }
0x207a   :  { %v6108_v60 = vmul.f32 1.442695, %v6100_v46 }
0x207b   :  { %13375 = vpow2.f32 %v6110_v57  ;;  %v6087_v24 = vpop.xlane.xlu0 %6086 }
0x207c   :  { %13377 = vpow2.f32 %v6108_v60  ;;  %v6103_v3 = vsub.f32 %v6071_v5, %v6087_v24 }
0x207e   :  { %v6114_v7 = vmul.f32 1.442695, %v6103_v3  ;;  %v6093_v45 = vpop.xlane.xlu1 %6092 }
0x207f   :  { %v6105_v54 = vsub.f32 %v6073_v48, %v6093_v45  ;;  %v6084_v39 = vpop.xlane.xlu0 %6083 }
0x2080   :  { %13379 = vpow2.f32 %v6114_v7  ;;  %v6102_v4 = vsub.f32 %v6070_v10, %v6084_v39 }
0x2081   :  { %v6118_v17 = vmul.f32 1.442695, %v6105_v54 }
0x2082   :  { %v6112_v14 = vmul.f32 1.442695, %v6102_v4  ;;  %v6099_v58 = vpop.xlane.xlu1 %6098 }
0x2083   :  { %v6090_v59 = vpop.xlane.xlu0 %6089 }
0x2084   :  { %13381 = vpow2.f32 %v6112_v14  ;;  %v6104_v37 = vsub.f32 %v6072_v51, %v6090_v59 }
0x2085   :  { %v15765_v52 = vpop.eup %13375  ;;  %13383 = vpow2.f32 %v6118_v17 }
0x2086   :  { %v15767_v12 = vpop.eup %13377  ;;  %v6116_v20 = vmul.f32 1.442695, %v6104_v37  ;;  %v12882_v43 = vpop.permute.xlu1 %12881  ;;  %v6127_v5 = vsel %vm613_vm3, %v15765_v52, 0.0 }
0x2087   :  { %6128 = vadd.xlane.f32.xlu1 %v6127_v5  ;;  %v6096_v48 = vpop.xlane.xlu0 %6095  ;;  %v6124_v10 = vsel %vm613_vm3, %v15767_v12, 0.0  ;;  %v12884_v15 = vunpack.i.h.bf16 %v12882_v43  ;;  %v12883_v0 = vunpack.i.l.bf16 %v12882_v43 }
0x2088   :  { %6125 = vadd.xlane.f32.xlu0 %v6124_v10  ;;  %13385 = vpow2.f32 %v6116_v20 }
0x2089   :  { %v12314_v7 = vpack.c.bf16 %v12884_v15, %v12883_v0 }
0x208a   :  { %v15773_v61 = vpop.eup %13379  ;;  %v12887_v51 = vpop.permute.xlu1 %12886 }
0x208b   :  { %v12877_v47 = vpop.permute.xlu0 %12876  ;;  %v6133_v21 = vsel %vm613_vm3, %v15773_v61, 0.0  ;;  %v12889_v24 = vunpack.i.h.bf16 %v12887_v51  ;;  %v12888_v3 = vunpack.i.l.bf16 %v12887_v51  ;;  %v6107_v51 = vsub.f32 %v15743_v19, %v6099_v58 }
0x208c   :  { %v12879_v34 = vunpack.i.h.bf16 %v12877_v47  ;;  %v12878_v40 = vunpack.i.l.bf16 %v12877_v47  ;;  %6134 = vadd.xlane.f32.xlu1 %v6133_v21  ;;  %v6106_v21 = vsub.f32 %v15748_v32, %v6096_v48 }
0x208d   :  { %v12318_v14 = vpack.c.bf16 %v12889_v24, %v12888_v3  ;;  %v6122_v47 = vmul.f32 1.442695, %v6107_v51 }
0x208e   :  { %v15777_v56 = vpop.eup %13381  ;;  %v12310_v46 = vpack.c.bf16 %v12879_v34, %v12878_v40  ;;  %v12892_v45 = vpop.permute.xlu1 %12891  ;;  %v6120_v15 = vmul.f32 1.442695, %v6106_v21 }
0x208f   :  { %v6130_v57 = vsel %vm613_vm3, %v15777_v56, 0.0  ;;  %v15781_v60 = vpop.eup %13383  ;;  %v12894_v4 = vunpack.i.h.bf16 %v12892_v45  ;;  %v12893_v17 = vunpack.i.l.bf16 %v12892_v45  ;;  %v12897_v59 = vpop.permute.xlu0 %12896  ;;  %13387 = vpow2.f32 %v6122_v47 }
0x2090   :  { %6131 = vadd.xlane.f32.xlu0 %v6130_v57  ;;  %12311 = vmatprep.subr.bf16.mxu0 %v12310_v46  ;;  %v6139_v54 = vsel %vm613_vm3, %v15781_v60, 0.0  ;;  %v12899_v20 = vunpack.i.h.bf16 %v12897_v59  ;;  %v12898_v43 = vunpack.i.l.bf16 %v12897_v59  ;;  %13389 = vpow2.f32 %v6120_v15 }
0x2091   :  { %12313 = vmatpush3.bf16.msra.mxu0 %v12310_v46  ;;  %v12322_v5 = vpack.c.bf16 %v12894_v4, %v12893_v17 }
0x2092   :  { %12315 = vmatprep.subr.bf16.mxu0 %v12314_v7  ;;  %v15785_v39 = vpop.eup %13385  ;;  %v12326_v10 = vpack.c.bf16 %v12899_v20, %v12898_v43 }
0x2093   :  { %v6136_v37 = vsel %vm613_vm3, %v15785_v39, 0.0 }
0x2094   :  { %6140 = vadd.xlane.f32.xlu0 %v6139_v54 }
0x2095   :  { %12317 = vmatpush3.bf16.msra.mxu0 %v12314_v7 }
0x2096   :  { %12319 = vmatprep.subr.bf16.mxu0 %v12318_v14 }
0x2098   :  { %6137 = vadd.xlane.f32.xlu0 %v6136_v37 }
0x2099   :  { %12321 = vmatpush3.bf16.msra.mxu0 %v12318_v14 }
0x209a   :  { %12323 = vmatprep.subr.bf16.mxu0 %v12322_v5 }
0x209d   :  { %12911 = vrot.lane.b32.xlu1 %v15385_v27, %s13668_s21  ;;  %12325 = vmatpush3.bf16.msra.mxu0 %v12322_v5  ;;  %v15803_v27 = vpop.eup %13387 }
0x209e   :  { %12328 = vmatprep.subr.msk.bf16.mxu0 %vm13791_vm2, %v12326_v10  ;;  %v15809_v19 = vpop.eup %13389 }
0x20ae   :  { %12906 = vrot.lane.b32.xlu0 %v15370_v42, %s13668_s21  ;;  %v6145_v42 = vsel %vm613_vm3, %v15803_v27, 0.0 }
0x20b2   :  { %6317 = vrot.lane.b32.xlu0 %v15345_v9, %s13668_s21  ;;  %v6142_v9 = vsel %vm613_vm3, %v15809_v19, 0.0 }
0x20b6   :  { %6321 = vrot.lane.b32.xlu0 %v15399_v29, %s13668_s21 }
0x20ba   :  { %6325 = vrot.lane.b32.xlu0 %v15368_v35, %s13668_s21  ;;  %v12902_v35 = vpop.permute.xlu1 %12901 }
0x20bb   :  { %v12904_v0 = vunpack.i.h.bf16 %v12902_v35  ;;  %v12903_v34 = vunpack.i.l.bf16 %v12902_v35 }
0x20be   :  { %6329 = vrot.lane.b32.xlu0 %v15380_v44, %s13668_s21 }
0x20c1   :  { %6146 = vadd.xlane.f32.xlu1 %v6145_v42 }
0x20c5   :  { %6143 = vadd.xlane.f32.xlu1 %v6142_v9 }
0x20d6   :  { %6319 = vrot.lane.b32.xlu1 %v15394_v18, %s13668_s21 }
0x20da   :  { %6323 = vrot.lane.b32.xlu1 %v15356_v49, %s13668_s21 }
0x20de   :  { %6327 = vrot.lane.b32.xlu1 %v15365_v8, %s13668_s21 }
0x20e2   :  { %6331 = vrot.lane.b32.xlu1 %v15377_v30, %s13668_s21  ;;  %v12332_v30 = vpack.c.bf16 %v12904_v0, %v12903_v34 }
0x2114   :  { %v6129_v44 = vpop.xlane.xlu1 %6128 }
0x2115   :  { %13391 = vrcp.f32 %v6129_v44  ;;  %v6126_v29 = vpop.xlane.xlu0 %6125 }
0x2116   :  { %13393 = vrcp.f32 %v6126_v29 }
0x2119   :  { %v6135_v32 = vpop.xlane.xlu1 %6134 }
0x211a   :  { %13395 = vrcp.f32 %v6135_v32 }
0x211d   :  { %v6132_v58 = vpop.xlane.xlu0 %6131  ;;  %v12912_v4 = vpop.permute.xlu1 %12911 }
0x211e   :  { %13397 = vrcp.f32 %v6132_v58  ;;  %v12914_v59 = vunpack.i.h.bf16 %v12912_v4 }
0x211f   :  { %v13392_v48 = vpop.eup %13391 }
0x2120   :  { %v13394_v18 = vpop.eup %13393  ;;  %v6157_v8 = vmul.f32 %v13392_v48, %v15765_v52 }
0x2121   :  { %v6141_v49 = vpop.xlane.xlu0 %6140  ;;  %v6156_v40 = vmul.f32 %v13394_v18, %v15767_v12 }
0x2122   :  { %13399 = vrcp.f32 %v6141_v49 }
0x2123   :  { %11406 = vmatprep.mubr.msk.f32.mxu0 %vm613_vm3, %v6156_v40 }
0x2124   :  { %11407 = vmatmul.mubr.msk.f32.vlgmr.msra.gmra.mrb[128].mxu0 %vm613_vm3, %v6157_v8  ;;  %v13396_v57 = vpop.eup %13395 }
0x2125   :  { %12331 = vmatpush3.bf16.xpose.msk.msra.mxu0 %vm13791_vm2, %v12326_v10  ;;  %v6138_v46 = vpop.xlane.xlu0 %6137  ;;  %v6159_v45 = vmul.f32 %v13396_v57, %v15773_v61 }
0x2126   :  { %13401 = vrcp.f32 %v6138_v46  ;;  %12334 = vmatprep.subr.msk.bf16.mxu0 %vm13791_vm2, %v12332_v30  ;;  %v13591_v46 = vld [vmem:[%s16814_s3 + $0x8] sm:$0xff] }
0x2128   :  { %v13398_v24 = vpop.eup %13397 }
0x2129   :  { %v12907_v3 = vpop.permute.xlu0 %12906  ;;  %v6158_v12 = vmul.f32 %v13398_v24, %v15777_v56  ;;  %v12913_v56 = vunpack.i.l.bf16 %v12912_v4  ;;  %v13592_v24 = vld [vmem:[%s16814_s3] sm:$0xff] }
0x212a   :  { %v12909_v52 = vunpack.i.h.bf16 %v12907_v3  ;;  %v12908_v7 = vunpack.i.l.bf16 %v12907_v3 }
0x212b   :  { %11409 = vmatprep.mubr.msk.f32.mxu0 %vm613_vm3, %v6158_v12  ;;  %v12344_v20 = vpack.c.bf16 %v12914_v59, %v12913_v56 }
0x212c   :  { %v12338_v54 = vpack.c.bf16 %v12909_v52, %v12908_v7  ;;  %11410 = vmatmul.mubr.msk.f32.gmra.mrb[130].mxu0 %vm613_vm3, %v6159_v45  ;;  %v13400_v17 = vpop.eup %13399 }
0x212d   :  { %12337 = vmatpush3.bf16.xpose.msk.msra.mxu0 %vm13791_vm2, %v12332_v30  ;;  %v6161_v61 = vmul.f32 %v13400_v17, %v15781_v60  ;;  %v13593_v17 = vld [vmem:[%s16814_s3 + $0x18] sm:$0xff] }
0x212e   :  { %12340 = vmatprep.subr.msk.bf16.mxu0 %vm13791_vm2, %v12338_v54 }
0x2130   :  { %v13402_v14 = vpop.eup %13401 }
0x2131   :  { %v6160_v37 = vmul.f32 %v13402_v14, %v15785_v39  ;;  %v6318_v39 = vpop.permute.xlu0 %6317 }
0x2133   :  { %11412 = vmatprep.mubr.msk.f32.mxu0 %vm613_vm3, %v6160_v37 }
0x2134   :  { %11413 = vmatmul.mubr.msk.f32.gmra.mrb[132].mxu0 %vm613_vm3, %v6161_v61 }
0x2135   :  { %12343 = vmatpush3.bf16.xpose.msk.msra.mxu0 %vm13791_vm2, %v12338_v54  ;;  %v6322_v15 = vpop.permute.xlu0 %6321 }
0x2136   :  { %12346 = vmatprep.subr.msk.bf16.mxu0 %vm13791_vm2, %v12344_v20 }
0x2139   :  { %v6326_v9 = vpop.permute.xlu0 %6325 }
0x213d   :  { %12349 = vmatpush3.bf16.xpose.msk.msra.mxu0 %vm13791_vm2, %v12344_v20  ;;  %v13594_v20 = vld [vmem:[%s16814_s3 + $0x10] sm:$0xff] }
0x214e   :  { %v6147_v43 = vpop.xlane.xlu1 %6146 }
0x214f   :  { %13403 = vrcp.f32 %v6147_v43 }
0x2152   :  { %v6144_v5 = vpop.xlane.xlu1 %6143 }
0x2153   :  { %13405 = vrcp.f32 %v6144_v5 }
0x2156   :  { %v6320_v51 = vpop.permute.xlu1 %6319 }
0x2159   :  { %v13404_v60 = vpop.eup %13403 }
0x215a   :  { %v6163_v21 = vmul.f32 %v13404_v60, %v15803_v27  ;;  %v6324_v42 = vpop.permute.xlu1 %6323 }
0x215d   :  { %v13406_v10 = vpop.eup %13405 }
0x215e   :  { %v6162_v47 = vmul.f32 %v13406_v10, %v15809_v19  ;;  %v6328_v35 = vpop.permute.xlu1 %6327  ;;  %v6330_v19 = vpop.permute.xlu0 %6329 }
0x2160   :  { %11415 = vmatprep.mubr.msk.f32.mxu0 %vm613_vm3, %v6162_v47 }
0x2161   :  { %11416 = vmatmul.mubr.msk.f32.gmra.mrb[134].mxu0 %vm613_vm3, %v6163_v21 }
0x2162   :  { %11434 = vmatprep.mubr.msk.f32.mxu0 %vm443_vm1, %v6318_v39  ;;  %v6332_v27 = vpop.permute.xlu1 %6331  ;;  %v13595_v39 = vld [vmem:[%s16814_s3 + $0x28] sm:$0xff] }
0x2165   :  { %11435 = vmatmul.mubr.msk.f32.vlgmr.msra.gmra.mrb[136].mxu0 %vm443_vm1, %v6320_v51 }
0x2166   :  { %11437 = vmatprep.mubr.msk.f32.mxu0 %vm443_vm1, %v6322_v15  ;;  %v13596_v15 = vld [vmem:[%s16814_s3 + $0x20] sm:$0xff] }
0x2169   :  { %11438 = vmatmul.mubr.msk.f32.gmra.mrb[138].mxu0 %vm443_vm1, %v6324_v42 }
0x216a   :  { %11440 = vmatprep.mubr.msk.f32.mxu0 %vm443_vm1, %v6326_v9 }
0x216d   :  { %11441 = vmatmul.mubr.msk.f32.gmra.mrb[140].mxu0 %vm443_vm1, %v6328_v35 }
0x216e   :  { %11443 = vmatprep.mubr.msk.f32.mxu0 %vm443_vm1, %v6330_v19  ;;  %v13597_v19 = vld [vmem:[%s16814_s3 + $0x38] sm:$0xff] }
0x2171   :  { %11444 = vmatmul.mubr.msk.f32.gmra.mrb[142].mxu0 %vm443_vm1, %v6332_v27 }
0x21f7   :  { %v15859_v44 = vpop.f32.mrb[128].mxu0 }
0x21f8   :  { %v15861_v29 = vpop.f32.mrb[129].mxu0 }
0x21ff   :  { %v15863_v32 = vpop.f32.mrb[130].mxu0 }
0x2200   :  { %v15865_v58 = vpop.f32.mrb[131].mxu0 }
0x2207   :  { %v15867_v48 = vpop.f32.mrb[132].mxu0 }
0x2208   :  { %v15869_v18 = vpop.f32.mrb[133].mxu0 }
0x2234   :  { %v15871_v0 = vpop.f32.mrb[134].mxu0 }
0x2235   :  { %v15873_v34 = vpop.f32.mrb[135].mxu0 }
0x2238   :  { %v11436_v49 = vpop.f32.mrb[136].mxu0 }
0x2239   :  { %v6487_v40 = vmul.f32 0.35355338, %v11436_v49  ;;  %v6447_v8 = vpop.f32.mrb[137].mxu0 }
0x223a   :  { %v6486_v30 = vmul.f32 0.35355338, %v6447_v8 }
0x223b   :  { %v6495_v57 = vadd.f32 %v13591_v46, %v6487_v40  ;;  %v13598_v40 = vld [vmem:[%s16814_s3 + $0x30] sm:$0xff] }
0x223c   :  { %v6494_v3 = vadd.f32 %v13592_v24, %v6486_v30  ;;  %v11439_v12 = vpop.f32.mrb[138].mxu0 }
0x223d   :  { %v6489_v52 = vmul.f32 0.35355338, %v11439_v12  ;;  %v6457_v7 = vpop.f32.mrb[139].mxu0  ;;  %v6505_v45 = vsel %vm613_vm3, %v6495_v57, -inf }
0x223e   :  { %v6488_v54 = vmul.f32 0.35355338, %v6457_v7  ;;  %6506 = vmax.xlane.f32.xlu1 %v6505_v45  ;;  %v6502_v4 = vsel %vm613_vm3, %v6494_v3, -inf }
0x223f   :  { %v6497_v14 = vadd.f32 %v13593_v17, %v6489_v52  ;;  %6503 = vmax.xlane.f32.xlu0 %v6502_v4 }
0x2240   :  { %v11442_v59 = vpop.f32.mrb[140].mxu0  ;;  %v6496_v43 = vadd.f32 %v13594_v20, %v6488_v54 }
0x2241   :  { %v6491_v56 = vmul.f32 0.35355338, %v11442_v59  ;;  %v6467_v37 = vpop.f32.mrb[141].mxu0  ;;  %v6511_v61 = vsel %vm613_vm3, %v6497_v14, -inf }
0x2242   :  { %v6490_v5 = vmul.f32 0.35355338, %v6467_v37  ;;  %v6508_v35 = vsel %vm613_vm3, %v6496_v43, -inf }
0x2243   :  { %v6499_v60 = vadd.f32 %v13595_v39, %v6491_v56  ;;  %6512 = vmax.xlane.f32.xlu0 %v6511_v61 }
0x2244   :  { %v11445_v10 = vpop.f32.mrb[142].mxu0  ;;  %v6498_v42 = vadd.f32 %v13596_v15, %v6490_v5 }
0x2245   :  { %v6493_v51 = vmul.f32 0.35355338, %v11445_v10  ;;  %v6477_v47 = vpop.f32.mrb[143].mxu0  ;;  %v6517_v21 = vsel %vm613_vm3, %v6499_v60, -inf }
0x2246   :  { %v6492_v9 = vmul.f32 0.35355338, %v6477_v47  ;;  %6518 = vmax.xlane.f32.xlu1 %v6517_v21  ;;  %v6514_v30 = vsel %vm613_vm3, %v6498_v42, -inf }
0x2247   :  { %v15901_v27 = vadd.f32 %v13597_v19, %v6493_v51  ;;  %6509 = vmax.xlane.f32.xlu0 %v6508_v35 }
0x2248   :  { %v15908_v8 = vadd.f32 %v13598_v40, %v6492_v9 }
0x2249   :  { %v6523_v49 = vsel %vm613_vm3, %v15901_v27, -inf }
0x224a   :  { %6524 = vmax.xlane.f32.xlu1 %v6523_v49  ;;  %v6520_v46 = vsel %vm613_vm3, %v15908_v8, -inf }
0x224b   :  { %6515 = vmax.xlane.f32.xlu0 %v6514_v30 }
0x224f   :  { %6521 = vmax.xlane.f32.xlu0 %v6520_v46 }
0x225b   :  { %12921 = vrot.lane.b32.xlu1 %v15396_v53, %s13668_s21 }
0x2265   :  { %12916 = vrot.lane.b32.xlu0 %v15391_v36, %s13668_s21 }
0x22cb   :  { %v6507_v24 = vpop.xlane.xlu1 %6506 }
0x22cc   :  { %v6527_v12 = vsub.f32 %v6495_v57, %v6507_v24  ;;  %v6504_v52 = vpop.xlane.xlu0 %6503 }
0x22cd   :  { %v6526_v7 = vsub.f32 %v6494_v3, %v6504_v52 }
0x22ce   :  { %v6536_v45 = vmul.f32 1.442695, %v6527_v12 }
0x22cf   :  { %v6534_v54 = vmul.f32 1.442695, %v6526_v7 }
0x22d0   :  { %13407 = vpow2.f32 %v6536_v45  ;;  %v6513_v4 = vpop.xlane.xlu0 %6512 }
0x22d1   :  { %13409 = vpow2.f32 %v6534_v54  ;;  %v6529_v17 = vsub.f32 %v6497_v14, %v6513_v4 }
0x22d3   :  { %v6540_v59 = vmul.f32 1.442695, %v6529_v17  ;;  %v6519_v56 = vpop.xlane.xlu1 %6518 }
0x22d4   :  { %v6531_v37 = vsub.f32 %v6499_v60, %v6519_v56  ;;  %v6510_v61 = vpop.xlane.xlu0 %6509 }
0x22d5   :  { %13411 = vpow2.f32 %v6540_v59  ;;  %v6528_v20 = vsub.f32 %v6496_v43, %v6510_v61 }
0x22d6   :  { %v6544_v53 = vmul.f32 1.442695, %v6531_v37 }
0x22d7   :  { %v6538_v5 = vmul.f32 1.442695, %v6528_v20  ;;  %v6525_v39 = vpop.xlane.xlu1 %6524 }
0x22d8   :  { %v6516_v36 = vpop.xlane.xlu0 %6515  ;;  %v6533_v54 = vsub.f32 %v15901_v27, %v6525_v39 }
0x22d9   :  { %13413 = vpow2.f32 %v6538_v5  ;;  %v6530_v57 = vsub.f32 %v6498_v42, %v6516_v36 }
0x22da   :  { %v15917_v10 = vpop.eup %13407  ;;  %13415 = vpow2.f32 %v6544_v53  ;;  %v6548_v17 = vmul.f32 1.442695, %v6533_v54 }
0x22db   :  { %v15919_v3 = vpop.eup %13409  ;;  %v6542_v51 = vmul.f32 1.442695, %v6530_v57  ;;  %v6553_v14 = vsel %vm613_vm3, %v15917_v10, 0.0  ;;  %v12922_v47 = vpop.permute.xlu1 %12921 }
0x22dc   :  { %6554 = vadd.xlane.f32.xlu1 %v6553_v14  ;;  %v6522_v60 = vpop.xlane.xlu0 %6521  ;;  %v6550_v43 = vsel %vm613_vm3, %v15919_v3, 0.0  ;;  %v12924_v9 = vunpack.i.h.bf16 %v12922_v47  ;;  %v12923_v35 = vunpack.i.l.bf16 %v12922_v47 }
0x22dd   :  { %13417 = vpow2.f32 %v6542_v51  ;;  %6551 = vadd.xlane.f32.xlu0 %v6550_v43  ;;  %v6532_v4 = vsub.f32 %v15908_v8, %v6522_v60 }
0x22de   :  { %v12354_v12 = vpack.c.bf16 %v12924_v9, %v12923_v35  ;;  %13419 = vpow2.f32 %v6548_v17 }
0x22df   :  { %v15925_v21 = vpop.eup %13411  ;;  %v6546_v59 = vmul.f32 1.442695, %v6532_v4 }
0x22e0   :  { %v12917_v15 = vpop.permute.xlu0 %12916  ;;  %v6559_v42 = vsel %vm613_vm3, %v15925_v21, 0.0 }
0x22e1   :  { %v12919_v19 = vunpack.i.h.bf16 %v12917_v15  ;;  %v12918_v49 = vunpack.i.l.bf16 %v12917_v15  ;;  %6560 = vadd.xlane.f32.xlu1 %v6559_v42  ;;  %13421 = vpow2.f32 %v6546_v59  ;;  %v7004_v59 = vld [vmem:[#allocation2 + $0x1a0] sm:$0xff] }
0x22e3   :  { %v15929_v40 = vpop.eup %13413  ;;  %v12350_v30 = vpack.c.bf16 %v12919_v19, %v12918_v49  ;;  %v4702_v49 = vld [vmem:[#allocation2 + $0x160] sm:$0xff] }
0x22e4   :  { %v6556_v46 = vsel %vm613_vm3, %v15929_v40, 0.0  ;;  %v15933_v24 = vpop.eup %13415 }
0x22e5   :  { %6557 = vadd.xlane.f32.xlu0 %v6556_v46  ;;  %12351 = vmatprep.subr.bf16.mxu1 %v12350_v30  ;;  %v6565_v45 = vsel %vm613_vm3, %v15933_v24, 0.0 }
0x22e6   :  { %12353 = vmatpush3.bf16.msra.mxu1 %v12350_v30  ;;  %v4704_v30 = vld [vmem:[#allocation2 + $0x170] sm:$0xff] }
0x22e7   :  { %v15935_v52 = vpop.eup %13417  ;;  %12355 = vmatprep.subr.bf16.mxu1 %v12354_v12 }
0x22e8   :  { %v6562_v7 = vsel %vm613_vm3, %v15935_v52, 0.0  ;;  %v15947_v56 = vpop.eup %13419 }
0x22e9   :  { %6563 = vadd.xlane.f32.xlu1 %v6562_v7  ;;  %6566 = vadd.xlane.f32.xlu0 %v6565_v45  ;;  %v6571_v61 = vsel %vm613_vm3, %v15947_v56, 0.0 }
0x22ea   :  { %12357 = vmatpush3.bf16.msra.mxu1 %v12354_v12 }
0x22eb   :  { %v15949_v37 = vpop.eup %13421 }
0x22fa   :  { %12931 = vrot.lane.b32.xlu1 %v15411_v22, %s13668_s21  ;;  %v6568_v22 = vsel %vm613_vm3, %v15949_v37, 0.0 }
0x22ff   :  { %12926 = vrot.lane.b32.xlu0 %v15405_v16, %s13668_s21 }
0x231e   :  { %6572 = vadd.xlane.f32.xlu0 %v6571_v61  ;;  %6569 = vadd.xlane.f32.xlu1 %v6568_v22 }
0x232f   :  { %6753 = vrot.lane.b32.xlu1 %v15715_v50, %s13665_s29 }
0x2333   :  { %6783 = vrot.lane.b32.xlu1 %v15861_v29, %s13669_s13 }
0x2334   :  { %6751 = vrot.lane.b32.xlu0 %v15717_v41, %s13665_s29 }
0x2337   :  { %6785 = vrot.lane.b32.xlu1 %v15859_v44, %s13669_s13 }
0x2338   :  { %6755 = vrot.lane.b32.xlu0 %v15721_v6, %s13665_s29 }
0x233b   :  { %6757 = vrot.lane.b32.xlu1 %v15719_v1, %s13665_s29 }
0x233c   :  { %6787 = vrot.lane.b32.xlu0 %v15865_v58, %s13669_s13 }
0x233f   :  { %6789 = vrot.lane.b32.xlu1 %v15863_v32, %s13669_s13 }
0x2340   :  { %6759 = vrot.lane.b32.xlu0 %v15725_v28, %s13665_s29 }
0x2343   :  { %6761 = vrot.lane.b32.xlu1 %v15723_v33, %s13665_s29 }
0x2369   :  { %v6555_v50 = vpop.xlane.xlu1 %6554 }
0x236a   :  { %v6552_v16 = vpop.xlane.xlu0 %6551 }
0x236b   :  { %13423 = vrcp.f32 %v6552_v16 }
0x236c   :  { %13425 = vrcp.f32 %v6555_v50 }
0x236e   :  { %v6561_v41 = vpop.xlane.xlu1 %6560 }
0x2372   :  { %v6558_v6 = vpop.xlane.xlu0 %6557 }
0x2373   :  { %13427 = vrcp.f32 %v6558_v6 }
0x2374   :  { %13429 = vrcp.f32 %v6561_v41 }
0x2375   :  { %v13424_v44 = vpop.eup %13423 }
0x2376   :  { %v6564_v29 = vpop.xlane.xlu1 %6563  ;;  %v6567_v1 = vpop.xlane.xlu0 %6566  ;;  %v6582_v27 = vmul.f32 %v13424_v44, %v15919_v3 }
0x2377   :  { %13431 = vrcp.f32 %v6564_v29  ;;  %v13426_v39 = vpop.eup %13425 }
0x2378   :  { %11462 = vmatprep.mubr.msk.f32.mxu1 %vm613_vm3, %v6582_v27  ;;  %13433 = vrcp.f32 %v6567_v1  ;;  %v6583_v57 = vmul.f32 %v13426_v39, %v15917_v10 }
0x237a   :  { %v12932_v32 = vpop.permute.xlu1 %12931  ;;  %v12927_v58 = vpop.permute.xlu0 %12926 }
0x237b   :  { %v12934_v28 = vunpack.i.h.bf16 %v12932_v32  ;;  %v12933_v8 = vunpack.i.l.bf16 %v12932_v32  ;;  %v12929_v20 = vunpack.i.h.bf16 %v12927_v58  ;;  %v12928_v33 = vunpack.i.l.bf16 %v12927_v58 }
0x237d   :  { %v12358_v53 = vpack.c.bf16 %v12929_v20, %v12928_v33  ;;  %v12362_v5 = vpack.c.bf16 %v12934_v28, %v12933_v8  ;;  %v13428_v36 = vpop.eup %13427 }
0x237e   :  { %v13430_v3 = vpop.eup %13429  ;;  %v6584_v51 = vmul.f32 %v13428_v36, %v15929_v40  ;;  %v4703_v40 = vld [vmem:[#allocation2 + $0x168] sm:$0xff] }
0x237f   :  { %12359 = vmatprep.subr.bf16.mxu1 %v12358_v53  ;;  %v6585_v60 = vmul.f32 %v13430_v3, %v15925_v21  ;;  %v12366_v46 = vpack.c.bf16 %v4703_v40, %v4702_v49 }
0x2380   :  { %12361 = vmatpush3.bf16.msra.mxu1 %v12358_v53 }
0x2381   :  { %12363 = vmatprep.subr.bf16.mxu1 %v12362_v5  ;;  %v13432_v14 = vpop.eup %13431 }
0x2382   :  { %v13434_v43 = vpop.eup %13433  ;;  %v6586_v47 = vmul.f32 %v13432_v14, %v15935_v52 }
0x2383   :  { %v6587_v15 = vmul.f32 %v13434_v43, %v15933_v24  ;;  %v4705_v24 = vld [vmem:[#allocation2 + $0x178] sm:$0xff] }
0x2384   :  { %12365 = vmatpush3.bf16.msra.mxu1 %v12362_v5  ;;  %v12370_v12 = vpack.c.bf16 %v4705_v24, %v4704_v30 }
0x2385   :  { %12367 = vmatprep.subr.bf16.mxu1 %v12366_v46 }
0x2387   :  { %11463 = vmatmul.mubr.msk.f32.vlgmr.msra.gmra.mrb[128].mxu1 %vm613_vm3, %v6583_v57 }
0x2388   :  { %11465 = vmatprep.mubr.msk.f32.mxu1 %vm613_vm3, %v6584_v51  ;;  %12369 = vmatpush3.bf16.msra.mxu1 %v12366_v46 }
0x2389   :  { %12371 = vmatprep.subr.bf16.mxu1 %v12370_v12 }
0x238b   :  { %11466 = vmatmul.mubr.msk.f32.gmra.mrb[130].mxu1 %vm613_vm3, %v6585_v60 }
0x238c   :  { %11468 = vmatprep.mubr.msk.f32.mxu1 %vm613_vm3, %v6586_v47  ;;  %12373 = vmatpush3.bf16.msra.mxu1 %v12370_v12 }
0x238f   :  { %11469 = vmatmul.mubr.msk.f32.gmra.mrb[132].mxu1 %vm613_vm3, %v6587_v15 }
0x23ab   :  { %v6570_v10 = vpop.xlane.xlu1 %6569  ;;  %v6573_v42 = vpop.xlane.xlu0 %6572 }
0x23ac   :  { %13435 = vrcp.f32 %v6570_v10 }
0x23ad   :  { %13437 = vrcp.f32 %v6573_v42 }
0x23af   :  { %v6754_v22 = vpop.permute.xlu1 %6753  ;;  %v6752_v50 = vpop.permute.xlu0 %6751 }
0x23b0   :  { %v6839_v27 = vsel %vm443_vm1, %v15573_v11, %v6752_v50  ;;  %v6840_v58 = vsel %vm443_vm1, %v15571_v26, %v6754_v22 }
0x23b3   :  { %v6756_v41 = vpop.permute.xlu0 %6755 }
0x23b4   :  { %v6841_v11 = vsel %vm443_vm1, %v15577_v13, %v6756_v41 }
0x23b6   :  { %v13436_v9 = vpop.eup %13435 }
0x23b7   :  { %v13438_v35 = vpop.eup %13437  ;;  %v6588_v19 = vmul.f32 %v13436_v9, %v15949_v37  ;;  %v7005_v37 = vld [vmem:[#allocation2 + $0x1a8] sm:$0xff]  ;;  %v6788_v44 = vpop.permute.xlu0 %6787 }
0x23b8   :  { %v6589_v21 = vmul.f32 %v13438_v35, %v15947_v56  ;;  %v12382_v61 = vpack.c.bf16 %v7005_v37, %v7004_v59  ;;  %v6849_v36 = vsel %vm2221_vm4, %v6841_v11, %v6788_v44  ;;  %v9733_v59 = vld [vmem:[%s16813_s2 + $0xb] ss:$0 sm:$0xff]  ;;  %v7011_v37 = vld [vmem:[#allocation2 + $0x1d0] sm:$0xff] }
0x23b9   :  { %11471 = vmatprep.mubr.msk.f32.mxu1 %vm613_vm3, %v6588_v19 }
0x23ba   :  { %11472 = vmatmul.mubr.msk.f32.gmra.mrb[134].mxu1 %vm613_vm3, %v6589_v21  ;;  %12383 = vmatprep.subr.bf16.mxu1 %v12382_v61 }
0x23bb   :  { %v6760_v1 = vpop.permute.xlu0 %6759 }
0x23bc   :  { %v6843_v13 = vsel %vm443_vm1, %v15581_v62, %v6760_v1 }
0x245a   :  { %v11464_v52 = vpop.f32.mrb[128].mxu1 }
0x245b   :  { %6817 = vrot.lane.b32.xlu1 %v11464_v52, %s13670_s14  ;;  %v6704_v7 = vpop.f32.mrb[129].mxu1 }
0x245c   :  { %6815 = vrot.lane.b32.xlu0 %v6704_v7, %s13670_s14  ;;  %v7001_v7 = vld [vmem:[#allocation2 + $0x190] sm:$0xff] }
0x245e   :  { %v11467_v45 = vpop.f32.mrb[130].mxu1 }
0x245f   :  { %6793 = vrot.lane.b32.xlu1 %v15867_v48, %s13669_s13  ;;  %v6714_v54 = vpop.f32.mrb[131].mxu1  ;;  %v6999_v48 = vld [vmem:[#allocation2 + $0x180] sm:$0xff] }
0x2460   :  { %6791 = vrot.lane.b32.xlu0 %v15869_v18, %s13669_s13  ;;  %v7000_v18 = vld [vmem:[#allocation2 + $0x188] sm:$0xff] }
0x2461   :  { %v12374_v56 = vpack.c.bf16 %v7000_v18, %v6999_v48  ;;  %v7010_v48 = vld [vmem:[#allocation2 + $0x1c8] sm:$0xff] }
0x2462   :  { %v11470_v4 = vpop.f32.mrb[132].mxu1 }
0x2463   :  { %6821 = vrot.lane.b32.xlu1 %v11467_v45, %s13670_s14  ;;  %v6724_v17 = vpop.f32.mrb[133].mxu1  ;;  %12375 = vmatprep.subr.bf16.mxu0 %v12374_v56  ;;  %v7002_v45 = vld [vmem:[#allocation2 + $0x198] sm:$0xff] }
0x2464   :  { %6819 = vrot.lane.b32.xlu0 %v6714_v54, %s13670_s14  ;;  %12377 = vmatpush3.bf16.msra.mxu0 %v12374_v56  ;;  %v12378_v54 = vpack.c.bf16 %v7002_v45, %v7001_v7 }
0x2466   :  { %12379 = vmatprep.subr.bf16.mxu0 %v12378_v54 }
0x2467   :  { %6765 = vrot.lane.b32.xlu1 %v15727_v38, %s13665_s29 }
0x2468   :  { %6763 = vrot.lane.b32.xlu0 %v15729_v2, %s13665_s29  ;;  %12381 = vmatpush3.bf16.msra.mxu0 %v12378_v54 }
0x246b   :  { %6825 = vrot.lane.b32.xlu1 %v11470_v4, %s13670_s14  ;;  %v7007_v4 = vld [vmem:[#allocation2 + $0x1b8] sm:$0xff] }
0x246c   :  { %6823 = vrot.lane.b32.xlu0 %v6724_v17, %s13670_s14 }
0x246f   :  { %6797 = vrot.lane.b32.xlu1 %v15871_v0, %s13669_s13  ;;  %v6784_v0 = vpop.permute.xlu1 %6783 }
0x2470   :  { %6795 = vrot.lane.b32.xlu0 %v15873_v34, %s13669_s13  ;;  %v6847_v28 = vsel %vm2221_vm4, %v6839_v27, %v6784_v0 }
0x2473   :  { %v6786_v16 = vpop.permute.xlu1 %6785 }
0x2474   :  { %v6848_v20 = vsel %vm2221_vm4, %v6840_v58, %v6786_v16 }
0x2477   :  { %v6758_v34 = vpop.permute.xlu1 %6757 }
0x2478   :  { %v6842_v57 = vsel %vm443_vm1, %v15575_v63, %v6758_v34 }
0x247b   :  { %v6790_v6 = vpop.permute.xlu1 %6789 }
0x247c   :  { %v6850_v51 = vsel %vm2221_vm4, %v6842_v57, %v6790_v6 }
0x247f   :  { %v6762_v29 = vpop.permute.xlu1 %6761 }
0x2480   :  { %v6844_v63 = vsel %vm443_vm1, %v15579_v23, %v6762_v29 }
0x248d   :  { %v11473_v38 = vpop.f32.mrb[134].mxu1 }
0x248e   :  { %6829 = vrot.lane.b32.xlu1 %v11473_v38, %s13670_s14  ;;  %v6734_v2 = vpop.f32.mrb[135].mxu1 }
0x248f   :  { %6827 = vrot.lane.b32.xlu0 %v6734_v2, %s13670_s14 }
0x24cd   :  { %v6818_v32 = vpop.permute.xlu1 %6817 }
0x24ce   :  { %v6816_v8 = vpop.permute.xlu0 %6815  ;;  %v6856_v53 = vsel %vm2230_vm5, %v6848_v20, %v6818_v32  ;;  %v16084_v20 = vld [vmem:[%s16813_s2 + $0xc] ss:$0 sm:$0xff] }
0x24cf   :  { %v6855_v33 = vsel %vm2230_vm5, %v6847_v28, %v6816_v8  ;;  %v9755_v8 = vld [vmem:[%s16813_s2 + $0xd] ss:$0 sm:$0xff] }
0x24d0   :  { %11482 = vmatprep.mubr.msk.f32.mxu1 %vm91_vm0, %v6855_v33 }
0x24d1   :  { %v6794_v5 = vpop.permute.xlu1 %6793  ;;  %11483 = vmatmul.mubr.msk.f32.vlgmr.msra.gmra.mrb[136].mxu1 %vm91_vm0, %v6856_v53 }
0x24d2   :  { %v6792_v39 = vpop.permute.xlu0 %6791  ;;  %12385 = vmatpush3.bf16.msra.mxu1 %v12382_v61  ;;  %v6852_v9 = vsel %vm2221_vm4, %v6844_v63, %v6794_v5  ;;  %v7012_v61 = vld [vmem:[#allocation2 + $0x1d8] sm:$0xff] }
0x24d3   :  { %v6851_v10 = vsel %vm2221_vm4, %v6843_v13, %v6792_v39  ;;  %v12394_v0 = vpack.c.bf16 %v7012_v61, %v7011_v37 }
0x24d5   :  { %v6822_v26 = vpop.permute.xlu1 %6821 }
0x24d6   :  { %v6820_v3 = vpop.permute.xlu0 %6819  ;;  %v6858_v60 = vsel %vm2230_vm5, %v6850_v51, %v6822_v26 }
0x24d7   :  { %v6857_v14 = vsel %vm2230_vm5, %v6849_v36, %v6820_v3 }
0x24d8   :  { %11485 = vmatprep.mubr.msk.f32.mxu1 %vm91_vm0, %v6857_v14 }
0x24d9   :  { %v6766_v43 = vpop.permute.xlu1 %6765  ;;  %11486 = vmatmul.mubr.msk.f32.gmra.mrb[138].mxu1 %vm91_vm0, %v6858_v60 }
0x24da   :  { %v6764_v47 = vpop.permute.xlu0 %6763  ;;  %v6846_v23 = vsel %vm443_vm1, %v15583_v55, %v6766_v43  ;;  %v7009_v55 = vld [vmem:[#allocation2 + $0x1c0] sm:$0xff] }
0x24db   :  { %v6845_v62 = vsel %vm443_vm1, %v15585_v31, %v6764_v47  ;;  %v7006_v31 = vld [vmem:[#allocation2 + $0x1b0] sm:$0xff]  ;;  %v12390_v18 = vpack.c.bf16 %v7010_v48, %v7009_v55 }
0x24dc   :  { %v12386_v17 = vpack.c.bf16 %v7007_v4, %v7006_v31  ;;  %v9764_v4 = vld [vmem:[%s16813_s2 + $0xe] ss:$0 sm:$0xff] }
0x24dd   :  { %v6826_v15 = vpop.permute.xlu1 %6825  ;;  %12391 = vmatprep.subr.bf16.mxu0 %v12390_v18 }
0x24de   :  { %v6824_v42 = vpop.permute.xlu0 %6823  ;;  %v6860_v19 = vsel %vm2230_vm5, %v6852_v9, %v6826_v15  ;;  %12387 = vmatprep.subr.bf16.mxu1 %v12386_v17 }
0x24df   :  { %v6859_v35 = vsel %vm2230_vm5, %v6851_v10, %v6824_v42  ;;  %12389 = vmatpush3.bf16.msra.mxu1 %v12386_v17 }
0x24e0   :  { %11488 = vmatprep.mubr.msk.f32.mxu1 %vm91_vm0, %v6859_v35 }
0x24e1   :  { %11489 = vmatmul.mubr.msk.f32.gmra.mrb[140].mxu1 %vm91_vm0, %v6860_v19  ;;  %v6798_v21 = vpop.permute.xlu1 %6797 }
0x24e2   :  { %v6796_v49 = vpop.permute.xlu0 %6795  ;;  %v6854_v24 = vsel %vm2221_vm4, %v6846_v23, %v6798_v21 }
0x24e3   :  { %v6853_v30 = vsel %vm2221_vm4, %v6845_v62, %v6796_v49 }
0x2500   :  { %v6830_v40 = vpop.permute.xlu1 %6829 }
0x2501   :  { %v6828_v46 = vpop.permute.xlu0 %6827  ;;  %v6862_v52 = vsel %vm2230_vm5, %v6854_v24, %v6830_v40 }
0x2502   :  { %v6861_v12 = vsel %vm2230_vm5, %v6853_v30, %v6828_v46 }
0x2503   :  { %11491 = vmatprep.mubr.msk.f32.mxu1 %vm91_vm0, %v6861_v12 }
0x2504   :  { %11492 = vmatmul.mubr.msk.f32.gmra.mrb[142].mxu1 %vm91_vm0, %v6862_v52 }
0x25a4   :  { %v11484_v56 = vpop.f32.mrb[136].mxu1 }
0x25a5   :  { %v6959_v38 = vpop.f32.mrb[137].mxu1  ;;  %v6965_v22 = vadd.f32 %v11484_v56, %v9733_v59 }
0x25a6   :  { %v6960_v2 = vadd.f32 %v9733_v59, %v6959_v38 }
0x25a8   :  { %11502 = vmatprep.mubr.msk.f32.mxu0 %vm91_vm0, %v6960_v2  ;;  %11522 = vmatprep.mubr.msk.f32.mxu1 %vm91_vm0, %v6960_v2 }
0x25a9   :  { %11503 = vmatmul.mubr.msk.f32.vlgmr.msra.gmra.mrb[144].mxu0 %vm91_vm0, %v6965_v22  ;;  %11523 = vmatmul.mubr.msk.f32.vlgmr.msra.gmra.mrb[144].mxu1 %vm91_vm0, %v6965_v22 }
0x25aa   :  { %12393 = vmatpush3.bf16.msra.mxu0 %v12390_v18 }
0x25ab   :  { %12395 = vmatprep.subr.bf16.mxu0 %v12394_v0 }
0x25ac   :  { %v11487_v16 = vpop.f32.mrb[138].mxu1 }
0x25ad   :  { %v6969_v50 = vpop.f32.mrb[139].mxu1  ;;  %v6975_v41 = vadd.f32 %v11487_v16, %v9733_v59 }
0x25ae   :  { %v6970_v34 = vadd.f32 %v9733_v59, %v6969_v50  ;;  %12397 = vmatpush3.bf16.msra.mxu0 %v12394_v0 }
0x25b0   :  { %11505 = vmatprep.mubr.msk.f32.mxu0 %vm91_vm0, %v6970_v34  ;;  %11525 = vmatprep.mubr.msk.f32.mxu1 %vm91_vm0, %v6970_v34 }
0x25b1   :  { %11506 = vmatmul.mubr.msk.f32.gmra.mrb[146].mxu0 %vm91_vm0, %v6975_v41  ;;  %11526 = vmatmul.mubr.msk.f32.gmra.mrb[146].mxu1 %vm91_vm0, %v6975_v41 }
0x25b4   :  { %v11490_v6 = vpop.f32.mrb[140].mxu1 }
0x25b5   :  { %v6979_v44 = vpop.f32.mrb[141].mxu1  ;;  %v6985_v1 = vadd.f32 %v11490_v6, %v9733_v59 }
0x25b6   :  { %v6980_v29 = vadd.f32 %v9733_v59, %v6979_v44 }
0x25b8   :  { %11508 = vmatprep.mubr.msk.f32.mxu0 %vm91_vm0, %v6980_v29  ;;  %11528 = vmatprep.mubr.msk.f32.mxu1 %vm91_vm0, %v6980_v29 }
0x25b9   :  { %11509 = vmatmul.mubr.msk.f32.gmra.mrb[148].mxu0 %vm91_vm0, %v6985_v1  ;;  %11529 = vmatmul.mubr.msk.f32.gmra.mrb[148].mxu1 %vm91_vm0, %v6985_v1 }
0x25d7   :  { %v11493_v27 = vpop.f32.mrb[142].mxu1 }
0x25d8   :  { %v6989_v32 = vpop.f32.mrb[143].mxu1  ;;  %v6995_v28 = vadd.f32 %v11493_v27, %v9733_v59 }
0x25d9   :  { %v6990_v58 = vadd.f32 %v9733_v59, %v6989_v32 }
0x25db   :  { %11511 = vmatprep.mubr.msk.f32.mxu0 %vm91_vm0, %v6990_v58  ;;  %11531 = vmatprep.mubr.msk.f32.mxu1 %vm91_vm0, %v6990_v58 }
0x25dc   :  { %11512 = vmatmul.mubr.msk.f32.gmra.mrb[150].mxu0 %vm91_vm0, %v6995_v28  ;;  %11532 = vmatmul.mubr.msk.f32.gmra.mrb[150].mxu1 %vm91_vm0, %v6995_v28 }
0x25dd   :  { %11542 = vmatprep.mubr.msk.f32.mxu0 %vm91_vm0, %v6960_v2 }
0x25e0   :  { %11543 = vmatmul.mubr.msk.f32.vlgmr.msra.gmra.mrb[152].mxu0 %vm91_vm0, %v6965_v22 }
0x25e1   :  { %11545 = vmatprep.mubr.msk.f32.mxu0 %vm91_vm0, %v6970_v34 }
0x25e4   :  { %11546 = vmatmul.mubr.msk.f32.gmra.mrb[154].mxu0 %vm91_vm0, %v6975_v41 }
0x25e5   :  { %11548 = vmatprep.mubr.msk.f32.mxu0 %vm91_vm0, %v6980_v29 }
0x25e8   :  { %11549 = vmatmul.mubr.msk.f32.gmra.mrb[156].mxu0 %vm91_vm0, %v6985_v1 }
0x25e9   :  { %11551 = vmatprep.mubr.msk.f32.mxu0 %vm91_vm0, %v6990_v58 }
0x25ec   :  { %11552 = vmatmul.mubr.msk.f32.gmra.mrb[158].mxu0 %vm91_vm0, %v6995_v28 }
0x267c   :  { %v11504_v33 = vpop.f32.mrb[144].mxu0  ;;  %v11524_v53 = vpop.f32.mrb[144].mxu1 }
0x267d   :  { %v7239_v5 = vadd.f32 %v11524_v53, %v9755_v8  ;;  %v7122_v39 = vpop.f32.mrb[145].mxu0  ;;  %v7233_v11 = vpop.f32.mrb[145].mxu1  ;;  %v16136_v16 = vadd.f32 %v11504_v33, %v16084_v20 }
0x267e   :  { %v16087_v26 = vadd.f32 %v16084_v20, %v7122_v39  ;;  %v7234_v36 = vadd.f32 %v9755_v8, %v7233_v11 }
0x2680   :  { %11570 = vmatprep.mubr.msk.f32.mxu1 %vm443_vm1, %v16087_v26  ;;  %v12398_v57 = vpack.c.bf16 %v7239_v5, %v7234_v36  ;;  %v16091_v3 = vpack.i.bf16 %v7239_v5, %v7234_v36 }
0x2682   :  { %12400 = vmatprep.subr.msk.bf16.mxu1 %vm13791_vm2, %v12398_v57 }
0x2683   :  { %12403 = vmatpush3.bf16.xpose.msk.msra.mxu1 %vm13791_vm2, %v12398_v57  ;;  %v16164_v57 = vld [vmem:[%s16815_s4 + $0x8] sm:$0xff] }
0x2684   :  { %v11507_v51 = vpop.f32.mrb[146].mxu0  ;;  %v11527_v14 = vpop.f32.mrb[146].mxu1 }
0x2685   :  { %v16098_v60 = vadd.f32 %v11507_v51, %v16084_v20  ;;  %v7249_v43 = vadd.f32 %v11527_v14, %v9755_v8  ;;  %v7132_v47 = vpop.f32.mrb[147].mxu0  ;;  %v7243_v13 = vpop.f32.mrb[147].mxu1  ;;  %v16170_v14 = vld [vmem:[%s16815_s4] sm:$0xff] }
0x2686   :  { %v7244_v15 = vadd.f32 %v9755_v8, %v7243_v13  ;;  %v16141_v6 = vadd.f32 %v16084_v20, %v7132_v47 }
0x2688   :  { %v12404_v63 = vpack.c.bf16 %v7249_v43, %v7244_v15  ;;  %v16100_v10 = vpack.i.bf16 %v7249_v43, %v7244_v15 }
0x268a   :  { %12406 = vmatprep.subr.msk.bf16.mxu1 %vm13791_vm2, %v12404_v63 }
0x268b   :  { %12409 = vmatpush3.bf16.xpose.msk.msra.mxu1 %vm13791_vm2, %v12404_v63 }
0x268c   :  { %v11510_v42 = vpop.f32.mrb[148].mxu0  ;;  %v11530_v9 = vpop.f32.mrb[148].mxu1 }
0x268d   :  { %v16107_v35 = vadd.f32 %v11510_v42, %v16084_v20  ;;  %v7259_v19 = vadd.f32 %v11530_v9, %v9755_v8  ;;  %v7142_v21 = vpop.f32.mrb[149].mxu0  ;;  %v7253_v49 = vpop.f32.mrb[149].mxu1 }
0x268e   :  { %v16110_v62 = vadd.f32 %v16084_v20, %v7142_v21  ;;  %v7254_v40 = vadd.f32 %v9755_v8, %v7253_v49 }
0x2690   :  { %v12410_v23 = vpack.c.bf16 %v7259_v19, %v7254_v40  ;;  %v16112_v30 = vpack.i.bf16 %v7259_v19, %v7254_v40  ;;  %v16178_v19 = vld [vmem:[%s16815_s4 + $0x18] sm:$0xff] }
0x2692   :  { %12412 = vmatprep.subr.msk.bf16.mxu1 %vm13791_vm2, %v12410_v23 }
0x2693   :  { %12415 = vmatpush3.bf16.xpose.msk.msra.mxu1 %vm13791_vm2, %v12410_v23 }
0x26af   :  { %v11513_v46 = vpop.f32.mrb[150].mxu0  ;;  %v11533_v24 = vpop.f32.mrb[150].mxu1 }
0x26b0   :  { %v16119_v12 = vadd.f32 %v11513_v46, %v16084_v20  ;;  %v7269_v52 = vadd.f32 %v11533_v24, %v9755_v8  ;;  %v7152_v7 = vpop.f32.mrb[151].mxu0  ;;  %v7263_v45 = vpop.f32.mrb[151].mxu1  ;;  %v16185_v24 = vld [vmem:[%s16815_s4 + $0x10] sm:$0xff] }
0x26b1   :  { %v16122_v31 = vadd.f32 %v16084_v20, %v7152_v7  ;;  %v7264_v54 = vadd.f32 %v9755_v8, %v7263_v45  ;;  %v16191_v45 = vld [vmem:[%s16815_s4 + $0x28] sm:$0xff] }
0x26b3   :  { %v11544_v17 = vpop.f32.mrb[152].mxu0  ;;  %v12416_v55 = vpack.c.bf16 %v7269_v52, %v7264_v54  ;;  %v16127_v48 = vpack.i.bf16 %v7269_v52, %v7264_v54 }
0x26b4   :  { %v7350_v18 = vadd.f32 %v11544_v17, %v9764_v4  ;;  %v7344_v59 = vpop.f32.mrb[153].mxu0 }
0x26b5   :  { %v7345_v56 = vadd.f32 %v9764_v4, %v7344_v59  ;;  %12418 = vmatprep.subr.msk.bf16.mxu1 %vm13791_vm2, %v12416_v55  ;;  %v16198_v59 = vld [vmem:[%s16815_s4 + $0x20] sm:$0xff] }
0x26b6   :  { %12421 = vmatpush3.bf16.xpose.msk.msra.mxu1 %vm13791_vm2, %v12416_v55 }
0x26b7   :  { %v11547_v37 = vpop.f32.mrb[154].mxu0  ;;  %v12422_v61 = vpack.c.bf16 %v7350_v18, %v7345_v56  ;;  %v16133_v38 = vpack.i.bf16 %v7350_v18, %v7345_v56 }
0x26b8   :  { %v7360_v2 = vadd.f32 %v11547_v37, %v9764_v4  ;;  %v7354_v22 = vpop.f32.mrb[155].mxu0 }
0x26b9   :  { %v7355_v0 = vadd.f32 %v9764_v4, %v7354_v22  ;;  %12423 = vmatprep.subr.bf16.mxu0 %v12422_v61 }
0x26ba   :  { %12425 = vmatpush3.bf16.msra.mxu0 %v12422_v61 }
0x26bb   :  { %v11550_v50 = vpop.f32.mrb[156].mxu0  ;;  %v12426_v34 = vpack.c.bf16 %v7360_v2, %v7355_v0  ;;  %v16138_v41 = vpack.i.bf16 %v7360_v2, %v7355_v0  ;;  %v16205_v2 = vld [vmem:[%s16815_s4 + $0x38] sm:$0xff] }
0x26bc   :  { %v7370_v44 = vadd.f32 %v11550_v50, %v9764_v4  ;;  %v7364_v29 = vpop.f32.mrb[157].mxu0  ;;  %v16212_v50 = vld [vmem:[%s16815_s4 + $0x30] sm:$0xff] }
0x26bd   :  { %v7365_v1 = vadd.f32 %v9764_v4, %v7364_v29  ;;  %11571 = vmatmul.mubr.msk.f32.vlgmr.msra.gmra.mrb[152].mxu1 %vm443_vm1, %v16136_v16  ;;  %12427 = vmatprep.subr.bf16.mxu0 %v12426_v34 }
0x26be   :  { %11573 = vmatprep.mubr.msk.f32.mxu1 %vm443_vm1, %v16141_v6  ;;  %12429 = vmatpush3.bf16.msra.mxu0 %v12426_v34 }
0x26bf   :  { %v11553_v27 = vpop.f32.mrb[158].mxu0  ;;  %v12430_v32 = vpack.c.bf16 %v7370_v44, %v7365_v1  ;;  %v16147_v58 = vpack.i.bf16 %v7370_v44, %v7365_v1 }
0x26c0   :  { %v7380_v28 = vadd.f32 %v11553_v27, %v9764_v4  ;;  %v7374_v8 = vpop.f32.mrb[159].mxu0 }
0x26c1   :  { %v7375_v33 = vadd.f32 %v9764_v4, %v7374_v8  ;;  %11574 = vmatmul.mubr.msk.f32.gmra.mrb[154].mxu1 %vm443_vm1, %v16098_v60  ;;  %12431 = vmatprep.subr.bf16.mxu0 %v12430_v32 }
0x26c2   :  { %11576 = vmatprep.mubr.msk.f32.mxu1 %vm443_vm1, %v16110_v62  ;;  %12433 = vmatpush3.bf16.msra.mxu0 %v12430_v32 }
0x26c3   :  { %v12434_v20 = vpack.c.bf16 %v7380_v28, %v7375_v33  ;;  %v16153_v53 = vpack.i.bf16 %v7380_v28, %v7375_v33 }
0x26c5   :  { %11577 = vmatmul.mubr.msk.f32.gmra.mrb[156].mxu1 %vm443_vm1, %v16107_v35  ;;  %12435 = vmatprep.subr.bf16.mxu0 %v12434_v20 }
0x26c6   :  { %11579 = vmatprep.mubr.msk.f32.mxu1 %vm443_vm1, %v16122_v31  ;;  %12437 = vmatpush3.bf16.msra.mxu0 %v12434_v20 }
0x26c9   :  { %11580 = vmatmul.mubr.msk.f32.gmra.mrb[158].mxu1 %vm443_vm1, %v16119_v12 }
0x2790   :  { %v11572_v5 = vpop.f32.mrb[152].mxu1 }
0x2791   :  { %v7537_v39 = vmul.f32 0.35355338, %v11572_v5  ;;  %v7497_v11 = vpop.f32.mrb[153].mxu1 }
0x2792   :  { %v7536_v36 = vmul.f32 0.35355338, %v7497_v11 }
0x2793   :  { %v7545_v51 = vadd.f32 %v16164_v57, %v7537_v39 }
0x2794   :  { %v7544_v43 = vadd.f32 %v16170_v14, %v7536_v36  ;;  %v11575_v47 = vpop.f32.mrb[154].mxu1 }
0x2795   :  { %v7539_v13 = vmul.f32 0.35355338, %v11575_v47  ;;  %v7507_v15 = vpop.f32.mrb[155].mxu1  ;;  %v7555_v63 = vsel %vm613_vm3, %v7545_v51, -inf }
0x2796   :  { %v7538_v42 = vmul.f32 0.35355338, %v7507_v15  ;;  %7556 = vmax.xlane.f32.xlu1 %v7555_v63  ;;  %v7552_v9 = vsel %vm613_vm3, %v7544_v43, -inf }
0x2797   :  { %v7547_v21 = vadd.f32 %v16178_v19, %v7539_v13  ;;  %7553 = vmax.xlane.f32.xlu0 %v7552_v9 }
0x2798   :  { %v11578_v49 = vpop.f32.mrb[156].mxu1  ;;  %v7546_v52 = vadd.f32 %v16185_v24, %v7538_v42 }
0x2799   :  { %v7541_v40 = vmul.f32 0.35355338, %v11578_v49  ;;  %v7517_v23 = vpop.f32.mrb[157].mxu1  ;;  %v7561_v46 = vsel %vm613_vm3, %v7547_v21, -inf }
0x279a   :  { %v7540_v7 = vmul.f32 0.35355338, %v7517_v23  ;;  %v7558_v61 = vsel %vm613_vm3, %v7546_v52, -inf }
0x279b   :  { %v7549_v54 = vadd.f32 %v16191_v45, %v7541_v40  ;;  %7562 = vmax.xlane.f32.xlu0 %v7561_v46 }
0x279c   :  { %v11581_v4 = vpop.f32.mrb[158].mxu1  ;;  %v7548_v56 = vadd.f32 %v16198_v59, %v7540_v7 }
0x279d   :  { %v7543_v17 = vmul.f32 0.35355338, %v11581_v4  ;;  %v7527_v55 = vpop.f32.mrb[159].mxu1  ;;  %v7567_v18 = vsel %vm613_vm3, %v7549_v54, -inf }
0x279e   :  { %v7542_v37 = vmul.f32 0.35355338, %v7527_v55  ;;  %7568 = vmax.xlane.f32.xlu1 %v7567_v18  ;;  %v7564_v44 = vsel %vm613_vm3, %v7548_v56, -inf }
0x279f   :  { %v7551_v22 = vadd.f32 %v16205_v2, %v7543_v17  ;;  %7559 = vmax.xlane.f32.xlu0 %v7558_v61 }
0x27a0   :  { %v7550_v34 = vadd.f32 %v16212_v50, %v7542_v37 }
0x27a1   :  { %v7573_v0 = vsel %vm613_vm3, %v7551_v22, -inf }
0x27a2   :  { %7574 = vmax.xlane.f32.xlu1 %v7573_v0  ;;  %v7570_v29 = vsel %vm613_vm3, %v7550_v34, -inf }
0x27a3   :  { %7565 = vmax.xlane.f32.xlu0 %v7564_v44 }
0x27a7   :  { %7571 = vmax.xlane.f32.xlu0 %v7570_v29 }
0x2823   :  { %v7557_v1 = vpop.xlane.xlu1 %7556 }
0x2824   :  { %v7577_v27 = vsub.f32 %v7545_v51, %v7557_v1  ;;  %v7554_v32 = vpop.xlane.xlu0 %7553 }
0x2825   :  { %v7576_v28 = vsub.f32 %v7544_v43, %v7554_v32 }
0x2826   :  { %v7586_v8 = vmul.f32 1.442695, %v7577_v27 }
0x2827   :  { %v7584_v33 = vmul.f32 1.442695, %v7576_v28 }
0x2828   :  { %13439 = vpow2.f32 %v7586_v8  ;;  %v7563_v36 = vpop.xlane.xlu0 %7562 }
0x2829   :  { %13441 = vpow2.f32 %v7584_v33  ;;  %v7579_v43 = vsub.f32 %v7547_v21, %v7563_v36 }
0x282b   :  { %v7569_v47 = vpop.xlane.xlu1 %7568  ;;  %v7590_v63 = vmul.f32 1.442695, %v7579_v43 }
0x282c   :  { %v7560_v51 = vpop.xlane.xlu0 %7559  ;;  %v7581_v42 = vsub.f32 %v7549_v54, %v7569_v47 }
0x282d   :  { %v7578_v13 = vsub.f32 %v7546_v52, %v7560_v51  ;;  %13443 = vpow2.f32 %v7590_v63 }
0x282e   :  { %v7594_v40 = vmul.f32 1.442695, %v7581_v42 }
0x282f   :  { %v7588_v9 = vmul.f32 1.442695, %v7578_v13  ;;  %v7575_v18 = vpop.xlane.xlu1 %7574 }
0x2830   :  { %v7566_v15 = vpop.xlane.xlu0 %7565 }
0x2831   :  { %v7580_v49 = vsub.f32 %v7548_v56, %v7566_v15  ;;  %13445 = vpow2.f32 %v7588_v9  ;;  %v7583_v56 = vsub.f32 %v7551_v22, %v7575_v18 }
0x2832   :  { %v16217_v20 = vpop.eup %13439  ;;  %13447 = vpow2.f32 %v7594_v40 }
0x2833   :  { %v16219_v5 = vpop.eup %13441  ;;  %v7603_v39 = vsel %vm613_vm3, %v16217_v20, 0.0  ;;  %v7592_v23 = vmul.f32 1.442695, %v7580_v49  ;;  %v7598_v61 = vmul.f32 1.442695, %v7583_v56 }
0x2834   :  { %7604 = vadd.xlane.f32.xlu1 %v7603_v39  ;;  %v7600_v11 = vsel %vm613_vm3, %v16219_v5, 0.0  ;;  %v7572_v37 = vpop.xlane.xlu0 %7571 }
0x2835   :  { %7601 = vadd.xlane.f32.xlu0 %v7600_v11  ;;  %13449 = vpow2.f32 %v7592_v23  ;;  %v7582_v0 = vsub.f32 %v7550_v34, %v7572_v37 }
0x2836   :  { %13451 = vpow2.f32 %v7598_v61 }
0x2837   :  { %v16229_v46 = vpop.eup %13443  ;;  %v7596_v44 = vmul.f32 1.442695, %v7582_v0 }
0x2838   :  { %v7609_v21 = vsel %vm613_vm3, %v16229_v46, 0.0 }
0x2839   :  { %13453 = vpow2.f32 %v7596_v44 }
0x283b   :  { %v16231_v7 = vpop.eup %13445 }
0x283c   :  { %v16235_v4 = vpop.eup %13447  ;;  %v7606_v52 = vsel %vm613_vm3, %v16231_v7, 0.0 }
0x283d   :  { %v7615_v17 = vsel %vm613_vm3, %v16235_v4, 0.0 }
0x283f   :  { %v16239_v54 = vpop.eup %13449 }
0x2840   :  { %v7612_v55 = vsel %vm613_vm3, %v16239_v54, 0.0  ;;  %v16257_v29 = vpop.eup %13451 }
0x2841   :  { %v7621_v22 = vsel %vm613_vm3, %v16257_v29, 0.0 }
0x2843   :  { %v16261_v1 = vpop.eup %13453 }
0x2844   :  { %v7618_v34 = vsel %vm613_vm3, %v16261_v1, 0.0 }
0x2845   :  { %12941 = vrot.lane.b32.xlu1 %v16100_v10, %s13666_s19 }
0x284b   :  { %12936 = vrot.lane.b32.xlu0 %v16091_v3, %s13666_s19 }
0x2869   :  { %7610 = vadd.xlane.f32.xlu1 %v7609_v21 }
0x286a   :  { %7607 = vadd.xlane.f32.xlu0 %v7606_v52 }
0x286d   :  { %7616 = vadd.xlane.f32.xlu1 %v7615_v17 }
0x286e   :  { %7613 = vadd.xlane.f32.xlu0 %v7612_v55 }
0x287e   :  { %12951 = vrot.lane.b32.xlu1 %v16127_v48, %s13666_s19 }
0x2884   :  { %12946 = vrot.lane.b32.xlu0 %v16112_v30, %s13666_s19 }
0x2888   :  { %7769 = vrot.lane.b32.xlu0 %v16087_v26, %s13666_s19 }
0x288c   :  { %7773 = vrot.lane.b32.xlu0 %v16141_v6, %s13666_s19 }
0x2890   :  { %7777 = vrot.lane.b32.xlu0 %v16110_v62, %s13666_s19 }
0x2894   :  { %7781 = vrot.lane.b32.xlu0 %v16122_v31, %s13666_s19 }
0x28a2   :  { %7622 = vadd.xlane.f32.xlu1 %v7621_v22 }
0x28a6   :  { %7619 = vadd.xlane.f32.xlu1 %v7618_v34 }
0x28b7   :  { %7771 = vrot.lane.b32.xlu1 %v16136_v16, %s13666_s19 }
0x28bb   :  { %7775 = vrot.lane.b32.xlu1 %v16098_v60, %s13666_s19 }
0x28bf   :  { %7779 = vrot.lane.b32.xlu1 %v16107_v35, %s13666_s19 }
0x28c1   :  { %v7605_v27 = vpop.xlane.xlu1 %7604 }
0x28c2   :  { %13455 = vrcp.f32 %v7605_v27  ;;  %v7602_v32 = vpop.xlane.xlu0 %7601 }
0x28c3   :  { %13457 = vrcp.f32 %v7602_v32  ;;  %7783 = vrot.lane.b32.xlu1 %v16119_v12, %s13666_s19 }
0x28c5   :  { %v12942_v11 = vpop.permute.xlu1 %12941 }
0x28c6   :  { %v12937_v28 = vpop.permute.xlu0 %12936  ;;  %v12944_v43 = vunpack.i.h.bf16 %v12942_v11  ;;  %v12943_v47 = vunpack.i.l.bf16 %v12942_v11 }
0x28c7   :  { %v12939_v8 = vunpack.i.h.bf16 %v12937_v28  ;;  %v12938_v33 = vunpack.i.l.bf16 %v12937_v28 }
0x28c8   :  { %v12444_v63 = vpack.c.bf16 %v12944_v43, %v12943_v47 }
0x28c9   :  { %v12438_v39 = vpack.c.bf16 %v12939_v8, %v12938_v33 }
0x28cb   :  { %12440 = vmatprep.subr.msk.bf16.mxu0 %vm13791_vm2, %v12438_v39 }
0x28cc   :  { %v13456_v36 = vpop.eup %13455 }
0x28cd   :  { %v13458_v51 = vpop.eup %13457  ;;  %v7633_v15 = vmul.f32 %v13456_v36, %v16217_v20 }
0x28ce   :  { %v7632_v13 = vmul.f32 %v13458_v51, %v16219_v5 }
0x28d0   :  { %11598 = vmatprep.mubr.msk.f32.mxu0 %vm613_vm3, %v7632_v13 }
0x28d1   :  { %11599 = vmatmul.mubr.msk.f32.vlgmr.msra.gmra.mrb[160].mxu0 %vm613_vm3, %v7633_v15 }
0x28d2   :  { %12443 = vmatpush3.bf16.xpose.msk.msra.mxu0 %vm13791_vm2, %v12438_v39 }
0x28d3   :  { %12446 = vmatprep.subr.msk.bf16.mxu0 %vm13791_vm2, %v12444_v63 }
0x28da   :  { %12449 = vmatpush3.bf16.xpose.msk.msra.mxu0 %vm13791_vm2, %v12444_v63 }
0x28f6   :  { %v7611_v42 = vpop.xlane.xlu1 %7610 }
0x28f7   :  { %13459 = vrcp.f32 %v7611_v42  ;;  %v7608_v9 = vpop.xlane.xlu0 %7607 }
0x28f8   :  { %13461 = vrcp.f32 %v7608_v9 }
0x28fa   :  { %v7617_v5 = vpop.xlane.xlu1 %7616 }
0x28fb   :  { %13463 = vrcp.f32 %v7617_v5  ;;  %v7614_v20 = vpop.xlane.xlu0 %7613 }
0x28fc   :  { %13465 = vrcp.f32 %v7614_v20 }
0x28fe   :  { %v12952_v49 = vpop.permute.xlu1 %12951 }
0x28ff   :  { %v12947_v40 = vpop.permute.xlu0 %12946  ;;  %v12954_v23 = vunpack.i.h.bf16 %v12952_v49  ;;  %v12953_v21 = vunpack.i.l.bf16 %v12952_v49 }
0x2900   :  { %v12949_v52 = vunpack.i.h.bf16 %v12947_v40  ;;  %v12948_v17 = vunpack.i.l.bf16 %v12947_v40 }
0x2901   :  { %v13460_v55 = vpop.eup %13459  ;;  %v12456_v61 = vpack.c.bf16 %v12954_v23, %v12953_v21 }
0x2902   :  { %v13462_v18 = vpop.eup %13461  ;;  %v12450_v56 = vpack.c.bf16 %v12949_v52, %v12948_v17  ;;  %v7635_v0 = vmul.f32 %v13460_v55, %v16229_v46 }
0x2903   :  { %v7634_v37 = vmul.f32 %v13462_v18, %v16231_v7  ;;  %v7770_v32 = vpop.permute.xlu0 %7769 }
0x2904   :  { %12452 = vmatprep.subr.msk.bf16.mxu0 %vm13791_vm2, %v12450_v56 }
0x2905   :  { %v13464_v44 = vpop.eup %13463  ;;  %11601 = vmatprep.mubr.msk.f32.mxu0 %vm613_vm3, %v7634_v37  ;;  %12455 = vmatpush3.bf16.xpose.msk.msra.mxu0 %vm13791_vm2, %v12450_v56 }
0x2906   :  { %v13466_v22 = vpop.eup %13465  ;;  %11602 = vmatmul.mubr.msk.f32.gmra.mrb[162].mxu0 %vm613_vm3, %v7635_v0  ;;  %12458 = vmatprep.subr.msk.bf16.mxu0 %vm13791_vm2, %v12456_v61  ;;  %v7637_v34 = vmul.f32 %v13464_v44, %v16235_v4 }
0x2907   :  { %v7636_v7 = vmul.f32 %v13466_v22, %v16239_v54  ;;  %v7774_v4 = vpop.permute.xlu0 %7773 }
0x2909   :  { %11604 = vmatprep.mubr.msk.f32.mxu0 %vm613_vm3, %v7636_v7 }
0x290a   :  { %11605 = vmatmul.mubr.msk.f32.gmra.mrb[164].mxu0 %vm613_vm3, %v7637_v34 }
0x290b   :  { %v7778_v36 = vpop.permute.xlu0 %7777 }
0x290d   :  { %12461 = vmatpush3.bf16.xpose.msk.msra.mxu0 %vm13791_vm2, %v12456_v61 }
0x292f   :  { %v7623_v46 = vpop.xlane.xlu1 %7622 }
0x2930   :  { %13467 = vrcp.f32 %v7623_v46 }
0x2933   :  { %v7620_v27 = vpop.xlane.xlu1 %7619 }
0x2934   :  { %13469 = vrcp.f32 %v7620_v27 }
0x2937   :  { %v7772_v33 = vpop.permute.xlu1 %7771 }
0x293a   :  { %v13468_v28 = vpop.eup %13467 }
0x293b   :  { %v7639_v54 = vmul.f32 %v13468_v28, %v16257_v29  ;;  %v7776_v11 = vpop.permute.xlu1 %7775 }
0x293e   :  { %v13470_v8 = vpop.eup %13469 }
0x293f   :  { %v7638_v39 = vmul.f32 %v13470_v8, %v16261_v1  ;;  %v7780_v51 = vpop.permute.xlu1 %7779  ;;  %v7782_v1 = vpop.permute.xlu0 %7781 }
0x2941   :  { %11607 = vmatprep.mubr.msk.f32.mxu0 %vm613_vm3, %v7638_v39 }
0x2942   :  { %11608 = vmatmul.mubr.msk.f32.gmra.mrb[166].mxu0 %vm613_vm3, %v7639_v54 }
0x2943   :  { %11626 = vmatprep.mubr.msk.f32.mxu0 %vm443_vm1, %v7770_v32  ;;  %v7784_v29 = vpop.permute.xlu1 %7783 }
0x2946   :  { %11627 = vmatmul.mubr.msk.f32.vlgmr.msra.gmra.mrb[168].mxu0 %vm443_vm1, %v7772_v33 }
0x2947   :  { %11629 = vmatprep.mubr.msk.f32.mxu0 %vm443_vm1, %v7774_v4 }
0x294a   :  { %11630 = vmatmul.mubr.msk.f32.gmra.mrb[170].mxu0 %vm443_vm1, %v7776_v11 }
0x294b   :  { %11632 = vmatprep.mubr.msk.f32.mxu0 %vm443_vm1, %v7778_v36 }
0x294e   :  { %11633 = vmatmul.mubr.msk.f32.gmra.mrb[172].mxu0 %vm443_vm1, %v7780_v51 }
0x294f   :  { %11635 = vmatprep.mubr.msk.f32.mxu0 %vm443_vm1, %v7782_v1 }
0x2952   :  { %11636 = vmatmul.mubr.msk.f32.gmra.mrb[174].mxu0 %vm443_vm1, %v7784_v29 }
0x29a4   :  { %v16313_v43 = vpop.f32.mrb[160].mxu0 }
0x29a5   :  { %v16315_v47 = vpop.f32.mrb[161].mxu0 }
0x29d9   :  { %v16317_v13 = vpop.f32.mrb[162].mxu0 }
0x29da   :  { %v16319_v15 = vpop.f32.mrb[163].mxu0 }
0x29dd   :  { %v16321_v63 = vpop.f32.mrb[164].mxu0 }
0x29de   :  { %v16323_v42 = vpop.f32.mrb[165].mxu0 }
0x2a15   :  { %v16325_v9 = vpop.f32.mrb[166].mxu0 }
0x2a16   :  { %v16327_v5 = vpop.f32.mrb[167].mxu0 }
0x2a19   :  { %v11628_v20 = vpop.f32.mrb[168].mxu0 }
0x2a1a   :  { %v7939_v49 = vmul.f32 0.35355338, %v11628_v20  ;;  %v7899_v40 = vpop.f32.mrb[169].mxu0 }
0x2a1b   :  { %v7938_v23 = vmul.f32 0.35355338, %v7899_v40 }
0x2a1c   :  { %v7947_v21 = vadd.f32 %v16164_v57, %v7939_v49 }
0x2a1d   :  { %v7946_v52 = vadd.f32 %v16170_v14, %v7938_v23  ;;  %v11631_v17 = vpop.f32.mrb[170].mxu0 }
0x2a1e   :  { %v7941_v55 = vmul.f32 0.35355338, %v11631_v17  ;;  %v7909_v18 = vpop.f32.mrb[171].mxu0  ;;  %v7957_v56 = vsel %vm613_vm3, %v7947_v21, -inf }
0x2a1f   :  { %v7940_v37 = vmul.f32 0.35355338, %v7909_v18  ;;  %7958 = vmax.xlane.f32.xlu1 %v7957_v56  ;;  %v7954_v61 = vsel %vm613_vm3, %v7946_v52, -inf }
0x2a20   :  { %v7949_v0 = vadd.f32 %v16178_v19, %v7941_v55  ;;  %7955 = vmax.xlane.f32.xlu0 %v7954_v61 }
0x2a21   :  { %v11634_v44 = vpop.f32.mrb[172].mxu0  ;;  %v7948_v46 = vadd.f32 %v16185_v24, %v7940_v37 }
0x2a22   :  { %v7943_v22 = vmul.f32 0.35355338, %v11634_v44  ;;  %v7919_v7 = vpop.f32.mrb[173].mxu0  ;;  %v7963_v34 = vsel %vm613_vm3, %v7949_v0, -inf }
0x2a23   :  { %v7942_v27 = vmul.f32 0.35355338, %v7919_v7  ;;  %v7960_v11 = vsel %vm613_vm3, %v7948_v46, -inf }
0x2a24   :  { %v7951_v32 = vadd.f32 %v16191_v45, %v7943_v22  ;;  %7964 = vmax.xlane.f32.xlu0 %v7963_v34 }
0x2a25   :  { %v11637_v28 = vpop.f32.mrb[174].mxu0  ;;  %v7950_v54 = vadd.f32 %v16198_v59, %v7942_v27 }
0x2a26   :  { %v7945_v8 = vmul.f32 0.35355338, %v11637_v28  ;;  %v7929_v33 = vpop.f32.mrb[175].mxu0  ;;  %v7969_v39 = vsel %vm613_vm3, %v7951_v32, -inf }
0x2a27   :  { %v7944_v4 = vmul.f32 0.35355338, %v7929_v33  ;;  %7970 = vmax.xlane.f32.xlu1 %v7969_v39  ;;  %v7966_v29 = vsel %vm613_vm3, %v7950_v54, -inf }
0x2a28   :  { %v16341_v36 = vadd.f32 %v16205_v2, %v7945_v8  ;;  %7961 = vmax.xlane.f32.xlu0 %v7960_v11 }
0x2a29   :  { %v16346_v1 = vadd.f32 %v16212_v50, %v7944_v4 }
0x2a2a   :  { %v7975_v51 = vsel %vm613_vm3, %v16341_v36, -inf }
0x2a2b   :  { %7976 = vmax.xlane.f32.xlu1 %v7975_v51  ;;  %v7972_v20 = vsel %vm613_vm3, %v16346_v1, -inf }
0x2a2c   :  { %7967 = vmax.xlane.f32.xlu0 %v7966_v29 }
0x2a30   :  { %7973 = vmax.xlane.f32.xlu0 %v7972_v20 }
0x2a3c   :  { %12961 = vrot.lane.b32.xlu1 %v16138_v41, %s13666_s19 }
0x2a40   :  { %12966 = vrot.lane.b32.xlu1 %v16147_v58, %s13666_s19 }
0x2a44   :  { %12971 = vrot.lane.b32.xlu1 %v16153_v53, %s13666_s19 }
0x2a46   :  { %12956 = vrot.lane.b32.xlu0 %v16133_v38, %s13666_s19 }
0x2a48   :  { %12981 = vrot.lane.b32.xlu1 %v16100_v10, %s13667_s20 }
0x2a4a   :  { %12976 = vrot.lane.b32.xlu0 %v16091_v3, %s13667_s20 }
0x2aac   :  { %v7959_v49 = vpop.xlane.xlu1 %7958 }
0x2aad   :  { %v7979_v40 = vsub.f32 %v7947_v21, %v7959_v49  ;;  %v7956_v23 = vpop.xlane.xlu0 %7955 }
0x2aae   :  { %v7978_v17 = vsub.f32 %v7946_v52, %v7956_v23 }
0x2aaf   :  { %v7988_v55 = vmul.f32 1.442695, %v7979_v40 }
0x2ab0   :  { %v7986_v18 = vmul.f32 1.442695, %v7978_v17 }
0x2ab1   :  { %13471 = vpow2.f32 %v7988_v55  ;;  %v7965_v56 = vpop.xlane.xlu0 %7964 }
0x2ab2   :  { %13473 = vpow2.f32 %v7986_v18  ;;  %v7981_v37 = vsub.f32 %v7949_v0, %v7965_v56 }
0x2ab4   :  { %v7992_v61 = vmul.f32 1.442695, %v7981_v37  ;;  %v7971_v44 = vpop.xlane.xlu1 %7970 }
0x2ab5   :  { %v7983_v22 = vsub.f32 %v7951_v32, %v7971_v44  ;;  %v7962_v7 = vpop.xlane.xlu0 %7961 }
0x2ab6   :  { %13475 = vpow2.f32 %v7992_v61  ;;  %v7980_v34 = vsub.f32 %v7948_v46, %v7962_v7 }
0x2ab7   :  { %v7996_v27 = vmul.f32 1.442695, %v7983_v22 }
0x2ab8   :  { %v7990_v28 = vmul.f32 1.442695, %v7980_v34  ;;  %v7977_v8 = vpop.xlane.xlu1 %7976 }
0x2ab9   :  { %v7968_v33 = vpop.xlane.xlu0 %7967 }
0x2aba   :  { %13477 = vpow2.f32 %v7990_v28  ;;  %v7982_v21 = vsub.f32 %v7950_v54, %v7968_v33 }
0x2abb   :  { %v16363_v39 = vpop.eup %13471  ;;  %13479 = vpow2.f32 %v7996_v27 }
0x2abc   :  { %v16365_v52 = vpop.eup %13473  ;;  %v7994_v4 = vmul.f32 1.442695, %v7982_v21  ;;  %v12962_v11 = vpop.permute.xlu1 %12961  ;;  %v8005_v0 = vsel %vm613_vm3, %v16363_v39, 0.0 }
0x2abd   :  { %8006 = vadd.xlane.f32.xlu1 %v8005_v0  ;;  %v7974_v32 = vpop.xlane.xlu0 %7973  ;;  %v8002_v46 = vsel %vm613_vm3, %v16365_v52, 0.0  ;;  %v12964_v49 = vunpack.i.h.bf16 %v12962_v11  ;;  %v12963_v40 = vunpack.i.l.bf16 %v12962_v11 }
0x2abe   :  { %8003 = vadd.xlane.f32.xlu0 %v8002_v46  ;;  %13481 = vpow2.f32 %v7994_v4 }
0x2abf   :  { %v12466_v22 = vpack.c.bf16 %v12964_v49, %v12963_v40  ;;  %v7984_v40 = vsub.f32 %v16346_v1, %v7974_v32 }
0x2ac0   :  { %v16371_v51 = vpop.eup %13475  ;;  %v12967_v54 = vpop.permute.xlu1 %12966 }
0x2ac1   :  { %v12957_v29 = vpop.permute.xlu0 %12956  ;;  %v8011_v20 = vsel %vm613_vm3, %v16371_v51, 0.0  ;;  %v12969_v61 = vunpack.i.h.bf16 %v12967_v54  ;;  %v12968_v44 = vunpack.i.l.bf16 %v12967_v54 }
0x2ac2   :  { %v12959_v23 = vunpack.i.h.bf16 %v12957_v29  ;;  %v12958_v17 = vunpack.i.l.bf16 %v12957_v29  ;;  %8012 = vadd.xlane.f32.xlu1 %v8011_v20  ;;  %v7985_v20 = vsub.f32 %v16341_v36, %v7977_v8 }
0x2ac3   :  { %v12470_v21 = vpack.c.bf16 %v12969_v61, %v12968_v44 }
0x2ac4   :  { %v16375_v55 = vpop.eup %13477  ;;  %v12462_v18 = vpack.c.bf16 %v12959_v23, %v12958_v17  ;;  %v12972_v7 = vpop.permute.xlu1 %12971  ;;  %v8000_v49 = vmul.f32 1.442695, %v7985_v20  ;;  %v7998_v23 = vmul.f32 1.442695, %v7984_v40 }
0x2ac5   :  { %v8008_v56 = vsel %vm613_vm3, %v16375_v55, 0.0  ;;  %v16379_v37 = vpop.eup %13479  ;;  %v12974_v28 = vunpack.i.h.bf16 %v12972_v7  ;;  %v12973_v33 = vunpack.i.l.bf16 %v12972_v7  ;;  %v12977_v4 = vpop.permute.xlu0 %12976 }
0x2ac6   :  { %8009 = vadd.xlane.f32.xlu0 %v8008_v56  ;;  %12463 = vmatprep.subr.bf16.mxu1 %v12462_v18  ;;  %v8017_v34 = vsel %vm613_vm3, %v16379_v37, 0.0  ;;  %v12979_v46 = vunpack.i.h.bf16 %v12977_v4  ;;  %v12978_v54 = vunpack.i.l.bf16 %v12977_v4  ;;  %13483 = vpow2.f32 %v8000_v49 }
0x2ac7   :  { %12465 = vmatpush3.bf16.msra.mxu1 %v12462_v18  ;;  %v12474_v0 = vpack.c.bf16 %v12974_v28, %v12973_v33  ;;  %13485 = vpow2.f32 %v7998_v23 }
0x2ac8   :  { %12467 = vmatprep.subr.bf16.mxu1 %v12466_v22  ;;  %v16383_v27 = vpop.eup %13481  ;;  %v12478_v29 = vpack.c.bf16 %v12979_v46, %v12978_v54  ;;  %v12982_v32 = vpop.permute.xlu1 %12981 }
0x2ac9   :  { %v8014_v11 = vsel %vm613_vm3, %v16383_v27, 0.0  ;;  %v12983_v28 = vunpack.i.l.bf16 %v12982_v32 }
0x2aca   :  { %8018 = vadd.xlane.f32.xlu0 %v8017_v34  ;;  %v12984_v34 = vunpack.i.h.bf16 %v12982_v32 }
0x2acb   :  { %12469 = vmatpush3.bf16.msra.mxu1 %v12466_v22 }
0x2acc   :  { %12471 = vmatprep.subr.bf16.mxu1 %v12470_v21 }
0x2ace   :  { %8015 = vadd.xlane.f32.xlu0 %v8014_v11  ;;  %v12484_v11 = vpack.c.bf16 %v12984_v34, %v12983_v28 }
0x2acf   :  { %12473 = vmatpush3.bf16.msra.mxu1 %v12470_v21 }
0x2ad0   :  { %12475 = vmatprep.subr.bf16.mxu1 %v12474_v0  ;;  %v16401_v17 = vpop.eup %13483 }
0x2ad1   :  { %v8023_v36 = vsel %vm613_vm3, %v16401_v17, 0.0  ;;  %v16407_v1 = vpop.eup %13485 }
0x2ad2   :  { %v8020_v8 = vsel %vm613_vm3, %v16407_v1, 0.0 }
0x2ad3   :  { %12991 = vrot.lane.b32.xlu1 %v16127_v48, %s13667_s20  ;;  %12477 = vmatpush3.bf16.msra.mxu1 %v12474_v0 }
0x2ad4   :  { %12480 = vmatprep.subr.msk.bf16.mxu1 %vm13791_vm2, %v12478_v29 }
0x2ae4   :  { %12986 = vrot.lane.b32.xlu0 %v16112_v30, %s13667_s20 }
0x2ae8   :  { %8203 = vrot.lane.b32.xlu0 %v16087_v26, %s13667_s20 }
0x2aec   :  { %8207 = vrot.lane.b32.xlu0 %v16141_v6, %s13667_s20 }
0x2af0   :  { %8211 = vrot.lane.b32.xlu0 %v16110_v62, %s13667_s20 }
0x2af4   :  { %8215 = vrot.lane.b32.xlu0 %v16122_v31, %s13667_s20 }
0x2af7   :  { %8024 = vadd.xlane.f32.xlu1 %v8023_v36 }
0x2afb   :  { %8021 = vadd.xlane.f32.xlu1 %v8020_v8 }
0x2b0c   :  { %8205 = vrot.lane.b32.xlu1 %v16136_v16, %s13667_s20 }
0x2b10   :  { %8209 = vrot.lane.b32.xlu1 %v16098_v60, %s13667_s20 }
0x2b14   :  { %8213 = vrot.lane.b32.xlu1 %v16107_v35, %s13667_s20 }
0x2b18   :  { %8217 = vrot.lane.b32.xlu1 %v16119_v12, %s13667_s20 }
0x2b4a   :  { %v8007_v18 = vpop.xlane.xlu1 %8006 }
0x2b4b   :  { %13487 = vrcp.f32 %v8007_v18  ;;  %v8004_v56 = vpop.xlane.xlu0 %8003 }
0x2b4c   :  { %13489 = vrcp.f32 %v8004_v56 }
0x2b4f   :  { %v8013_v61 = vpop.xlane.xlu1 %8012 }
0x2b50   :  { %13491 = vrcp.f32 %v8013_v61 }
0x2b53   :  { %v8010_v44 = vpop.xlane.xlu0 %8009 }
0x2b54   :  { %13493 = vrcp.f32 %v8010_v44 }
0x2b55   :  { %v13488_v22 = vpop.eup %13487 }
0x2b56   :  { %v13490_v7 = vpop.eup %13489  ;;  %v8035_v4 = vmul.f32 %v13488_v22, %v16363_v39 }
0x2b57   :  { %v8019_v33 = vpop.xlane.xlu0 %8018  ;;  %v8034_v21 = vmul.f32 %v13490_v7, %v16365_v52 }
0x2b58   :  { %13495 = vrcp.f32 %v8019_v33 }
0x2b59   :  { %11654 = vmatprep.mubr.msk.f32.mxu1 %vm613_vm3, %v8034_v21 }
0x2b5a   :  { %11655 = vmatmul.mubr.msk.f32.vlgmr.msra.gmra.mrb[160].mxu1 %vm613_vm3, %v8035_v4  ;;  %v13492_v46 = vpop.eup %13491 }
0x2b5b   :  { %12483 = vmatpush3.bf16.xpose.msk.msra.mxu1 %vm13791_vm2, %v12478_v29  ;;  %v8016_v0 = vpop.xlane.xlu0 %8015  ;;  %v8037_v40 = vmul.f32 %v13492_v46, %v16371_v51  ;;  %v12992_v29 = vpop.permute.xlu1 %12991 }
0x2b5c   :  { %13497 = vrcp.f32 %v8016_v0  ;;  %12486 = vmatprep.subr.msk.bf16.mxu1 %vm13791_vm2, %v12484_v11  ;;  %v12994_v32 = vunpack.i.h.bf16 %v12992_v29 }
0x2b5e   :  { %v13494_v54 = vpop.eup %13493 }
0x2b5f   :  { %v12987_v20 = vpop.permute.xlu0 %12986  ;;  %v8036_v52 = vmul.f32 %v13494_v54, %v16375_v55  ;;  %v12993_v55 = vunpack.i.l.bf16 %v12992_v29 }
0x2b60   :  { %v12989_v39 = vunpack.i.h.bf16 %v12987_v20  ;;  %v12988_v49 = vunpack.i.l.bf16 %v12987_v20 }
0x2b61   :  { %11657 = vmatprep.mubr.msk.f32.mxu1 %vm613_vm3, %v8036_v52  ;;  %v12496_v56 = vpack.c.bf16 %v12994_v32, %v12993_v55 }
0x2b62   :  { %v12490_v23 = vpack.c.bf16 %v12989_v39, %v12988_v49  ;;  %11658 = vmatmul.mubr.msk.f32.gmra.mrb[162].mxu1 %vm613_vm3, %v8037_v40  ;;  %v13496_v36 = vpop.eup %13495 }
0x2b63   :  { %12489 = vmatpush3.bf16.xpose.msk.msra.mxu1 %vm13791_vm2, %v12484_v11  ;;  %v8039_v51 = vmul.f32 %v13496_v36, %v16379_v37 }
0x2b64   :  { %12492 = vmatprep.subr.msk.bf16.mxu1 %vm13791_vm2, %v12490_v23 }
0x2b66   :  { %v13498_v8 = vpop.eup %13497 }
0x2b67   :  { %v8038_v18 = vmul.f32 %v13498_v8, %v16383_v27  ;;  %v8204_v27 = vpop.permute.xlu0 %8203 }
0x2b69   :  { %11660 = vmatprep.mubr.msk.f32.mxu1 %vm613_vm3, %v8038_v18 }
0x2b6a   :  { %11661 = vmatmul.mubr.msk.f32.gmra.mrb[164].mxu1 %vm613_vm3, %v8039_v51 }
0x2b6b   :  { %12495 = vmatpush3.bf16.xpose.msk.msra.mxu1 %vm13791_vm2, %v12490_v23  ;;  %v8208_v33 = vpop.permute.xlu0 %8207 }
0x2b6c   :  { %12498 = vmatprep.subr.msk.bf16.mxu1 %vm13791_vm2, %v12496_v56 }
0x2b6f   :  { %v8212_v4 = vpop.permute.xlu0 %8211 }
0x2b73   :  { %12501 = vmatpush3.bf16.xpose.msk.msra.mxu1 %vm13791_vm2, %v12496_v56 }
0x2b84   :  { %v8025_v61 = vpop.xlane.xlu1 %8024 }
0x2b85   :  { %13499 = vrcp.f32 %v8025_v61 }
0x2b88   :  { %v8022_v44 = vpop.xlane.xlu1 %8021 }
0x2b89   :  { %13501 = vrcp.f32 %v8022_v44 }
0x2b8c   :  { %v8206_v7 = vpop.permute.xlu1 %8205 }
0x2b8f   :  { %v13500_v37 = vpop.eup %13499 }
0x2b90   :  { %v8041_v28 = vmul.f32 %v13500_v37, %v16401_v17  ;;  %v8210_v21 = vpop.permute.xlu1 %8209 }
0x2b93   :  { %v13502_v22 = vpop.eup %13501 }
0x2b94   :  { %v8040_v34 = vmul.f32 %v13502_v22, %v16407_v1  ;;  %v8214_v11 = vpop.permute.xlu1 %8213  ;;  %v8216_v1 = vpop.permute.xlu0 %8215 }
0x2b96   :  { %11663 = vmatprep.mubr.msk.f32.mxu1 %vm613_vm3, %v8040_v34 }
0x2b97   :  { %11664 = vmatmul.mubr.msk.f32.gmra.mrb[166].mxu1 %vm613_vm3, %v8041_v28 }
0x2b98   :  { %11682 = vmatprep.mubr.msk.f32.mxu1 %vm443_vm1, %v8204_v27  ;;  %v8218_v17 = vpop.permute.xlu1 %8217 }
0x2b9b   :  { %11683 = vmatmul.mubr.msk.f32.vlgmr.msra.gmra.mrb[168].mxu1 %vm443_vm1, %v8206_v7 }
0x2b9c   :  { %11685 = vmatprep.mubr.msk.f32.mxu1 %vm443_vm1, %v8208_v33 }
0x2b9f   :  { %11686 = vmatmul.mubr.msk.f32.gmra.mrb[170].mxu1 %vm443_vm1, %v8210_v21 }
0x2ba0   :  { %11688 = vmatprep.mubr.msk.f32.mxu1 %vm443_vm1, %v8212_v4 }
0x2ba3   :  { %11689 = vmatmul.mubr.msk.f32.gmra.mrb[172].mxu1 %vm443_vm1, %v8214_v11 }
0x2ba4   :  { %11691 = vmatprep.mubr.msk.f32.mxu1 %vm443_vm1, %v8216_v1 }
0x2ba7   :  { %11692 = vmatmul.mubr.msk.f32.gmra.mrb[174].mxu1 %vm443_vm1, %v8218_v17 }
0x2c2d   :  { %v16457_v0 = vpop.f32.mrb[160].mxu1 }
0x2c2e   :  { %v16459_v46 = vpop.f32.mrb[161].mxu1 }
0x2c35   :  { %v16461_v54 = vpop.f32.mrb[162].mxu1 }
0x2c36   :  { %v16463_v20 = vpop.f32.mrb[163].mxu1 }
0x2c3d   :  { %v16465_v52 = vpop.f32.mrb[164].mxu1 }
0x2c3e   :  { %v16467_v39 = vpop.f32.mrb[165].mxu1 }
0x2c6a   :  { %v16469_v49 = vpop.f32.mrb[166].mxu1 }
0x2c6b   :  { %v16471_v40 = vpop.f32.mrb[167].mxu1 }
0x2c6e   :  { %v11684_v23 = vpop.f32.mrb[168].mxu1 }
0x2c6f   :  { %v8373_v29 = vmul.f32 0.35355338, %v11684_v23  ;;  %v8333_v36 = vpop.f32.mrb[169].mxu1 }
0x2c70   :  { %v8372_v8 = vmul.f32 0.35355338, %v8333_v36 }
0x2c71   :  { %v8381_v32 = vadd.f32 %v16164_v57, %v8373_v29 }
0x2c72   :  { %v8380_v55 = vadd.f32 %v16170_v14, %v8372_v8  ;;  %v11687_v18 = vpop.f32.mrb[170].mxu1 }
0x2c73   :  { %v8375_v51 = vmul.f32 0.35355338, %v11687_v18  ;;  %v8343_v56 = vpop.f32.mrb[171].mxu1  ;;  %v8391_v61 = vsel %vm613_vm3, %v8381_v32, -inf }
0x2c74   :  { %v8374_v44 = vmul.f32 0.35355338, %v8343_v56  ;;  %8392 = vmax.xlane.f32.xlu1 %v8391_v61  ;;  %v8388_v27 = vsel %vm613_vm3, %v8380_v55, -inf }
0x2c75   :  { %v8383_v37 = vadd.f32 %v16178_v19, %v8375_v51  ;;  %8389 = vmax.xlane.f32.xlu0 %v8388_v27 }
0x2c76   :  { %v11690_v22 = vpop.f32.mrb[172].mxu1  ;;  %v8382_v57 = vadd.f32 %v16185_v24, %v8374_v44 }
0x2c77   :  { %v8377_v7 = vmul.f32 0.35355338, %v11690_v22  ;;  %v8353_v34 = vpop.f32.mrb[173].mxu1  ;;  %v8397_v28 = vsel %vm613_vm3, %v8383_v37, -inf }
0x2c78   :  { %v8376_v14 = vmul.f32 0.35355338, %v8353_v34  ;;  %v8394_v23 = vsel %vm613_vm3, %v8382_v57, -inf }
0x2c79   :  { %v8385_v33 = vadd.f32 %v16191_v45, %v8377_v7  ;;  %8398 = vmax.xlane.f32.xlu0 %v8397_v28 }
0x2c7a   :  { %v11693_v21 = vpop.f32.mrb[174].mxu1  ;;  %v8384_v17 = vadd.f32 %v16198_v59, %v8376_v14 }
0x2c7b   :  { %v8379_v4 = vmul.f32 0.35355338, %v11693_v21  ;;  %v8363_v11 = vpop.f32.mrb[175].mxu1  ;;  %v8403_v1 = vsel %vm613_vm3, %v8385_v33, -inf }
0x2c7c   :  { %v8378_v19 = vmul.f32 0.35355338, %v8363_v11  ;;  %8404 = vmax.xlane.f32.xlu1 %v8403_v1  ;;  %v8400_v36 = vsel %vm613_vm3, %v8384_v17, -inf }
0x2c7d   :  { %v16485_v29 = vadd.f32 %v16205_v2, %v8379_v4  ;;  %8395 = vmax.xlane.f32.xlu0 %v8394_v23 }
0x2c7e   :  { %v16490_v45 = vadd.f32 %v16212_v50, %v8378_v19 }
0x2c7f   :  { %v8409_v24 = vsel %vm613_vm3, %v16485_v29, -inf }
0x2c80   :  { %8410 = vmax.xlane.f32.xlu1 %v8409_v24  ;;  %v8406_v59 = vsel %vm613_vm3, %v16490_v45, -inf }
0x2c81   :  { %8401 = vmax.xlane.f32.xlu0 %v8400_v36 }
0x2c85   :  { %8407 = vmax.xlane.f32.xlu0 %v8406_v59 }
0x2c91   :  { %13001 = vrot.lane.b32.xlu1 %v16138_v41, %s13667_s20 }
0x2c95   :  { %13006 = vrot.lane.b32.xlu1 %v16147_v58, %s13667_s20 }
0x2c99   :  { %13011 = vrot.lane.b32.xlu1 %v16153_v53, %s13667_s20 }
0x2c9b   :  { %12996 = vrot.lane.b32.xlu0 %v16133_v38, %s13667_s20 }
0x2c9d   :  { %13021 = vrot.lane.b32.xlu1 %v16100_v10, %s13668_s21 }
0x2c9f   :  { %13016 = vrot.lane.b32.xlu0 %v16091_v3, %s13668_s21 }
0x2d01   :  { %v8393_v2 = vpop.xlane.xlu1 %8392 }
0x2d02   :  { %v8413_v50 = vsub.f32 %v8381_v32, %v8393_v2  ;;  %v8390_v8 = vpop.xlane.xlu0 %8389 }
0x2d03   :  { %v8412_v18 = vsub.f32 %v8380_v55, %v8390_v8 }
0x2d04   :  { %v8422_v51 = vmul.f32 1.442695, %v8413_v50 }
0x2d05   :  { %v8420_v56 = vmul.f32 1.442695, %v8412_v18 }
0x2d06   :  { %13503 = vpow2.f32 %v8422_v51  ;;  %v8399_v61 = vpop.xlane.xlu0 %8398 }
0x2d07   :  { %13505 = vpow2.f32 %v8420_v56  ;;  %v8415_v44 = vsub.f32 %v8383_v37, %v8399_v61 }
0x2d09   :  { %v8426_v27 = vmul.f32 1.442695, %v8415_v44  ;;  %v8405_v22 = vpop.xlane.xlu1 %8404 }
0x2d0a   :  { %v8417_v7 = vsub.f32 %v8385_v33, %v8405_v22  ;;  %v8396_v34 = vpop.xlane.xlu0 %8395 }
0x2d0b   :  { %13507 = vpow2.f32 %v8426_v27  ;;  %v8414_v28 = vsub.f32 %v8382_v57, %v8396_v34 }
0x2d0c   :  { %v8430_v10 = vmul.f32 1.442695, %v8417_v7 }
0x2d0d   :  { %v8424_v14 = vmul.f32 1.442695, %v8414_v28  ;;  %v8411_v21 = vpop.xlane.xlu1 %8410 }
0x2d0e   :  { %v8402_v3 = vpop.xlane.xlu0 %8401 }
0x2d0f   :  { %13509 = vpow2.f32 %v8424_v14  ;;  %v8416_v32 = vsub.f32 %v8384_v17, %v8402_v3 }
0x2d10   :  { %v16507_v4 = vpop.eup %13503  ;;  %13511 = vpow2.f32 %v8430_v10 }
0x2d11   :  { %v16509_v55 = vpop.eup %13505  ;;  %v8428_v11 = vmul.f32 1.442695, %v8416_v32  ;;  %v13002_v1 = vpop.permute.xlu1 %13001  ;;  %v8439_v37 = vsel %vm613_vm3, %v16507_v4, 0.0 }
0x2d12   :  { %8440 = vadd.xlane.f32.xlu1 %v8439_v37  ;;  %v8408_v33 = vpop.xlane.xlu0 %8407  ;;  %v8436_v57 = vsel %vm613_vm3, %v16509_v55, 0.0  ;;  %v13004_v36 = vunpack.i.h.bf16 %v13002_v1  ;;  %v13003_v59 = vunpack.i.l.bf16 %v13002_v1 }
0x2d13   :  { %8437 = vadd.xlane.f32.xlu0 %v8436_v57  ;;  %13513 = vpow2.f32 %v8428_v11 }
0x2d14   :  { %v12506_v61 = vpack.c.bf16 %v13004_v36, %v13003_v59 }
0x2d15   :  { %v16515_v19 = vpop.eup %13507  ;;  %v13007_v17 = vpop.permute.xlu1 %13006 }
0x2d16   :  { %v12997_v23 = vpop.permute.xlu0 %12996  ;;  %v8445_v24 = vsel %vm613_vm3, %v16515_v19, 0.0  ;;  %v13009_v44 = vunpack.i.h.bf16 %v13007_v17  ;;  %v13008_v27 = vunpack.i.l.bf16 %v13007_v17  ;;  %v8419_v17 = vsub.f32 %v16485_v29, %v8411_v21 }
0x2d17   :  { %v12999_v2 = vunpack.i.h.bf16 %v12997_v23  ;;  %v12998_v50 = vunpack.i.l.bf16 %v12997_v23  ;;  %8446 = vadd.xlane.f32.xlu1 %v8445_v24  ;;  %v8418_v24 = vsub.f32 %v16490_v45, %v8408_v33 }
0x2d18   :  { %v12510_v28 = vpack.c.bf16 %v13009_v44, %v13008_v27  ;;  %v8434_v23 = vmul.f32 1.442695, %v8419_v17 }
0x2d19   :  { %v16519_v8 = vpop.eup %13509  ;;  %v12502_v18 = vpack.c.bf16 %v12999_v2, %v12998_v50  ;;  %v13012_v22 = vpop.permute.xlu1 %13011 }
0x2d1a   :  { %v8442_v51 = vsel %vm613_vm3, %v16519_v8, 0.0  ;;  %v16523_v56 = vpop.eup %13511  ;;  %v13014_v10 = vunpack.i.h.bf16 %v13012_v22  ;;  %v13013_v14 = vunpack.i.l.bf16 %v13012_v22  ;;  %v13017_v3 = vpop.permute.xlu0 %13016  ;;  %13515 = vpow2.f32 %v8434_v23 }
0x2d1b   :  { %8443 = vadd.xlane.f32.xlu0 %v8442_v51  ;;  %12503 = vmatprep.subr.bf16.mxu0 %v12502_v18  ;;  %v8451_v7 = vsel %vm613_vm3, %v16523_v56, 0.0  ;;  %v13019_v1 = vunpack.i.h.bf16 %v13017_v3  ;;  %v13018_v37 = vunpack.i.l.bf16 %v13017_v3 }
0x2d1c   :  { %12505 = vmatpush3.bf16.msra.mxu0 %v12502_v18  ;;  %v12514_v11 = vpack.c.bf16 %v13014_v10, %v13013_v14 }
0x2d1d   :  { %12507 = vmatprep.subr.bf16.mxu0 %v12506_v61  ;;  %v16527_v34 = vpop.eup %13513  ;;  %v12518_v57 = vpack.c.bf16 %v13019_v1, %v13018_v37 }
0x2d1e   :  { %v8448_v32 = vsel %vm613_vm3, %v16527_v34, 0.0 }
0x2d1f   :  { %8452 = vadd.xlane.f32.xlu0 %v8451_v7 }
0x2d20   :  { %12509 = vmatpush3.bf16.msra.mxu0 %v12506_v61 }
0x2d21   :  { %12511 = vmatprep.subr.bf16.mxu0 %v12510_v28 }
0x2d23   :  { %8449 = vadd.xlane.f32.xlu0 %v8448_v32 }
0x2d24   :  { %12513 = vmatpush3.bf16.msra.mxu0 %v12510_v28 }
0x2d25   :  { %12515 = vmatprep.subr.bf16.mxu0 %v12514_v11 }
0x2d28   :  { %13031 = vrot.lane.b32.xlu1 %v16127_v48, %s13668_s21  ;;  %12517 = vmatpush3.bf16.msra.mxu0 %v12514_v11  ;;  %v8432_v48 = vmul.f32 1.442695, %v8418_v24 }
0x2d29   :  { %12520 = vmatprep.subr.msk.bf16.mxu0 %vm13791_vm2, %v12518_v57 }
0x2d2a   :  { %13517 = vpow2.f32 %v8432_v48 }
0x2d2c   :  { %8631 = vrot.lane.b32.xlu1 %v16136_v16, %s13668_s21 }
0x2d39   :  { %13026 = vrot.lane.b32.xlu0 %v16112_v30, %s13668_s21  ;;  %v16549_v30 = vpop.eup %13515 }
0x2d3a   :  { %v16553_v16 = vpop.eup %13517 }
0x2d3d   :  { %8629 = vrot.lane.b32.xlu0 %v16087_v26, %s13668_s21  ;;  %v8457_v26 = vsel %vm613_vm3, %v16549_v30, 0.0 }
0x2d41   :  { %8633 = vrot.lane.b32.xlu0 %v16141_v6, %s13668_s21  ;;  %v8454_v6 = vsel %vm613_vm3, %v16553_v16, 0.0 }
0x2d45   :  { %8637 = vrot.lane.b32.xlu0 %v16110_v62, %s13668_s21  ;;  %v13022_v62 = vpop.permute.xlu1 %13021 }
0x2d46   :  { %v13024_v59 = vunpack.i.h.bf16 %v13022_v62  ;;  %v13023_v2 = vunpack.i.l.bf16 %v13022_v62 }
0x2d49   :  { %8641 = vrot.lane.b32.xlu0 %v16122_v31, %s13668_s21 }
0x2d50   :  { %8458 = vadd.xlane.f32.xlu1 %v8457_v26 }
0x2d54   :  { %8455 = vadd.xlane.f32.xlu1 %v8454_v6 }
0x2d65   :  { %8635 = vrot.lane.b32.xlu1 %v16098_v60, %s13668_s21 }
0x2d69   :  { %8639 = vrot.lane.b32.xlu1 %v16107_v35, %s13668_s21 }
0x2d6d   :  { %8643 = vrot.lane.b32.xlu1 %v16119_v12, %s13668_s21  ;;  %v12524_v12 = vpack.c.bf16 %v13024_v59, %v13023_v2 }
0x2d9f   :  { %v8441_v31 = vpop.xlane.xlu1 %8440 }
0x2da0   :  { %13519 = vrcp.f32 %v8441_v31  ;;  %v8438_v29 = vpop.xlane.xlu0 %8437 }
0x2da1   :  { %13521 = vrcp.f32 %v8438_v29 }
0x2da4   :  { %v8447_v45 = vpop.xlane.xlu1 %8446 }
0x2da5   :  { %13523 = vrcp.f32 %v8447_v45 }
0x2da8   :  { %v8444_v21 = vpop.xlane.xlu0 %8443  ;;  %v13032_v28 = vpop.permute.xlu1 %13031 }
0x2da9   :  { %13525 = vrcp.f32 %v8444_v21  ;;  %v13034_v3 = vunpack.i.h.bf16 %v13032_v28 }
0x2daa   :  { %v13520_v33 = vpop.eup %13519 }
0x2dab   :  { %v13522_v36 = vpop.eup %13521  ;;  %v8469_v35 = vmul.f32 %v13520_v33, %v16507_v4 }
0x2dac   :  { %v8453_v60 = vpop.xlane.xlu0 %8452  ;;  %v8468_v50 = vmul.f32 %v13522_v36, %v16509_v55  ;;  %v8632_v1 = vpop.permute.xlu1 %8631 }
0x2dad   :  { %13527 = vrcp.f32 %v8453_v60 }
0x2dae   :  { %11710 = vmatprep.mubr.msk.f32.mxu0 %vm613_vm3, %v8468_v50 }
0x2daf   :  { %11711 = vmatmul.mubr.msk.f32.vlgmr.msra.gmra.mrb[176].mxu0 %vm613_vm3, %v8469_v35  ;;  %v13524_v51 = vpop.eup %13523 }
0x2db0   :  { %12523 = vmatpush3.bf16.xpose.msk.msra.mxu0 %vm13791_vm2, %v12518_v57  ;;  %v8450_v18 = vpop.xlane.xlu0 %8449  ;;  %v8471_v22 = vmul.f32 %v13524_v51, %v16515_v19  ;;  %v13608_v51 = vld [vmem:[%s16815_s4] sm:$0xff] }
0x2db1   :  { %13529 = vrcp.f32 %v8450_v18  ;;  %12526 = vmatprep.subr.msk.bf16.mxu0 %vm13791_vm2, %v12524_v12 }
0x2db3   :  { %v13526_v61 = vpop.eup %13525 }
0x2db4   :  { %v13027_v44 = vpop.permute.xlu0 %13026  ;;  %v8470_v55 = vmul.f32 %v13526_v61, %v16519_v8  ;;  %v13033_v8 = vunpack.i.l.bf16 %v13032_v28  ;;  %v13609_v28 = vld [vmem:[%s16815_s4 + $0x18] sm:$0xff] }
0x2db5   :  { %v13029_v4 = vunpack.i.h.bf16 %v13027_v44  ;;  %v13028_v27 = vunpack.i.l.bf16 %v13027_v44 }
0x2db6   :  { %11713 = vmatprep.mubr.msk.f32.mxu0 %vm613_vm3, %v8470_v55  ;;  %v12536_v11 = vpack.c.bf16 %v13034_v3, %v13033_v8 }
0x2db7   :  { %v12530_v7 = vpack.c.bf16 %v13029_v4, %v13028_v27  ;;  %11714 = vmatmul.mubr.msk.f32.gmra.mrb[178].mxu0 %vm613_vm3, %v8471_v22  ;;  %v13528_v10 = vpop.eup %13527 }
0x2db8   :  { %12529 = vmatpush3.bf16.xpose.msk.msra.mxu0 %vm13791_vm2, %v12524_v12  ;;  %v8473_v19 = vmul.f32 %v13528_v10, %v16523_v56  ;;  %v8630_v56 = vpop.permute.xlu0 %8629  ;;  %v13607_v12 = vld [vmem:[%s16815_s4 + $0x8] sm:$0xff] }
0x2db9   :  { %12532 = vmatprep.subr.msk.bf16.mxu0 %vm13791_vm2, %v12530_v7 }
0x2dbb   :  { %v13530_v14 = vpop.eup %13529 }
0x2dbc   :  { %v8472_v32 = vmul.f32 %v13530_v14, %v16527_v34  ;;  %v8634_v48 = vpop.permute.xlu0 %8633 }
0x2dbe   :  { %11716 = vmatprep.mubr.msk.f32.mxu0 %vm613_vm3, %v8472_v32 }
0x2dbf   :  { %11717 = vmatmul.mubr.msk.f32.gmra.mrb[180].mxu0 %vm613_vm3, %v8473_v19  ;;  %v13610_v19 = vld [vmem:[%s16815_s4 + $0x10] sm:$0xff] }
0x2dc0   :  { %12535 = vmatpush3.bf16.xpose.msk.msra.mxu0 %vm13791_vm2, %v12530_v7  ;;  %v8638_v26 = vpop.permute.xlu0 %8637 }
0x2dc1   :  { %12538 = vmatprep.subr.msk.bf16.mxu0 %vm13791_vm2, %v12536_v11 }
0x2dc8   :  { %12541 = vmatpush3.bf16.xpose.msk.msra.mxu0 %vm13791_vm2, %v12536_v11 }
0x2ddd   :  { %v8459_v37 = vpop.xlane.xlu1 %8458 }
0x2dde   :  { %13531 = vrcp.f32 %v8459_v37  ;;  %v13611_v37 = vld [vmem:[%s16815_s4 + $0x28] sm:$0xff] }
0x2de1   :  { %v8456_v34 = vpop.xlane.xlu1 %8455 }
0x2de2   :  { %13533 = vrcp.f32 %v8456_v34 }
0x2de5   :  { %v8636_v25 = vpop.permute.xlu1 %8635 }
0x2de8   :  { %v13532_v57 = vpop.eup %13531 }
0x2de9   :  { %v8475_v24 = vmul.f32 %v13532_v57, %v16549_v30  ;;  %v8640_v6 = vpop.permute.xlu1 %8639 }
0x2dec   :  { %v13534_v17 = vpop.eup %13533 }
0x2ded   :  { %v8474_v23 = vmul.f32 %v13534_v17, %v16553_v16  ;;  %v8642_v16 = vpop.permute.xlu0 %8641  ;;  %v8644_v30 = vpop.permute.xlu1 %8643 }
0x2def   :  { %11719 = vmatprep.mubr.msk.f32.mxu0 %vm613_vm3, %v8474_v23 }
0x2df0   :  { %11720 = vmatmul.mubr.msk.f32.gmra.mrb[182].mxu0 %vm613_vm3, %v8475_v24  ;;  %v13612_v24 = vld [vmem:[%s16815_s4 + $0x20] sm:$0xff] }
0x2df1   :  { %11738 = vmatprep.mubr.msk.f32.mxu0 %vm443_vm1, %v8630_v56 }
0x2df4   :  { %11739 = vmatmul.mubr.msk.f32.vlgmr.msra.gmra.mrb[184].mxu0 %vm443_vm1, %v8632_v1 }
0x2df5   :  { %11741 = vmatprep.mubr.msk.f32.mxu0 %vm443_vm1, %v8634_v48 }
0x2df8   :  { %11742 = vmatmul.mubr.msk.f32.gmra.mrb[186].mxu0 %vm443_vm1, %v8636_v25 }
0x2df9   :  { %11744 = vmatprep.mubr.msk.f32.mxu0 %vm443_vm1, %v8638_v26 }
0x2dfc   :  { %11745 = vmatmul.mubr.msk.f32.gmra.mrb[188].mxu0 %vm443_vm1, %v8640_v6  ;;  %v13613_v6 = vld [vmem:[%s16815_s4 + $0x38] sm:$0xff] }
0x2dfd   :  { %11747 = vmatprep.mubr.msk.f32.mxu0 %vm443_vm1, %v8642_v16 }
0x2e00   :  { %11748 = vmatmul.mubr.msk.f32.gmra.mrb[190].mxu0 %vm443_vm1, %v8644_v30 }
0x2e82   :  { %v16601_v62 = vpop.f32.mrb[176].mxu0 }
0x2e83   :  { %v16603_v31 = vpop.f32.mrb[177].mxu0 }
0x2e8a   :  { %v16605_v29 = vpop.f32.mrb[178].mxu0 }
0x2e8b   :  { %v16607_v45 = vpop.f32.mrb[179].mxu0 }
0x2e92   :  { %v16609_v21 = vpop.f32.mrb[180].mxu0 }
0x2e93   :  { %v16611_v33 = vpop.f32.mrb[181].mxu0 }
0x2ec3   :  { %v16613_v36 = vpop.f32.mrb[182].mxu0 }
0x2ec4   :  { %v16615_v59 = vpop.f32.mrb[183].mxu0 }
0x2ec7   :  { %v11740_v2 = vpop.f32.mrb[184].mxu0 }
0x2ec8   :  { %v8799_v60 = vmul.f32 0.35355338, %v11740_v2  ;;  %v8759_v50 = vpop.f32.mrb[185].mxu0  ;;  %v13614_v2 = vld [vmem:[%s16815_s4 + $0x30] sm:$0xff] }
0x2ec9   :  { %v8798_v35 = vmul.f32 0.35355338, %v8759_v50 }
0x2eca   :  { %v8807_v18 = vadd.f32 %v13607_v12, %v8799_v60 }
0x2ecb   :  { %v8806_v61 = vadd.f32 %v13608_v51, %v8798_v35  ;;  %v11743_v44 = vpop.f32.mrb[186].mxu0 }
0x2ecc   :  { %v8801_v55 = vmul.f32 0.35355338, %v11743_v44  ;;  %v8769_v4 = vpop.f32.mrb[187].mxu0  ;;  %v8817_v27 = vsel %vm613_vm3, %v8807_v18, -inf }
0x2ecd   :  { %v8800_v22 = vmul.f32 0.35355338, %v8769_v4  ;;  %8818 = vmax.xlane.f32.xlu1 %v8817_v27  ;;  %v8814_v7 = vsel %vm613_vm3, %v8806_v61, -inf }
0x2ece   :  { %v8809_v10 = vadd.f32 %v13609_v28, %v8801_v55  ;;  %8815 = vmax.xlane.f32.xlu0 %v8814_v7 }
0x2ecf   :  { %v11746_v14 = vpop.f32.mrb[188].mxu0  ;;  %v8808_v11 = vadd.f32 %v13610_v19, %v8800_v22 }
0x2ed0   :  { %v8803_v3 = vmul.f32 0.35355338, %v11746_v14  ;;  %v8779_v8 = vpop.f32.mrb[189].mxu0  ;;  %v8823_v32 = vsel %vm613_vm3, %v8809_v10, -inf }
0x2ed1   :  { %v8802_v1 = vmul.f32 0.35355338, %v8779_v8  ;;  %v8820_v26 = vsel %vm613_vm3, %v8808_v11, -inf }
0x2ed2   :  { %v8811_v34 = vadd.f32 %v13611_v37, %v8803_v3  ;;  %8824 = vmax.xlane.f32.xlu0 %v8823_v32 }
0x2ed3   :  { %v11749_v56 = vpop.f32.mrb[190].mxu0  ;;  %v8810_v48 = vadd.f32 %v13612_v24, %v8802_v1 }
0x2ed4   :  { %v8805_v57 = vmul.f32 0.35355338, %v11749_v56  ;;  %v8789_v17 = vpop.f32.mrb[191].mxu0  ;;  %v8829_v23 = vsel %vm613_vm3, %v8811_v34, -inf }
0x2ed5   :  { %v8804_v25 = vmul.f32 0.35355338, %v8789_v17  ;;  %8830 = vmax.xlane.f32.xlu1 %v8829_v23  ;;  %v8826_v50 = vsel %vm613_vm3, %v8810_v48, -inf }
0x2ed6   :  { %v8813_v16 = vadd.f32 %v13613_v6, %v8805_v57  ;;  %8821 = vmax.xlane.f32.xlu0 %v8820_v26 }
0x2ed7   :  { %v8812_v60 = vadd.f32 %v13614_v2, %v8804_v25 }
0x2ed8   :  { %v8835_v30 = vsel %vm613_vm3, %v8813_v16, -inf }
0x2ed9   :  { %8836 = vmax.xlane.f32.xlu1 %v8835_v30  ;;  %v8832_v35 = vsel %vm613_vm3, %v8812_v60, -inf }
0x2eda   :  { %8827 = vmax.xlane.f32.xlu0 %v8826_v50 }
0x2ede   :  { %8833 = vmax.xlane.f32.xlu0 %v8832_v35 }
0x2eea   :  { %13041 = vrot.lane.b32.xlu1 %v16138_v41, %s13668_s21 }
0x2ef4   :  { %13036 = vrot.lane.b32.xlu0 %v16133_v38, %s13668_s21 }
0x2f5a   :  { %v8819_v12 = vpop.xlane.xlu1 %8818 }
0x2f5b   :  { %v8839_v51 = vsub.f32 %v8807_v18, %v8819_v12  ;;  %v8816_v44 = vpop.xlane.xlu0 %8815 }
0x2f5c   :  { %v8838_v55 = vsub.f32 %v8806_v61, %v8816_v44 }
0x2f5d   :  { %v8848_v4 = vmul.f32 1.442695, %v8839_v51 }
0x2f5e   :  { %v8846_v27 = vmul.f32 1.442695, %v8838_v55 }
0x2f5f   :  { %13535 = vpow2.f32 %v8848_v4  ;;  %v8825_v22 = vpop.xlane.xlu0 %8824 }
0x2f60   :  { %13537 = vpow2.f32 %v8846_v27  ;;  %v8841_v7 = vsub.f32 %v8809_v10, %v8825_v22 }
0x2f62   :  { %v8852_v28 = vmul.f32 1.442695, %v8841_v7  ;;  %v8831_v14 = vpop.xlane.xlu1 %8830 }
0x2f63   :  { %v8843_v3 = vsub.f32 %v8811_v34, %v8831_v14  ;;  %v8822_v8 = vpop.xlane.xlu0 %8821 }
0x2f64   :  { %13539 = vpow2.f32 %v8852_v28  ;;  %v8840_v32 = vsub.f32 %v8808_v11, %v8822_v8 }
0x2f65   :  { %v8856_v41 = vmul.f32 1.442695, %v8843_v3 }
0x2f66   :  { %v8850_v19 = vmul.f32 1.442695, %v8840_v32  ;;  %v8837_v1 = vpop.xlane.xlu1 %8836 }
0x2f67   :  { %13541 = vpow2.f32 %v8856_v41  ;;  %v8845_v38 = vsub.f32 %v8813_v16, %v8837_v1  ;;  %v8828_v18 = vpop.xlane.xlu0 %8827 }
0x2f68   :  { %13543 = vpow2.f32 %v8850_v19  ;;  %v8842_v61 = vsub.f32 %v8810_v48, %v8828_v18 }
0x2f69   :  { %v16653_v37 = vpop.eup %13535  ;;  %v8860_v56 = vmul.f32 1.442695, %v8845_v38 }
0x2f6a   :  { %v16655_v57 = vpop.eup %13537  ;;  %v8854_v10 = vmul.f32 1.442695, %v8842_v61  ;;  %v8865_v34 = vsel %vm613_vm3, %v16653_v37, 0.0  ;;  %v13042_v48 = vpop.permute.xlu1 %13041 }
0x2f6b   :  { %13545 = vpow2.f32 %v8860_v56  ;;  %8866 = vadd.xlane.f32.xlu1 %v8865_v34  ;;  %v8834_v11 = vpop.xlane.xlu0 %8833  ;;  %v8862_v17 = vsel %vm613_vm3, %v16655_v57, 0.0  ;;  %v13044_v50 = vunpack.i.h.bf16 %v13042_v48  ;;  %v13043_v35 = vunpack.i.l.bf16 %v13042_v48  ;;  %v7017_v48 = vld [vmem:[#allocation2 + $0x1f8] sm:$0xff] }
0x2f6c   :  { %13547 = vpow2.f32 %v8854_v10  ;;  %v8844_v23 = vsub.f32 %v8812_v60, %v8834_v11  ;;  %8863 = vadd.xlane.f32.xlu0 %v8862_v17  ;;  %v7014_v11 = vld [vmem:[#allocation2 + $0x1e0] sm:$0xff]  ;;  %v7015_v17 = vld [vmem:[#allocation2 + $0x1e8] sm:$0xff] }
0x2f6d   :  { %v12546_v4 = vpack.c.bf16 %v13044_v50, %v13043_v35 }
0x2f6e   :  { %v16661_v24 = vpop.eup %13539  ;;  %v8858_v25 = vmul.f32 1.442695, %v8844_v23  ;;  %v7016_v23 = vld [vmem:[#allocation2 + $0x1f0] sm:$0xff] }
0x2f6f   :  { %v13037_v26 = vpop.permute.xlu0 %13036  ;;  %v8871_v6 = vsel %vm613_vm3, %v16661_v24, 0.0 }
0x2f70   :  { %13549 = vpow2.f32 %v8858_v25  ;;  %v13039_v16 = vunpack.i.h.bf16 %v13037_v26  ;;  %v13038_v30 = vunpack.i.l.bf16 %v13037_v26  ;;  %8872 = vadd.xlane.f32.xlu1 %v8871_v6  ;;  %v12562_v25 = vpack.c.bf16 %v7017_v48, %v7016_v23 }
0x2f71   :  { %v16665_v2 = vpop.eup %13541 }
0x2f72   :  { %v16667_v12 = vpop.eup %13543  ;;  %v12542_v60 = vpack.c.bf16 %v13039_v16, %v13038_v30  ;;  %v8877_v51 = vsel %vm613_vm3, %v16665_v2, 0.0 }
0x2f73   :  { %v8868_v44 = vsel %vm613_vm3, %v16667_v12, 0.0 }
0x2f74   :  { %8878 = vadd.xlane.f32.xlu1 %v8877_v51  ;;  %8869 = vadd.xlane.f32.xlu0 %v8868_v44 }
0x2f75   :  { %v16673_v55 = vpop.eup %13545  ;;  %12543 = vmatprep.subr.bf16.mxu1 %v12542_v60 }
0x2f76   :  { %v16675_v27 = vpop.eup %13547  ;;  %12545 = vmatpush3.bf16.msra.mxu1 %v12542_v60  ;;  %v8883_v22 = vsel %vm613_vm3, %v16673_v55, 0.0 }
0x2f77   :  { %12547 = vmatprep.subr.bf16.mxu1 %v12546_v4  ;;  %v8874_v7 = vsel %vm613_vm3, %v16675_v27, 0.0 }
0x2f78   :  { %8884 = vadd.xlane.f32.xlu1 %v8883_v22  ;;  %8875 = vadd.xlane.f32.xlu0 %v8874_v7 }
0x2f7a   :  { %v16681_v28 = vpop.eup %13549  ;;  %12549 = vmatpush3.bf16.msra.mxu1 %v12546_v4 }
0x2f7b   :  { %v8880_v14 = vsel %vm613_vm3, %v16681_v28, 0.0 }
0x2f7c   :  { %8881 = vadd.xlane.f32.xlu1 %v8880_v14 }
0x2f8d   :  { %13051 = vrot.lane.b32.xlu1 %v16153_v53, %s13668_s21 }
0x2f8e   :  { %13046 = vrot.lane.b32.xlu0 %v16147_v58, %s13668_s21 }
0x2f91   :  { %9065 = vrot.lane.b32.xlu1 %v16457_v0, %s13665_s29 }
0x2f92   :  { %9063 = vrot.lane.b32.xlu0 %v16459_v46, %s13665_s29 }
0x2f95   :  { %9097 = vrot.lane.b32.xlu1 %v16601_v62, %s13669_s13 }
0x2f96   :  { %9095 = vrot.lane.b32.xlu0 %v16603_v31, %s13669_s13 }
0x2f99   :  { %9069 = vrot.lane.b32.xlu1 %v16461_v54, %s13665_s29 }
0x2f9a   :  { %9067 = vrot.lane.b32.xlu0 %v16463_v20, %s13665_s29 }
0x2f9d   :  { %9101 = vrot.lane.b32.xlu1 %v16605_v29, %s13669_s13 }
0x2f9e   :  { %9099 = vrot.lane.b32.xlu0 %v16607_v45, %s13669_s13 }
0x2fa1   :  { %9073 = vrot.lane.b32.xlu1 %v16465_v52, %s13665_s29 }
0x2fa2   :  { %9071 = vrot.lane.b32.xlu0 %v16467_v39, %s13665_s29 }
0x2fa5   :  { %9105 = vrot.lane.b32.xlu1 %v16609_v21, %s13669_s13 }
0x2fa6   :  { %9103 = vrot.lane.b32.xlu0 %v16611_v33, %s13669_s13 }
0x2fa9   :  { %9077 = vrot.lane.b32.xlu1 %v16469_v49, %s13665_s29 }
0x2faa   :  { %9075 = vrot.lane.b32.xlu0 %v16471_v40, %s13665_s29 }
0x2fad   :  { %9109 = vrot.lane.b32.xlu1 %v16613_v36, %s13669_s13 }
0x2fae   :  { %9107 = vrot.lane.b32.xlu0 %v16615_v59, %s13669_s13 }
0x2ff8   :  { %v8867_v58 = vpop.xlane.xlu1 %8866 }
0x2ff9   :  { %v8864_v53 = vpop.xlane.xlu0 %8863 }
0x2ffa   :  { %13551 = vrcp.f32 %v8864_v53 }
0x2ffb   :  { %13553 = vrcp.f32 %v8867_v58 }
0x2ffd   :  { %v8873_v0 = vpop.xlane.xlu1 %8872 }
0x3001   :  { %v8879_v46 = vpop.xlane.xlu1 %8878  ;;  %v8870_v54 = vpop.xlane.xlu0 %8869 }
0x3002   :  { %13555 = vrcp.f32 %v8870_v54 }
0x3003   :  { %13557 = vrcp.f32 %v8873_v0 }
0x3004   :  { %v13552_v20 = vpop.eup %13551 }
0x3005   :  { %v8885_v52 = vpop.xlane.xlu1 %8884  ;;  %v8876_v39 = vpop.xlane.xlu0 %8875  ;;  %v8894_v49 = vmul.f32 %v13552_v20, %v16655_v57 }
0x3006   :  { %13559 = vrcp.f32 %v8876_v39  ;;  %v13554_v3 = vpop.eup %13553 }
0x3007   :  { %11766 = vmatprep.mubr.msk.f32.mxu1 %vm613_vm3, %v8894_v49  ;;  %13561 = vrcp.f32 %v8879_v46  ;;  %v8895_v32 = vmul.f32 %v13554_v3, %v16653_v37 }
0x3009   :  { %v8882_v40 = vpop.xlane.xlu1 %8881  ;;  %v13047_v62 = vpop.permute.xlu0 %13046 }
0x300a   :  { %v13049_v31 = vunpack.i.h.bf16 %v13047_v62  ;;  %v13048_v29 = vunpack.i.l.bf16 %v13047_v62  ;;  %13563 = vrcp.f32 %v8882_v40 }
0x300b   :  { %13565 = vrcp.f32 %v8885_v52 }
0x300c   :  { %v12550_v45 = vpack.c.bf16 %v13049_v31, %v13048_v29  ;;  %v13556_v8 = vpop.eup %13555 }
0x300d   :  { %v13052_v21 = vpop.permute.xlu1 %13051  ;;  %v13558_v41 = vpop.eup %13557  ;;  %v8896_v19 = vmul.f32 %v13556_v8, %v16667_v12 }
0x300e   :  { %v13054_v33 = vunpack.i.h.bf16 %v13052_v21  ;;  %v13053_v36 = vunpack.i.l.bf16 %v13052_v21  ;;  %12551 = vmatprep.subr.bf16.mxu1 %v12550_v45  ;;  %v8897_v38 = vmul.f32 %v13558_v41, %v16661_v24  ;;  %v12558_v24 = vpack.c.bf16 %v7015_v17, %v7014_v11  ;;  %v9064_v51 = vpop.permute.xlu0 %9063 }
0x300f   :  { %12553 = vmatpush3.bf16.msra.mxu1 %v12550_v45  ;;  %v9151_v52 = vsel %vm443_vm1, %v16315_v47, %v9064_v51 }
0x3010   :  { %v12554_v59 = vpack.c.bf16 %v13054_v33, %v13053_v36  ;;  %v13560_v1 = vpop.eup %13559 }
0x3011   :  { %v13562_v18 = vpop.eup %13561  ;;  %v8898_v61 = vmul.f32 %v13560_v1, %v16675_v27  ;;  %v9066_v60 = vpop.permute.xlu1 %9065 }
0x3012   :  { %12555 = vmatprep.subr.bf16.mxu1 %v12554_v59  ;;  %v8899_v37 = vmul.f32 %v13562_v18, %v16665_v2  ;;  %v9152_v49 = vsel %vm443_vm1, %v16313_v43, %v9066_v60 }
0x3013   :  { %12557 = vmatpush3.bf16.msra.mxu1 %v12554_v59 }
0x3014   :  { %v13564_v56 = vpop.eup %13563  ;;  %12559 = vmatprep.subr.bf16.mxu1 %v12558_v24 }
0x3015   :  { %v13566_v57 = vpop.eup %13565  ;;  %v8900_v10 = vmul.f32 %v13564_v56, %v16681_v28  ;;  %v9098_v44 = vpop.permute.xlu1 %9097 }
0x3016   :  { %11767 = vmatmul.mubr.msk.f32.vlgmr.msra.gmra.mrb[176].mxu1 %vm613_vm3, %v8895_v32  ;;  %v8901_v34 = vmul.f32 %v13566_v57, %v16673_v55  ;;  %v9096_v55 = vpop.permute.xlu0 %9095  ;;  %v9160_v31 = vsel %vm2221_vm4, %v9152_v49, %v9098_v44 }
0x3017   :  { %11769 = vmatprep.mubr.msk.f32.mxu1 %vm613_vm3, %v8896_v19  ;;  %12561 = vmatpush3.bf16.msra.mxu1 %v12558_v24  ;;  %v9159_v40 = vsel %vm2221_vm4, %v9151_v52, %v9096_v55 }
0x3018   :  { %12563 = vmatprep.subr.bf16.mxu1 %v12562_v25 }
0x3019   :  { %v9070_v4 = vpop.permute.xlu1 %9069 }
0x301a   :  { %11770 = vmatmul.mubr.msk.f32.gmra.mrb[178].mxu1 %vm613_vm3, %v8897_v38  ;;  %v9068_v27 = vpop.permute.xlu0 %9067  ;;  %v9154_v43 = vsel %vm443_vm1, %v16317_v13, %v9070_v4 }
0x301b   :  { %11772 = vmatprep.mubr.msk.f32.mxu1 %vm613_vm3, %v8898_v61  ;;  %12565 = vmatpush3.bf16.msra.mxu1 %v12562_v25  ;;  %v9153_v21 = vsel %vm443_vm1, %v16319_v15, %v9068_v27 }
0x301d   :  { %v9102_v22 = vpop.permute.xlu1 %9101 }
0x301e   :  { %11773 = vmatmul.mubr.msk.f32.gmra.mrb[180].mxu1 %vm613_vm3, %v8899_v37  ;;  %v9100_v7 = vpop.permute.xlu0 %9099  ;;  %v9162_v59 = vsel %vm2221_vm4, %v9154_v43, %v9102_v22 }
0x301f   :  { %11775 = vmatprep.mubr.msk.f32.mxu1 %vm613_vm3, %v8900_v10  ;;  %v9161_v33 = vsel %vm2221_vm4, %v9153_v21, %v9100_v7 }
0x3021   :  { %v9074_v28 = vpop.permute.xlu1 %9073 }
0x3022   :  { %11776 = vmatmul.mubr.msk.f32.gmra.mrb[182].mxu1 %vm613_vm3, %v8901_v34  ;;  %v9072_v14 = vpop.permute.xlu0 %9071  ;;  %v9156_v13 = vsel %vm443_vm1, %v16321_v63, %v9074_v28 }
0x3023   :  { %v9155_v15 = vsel %vm443_vm1, %v16323_v42, %v9072_v14 }
0x3025   :  { %v9106_v58 = vpop.permute.xlu1 %9105 }
0x3026   :  { %v9104_v53 = vpop.permute.xlu0 %9103  ;;  %v9164_v1 = vsel %vm2221_vm4, %v9156_v13, %v9106_v58 }
0x3027   :  { %v9163_v41 = vsel %vm2221_vm4, %v9155_v15, %v9104_v53 }
0x3029   :  { %v9078_v0 = vpop.permute.xlu1 %9077 }
0x302a   :  { %v9076_v46 = vpop.permute.xlu0 %9075  ;;  %v9158_v63 = vsel %vm443_vm1, %v16325_v9, %v9078_v0 }
0x302b   :  { %v9157_v42 = vsel %vm443_vm1, %v16327_v5, %v9076_v46  ;;  %v9869_v5 = vld [vmem:[%s16813_s2 + $0xf] ss:$0 sm:$0xff]  ;;  %s13671_s2 = smov [#allocation5]  }
0x302c   :  { %s9323_s13 = sshll.u32 %s13671_s2, 4  ;;  %s9324_s13 = int_to_ptr.vmem [resolvable:$true] %s9323_s13 }
0x302d   :  { %v9110_v54 = vpop.permute.xlu1 %9109  ;;  %p13642_p9 = scmp.lt.s32.totalorder %s9324_s13, %s9324_s13 }
0x302e   :  { %v9108_v20 = vpop.permute.xlu0 %9107  ;;  %v9166_v57 = vsel %vm2221_vm4, %v9158_v63, %v9110_v54 }
0x302f   :  { %v9165_v56 = vsel %vm2221_vm4, %v9157_v42, %v9108_v20 }
0x30e9   :  { %v11768_v26 = vpop.f32.mrb[176].mxu1 }
0x30ea   :  { %9129 = vrot.lane.b32.xlu1 %v11768_v26, %s13670_s14  ;;  %v9016_v6 = vpop.f32.mrb[177].mxu1 }
0x30eb   :  { %9127 = vrot.lane.b32.xlu0 %v9016_v6, %s13670_s14 }
0x30ed   :  { %v11771_v16 = vpop.f32.mrb[178].mxu1 }
0x30ee   :  { %9133 = vrot.lane.b32.xlu1 %v11771_v16, %s13670_s14  ;;  %v9026_v30 = vpop.f32.mrb[179].mxu1 }
0x30ef   :  { %9131 = vrot.lane.b32.xlu0 %v9026_v30, %s13670_s14 }
0x30f1   :  { %v11774_v2 = vpop.f32.mrb[180].mxu1 }
0x30f2   :  { %9137 = vrot.lane.b32.xlu1 %v11774_v2, %s13670_s14  ;;  %v9036_v50 = vpop.f32.mrb[181].mxu1 }
0x30f3   :  { %9135 = vrot.lane.b32.xlu0 %v9036_v50, %s13670_s14 }
0x30f5   :  { %v11777_v35 = vpop.f32.mrb[182].mxu1 }
0x30f6   :  { %9141 = vrot.lane.b32.xlu1 %v11777_v35, %s13670_s14  ;;  %v9046_v12 = vpop.f32.mrb[183].mxu1 }
0x30f7   :  { %9139 = vrot.lane.b32.xlu0 %v9046_v12, %s13670_s14  ;;  %s13637_s14 = scalar_lea.vmem %s9324_s13, 1024 }
0x30f8   :  { %p13638_p8 = scmp.ne.s32.totalorder %s9324_s13, %s13637_s14  ;;  %p13643_p10 = scmp.lt.s32.totalorder %s13637_s14, %s13637_s14 }
0x30fa   :  { %p13644_p11 = por %p13643_p10, %p13642_p9 }
0x30fc   :  { %p13645_p12 = pnand %p13644_p11, %p13638_p8 }
0x315c   :  { %v9130_v39 = vpop.permute.xlu1 %9129 }
0x315d   :  { %v9128_v62 = vpop.permute.xlu0 %9127  ;;  %v9168_v45 = vsel %vm2230_vm5, %v9160_v31, %v9130_v39 }
0x315e   :  { %v9167_v29 = vsel %vm2230_vm5, %v9159_v40, %v9128_v62 }
0x315f   :  { %11786 = vmatprep.mubr.msk.f32.mxu1 %vm91_vm0, %v9167_v29 }
0x3160   :  { %11787 = vmatmul.mubr.msk.f32.vlgmr.msra.gmra.mrb[184].mxu1 %vm91_vm0, %v9168_v45  ;;  %v9134_v47 = vpop.permute.xlu1 %9133 }
0x3161   :  { %v9132_v36 = vpop.permute.xlu0 %9131  ;;  %v9170_v8 = vsel %vm2230_vm5, %v9162_v59, %v9134_v47 }
0x3162   :  { %v9169_v3 = vsel %vm2230_vm5, %v9161_v33, %v9132_v36 }
0x3163   :  { %11789 = vmatprep.mubr.msk.f32.mxu1 %vm91_vm0, %v9169_v3 }
0x3164   :  { %11790 = vmatmul.mubr.msk.f32.gmra.mrb[186].mxu1 %vm91_vm0, %v9170_v8  ;;  %v9138_v32 = vpop.permute.xlu1 %9137 }
0x3165   :  { %v9136_v19 = vpop.permute.xlu0 %9135  ;;  %v9172_v18 = vsel %vm2230_vm5, %v9164_v1, %v9138_v32 }
0x3166   :  { %v9171_v38 = vsel %vm2230_vm5, %v9163_v41, %v9136_v19 }
0x3167   :  { %11792 = vmatprep.mubr.msk.f32.mxu1 %vm91_vm0, %v9171_v38 }
0x3168   :  { %11793 = vmatmul.mubr.msk.f32.gmra.mrb[188].mxu1 %vm91_vm0, %v9172_v18  ;;  %v9142_v61 = vpop.permute.xlu1 %9141 }
0x3169   :  { %v9140_v37 = vpop.permute.xlu0 %9139  ;;  %v9174_v34 = vsel %vm2230_vm5, %v9166_v57, %v9142_v61 }
0x316a   :  { %v9173_v10 = vsel %vm2230_vm5, %v9165_v56, %v9140_v37 }
0x316b   :  { %11795 = vmatprep.mubr.msk.f32.mxu1 %vm91_vm0, %v9173_v10 }
0x316c   :  { %11796 = vmatmul.mubr.msk.f32.gmra.mrb[190].mxu1 %vm91_vm0, %v9174_v34 }
0x3233   :  { %v11788_v11 = vpop.f32.mrb[184].mxu1 }
0x3234   :  { %v9277_v17 = vadd.f32 %v11788_v11, %v9869_v5  ;;  %v9271_v9 = vpop.f32.mrb[185].mxu1 }
0x3235   :  { %v9272_v23 = vadd.f32 %v9869_v5, %v9271_v9 }
0x3236   :  { %9311 = vst.msk [vmem:[#allocation5 + $0x8] sm:$0xff] %vm91_vm0, %v9277_v17 }
0x3237   :  { %9310 = vst.msk [vmem:[#allocation5] sm:$0xff] %vm91_vm0, %v9272_v23  ;;  %v11791_v24 = vpop.f32.mrb[186].mxu1 }
0x3238   :  { %v9287_v48 = vadd.f32 %v11791_v24, %v9869_v5  ;;  %v9281_v25 = vpop.f32.mrb[187].mxu1 }
0x3239   :  { %v9282_v26 = vadd.f32 %v9869_v5, %v9281_v25 }
0x323a   :  { %9313 = vst.msk [vmem:[#allocation5 + $0x18] sm:$0xff] %vm91_vm0, %v9287_v48 }
0x323b   :  { %9312 = vst.msk [vmem:[#allocation5 + $0x10] sm:$0xff] %vm91_vm0, %v9282_v26  ;;  %v11794_v6 = vpop.f32.mrb[188].mxu1 }
0x323c   :  { %v9297_v16 = vadd.f32 %v11794_v6, %v9869_v5  ;;  %v9291_v30 = vpop.f32.mrb[189].mxu1 }
0x323d   :  { %v9292_v2 = vadd.f32 %v9869_v5, %v9291_v30 }
0x323e   :  { %9315 = vst.msk [vmem:[#allocation5 + $0x28] sm:$0xff] %vm91_vm0, %v9297_v16 }
0x323f   :  { %9314 = vst.msk [vmem:[#allocation5 + $0x20] sm:$0xff] %vm91_vm0, %v9292_v2  ;;  %v11797_v50 = vpop.f32.mrb[190].mxu1 }
0x3240   :  { %v9307_v35 = vadd.f32 %v11797_v50, %v9869_v5  ;;  %v9301_v12 = vpop.f32.mrb[191].mxu1 }
0x3241   :  { %v9302_v60 = vadd.f32 %v9869_v5, %v9301_v12 }
0x3242   :  { %9317 = vst.msk [vmem:[#allocation5 + $0x38] sm:$0xff] %vm91_vm0, %v9307_v35 }
0x3243   :  { %9316 = vst.msk [vmem:[#allocation5 + $0x30] sm:$0xff] %vm91_vm0, %v9302_v60 }
0x3244   :  { %13648 = shalt.err (!%p13645_p12)
}
0x3245   :  { %s13649_s11 = scalar_lea.hbm %s16816_s5, 1024 }
0x3246   :  { %p13650_p13 = scmp.ne.s32.totalorder %s16816_s5, %s13649_s11  ;;  %p13653_p0 = scmp.lt.u32.totalorder %s13649_s11, %s16816_s5 }
0x3248   :  { %p13655_p1 = pnand %p13653_p0, %p13650_p13 }
0x324a   :  { %13658 = shalt.err (!%p13655_p1)
}
0x324b   :  { %9329 = dma.vmem_to_hbm [thread:$0]  %s9324_s13, 1024, %s16816_s5, [#allocation4], %s13664_s28, %s13664_s28, %s13665_s29  }
0x324c   :  { %13661 = dma.done.wait [#allocation4], 1024  }
0x324d   :  { %13662 = vsyncadd [#allocation4], 4294966272 }
0x324e   :  { %9333 = vsyncpa [#allocation3], 1 }
0x324f   :  { %9334 = vsyncpa [#allocation4], 1 }

</bundles_post_ra>
